<compile_context>
chip_gen: v7x
topology: tpu7x:2x2x1
jax: 0.10.0
libtpu: 0.0.40
codegen_flags: <defaults>
</compile_context>

<pallas_src>
import functools

import jax
import jax.numpy as jnp
from jax import lax
from jax.experimental import pallas as pl
from jax.experimental.pallas import tpu as pltpu


# --------------------------------------------------------------------------
# Fused conv kernel: tap-accumulated MXU matmuls + bias/InstanceNorm/act epilogue
# --------------------------------------------------------------------------
def _conv_phase_kernel(q_ref, w_ref, b_ref, o_ref, *, tap_plan, seg_len,
                       wo, wo1, normalize, slope, use_bias, inv_count):
    """q_ref: (1, Lq, K) bf16   flattened (padded) source, fully VMEM resident.
       w_ref: (T, K, tn) bf16   one (K, tn) matrix per tap.
       b_ref: (1, tn)    f32    bias (read only when use_bias).
       o_ref: (1, P*seg_len, tn) output; phase p occupies rows [p*L, (p+1)*L).
       tap_plan: static per-phase list of (weight_index, flat_row_offset)."""
    L = seg_len

    # --- phase accumulators: bf16 x bf16 -> f32 on the MXU --------------------
    accs = []
    for taps in tap_plan:
        acc = None
        for (wi, off) in taps:
            part = jnp.dot(q_ref[0, pl.ds(off, L), :], w_ref[wi, :, :],
                           preferred_element_type=jnp.float32)
            acc = part if acc is None else acc + part
        if use_bias:
            acc = acc + b_ref[...]
        accs.append(acc)

    # --- fused InstanceNorm2d (affine=False, eps=1e-5, biased var) in f32 -----
    if normalize:
        tn = o_ref.shape[-1]
        mask = (lax.broadcasted_iota(jnp.int32, (L, tn), 0) % wo1 < wo)
        maskf = mask.astype(jnp.float32)          # excludes the per-row "wrap" columns
        s = None
        for a in accs:
            m = a * maskf
            s = m if s is None else s + m
        mean = jnp.sum(s, axis=0, keepdims=True) * inv_count        # (1, tn)
        v = None
        for a in accs:
            d = jnp.square(a - mean) * maskf
            v = d if v is None else v + d
        var = jnp.sum(v, axis=0, keepdims=True) * inv_count
        rstd = lax.rsqrt(var + 1e-5)
        accs = [(a - mean) * rstd for a in accs]

    # --- fused activation ------------------------------------------------------
    if slope is not None:
        if slope == 0.0:
            accs = [jnp.maximum(a, 0.0) for a in accs]                  # ReLU
        else:
            accs = [jnp.where(a >= 0, a, slope * a) for a in accs]      # LeakyReLU

    for p, a in enumerate(accs):
        o_ref[0, pl.ds(p * L, L), :] = a.astype(o_ref.dtype)


def _phase_conv(q_flat, w_mat, bias, *, tap_plan, seg_len, wo, wo1,
                normalize, slope, use_bias, inv_count, out_dtype):
    """q_flat: (N, Lq, K), w_mat: (T, K, Cout), bias: (1, Cout).
       Returns (N, P*seg_len, Cout) with P = len(tap_plan)."""
    N, Lq, K = q_flat.shape
    T, _, Cout = w_mat.shape
    P = len(tap_plan)
    tn = Cout if Cout <= 128 else 128
    assert Cout % tn == 0

    kern = functools.partial(
        _conv_phase_kernel, tap_plan=tap_plan, seg_len=seg_len, wo=wo, wo1=wo1,
        normalize=normalize, slope=slope, use_bias=use_bias, inv_count=inv_count)

    return pl.pallas_call(
        kern,
        out_shape=jax.ShapeDtypeStruct((N, P * seg_len, Cout), out_dtype),
        grid=(N, Cout // tn),
        in_specs=[
            pl.BlockSpec((1, Lq, K), lambda n, j: (n, 0, 0)),
            pl.BlockSpec((T, K, tn), lambda n, j: (0, 0, j)),
            pl.BlockSpec((1, tn), lambda n, j: (0, j)),
        ],
        out_specs=pl.BlockSpec((1, P * seg_len, tn), lambda n, j: (n, 0, j)),
        compiler_params=pltpu.CompilerParams(
            dimension_semantics=("parallel", "parallel"),
            vmem_limit_bytes=48 * 1024 * 1024),
    )(q_flat, w_mat, bias)


# --------------------------------------------------------------------------
# Host-side layout glue (fuses into single copy fusions; ~1x activation traffic)
# --------------------------------------------------------------------------
def _flatten_pad(x4, extra):
    """(N, Hq, Wq, C) -> (N, Hq*Wq + extra, C); `extra` zero rows cover the last taps."""
    N, Hq, Wq, C = x4.shape
    q = x4.reshape(N, Hq * Wq, C)
    return jnp.pad(q, ((0, 0), (0, extra), (0, 0)))


def _interleave_phases(out, N, Ht, Wt, Wq, C):
    """(N, 4*Ht*Wq, C) phase-major kernel output -> (N, 2*Ht, 2*Wt, C)."""
    y = out.reshape(N, 2, 2, Ht, Wq, C)[:, :, :, :, :Wt, :]
    y = jnp.transpose(y, (0, 3, 1, 4, 2, 5))
    return y.reshape(N, 2 * Ht, 2 * Wt, C)


def down_conv(x, w_oihw, *, normalize):
    """Conv2d(k4, s2, p1, bias=False) [+ InstanceNorm] + LeakyReLU(0.2). x: NHWC bf16."""
    N, H, W, Cin = x.shape
    assert H % 2 == 0 and W % 2 == 0
    Cout = w_oihw.shape[0]
    Ho, Wo = H // 2, W // 2
    Wq = Wo + 1

    xp = jnp.pad(x, ((0, 0), (1, 1), (1, 1), (0, 0)))
    # space-to-depth: stride-2 4x4 conv == stride-1 2x2 conv over phase-stacked channels
    Q = jnp.concatenate([xp[:, a::2, b::2, :] for a in (0, 1) for b in (0, 1)], axis=-1)
    q_flat = _flatten_pad(Q, 1).astype(jnp.bfloat16)          # (N, (Ho+1)*(Wo+1)+1, 4Cin)

    wt = jnp.transpose(w_oihw, (2, 3, 1, 0))                  # (kh, kw, Cin, Cout)
    w_blocks, taps = [], []
    for t, (ry, rx) in enumerate([(0, 0), (0, 1), (1, 0), (1, 1)]):
        blk = jnp.concatenate([wt[2 * ry + a, 2 * rx + b]
                               for a in (0, 1) for b in (0, 1)], axis=0)  # (4Cin, Cout)
        w_blocks.append(blk)
        taps.append((t, ry * Wq + rx))
    w_mat = jnp.stack(w_blocks, 0).astype(jnp.bfloat16)       # (4, 4Cin, Cout)

    bias = jnp.zeros((1, Cout), jnp.float32)
    L = Ho * Wq
    out = _phase_conv(q_flat, w_mat, bias, tap_plan=[taps], seg_len=L,
                      wo=Wo, wo1=Wq, normalize=normalize, slope=0.2,
                      use_bias=False, inv_count=1.0 / float(Ho * Wo),
                      out_dtype=jnp.bfloat16)
    return out.reshape(N, Ho, Wq, Cout)[:, :, :Wo, :]


# output-row parity -> ((row offset in padded frame, kernel index dy), ...)
_ROW_TAPS = {0: ((0, 3), (1, 1)), 1: ((1, 2), (2, 0))}


def up_conv_transpose(x, w_iohw):
    """ConvTranspose2d(k4, s2, p1, bias=False) + InstanceNorm + ReLU. x: NHWC bf16."""
    N, Hh, Wh, Cin = x.shape
    Cout = w_iohw.shape[1]
    Hq, Wq = Hh + 2, Wh + 2

    xp = jnp.pad(x, ((0, 0), (1, 1), (1, 1), (0, 0)))
    q_flat = _flatten_pad(xp, 2).astype(jnp.bfloat16)

    wt = jnp.transpose(w_iohw, (2, 3, 0, 1))                  # (kh, kw, Cin, Cout)
    w_blocks, tap_plan = [], []
    wi = 0
    for ap in (0, 1):
        for bp in (0, 1):
            taps = []
            for (r, dy) in _ROW_TAPS[ap]:
                for (c, dx) in _ROW_TAPS[bp]:
                    w_blocks.append(wt[dy, dx])
                    taps.append((wi, r * Wq + c))
                    wi += 1
            tap_plan.append(taps)
    w_mat = jnp.stack(w_blocks, 0).astype(jnp.bfloat16)       # (16, Cin, Cout)

    bias = jnp.zeros((1, Cout), jnp.float32)
    L = Hh * Wq
    out = _phase_conv(q_flat, w_mat, bias, tap_plan=tap_plan, seg_len=L,
                      wo=Wh, wo1=Wq, normalize=True, slope=0.0,
                      use_bias=False, inv_count=1.0 / float(4 * Hh * Wh),
                      out_dtype=jnp.bfloat16)
    return _interleave_phases(out, N, Hh, Wh, Wq, Cout)


# output-row parity -> ((row offset, set of kernel dy summed into that tap), ...)
_ROW_SETS = {0: ((0, (0, 1)), (1, (2, 3)), (2, ())),
             1: ((0, (0,)), (1, (1, 2)), (2, (3,)))}


def final_conv(h, w_oihw, bias_vec):
    """Upsample(x2, nearest) + ZeroPad2d((1,0,1,0)) + Conv2d(k4, s1, p1, bias=True),
    folded into a 4-output-phase 3x3 conv over the un-upsampled feature map."""
    N, Hh, Wh, C2 = h.shape
    Cout = w_oihw.shape[0]
    Hq, Wq = Hh + 2, Wh + 2

    hp = jnp.pad(h, ((0, 0), (1, 1), (1, 1), (0, 0)))
    q_flat = _flatten_pad(hp, 2).astype(jnp.bfloat16)

    wt = jnp.transpose(w_oihw, (2, 3, 1, 0)).astype(jnp.float32)  # (4,4,C2,Cout)
    zero_blk = jnp.zeros((C2, Cout), jnp.float32)
    w_blocks, tap_plan = [], []
    for ap in (0, 1):
        for bp in (0, 1):
            taps = []
            for (r, dys) in _ROW_SETS[ap]:
                for (c, dxs) in _ROW_SETS[bp]:
                    if not dys or not dxs:
                        continue                                   # statically-zero tap
                    blk = zero_blk
                    for dy in dys:
                        for dx in dxs:
                            blk = blk + wt[dy, dx]
                    w_blocks.append(blk)
                    taps.append((len(w_blocks) - 1, r * Wq + c))
            tap_plan.append(taps)
    w_mat = jnp.stack(w_blocks, 0).astype(jnp.bfloat16)

    L = Hh * Wq
    out = _phase_conv(q_flat, w_mat,
                      bias_vec.reshape(1, Cout).astype(jnp.float32),
                      tap_plan=tap_plan, seg_len=L, wo=Wh, wo1=Wq,
                      normalize=False, slope=None, use_bias=True,
                      inv_count=1.0, out_dtype=jnp.float32)
    return _interleave_phases(out, N, Hh, Wh, Wq, Cout)


# --------------------------------------------------------------------------
# GeneratorUNet parameters + forward
# --------------------------------------------------------------------------
def init_params(key, in_ch, out_ch, mid):
    n_keys = 1 + len(mid) + len(mid) + 2
    keys = list(jax.random.split(key, n_keys))
    ki = iter(keys)

    def w(shape):
        return jax.random.normal(next(ki), shape, jnp.float32) * 0.05

    params = {"input_w": w((mid[0], in_ch, 4, 4))}                # Conv2d (O,I,4,4)
    down = [w((mid[i], mid[i - 1], 4, 4)) for i in range(1, len(mid))]
    down.append(w((mid[-1], mid[-1], 4, 4)))                      # last: no norm
    params["down_w"] = down
    up = [w((mid[i] * 2, mid[i - 1], 4, 4)) for i in range(1, len(mid))]  # ConvT (I,O,4,4)
    up.append(w((mid[-1], mid[-1], 4, 4)))
    params["up_w"] = up
    params["final_w"] = w((out_ch, mid[0] * 2, 4, 4))             # Conv2d with bias
    params["final_b"] = w((out_ch,))
    return params


def generator_unet(params, x_nchw):
    x = jnp.transpose(x_nchw, (0, 2, 3, 1)).astype(jnp.bfloat16)  # NCHW -> NHWC, bf16

    # input layer: Conv(k4,s2,p1,no bias) + LeakyReLU(0.2), no norm (fused)
    h = down_conv(x, params["input_w"], normalize=False)
    feats = [h]

    # down layers: Conv + [InstanceNorm] + LeakyReLU(0.2), fused per layer
    n_down = len(params["down_w"])
    for idx, w in enumerate(params["down_w"]):
        h = down_conv(h, w, normalize=(idx != n_down - 1))
        feats.append(h)

    # TODO(synk): nn.Dropout on the deep layers is identity here (inference semantics).

    # up layers: ConvTranspose + InstanceNorm + ReLU (fused), then concat with skip
    for i in range(len(params["up_w"]) - 1, -1, -1):
        y = up_conv_transpose(h, params["up_w"][i])
        h = jnp.concatenate([y, feats[i]], axis=-1)               # torch.cat((x, skip), 1)

    # final: Upsample(x2) -> ZeroPad2d((1,0,1,0)) -> Conv2d(k4,p1,bias), folded
    out = final_conv(h, params["final_w"], params["final_b"])
    return jnp.transpose(out, (0, 3, 1, 2)).astype(jnp.float32)   # NHWC -> NCHW


if __name__ == "__main__":
    # Small configuration consistent with the module's constructor arguments.
    in_channels, out_channels = 3, 3
    mid_channels = [8, 16, 32]              # 4 downsamplings -> spatial must be 2**4
    batch, spatial = 2, 16

    key = jax.random.PRNGKey(0)
    kp, kx = jax.random.split(key)
    params = init_params(kp, in_channels, out_channels, mid_channels)
    x = jax.random.normal(kx, (batch, in_channels, spatial, spatial), jnp.float32)

    fwd = jax.jit(generator_unet)
    y = jax.block_until_ready(fwd(params, x))
    assert y.shape == (batch, out_channels, spatial, spatial), y.shape
    assert bool(jnp.all(jnp.isfinite(y)))
    print("KERNEL_OK")
</pallas_src>

<mosaic_0001>
module attributes {stable_mosaic.version = 11 : i64} {
  func.func @_conv_phase_kernel(%arg0: i32, %arg1: i32, %arg2: memref<1x82x12xbf16, #tpu.memory_space<vmem>>, %arg3: memref<4x12x8xbf16, #tpu.memory_space<vmem>>, %arg4: memref<1x8xf32, #tpu.memory_space<vmem>>, %arg5: memref<1x72x8xbf16, #tpu.memory_space<vmem>>) attributes {dimension_semantics = [#tpu.dimension_semantics<parallel>, #tpu.dimension_semantics<parallel>], iteration_bounds = array<i64: 2, 1>, scalar_prefetch = 0 : i64, scratch_operands = 0 : i64, tpu.core_type = #tpu.core_type<tc>, window_params = [{transform_indices = @transform_0, window_bounds = array<i64: 1, 82, 12>}, {transform_indices = @transform_1, window_bounds = array<i64: 4, 12, 8>}, {transform_indices = @transform_2, window_bounds = array<i64: 1, 8>}, {transform_indices = @transform_3, window_bounds = array<i64: 1, 72, 8>}]} {
    %c0 = arith.constant 0 : index
    %c0_0 = arith.constant 0 : index
    %c0_1 = arith.constant 0 : index
    %0 = vector.load %arg2[%c0, %c0_0, %c0_1] : memref<1x82x12xbf16, #tpu.memory_space<vmem>>, vector<1x72x12xbf16>
    %1 = vector.shape_cast %0 : vector<1x72x12xbf16> to vector<72x12xbf16>
    %c0_2 = arith.constant 0 : index
    %c0_3 = arith.constant 0 : index
    %c0_4 = arith.constant 0 : index
    %2 = vector.load %arg3[%c0_2, %c0_3, %c0_4] : memref<4x12x8xbf16, #tpu.memory_space<vmem>>, vector<1x12x8xbf16>
    %3 = vector.shape_cast %2 : vector<1x12x8xbf16> to vector<12x8xbf16>
    %cst = arith.constant dense<0.000000e+00> : vector<72x8xf32>
    %4 = tpu.matmul %1, %3, %cst {dimension_numbers = #tpu.dot_dimension_numbers<[1], [0], [0], [1], [0, 0, 1, 1], [], []>} : vector<72x12xbf16>, vector<12x8xbf16>, vector<72x8xf32> -> vector<72x8xf32>
    %c0_5 = arith.constant 0 : index
    %c1 = arith.constant 1 : index
    %c0_6 = arith.constant 0 : index
    %5 = vector.load %arg2[%c0_5, %c1, %c0_6] : memref<1x82x12xbf16, #tpu.memory_space<vmem>>, vector<1x72x12xbf16>
    %6 = vector.shape_cast %5 : vector<1x72x12xbf16> to vector<72x12xbf16>
    %c1_7 = arith.constant 1 : index
    %c0_8 = arith.constant 0 : index
    %c0_9 = arith.constant 0 : index
    %7 = vector.load %arg3[%c1_7, %c0_8, %c0_9] : memref<4x12x8xbf16, #tpu.memory_space<vmem>>, vector<1x12x8xbf16>
    %8 = vector.shape_cast %7 : vector<1x12x8xbf16> to vector<12x8xbf16>
    %cst_10 = arith.constant dense<0.000000e+00> : vector<72x8xf32>
    %9 = tpu.matmul %6, %8, %cst_10 {dimension_numbers = #tpu.dot_dimension_numbers<[1], [0], [0], [1], [0, 0, 1, 1], [], []>} : vector<72x12xbf16>, vector<12x8xbf16>, vector<72x8xf32> -> vector<72x8xf32>
    %10 = arith.addf %4, %9 : vector<72x8xf32>
    %c0_11 = arith.constant 0 : index
    %c9 = arith.constant 9 : index
    %c0_12 = arith.constant 0 : index
    %11 = vector.load %arg2[%c0_11, %c9, %c0_12] : memref<1x82x12xbf16, #tpu.memory_space<vmem>>, vector<1x72x12xbf16>
    %12 = vector.shape_cast %11 : vector<1x72x12xbf16> to vector<72x12xbf16>
    %c2 = arith.constant 2 : index
    %c0_13 = arith.constant 0 : index
    %c0_14 = arith.constant 0 : index
    %13 = vector.load %arg3[%c2, %c0_13, %c0_14] : memref<4x12x8xbf16, #tpu.memory_space<vmem>>, vector<1x12x8xbf16>
    %14 = vector.shape_cast %13 : vector<1x12x8xbf16> to vector<12x8xbf16>
    %cst_15 = arith.constant dense<0.000000e+00> : vector<72x8xf32>
    %15 = tpu.matmul %12, %14, %cst_15 {dimension_numbers = #tpu.dot_dimension_numbers<[1], [0], [0], [1], [0, 0, 1, 1], [], []>} : vector<72x12xbf16>, vector<12x8xbf16>, vector<72x8xf32> -> vector<72x8xf32>
    %16 = arith.addf %10, %15 : vector<72x8xf32>
    %c0_16 = arith.constant 0 : index
    %c10 = arith.constant 10 : index
    %c0_17 = arith.constant 0 : index
    %17 = vector.load %arg2[%c0_16, %c10, %c0_17] : memref<1x82x12xbf16, #tpu.memory_space<vmem>>, vector<1x72x12xbf16>
    %18 = vector.shape_cast %17 : vector<1x72x12xbf16> to vector<72x12xbf16>
    %c3 = arith.constant 3 : index
    %c0_18 = arith.constant 0 : index
    %c0_19 = arith.constant 0 : index
    %19 = vector.load %arg3[%c3, %c0_18, %c0_19] : memref<4x12x8xbf16, #tpu.memory_space<vmem>>, vector<1x12x8xbf16>
    %20 = vector.shape_cast %19 : vector<1x12x8xbf16> to vector<12x8xbf16>
    %cst_20 = arith.constant dense<0.000000e+00> : vector<72x8xf32>
    %21 = tpu.matmul %18, %20, %cst_20 {dimension_numbers = #tpu.dot_dimension_numbers<[1], [0], [0], [1], [0, 0, 1, 1], [], []>} : vector<72x12xbf16>, vector<12x8xbf16>, vector<72x8xf32> -> vector<72x8xf32>
    %22 = arith.addf %16, %21 : vector<72x8xf32>
    %cst_21 = arith.constant 0.000000e+00 : f32
    %23 = vector.broadcast %cst_21 : f32 to vector<72x8xf32>
    %24 = arith.cmpf oge, %22, %23 : vector<72x8xf32>
    %cst_22 = arith.constant 2.000000e-01 : f32
    %25 = vector.broadcast %cst_22 : f32 to vector<72x8xf32>
    %26 = arith.mulf %25, %22 : vector<72x8xf32>
    %27 = arith.select %24, %22, %26 : vector<72x8xi1>, vector<72x8xf32>
    %28 = arith.truncf %27 : vector<72x8xf32> to vector<72x8xbf16>
    %c0_23 = arith.constant 0 : index
    %c0_24 = arith.constant 0 : index
    %c0_25 = arith.constant 0 : index
    %29 = vector.load %arg5[%c0_23, %c0_24, %c0_25] : memref<1x72x8xbf16, #tpu.memory_space<vmem>>, vector<1x72x8xbf16>
    %30 = vector.shape_cast %29 : vector<1x72x8xbf16> to vector<72x8xbf16>
    %31 = vector.shape_cast %28 : vector<72x8xbf16> to vector<1x72x8xbf16>
    tpu.vector_store %arg5[%c0_23, %c0_24, %c0_25], %31 {strides = array<i32>} : memref<1x72x8xbf16, #tpu.memory_space<vmem>>, vector<1x72x8xbf16>,
    return
  }
  func.func @transform_0(%arg0: i32, %arg1: i32) -> (i32, i32, i32) {
    %c0_i32 = arith.constant 0 : i32
    %c0_i32_0 = arith.constant 0 : i32
    %c0_i32_1 = arith.constant 0 : i32
    return %arg0, %c0_i32, %c0_i32_0 : i32, i32, i32
  }
  func.func @transform_1(%arg0: i32, %arg1: i32) -> (i32, i32, i32) {
    %c0_i32 = arith.constant 0 : i32
    %c0_i32_0 = arith.constant 0 : i32
    %c0_i32_1 = arith.constant 0 : i32
    return %c0_i32, %c0_i32_0, %arg1 : i32, i32, i32
  }
  func.func @transform_2(%arg0: i32, %arg1: i32) -> (i32, i32) {
    %c0_i32 = arith.constant 0 : i32
    %c0_i32_0 = arith.constant 0 : i32
    return %c0_i32, %arg1 : i32, i32
  }
  func.func @transform_3(%arg0: i32, %arg1: i32) -> (i32, i32, i32) {
    %c0_i32 = arith.constant 0 : i32
    %c0_i32_0 = arith.constant 0 : i32
    return %arg0, %c0_i32, %arg1 : i32, i32, i32
  }
}

module attributes {stable_mosaic.version = 11 : i64} {
  func.func @_conv_phase_kernel(%arg0: i32, %arg1: i32, %arg2: memref<1x26x32xbf16, #tpu.memory_space<vmem>>, %arg3: memref<4x32x16xbf16, #tpu.memory_space<vmem>>, %arg4: memref<1x16xf32, #tpu.memory_space<vmem>>, %arg5: memref<1x20x16xbf16, #tpu.memory_space<vmem>>) attributes {dimension_semantics = [#tpu.dimension_semantics<parallel>, #tpu.dimension_semantics<parallel>], iteration_bounds = array<i64: 2, 1>, scalar_prefetch = 0 : i64, scratch_operands = 0 : i64, tpu.core_type = #tpu.core_type<tc>, window_params = [{transform_indices = @transform_0, window_bounds = array<i64: 1, 26, 32>}, {transform_indices = @transform_1, window_bounds = array<i64: 4, 32, 16>}, {transform_indices = @transform_2, window_bounds = array<i64: 1, 16>}, {transform_indices = @transform_3, window_bounds = array<i64: 1, 20, 16>}]} {
    %c0 = arith.constant 0 : index
    %c0_0 = arith.constant 0 : index
    %c0_1 = arith.constant 0 : index
    %0 = vector.load %arg2[%c0, %c0_0, %c0_1] : memref<1x26x32xbf16, #tpu.memory_space<vmem>>, vector<1x20x32xbf16>
    %1 = vector.shape_cast %0 : vector<1x20x32xbf16> to vector<20x32xbf16>
    %c0_2 = arith.constant 0 : index
    %c0_3 = arith.constant 0 : index
    %c0_4 = arith.constant 0 : index
    %2 = vector.load %arg3[%c0_2, %c0_3, %c0_4] : memref<4x32x16xbf16, #tpu.memory_space<vmem>>, vector<1x32x16xbf16>
    %3 = vector.shape_cast %2 : vector<1x32x16xbf16> to vector<32x16xbf16>
    %cst = arith.constant dense<0.000000e+00> : vector<20x16xf32>
    %4 = tpu.matmul %1, %3, %cst {dimension_numbers = #tpu.dot_dimension_numbers<[1], [0], [0], [1], [0, 0, 1, 1], [], []>} : vector<20x32xbf16>, vector<32x16xbf16>, vector<20x16xf32> -> vector<20x16xf32>
    %c0_5 = arith.constant 0 : index
    %c1 = arith.constant 1 : index
    %c0_6 = arith.constant 0 : index
    %5 = vector.load %arg2[%c0_5, %c1, %c0_6] : memref<1x26x32xbf16, #tpu.memory_space<vmem>>, vector<1x20x32xbf16>
    %6 = vector.shape_cast %5 : vector<1x20x32xbf16> to vector<20x32xbf16>
    %c1_7 = arith.constant 1 : index
    %c0_8 = arith.constant 0 : index
    %c0_9 = arith.constant 0 : index
    %7 = vector.load %arg3[%c1_7, %c0_8, %c0_9] : memref<4x32x16xbf16, #tpu.memory_space<vmem>>, vector<1x32x16xbf16>
    %8 = vector.shape_cast %7 : vector<1x32x16xbf16> to vector<32x16xbf16>
    %cst_10 = arith.constant dense<0.000000e+00> : vector<20x16xf32>
    %9 = tpu.matmul %6, %8, %cst_10 {dimension_numbers = #tpu.dot_dimension_numbers<[1], [0], [0], [1], [0, 0, 1, 1], [], []>} : vector<20x32xbf16>, vector<32x16xbf16>, vector<20x16xf32> -> vector<20x16xf32>
    %10 = arith.addf %4, %9 : vector<20x16xf32>
    %c0_11 = arith.constant 0 : index
    %c5 = arith.constant 5 : index
    %c0_12 = arith.constant 0 : index
    %11 = vector.load %arg2[%c0_11, %c5, %c0_12] : memref<1x26x32xbf16, #tpu.memory_space<vmem>>, vector<1x20x32xbf16>
    %12 = vector.shape_cast %11 : vector<1x20x32xbf16> to vector<20x32xbf16>
    %c2 = arith.constant 2 : index
    %c0_13 = arith.constant 0 : index
    %c0_14 = arith.constant 0 : index
    %13 = vector.load %arg3[%c2, %c0_13, %c0_14] : memref<4x32x16xbf16, #tpu.memory_space<vmem>>, vector<1x32x16xbf16>
    %14 = vector.shape_cast %13 : vector<1x32x16xbf16> to vector<32x16xbf16>
    %cst_15 = arith.constant dense<0.000000e+00> : vector<20x16xf32>
    %15 = tpu.matmul %12, %14, %cst_15 {dimension_numbers = #tpu.dot_dimension_numbers<[1], [0], [0], [1], [0, 0, 1, 1], [], []>} : vector<20x32xbf16>, vector<32x16xbf16>, vector<20x16xf32> -> vector<20x16xf32>
    %16 = arith.addf %10, %15 : vector<20x16xf32>
    %c0_16 = arith.constant 0 : index
    %c6 = arith.constant 6 : index
    %c0_17 = arith.constant 0 : index
    %17 = vector.load %arg2[%c0_16, %c6, %c0_17] : memref<1x26x32xbf16, #tpu.memory_space<vmem>>, vector<1x20x32xbf16>
    %18 = vector.shape_cast %17 : vector<1x20x32xbf16> to vector<20x32xbf16>
    %c3 = arith.constant 3 : index
    %c0_18 = arith.constant 0 : index
    %c0_19 = arith.constant 0 : index
    %19 = vector.load %arg3[%c3, %c0_18, %c0_19] : memref<4x32x16xbf16, #tpu.memory_space<vmem>>, vector<1x32x16xbf16>
    %20 = vector.shape_cast %19 : vector<1x32x16xbf16> to vector<32x16xbf16>
    %cst_20 = arith.constant dense<0.000000e+00> : vector<20x16xf32>
    %21 = tpu.matmul %18, %20, %cst_20 {dimension_numbers = #tpu.dot_dimension_numbers<[1], [0], [0], [1], [0, 0, 1, 1], [], []>} : vector<20x32xbf16>, vector<32x16xbf16>, vector<20x16xf32> -> vector<20x16xf32>
    %22 = arith.addf %16, %21 : vector<20x16xf32>
    %23 = tpu.iota {dimensions = array<i32: 0>} : vector<20x16xi32>
    %c5_i32 = arith.constant 5 : i32
    %c0_i32 = arith.constant 0 : i32
    %24 = arith.cmpi eq, %c5_i32, %c0_i32 : i32
    %c1_i32 = arith.constant 1 : i32
    %25 = arith.select %24, %c1_i32, %c5_i32 : i32
    %26 = vector.broadcast %25 : i32 to vector<20x16xi32>
    %27 = arith.remsi %23, %26 : vector<20x16xi32>
    %c0_i32_21 = arith.constant 0 : i32
    %28 = vector.broadcast %c0_i32_21 : i32 to vector<20x16xi32>
    %29 = arith.cmpi ne, %27, %28 : vector<20x16xi32>
    %c0_i32_22 = arith.constant 0 : i32
    %30 = vector.broadcast %c0_i32_22 : i32 to vector<20x16xi32>
    %31 = arith.cmpi slt, %27, %30 : vector<20x16xi32>
    %c0_i32_23 = arith.constant 0 : i32
    %32 = arith.cmpi slt, %25, %c0_i32_23 : i32
    %33 = vector.broadcast %32 : i1 to vector<20x16xi1>
    %34 = vector.broadcast %33 : vector<20x16xi1> to vector<20x16xi1>
    %35 = arith.xori %31, %34 : vector<20x16xi1>
    %36 = arith.andi %35, %29 : vector<20x16xi1>
    %37 = vector.broadcast %25 : i32 to vector<20x16xi32>
    %38 = arith.addi %27, %37 : vector<20x16xi32>
    %39 = arith.select %36, %38, %27 : vector<20x16xi1>, vector<20x16xi32>
    %c4_i32 = arith.constant 4 : i32
    %40 = vector.broadcast %c4_i32 : i32 to vector<20x16xi32>
    %41 = arith.cmpi slt, %39, %40 : vector<20x16xi32>
    %42 = arith.extui %41 : vector<20x16xi1> to vector<20x16xi32>
    %43 = arith.sitofp %42 : vector<20x16xi32> to vector<20x16xf32>
    %44 = arith.mulf %22, %43 : vector<20x16xf32>
    %cst_24 = arith.constant dense<0.000000e+00> : vector<16xf32>
    %45 = vector.multi_reduction <add>, %44, %cst_24 [0] : vector<20x16xf32> to vector<16xf32>
    %46 = vector.shape_cast %45 : vector<16xf32> to vector<1x16xf32>
    %cst_25 = arith.constant 6.250000e-02 : f32
    %47 = vector.broadcast %cst_25 : f32 to vector<1x16xf32>
    %48 = arith.mulf %46, %47 : vector<1x16xf32>
    %49 = vector.broadcast %48 : vector<1x16xf32> to vector<20x16xf32>
    %50 = arith.subf %22, %49 : vector<20x16xf32>
    %51 = arith.mulf %50, %50 : vector<20x16xf32>
    %52 = arith.mulf %51, %43 : vector<20x16xf32>
    %cst_26 = arith.constant dense<0.000000e+00> : vector<16xf32>
    %53 = vector.multi_reduction <add>, %52, %cst_26 [0] : vector<20x16xf32> to vector<16xf32>
    %54 = vector.shape_cast %53 : vector<16xf32> to vector<1x16xf32>
    %cst_27 = arith.constant 6.250000e-02 : f32
    %55 = vector.broadcast %cst_27 : f32 to vector<1x16xf32>
    %56 = arith.mulf %54, %55 : vector<1x16xf32>
    %cst_28 = arith.constant 9.99999974E-6 : f32
    %57 = vector.broadcast %cst_28 : f32 to vector<1x16xf32>
    %58 = arith.addf %56, %57 : vector<1x16xf32>
    %59 = math.rsqrt %58 : vector<1x16xf32>
    %60 = vector.broadcast %48 : vector<1x16xf32> to vector<20x16xf32>
    %61 = arith.subf %22, %60 : vector<20x16xf32>
    %62 = vector.broadcast %59 : vector<1x16xf32> to vector<20x16xf32>
    %63 = arith.mulf %61, %62 : vector<20x16xf32>
    %cst_29 = arith.constant 0.000000e+00 : f32
    %64 = vector.broadcast %cst_29 : f32 to vector<20x16xf32>
    %65 = arith.cmpf oge, %63, %64 : vector<20x16xf32>
    %cst_30 = arith.constant 2.000000e-01 : f32
    %66 = vector.broadcast %cst_30 : f32 to vector<20x16xf32>
    %67 = arith.mulf %66, %63 : vector<20x16xf32>
    %68 = arith.select %65, %63, %67 : vector<20x16xi1>, vector<20x16xf32>
    %69 = arith.truncf %68 : vector<20x16xf32> to vector<20x16xbf16>
    %c0_31 = arith.constant 0 : index
    %c0_32 = arith.constant 0 : index
    %c0_33 = arith.constant 0 : index
    %70 = vector.load %arg5[%c0_31, %c0_32, %c0_33] : memref<1x20x16xbf16, #tpu.memory_space<vmem>>, vector<1x20x16xbf16>
    %71 = vector.shape_cast %70 : vector<1x20x16xbf16> to vector<20x16xbf16>
    %72 = vector.shape_cast %69 : vector<20x16xbf16> to vector<1x20x16xbf16>
    tpu.vector_store %arg5[%c0_31, %c0_32, %c0_33], %72 {strides = array<i32>} : memref<1x20x16xbf16, #tpu.memory_space<vmem>>, vector<1x20x16xbf16>,
    return
  }
  func.func @transform_0(%arg0: i32, %arg1: i32) -> (i32, i32, i32) {
    %c0_i32 = arith.constant 0 : i32
    %c0_i32_0 = arith.constant 0 : i32
    %c0_i32_1 = arith.constant 0 : i32
    return %arg0, %c0_i32, %c0_i32_0 : i32, i32, i32
  }
  func.func @transform_1(%arg0: i32, %arg1: i32) -> (i32, i32, i32) {
    %c0_i32 = arith.constant 0 : i32
    %c0_i32_0 = arith.constant 0 : i32
    %c0_i32_1 = arith.constant 0 : i32
    return %c0_i32, %c0_i32_0, %arg1 : i32, i32, i32
  }
  func.func @transform_2(%arg0: i32, %arg1: i32) -> (i32, i32) {
    %c0_i32 = arith.constant 0 : i32
    %c0_i32_0 = arith.constant 0 : i32
    return %c0_i32, %arg1 : i32, i32
  }
  func.func @transform_3(%arg0: i32, %arg1: i32) -> (i32, i32, i32) {
    %c0_i32 = arith.constant 0 : i32
    %c0_i32_0 = arith.constant 0 : i32
    return %arg0, %c0_i32, %arg1 : i32, i32, i32
  }
}

module attributes {stable_mosaic.version = 11 : i64} {
  func.func @_conv_phase_kernel(%arg0: i32, %arg1: i32, %arg2: memref<1x10x64xbf16, #tpu.memory_space<vmem>>, %arg3: memref<4x64x32xbf16, #tpu.memory_space<vmem>>, %arg4: memref<1x32xf32, #tpu.memory_space<vmem>>, %arg5: memref<1x6x32xbf16, #tpu.memory_space<vmem>>) attributes {dimension_semantics = [#tpu.dimension_semantics<parallel>, #tpu.dimension_semantics<parallel>], iteration_bounds = array<i64: 2, 1>, scalar_prefetch = 0 : i64, scratch_operands = 0 : i64, tpu.core_type = #tpu.core_type<tc>, window_params = [{transform_indices = @transform_0, window_bounds = array<i64: 1, 10, 64>}, {transform_indices = @transform_1, window_bounds = array<i64: 4, 64, 32>}, {transform_indices = @transform_2, window_bounds = array<i64: 1, 32>}, {transform_indices = @transform_3, window_bounds = array<i64: 1, 6, 32>}]} {
    %c0 = arith.constant 0 : index
    %c0_0 = arith.constant 0 : index
    %c0_1 = arith.constant 0 : index
    %0 = vector.load %arg2[%c0, %c0_0, %c0_1] : memref<1x10x64xbf16, #tpu.memory_space<vmem>>, vector<1x6x64xbf16>
    %1 = vector.shape_cast %0 : vector<1x6x64xbf16> to vector<6x64xbf16>
    %c0_2 = arith.constant 0 : index
    %c0_3 = arith.constant 0 : index
    %c0_4 = arith.constant 0 : index
    %2 = vector.load %arg3[%c0_2, %c0_3, %c0_4] : memref<4x64x32xbf16, #tpu.memory_space<vmem>>, vector<1x64x32xbf16>
    %3 = vector.shape_cast %2 : vector<1x64x32xbf16> to vector<64x32xbf16>
    %cst = arith.constant dense<0.000000e+00> : vector<6x32xf32>
    %4 = tpu.matmul %1, %3, %cst {dimension_numbers = #tpu.dot_dimension_numbers<[1], [0], [0], [1], [0, 0, 1, 1], [], []>} : vector<6x64xbf16>, vector<64x32xbf16>, vector<6x32xf32> -> vector<6x32xf32>
    %c0_5 = arith.constant 0 : index
    %c1 = arith.constant 1 : index
    %c0_6 = arith.constant 0 : index
    %5 = vector.load %arg2[%c0_5, %c1, %c0_6] : memref<1x10x64xbf16, #tpu.memory_space<vmem>>, vector<1x6x64xbf16>
    %6 = vector.shape_cast %5 : vector<1x6x64xbf16> to vector<6x64xbf16>
    %c1_7 = arith.constant 1 : index
    %c0_8 = arith.constant 0 : index
    %c0_9 = arith.constant 0 : index
    %7 = vector.load %arg3[%c1_7, %c0_8, %c0_9] : memref<4x64x32xbf16, #tpu.memory_space<vmem>>, vector<1x64x32xbf16>
    %8 = vector.shape_cast %7 : vector<1x64x32xbf16> to vector<64x32xbf16>
    %cst_10 = arith.constant dense<0.000000e+00> : vector<6x32xf32>
    %9 = tpu.matmul %6, %8, %cst_10 {dimension_numbers = #tpu.dot_dimension_numbers<[1], [0], [0], [1], [0, 0, 1, 1], [], []>} : vector<6x64xbf16>, vector<64x32xbf16>, vector<6x32xf32> -> vector<6x32xf32>
    %10 = arith.addf %4, %9 : vector<6x32xf32>
    %c0_11 = arith.constant 0 : index
    %c3 = arith.constant 3 : index
    %c0_12 = arith.constant 0 : index
    %11 = vector.load %arg2[%c0_11, %c3, %c0_12] : memref<1x10x64xbf16, #tpu.memory_space<vmem>>, vector<1x6x64xbf16>
    %12 = vector.shape_cast %11 : vector<1x6x64xbf16> to vector<6x64xbf16>
    %c2 = arith.constant 2 : index
    %c0_13 = arith.constant 0 : index
    %c0_14 = arith.constant 0 : index
    %13 = vector.load %arg3[%c2, %c0_13, %c0_14] : memref<4x64x32xbf16, #tpu.memory_space<vmem>>, vector<1x64x32xbf16>
    %14 = vector.shape_cast %13 : vector<1x64x32xbf16> to vector<64x32xbf16>
    %cst_15 = arith.constant dense<0.000000e+00> : vector<6x32xf32>
    %15 = tpu.matmul %12, %14, %cst_15 {dimension_numbers = #tpu.dot_dimension_numbers<[1], [0], [0], [1], [0, 0, 1, 1], [], []>} : vector<6x64xbf16>, vector<64x32xbf16>, vector<6x32xf32> -> vector<6x32xf32>
    %16 = arith.addf %10, %15 : vector<6x32xf32>
    %c0_16 = arith.constant 0 : index
    %c4 = arith.constant 4 : index
    %c0_17 = arith.constant 0 : index
    %17 = vector.load %arg2[%c0_16, %c4, %c0_17] : memref<1x10x64xbf16, #tpu.memory_space<vmem>>, vector<1x6x64xbf16>
    %18 = vector.shape_cast %17 : vector<1x6x64xbf16> to vector<6x64xbf16>
    %c3_18 = arith.constant 3 : index
    %c0_19 = arith.constant 0 : index
    %c0_20 = arith.constant 0 : index
    %19 = vector.load %arg3[%c3_18, %c0_19, %c0_20] : memref<4x64x32xbf16, #tpu.memory_space<vmem>>, vector<1x64x32xbf16>
    %20 = vector.shape_cast %19 : vector<1x64x32xbf16> to vector<64x32xbf16>
    %cst_21 = arith.constant dense<0.000000e+00> : vector<6x32xf32>
    %21 = tpu.matmul %18, %20, %cst_21 {dimension_numbers = #tpu.dot_dimension_numbers<[1], [0], [0], [1], [0, 0, 1, 1], [], []>} : vector<6x64xbf16>, vector<64x32xbf16>, vector<6x32xf32> -> vector<6x32xf32>
    %22 = arith.addf %16, %21 : vector<6x32xf32>
    %23 = tpu.iota {dimensions = array<i32: 0>} : vector<6x32xi32>
    %c3_i32 = arith.constant 3 : i32
    %c0_i32 = arith.constant 0 : i32
    %24 = arith.cmpi eq, %c3_i32, %c0_i32 : i32
    %c1_i32 = arith.constant 1 : i32
    %25 = arith.select %24, %c1_i32, %c3_i32 : i32
    %26 = vector.broadcast %25 : i32 to vector<6x32xi32>
    %27 = arith.remsi %23, %26 : vector<6x32xi32>
    %c0_i32_22 = arith.constant 0 : i32
    %28 = vector.broadcast %c0_i32_22 : i32 to vector<6x32xi32>
    %29 = arith.cmpi ne, %27, %28 : vector<6x32xi32>
    %c0_i32_23 = arith.constant 0 : i32
    %30 = vector.broadcast %c0_i32_23 : i32 to vector<6x32xi32>
    %31 = arith.cmpi slt, %27, %30 : vector<6x32xi32>
    %c0_i32_24 = arith.constant 0 : i32
    %32 = arith.cmpi slt, %25, %c0_i32_24 : i32
    %33 = vector.broadcast %32 : i1 to vector<6x32xi1>
    %34 = vector.broadcast %33 : vector<6x32xi1> to vector<6x32xi1>
    %35 = arith.xori %31, %34 : vector<6x32xi1>
    %36 = arith.andi %35, %29 : vector<6x32xi1>
    %37 = vector.broadcast %25 : i32 to vector<6x32xi32>
    %38 = arith.addi %27, %37 : vector<6x32xi32>
    %39 = arith.select %36, %38, %27 : vector<6x32xi1>, vector<6x32xi32>
    %c2_i32 = arith.constant 2 : i32
    %40 = vector.broadcast %c2_i32 : i32 to vector<6x32xi32>
    %41 = arith.cmpi slt, %39, %40 : vector<6x32xi32>
    %42 = arith.extui %41 : vector<6x32xi1> to vector<6x32xi32>
    %43 = arith.sitofp %42 : vector<6x32xi32> to vector<6x32xf32>
    %44 = arith.mulf %22, %43 : vector<6x32xf32>
    %cst_25 = arith.constant dense<0.000000e+00> : vector<32xf32>
    %45 = vector.multi_reduction <add>, %44, %cst_25 [0] : vector<6x32xf32> to vector<32xf32>
    %46 = vector.shape_cast %45 : vector<32xf32> to vector<1x32xf32>
    %cst_26 = arith.constant 2.500000e-01 : f32
    %47 = vector.broadcast %cst_26 : f32 to vector<1x32xf32>
    %48 = arith.mulf %46, %47 : vector<1x32xf32>
    %49 = vector.broadcast %48 : vector<1x32xf32> to vector<6x32xf32>
    %50 = arith.subf %22, %49 : vector<6x32xf32>
    %51 = arith.mulf %50, %50 : vector<6x32xf32>
    %52 = arith.mulf %51, %43 : vector<6x32xf32>
    %cst_27 = arith.constant dense<0.000000e+00> : vector<32xf32>
    %53 = vector.multi_reduction <add>, %52, %cst_27 [0] : vector<6x32xf32> to vector<32xf32>
    %54 = vector.shape_cast %53 : vector<32xf32> to vector<1x32xf32>
    %cst_28 = arith.constant 2.500000e-01 : f32
    %55 = vector.broadcast %cst_28 : f32 to vector<1x32xf32>
    %56 = arith.mulf %54, %55 : vector<1x32xf32>
    %cst_29 = arith.constant 9.99999974E-6 : f32
    %57 = vector.broadcast %cst_29 : f32 to vector<1x32xf32>
    %58 = arith.addf %56, %57 : vector<1x32xf32>
    %59 = math.rsqrt %58 : vector<1x32xf32>
    %60 = vector.broadcast %48 : vector<1x32xf32> to vector<6x32xf32>
    %61 = arith.subf %22, %60 : vector<6x32xf32>
    %62 = vector.broadcast %59 : vector<1x32xf32> to vector<6x32xf32>
    %63 = arith.mulf %61, %62 : vector<6x32xf32>
    %cst_30 = arith.constant 0.000000e+00 : f32
    %64 = vector.broadcast %cst_30 : f32 to vector<6x32xf32>
    %65 = arith.cmpf oge, %63, %64 : vector<6x32xf32>
    %cst_31 = arith.constant 2.000000e-01 : f32
    %66 = vector.broadcast %cst_31 : f32 to vector<6x32xf32>
    %67 = arith.mulf %66, %63 : vector<6x32xf32>
    %68 = arith.select %65, %63, %67 : vector<6x32xi1>, vector<6x32xf32>
    %69 = arith.truncf %68 : vector<6x32xf32> to vector<6x32xbf16>
    %c0_32 = arith.constant 0 : index
    %c0_33 = arith.constant 0 : index
    %c0_34 = arith.constant 0 : index
    %70 = vector.load %arg5[%c0_32, %c0_33, %c0_34] : memref<1x6x32xbf16, #tpu.memory_space<vmem>>, vector<1x6x32xbf16>
    %71 = vector.shape_cast %70 : vector<1x6x32xbf16> to vector<6x32xbf16>
    %72 = vector.shape_cast %69 : vector<6x32xbf16> to vector<1x6x32xbf16>
    tpu.vector_store %arg5[%c0_32, %c0_33, %c0_34], %72 {strides = array<i32>} : memref<1x6x32xbf16, #tpu.memory_space<vmem>>, vector<1x6x32xbf16>,
    return
  }
  func.func @transform_0(%arg0: i32, %arg1: i32) -> (i32, i32, i32) {
    %c0_i32 = arith.constant 0 : i32
    %c0_i32_0 = arith.constant 0 : i32
    %c0_i32_1 = arith.constant 0 : i32
    return %arg0, %c0_i32, %c0_i32_0 : i32, i32, i32
  }
  func.func @transform_1(%arg0: i32, %arg1: i32) -> (i32, i32, i32) {
    %c0_i32 = arith.constant 0 : i32
    %c0_i32_0 = arith.constant 0 : i32
    %c0_i32_1 = arith.constant 0 : i32
    return %c0_i32, %c0_i32_0, %arg1 : i32, i32, i32
  }
  func.func @transform_2(%arg0: i32, %arg1: i32) -> (i32, i32) {
    %c0_i32 = arith.constant 0 : i32
    %c0_i32_0 = arith.constant 0 : i32
    return %c0_i32, %arg1 : i32, i32
  }
  func.func @transform_3(%arg0: i32, %arg1: i32) -> (i32, i32, i32) {
    %c0_i32 = arith.constant 0 : i32
    %c0_i32_0 = arith.constant 0 : i32
    return %arg0, %c0_i32, %arg1 : i32, i32, i32
  }
}

module attributes {stable_mosaic.version = 11 : i64} {
  func.func @_conv_phase_kernel(%arg0: i32, %arg1: i32, %arg2: memref<1x5x128xbf16, #tpu.memory_space<vmem>>, %arg3: memref<4x128x32xbf16, #tpu.memory_space<vmem>>, %arg4: memref<1x32xf32, #tpu.memory_space<vmem>>, %arg5: memref<1x2x32xbf16, #tpu.memory_space<vmem>>) attributes {dimension_semantics = [#tpu.dimension_semantics<parallel>, #tpu.dimension_semantics<parallel>], iteration_bounds = array<i64: 2, 1>, scalar_prefetch = 0 : i64, scratch_operands = 0 : i64, tpu.core_type = #tpu.core_type<tc>, window_params = [{transform_indices = @transform_0, window_bounds = array<i64: 1, 5, 128>}, {transform_indices = @transform_1, window_bounds = array<i64: 4, 128, 32>}, {transform_indices = @transform_2, window_bounds = array<i64: 1, 32>}, {transform_indices = @transform_3, window_bounds = array<i64: 1, 2, 32>}]} {
    %c0 = arith.constant 0 : index
    %c0_0 = arith.constant 0 : index
    %c0_1 = arith.constant 0 : index
    %0 = vector.load %arg2[%c0, %c0_0, %c0_1] : memref<1x5x128xbf16, #tpu.memory_space<vmem>>, vector<1x2x128xbf16>
    %1 = vector.shape_cast %0 : vector<1x2x128xbf16> to vector<2x128xbf16>
    %c0_2 = arith.constant 0 : index
    %c0_3 = arith.constant 0 : index
    %c0_4 = arith.constant 0 : index
    %2 = vector.load %arg3[%c0_2, %c0_3, %c0_4] : memref<4x128x32xbf16, #tpu.memory_space<vmem>>, vector<1x128x32xbf16>
    %3 = vector.shape_cast %2 : vector<1x128x32xbf16> to vector<128x32xbf16>
    %cst = arith.constant dense<0.000000e+00> : vector<2x32xf32>
    %4 = tpu.matmul %1, %3, %cst {dimension_numbers = #tpu.dot_dimension_numbers<[1], [0], [0], [1], [0, 0, 1, 1], [], []>} : vector<2x128xbf16>, vector<128x32xbf16>, vector<2x32xf32> -> vector<2x32xf32>
    %c0_5 = arith.constant 0 : index
    %c1 = arith.constant 1 : index
    %c0_6 = arith.constant 0 : index
    %5 = vector.load %arg2[%c0_5, %c1, %c0_6] : memref<1x5x128xbf16, #tpu.memory_space<vmem>>, vector<1x2x128xbf16>
    %6 = vector.shape_cast %5 : vector<1x2x128xbf16> to vector<2x128xbf16>
    %c1_7 = arith.constant 1 : index
    %c0_8 = arith.constant 0 : index
    %c0_9 = arith.constant 0 : index
    %7 = vector.load %arg3[%c1_7, %c0_8, %c0_9] : memref<4x128x32xbf16, #tpu.memory_space<vmem>>, vector<1x128x32xbf16>
    %8 = vector.shape_cast %7 : vector<1x128x32xbf16> to vector<128x32xbf16>
    %cst_10 = arith.constant dense<0.000000e+00> : vector<2x32xf32>
    %9 = tpu.matmul %6, %8, %cst_10 {dimension_numbers = #tpu.dot_dimension_numbers<[1], [0], [0], [1], [0, 0, 1, 1], [], []>} : vector<2x128xbf16>, vector<128x32xbf16>, vector<2x32xf32> -> vector<2x32xf32>
    %10 = arith.addf %4, %9 : vector<2x32xf32>
    %c0_11 = arith.constant 0 : index
    %c2 = arith.constant 2 : index
    %c0_12 = arith.constant 0 : index
    %11 = vector.load %arg2[%c0_11, %c2, %c0_12] : memref<1x5x128xbf16, #tpu.memory_space<vmem>>, vector<1x2x128xbf16>
    %12 = vector.shape_cast %11 : vector<1x2x128xbf16> to vector<2x128xbf16>
    %c2_13 = arith.constant 2 : index
    %c0_14 = arith.constant 0 : index
    %c0_15 = arith.constant 0 : index
    %13 = vector.load %arg3[%c2_13, %c0_14, %c0_15] : memref<4x128x32xbf16, #tpu.memory_space<vmem>>, vector<1x128x32xbf16>
    %14 = vector.shape_cast %13 : vector<1x128x32xbf16> to vector<128x32xbf16>
    %cst_16 = arith.constant dense<0.000000e+00> : vector<2x32xf32>
    %15 = tpu.matmul %12, %14, %cst_16 {dimension_numbers = #tpu.dot_dimension_numbers<[1], [0], [0], [1], [0, 0, 1, 1], [], []>} : vector<2x128xbf16>, vector<128x32xbf16>, vector<2x32xf32> -> vector<2x32xf32>
    %16 = arith.addf %10, %15 : vector<2x32xf32>
    %c0_17 = arith.constant 0 : index
    %c3 = arith.constant 3 : index
    %c0_18 = arith.constant 0 : index
    %17 = vector.load %arg2[%c0_17, %c3, %c0_18] : memref<1x5x128xbf16, #tpu.memory_space<vmem>>, vector<1x2x128xbf16>
    %18 = vector.shape_cast %17 : vector<1x2x128xbf16> to vector<2x128xbf16>
    %c3_19 = arith.constant 3 : index
    %c0_20 = arith.constant 0 : index
    %c0_21 = arith.constant 0 : index
    %19 = vector.load %arg3[%c3_19, %c0_20, %c0_21] : memref<4x128x32xbf16, #tpu.memory_space<vmem>>, vector<1x128x32xbf16>
    %20 = vector.shape_cast %19 : vector<1x128x32xbf16> to vector<128x32xbf16>
    %cst_22 = arith.constant dense<0.000000e+00> : vector<2x32xf32>
    %21 = tpu.matmul %18, %20, %cst_22 {dimension_numbers = #tpu.dot_dimension_numbers<[1], [0], [0], [1], [0, 0, 1, 1], [], []>} : vector<2x128xbf16>, vector<128x32xbf16>, vector<2x32xf32> -> vector<2x32xf32>
    %22 = arith.addf %16, %21 : vector<2x32xf32>
    %cst_23 = arith.constant 0.000000e+00 : f32
    %23 = vector.broadcast %cst_23 : f32 to vector<2x32xf32>
    %24 = arith.cmpf oge, %22, %23 : vector<2x32xf32>
    %cst_24 = arith.constant 2.000000e-01 : f32
    %25 = vector.broadcast %cst_24 : f32 to vector<2x32xf32>
    %26 = arith.mulf %25, %22 : vector<2x32xf32>
    %27 = arith.select %24, %22, %26 : vector<2x32xi1>, vector<2x32xf32>
    %28 = arith.truncf %27 : vector<2x32xf32> to vector<2x32xbf16>
    %c0_25 = arith.constant 0 : index
    %c0_26 = arith.constant 0 : index
    %c0_27 = arith.constant 0 : index
    %29 = vector.load %arg5[%c0_25, %c0_26, %c0_27] : memref<1x2x32xbf16, #tpu.memory_space<vmem>>, vector<1x2x32xbf16>
    %30 = vector.shape_cast %29 : vector<1x2x32xbf16> to vector<2x32xbf16>
    %31 = vector.shape_cast %28 : vector<2x32xbf16> to vector<1x2x32xbf16>
    tpu.vector_store %arg5[%c0_25, %c0_26, %c0_27], %31 {strides = array<i32>} : memref<1x2x32xbf16, #tpu.memory_space<vmem>>, vector<1x2x32xbf16>,
    return
  }
  func.func @transform_0(%arg0: i32, %arg1: i32) -> (i32, i32, i32) {
    %c0_i32 = arith.constant 0 : i32
    %c0_i32_0 = arith.constant 0 : i32
    %c0_i32_1 = arith.constant 0 : i32
    return %arg0, %c0_i32, %c0_i32_0 : i32, i32, i32
  }
  func.func @transform_1(%arg0: i32, %arg1: i32) -> (i32, i32, i32) {
    %c0_i32 = arith.constant 0 : i32
    %c0_i32_0 = arith.constant 0 : i32
    %c0_i32_1 = arith.constant 0 : i32
    return %c0_i32, %c0_i32_0, %arg1 : i32, i32, i32
  }
  func.func @transform_2(%arg0: i32, %arg1: i32) -> (i32, i32) {
    %c0_i32 = arith.constant 0 : i32
    %c0_i32_0 = arith.constant 0 : i32
    return %c0_i32, %arg1 : i32, i32
  }
  func.func @transform_3(%arg0: i32, %arg1: i32) -> (i32, i32, i32) {
    %c0_i32 = arith.constant 0 : i32
    %c0_i32_0 = arith.constant 0 : i32
    return %arg0, %c0_i32, %arg1 : i32, i32, i32
  }
}

module attributes {stable_mosaic.version = 11 : i64} {
  func.func @_conv_phase_kernel(%arg0: i32, %arg1: i32, %arg2: memref<1x11x32xbf16, #tpu.memory_space<vmem>>, %arg3: memref<16x32x32xbf16, #tpu.memory_space<vmem>>, %arg4: memref<1x32xf32, #tpu.memory_space<vmem>>, %arg5: memref<1x12x32xbf16, #tpu.memory_space<vmem>>) attributes {dimension_semantics = [#tpu.dimension_semantics<parallel>, #tpu.dimension_semantics<parallel>], iteration_bounds = array<i64: 2, 1>, scalar_prefetch = 0 : i64, scratch_operands = 0 : i64, tpu.core_type = #tpu.core_type<tc>, window_params = [{transform_indices = @transform_0, window_bounds = array<i64: 1, 11, 32>}, {transform_indices = @transform_1, window_bounds = array<i64: 16, 32, 32>}, {transform_indices = @transform_2, window_bounds = array<i64: 1, 32>}, {transform_indices = @transform_3, window_bounds = array<i64: 1, 12, 32>}]} {
    %c0 = arith.constant 0 : index
    %c0_0 = arith.constant 0 : index
    %c0_1 = arith.constant 0 : index
    %0 = vector.load %arg2[%c0, %c0_0, %c0_1] : memref<1x11x32xbf16, #tpu.memory_space<vmem>>, vector<1x3x32xbf16>
    %1 = vector.shape_cast %0 : vector<1x3x32xbf16> to vector<3x32xbf16>
    %c0_2 = arith.constant 0 : index
    %c0_3 = arith.constant 0 : index
    %c0_4 = arith.constant 0 : index
    %2 = vector.load %arg3[%c0_2, %c0_3, %c0_4] : memref<16x32x32xbf16, #tpu.memory_space<vmem>>, vector<1x32x32xbf16>
    %3 = vector.shape_cast %2 : vector<1x32x32xbf16> to vector<32x32xbf16>
    %cst = arith.constant dense<0.000000e+00> : vector<3x32xf32>
    %4 = tpu.matmul %1, %3, %cst {dimension_numbers = #tpu.dot_dimension_numbers<[1], [0], [0], [1], [0, 0, 1, 1], [], []>} : vector<3x32xbf16>, vector<32x32xbf16>, vector<3x32xf32> -> vector<3x32xf32>
    %c0_5 = arith.constant 0 : index
    %c1 = arith.constant 1 : index
    %c0_6 = arith.constant 0 : index
    %5 = vector.load %arg2[%c0_5, %c1, %c0_6] : memref<1x11x32xbf16, #tpu.memory_space<vmem>>, vector<1x3x32xbf16>
    %6 = vector.shape_cast %5 : vector<1x3x32xbf16> to vector<3x32xbf16>
    %c1_7 = arith.constant 1 : index
    %c0_8 = arith.constant 0 : index
    %c0_9 = arith.constant 0 : index
    %7 = vector.load %arg3[%c1_7, %c0_8, %c0_9] : memref<16x32x32xbf16, #tpu.memory_space<vmem>>, vector<1x32x32xbf16>
    %8 = vector.shape_cast %7 : vector<1x32x32xbf16> to vector<32x32xbf16>
    %cst_10 = arith.constant dense<0.000000e+00> : vector<3x32xf32>
    %9 = tpu.matmul %6, %8, %cst_10 {dimension_numbers = #tpu.dot_dimension_numbers<[1], [0], [0], [1], [0, 0, 1, 1], [], []>} : vector<3x32xbf16>, vector<32x32xbf16>, vector<3x32xf32> -> vector<3x32xf32>
    %10 = arith.addf %4, %9 : vector<3x32xf32>
    %c0_11 = arith.constant 0 : index
    %c3 = arith.constant 3 : index
    %c0_12 = arith.constant 0 : index
    %11 = vector.load %arg2[%c0_11, %c3, %c0_12] : memref<1x11x32xbf16, #tpu.memory_space<vmem>>, vector<1x3x32xbf16>
    %12 = vector.shape_cast %11 : vector<1x3x32xbf16> to vector<3x32xbf16>
    %c2 = arith.constant 2 : index
    %c0_13 = arith.constant 0 : index
    %c0_14 = arith.constant 0 : index
    %13 = vector.load %arg3[%c2, %c0_13, %c0_14] : memref<16x32x32xbf16, #tpu.memory_space<vmem>>, vector<1x32x32xbf16>
    %14 = vector.shape_cast %13 : vector<1x32x32xbf16> to vector<32x32xbf16>
    %cst_15 = arith.constant dense<0.000000e+00> : vector<3x32xf32>
    %15 = tpu.matmul %12, %14, %cst_15 {dimension_numbers = #tpu.dot_dimension_numbers<[1], [0], [0], [1], [0, 0, 1, 1], [], []>} : vector<3x32xbf16>, vector<32x32xbf16>, vector<3x32xf32> -> vector<3x32xf32>
    %16 = arith.addf %10, %15 : vector<3x32xf32>
    %c0_16 = arith.constant 0 : index
    %c4 = arith.constant 4 : index
    %c0_17 = arith.constant 0 : index
    %17 = vector.load %arg2[%c0_16, %c4, %c0_17] : memref<1x11x32xbf16, #tpu.memory_space<vmem>>, vector<1x3x32xbf16>
    %18 = vector.shape_cast %17 : vector<1x3x32xbf16> to vector<3x32xbf16>
    %c3_18 = arith.constant 3 : index
    %c0_19 = arith.constant 0 : index
    %c0_20 = arith.constant 0 : index
    %19 = vector.load %arg3[%c3_18, %c0_19, %c0_20] : memref<16x32x32xbf16, #tpu.memory_space<vmem>>, vector<1x32x32xbf16>
    %20 = vector.shape_cast %19 : vector<1x32x32xbf16> to vector<32x32xbf16>
    %cst_21 = arith.constant dense<0.000000e+00> : vector<3x32xf32>
    %21 = tpu.matmul %18, %20, %cst_21 {dimension_numbers = #tpu.dot_dimension_numbers<[1], [0], [0], [1], [0, 0, 1, 1], [], []>} : vector<3x32xbf16>, vector<32x32xbf16>, vector<3x32xf32> -> vector<3x32xf32>
    %22 = arith.addf %16, %21 : vector<3x32xf32>
    %c0_22 = arith.constant 0 : index
    %c1_23 = arith.constant 1 : index
    %c0_24 = arith.constant 0 : index
    %23 = vector.load %arg2[%c0_22, %c1_23, %c0_24] : memref<1x11x32xbf16, #tpu.memory_space<vmem>>, vector<1x3x32xbf16>
    %24 = vector.shape_cast %23 : vector<1x3x32xbf16> to vector<3x32xbf16>
    %c4_25 = arith.constant 4 : index
    %c0_26 = arith.constant 0 : index
    %c0_27 = arith.constant 0 : index
    %25 = vector.load %arg3[%c4_25, %c0_26, %c0_27] : memref<16x32x32xbf16, #tpu.memory_space<vmem>>, vector<1x32x32xbf16>
    %26 = vector.shape_cast %25 : vector<1x32x32xbf16> to vector<32x32xbf16>
    %cst_28 = arith.constant dense<0.000000e+00> : vector<3x32xf32>
    %27 = tpu.matmul %24, %26, %cst_28 {dimension_numbers = #tpu.dot_dimension_numbers<[1], [0], [0], [1], [0, 0, 1, 1], [], []>} : vector<3x32xbf16>, vector<32x32xbf16>, vector<3x32xf32> -> vector<3x32xf32>
    %c0_29 = arith.constant 0 : index
    %c2_30 = arith.constant 2 : index
    %c0_31 = arith.constant 0 : index
    %28 = vector.load %arg2[%c0_29, %c2_30, %c0_31] : memref<1x11x32xbf16, #tpu.memory_space<vmem>>, vector<1x3x32xbf16>
    %29 = vector.shape_cast %28 : vector<1x3x32xbf16> to vector<3x32xbf16>
    %c5 = arith.constant 5 : index
    %c0_32 = arith.constant 0 : index
    %c0_33 = arith.constant 0 : index
    %30 = vector.load %arg3[%c5, %c0_32, %c0_33] : memref<16x32x32xbf16, #tpu.memory_space<vmem>>, vector<1x32x32xbf16>
    %31 = vector.shape_cast %30 : vector<1x32x32xbf16> to vector<32x32xbf16>
    %cst_34 = arith.constant dense<0.000000e+00> : vector<3x32xf32>
    %32 = tpu.matmul %29, %31, %cst_34 {dimension_numbers = #tpu.dot_dimension_numbers<[1], [0], [0], [1], [0, 0, 1, 1], [], []>} : vector<3x32xbf16>, vector<32x32xbf16>, vector<3x32xf32> -> vector<3x32xf32>
    %33 = arith.addf %27, %32 : vector<3x32xf32>
    %c0_35 = arith.constant 0 : index
    %c4_36 = arith.constant 4 : index
    %c0_37 = arith.constant 0 : index
    %34 = vector.load %arg2[%c0_35, %c4_36, %c0_37] : memref<1x11x32xbf16, #tpu.memory_space<vmem>>, vector<1x3x32xbf16>
    %35 = vector.shape_cast %34 : vector<1x3x32xbf16> to vector<3x32xbf16>
    %c6 = arith.constant 6 : index
    %c0_38 = arith.constant 0 : index
    %c0_39 = arith.constant 0 : index
    %36 = vector.load %arg3[%c6, %c0_38, %c0_39] : memref<16x32x32xbf16, #tpu.memory_space<vmem>>, vector<1x32x32xbf16>
    %37 = vector.shape_cast %36 : vector<1x32x32xbf16> to vector<32x32xbf16>
    %cst_40 = arith.constant dense<0.000000e+00> : vector<3x32xf32>
    %38 = tpu.matmul %35, %37, %cst_40 {dimension_numbers = #tpu.dot_dimension_numbers<[1], [0], [0], [1], [0, 0, 1, 1], [], []>} : vector<3x32xbf16>, vector<32x32xbf16>, vector<3x32xf32> -> vector<3x32xf32>
    %39 = arith.addf %33, %38 : vector<3x32xf32>
    %c0_41 = arith.constant 0 : index
    %c5_42 = arith.constant 5 : index
    %c0_43 = arith.constant 0 : index
    %40 = vector.load %arg2[%c0_41, %c5_42, %c0_43] : memref<1x11x32xbf16, #tpu.memory_space<vmem>>, vector<1x3x32xbf16>
    %41 = vector.shape_cast %40 : vector<1x3x32xbf16> to vector<3x32xbf16>
    %c7 = arith.constant 7 : index
    %c0_44 = arith.constant 0 : index
    %c0_45 = arith.constant 0 : index
    %42 = vector.load %arg3[%c7, %c0_44, %c0_45] : memref<16x32x32xbf16, #tpu.memory_space<vmem>>, vector<1x32x32xbf16>
    %43 = vector.shape_cast %42 : vector<1x32x32xbf16> to vector<32x32xbf16>
    %cst_46 = arith.constant dense<0.000000e+00> : vector<3x32xf32>
    %44 = tpu.matmul %41, %43, %cst_46 {dimension_numbers = #tpu.dot_dimension_numbers<[1], [0], [0], [1], [0, 0, 1, 1], [], []>} : vector<3x32xbf16>, vector<32x32xbf16>, vector<3x32xf32> -> vector<3x32xf32>
    %45 = arith.addf %39, %44 : vector<3x32xf32>
    %c0_47 = arith.constant 0 : index
    %c3_48 = arith.constant 3 : index
    %c0_49 = arith.constant 0 : index
    %46 = vector.load %arg2[%c0_47, %c3_48, %c0_49] : memref<1x11x32xbf16, #tpu.memory_space<vmem>>, vector<1x3x32xbf16>
    %47 = vector.shape_cast %46 : vector<1x3x32xbf16> to vector<3x32xbf16>
    %c8 = arith.constant 8 : index
    %c0_50 = arith.constant 0 : index
    %c0_51 = arith.constant 0 : index
    %48 = vector.load %arg3[%c8, %c0_50, %c0_51] : memref<16x32x32xbf16, #tpu.memory_space<vmem>>, vector<1x32x32xbf16>
    %49 = vector.shape_cast %48 : vector<1x32x32xbf16> to vector<32x32xbf16>
    %cst_52 = arith.constant dense<0.000000e+00> : vector<3x32xf32>
    %50 = tpu.matmul %47, %49, %cst_52 {dimension_numbers = #tpu.dot_dimension_numbers<[1], [0], [0], [1], [0, 0, 1, 1], [], []>} : vector<3x32xbf16>, vector<32x32xbf16>, vector<3x32xf32> -> vector<3x32xf32>
    %c0_53 = arith.constant 0 : index
    %c4_54 = arith.constant 4 : index
    %c0_55 = arith.constant 0 : index
    %51 = vector.load %arg2[%c0_53, %c4_54, %c0_55] : memref<1x11x32xbf16, #tpu.memory_space<vmem>>, vector<1x3x32xbf16>
    %52 = vector.shape_cast %51 : vector<1x3x32xbf16> to vector<3x32xbf16>
    %c9 = arith.constant 9 : index
    %c0_56 = arith.constant 0 : index
    %c0_57 = arith.constant 0 : index
    %53 = vector.load %arg3[%c9, %c0_56, %c0_57] : memref<16x32x32xbf16, #tpu.memory_space<vmem>>, vector<1x32x32xbf16>
    %54 = vector.shape_cast %53 : vector<1x32x32xbf16> to vector<32x32xbf16>
    %cst_58 = arith.constant dense<0.000000e+00> : vector<3x32xf32>
    %55 = tpu.matmul %52, %54, %cst_58 {dimension_numbers = #tpu.dot_dimension_numbers<[1], [0], [0], [1], [0, 0, 1, 1], [], []>} : vector<3x32xbf16>, vector<32x32xbf16>, vector<3x32xf32> -> vector<3x32xf32>
    %56 = arith.addf %50, %55 : vector<3x32xf32>
    %c0_59 = arith.constant 0 : index
    %c6_60 = arith.constant 6 : index
    %c0_61 = arith.constant 0 : index
    %57 = vector.load %arg2[%c0_59, %c6_60, %c0_61] : memref<1x11x32xbf16, #tpu.memory_space<vmem>>, vector<1x3x32xbf16>
    %58 = vector.shape_cast %57 : vector<1x3x32xbf16> to vector<3x32xbf16>
    %c10 = arith.constant 10 : index
    %c0_62 = arith.constant 0 : index
    %c0_63 = arith.constant 0 : index
    %59 = vector.load %arg3[%c10, %c0_62, %c0_63] : memref<16x32x32xbf16, #tpu.memory_space<vmem>>, vector<1x32x32xbf16>
    %60 = vector.shape_cast %59 : vector<1x32x32xbf16> to vector<32x32xbf16>
    %cst_64 = arith.constant dense<0.000000e+00> : vector<3x32xf32>
    %61 = tpu.matmul %58, %60, %cst_64 {dimension_numbers = #tpu.dot_dimension_numbers<[1], [0], [0], [1], [0, 0, 1, 1], [], []>} : vector<3x32xbf16>, vector<32x32xbf16>, vector<3x32xf32> -> vector<3x32xf32>
    %62 = arith.addf %56, %61 : vector<3x32xf32>
    %c0_65 = arith.constant 0 : index
    %c7_66 = arith.constant 7 : index
    %c0_67 = arith.constant 0 : index
    %63 = vector.load %arg2[%c0_65, %c7_66, %c0_67] : memref<1x11x32xbf16, #tpu.memory_space<vmem>>, vector<1x3x32xbf16>
    %64 = vector.shape_cast %63 : vector<1x3x32xbf16> to vector<3x32xbf16>
    %c11 = arith.constant 11 : index
    %c0_68 = arith.constant 0 : index
    %c0_69 = arith.constant 0 : index
    %65 = vector.load %arg3[%c11, %c0_68, %c0_69] : memref<16x32x32xbf16, #tpu.memory_space<vmem>>, vector<1x32x32xbf16>
    %66 = vector.shape_cast %65 : vector<1x32x32xbf16> to vector<32x32xbf16>
    %cst_70 = arith.constant dense<0.000000e+00> : vector<3x32xf32>
    %67 = tpu.matmul %64, %66, %cst_70 {dimension_numbers = #tpu.dot_dimension_numbers<[1], [0], [0], [1], [0, 0, 1, 1], [], []>} : vector<3x32xbf16>, vector<32x32xbf16>, vector<3x32xf32> -> vector<3x32xf32>
    %68 = arith.addf %62, %67 : vector<3x32xf32>
    %c0_71 = arith.constant 0 : index
    %c4_72 = arith.constant 4 : index
    %c0_73 = arith.constant 0 : index
    %69 = vector.load %arg2[%c0_71, %c4_72, %c0_73] : memref<1x11x32xbf16, #tpu.memory_space<vmem>>, vector<1x3x32xbf16>
    %70 = vector.shape_cast %69 : vector<1x3x32xbf16> to vector<3x32xbf16>
    %c12 = arith.constant 12 : index
    %c0_74 = arith.constant 0 : index
    %c0_75 = arith.constant 0 : index
    %71 = vector.load %arg3[%c12, %c0_74, %c0_75] : memref<16x32x32xbf16, #tpu.memory_space<vmem>>, vector<1x32x32xbf16>
    %72 = vector.shape_cast %71 : vector<1x32x32xbf16> to vector<32x32xbf16>
    %cst_76 = arith.constant dense<0.000000e+00> : vector<3x32xf32>
    %73 = tpu.matmul %70, %72, %cst_76 {dimension_numbers = #tpu.dot_dimension_numbers<[1], [0], [0], [1], [0, 0, 1, 1], [], []>} : vector<3x32xbf16>, vector<32x32xbf16>, vector<3x32xf32> -> vector<3x32xf32>
    %c0_77 = arith.constant 0 : index
    %c5_78 = arith.constant 5 : index
    %c0_79 = arith.constant 0 : index
    %74 = vector.load %arg2[%c0_77, %c5_78, %c0_79] : memref<1x11x32xbf16, #tpu.memory_space<vmem>>, vector<1x3x32xbf16>
    %75 = vector.shape_cast %74 : vector<1x3x32xbf16> to vector<3x32xbf16>
    %c13 = arith.constant 13 : index
    %c0_80 = arith.constant 0 : index
    %c0_81 = arith.constant 0 : index
    %76 = vector.load %arg3[%c13, %c0_80, %c0_81] : memref<16x32x32xbf16, #tpu.memory_space<vmem>>, vector<1x32x32xbf16>
    %77 = vector.shape_cast %76 : vector<1x32x32xbf16> to vector<32x32xbf16>
    %cst_82 = arith.constant dense<0.000000e+00> : vector<3x32xf32>
    %78 = tpu.matmul %75, %77, %cst_82 {dimension_numbers = #tpu.dot_dimension_numbers<[1], [0], [0], [1], [0, 0, 1, 1], [], []>} : vector<3x32xbf16>, vector<32x32xbf16>, vector<3x32xf32> -> vector<3x32xf32>
    %79 = arith.addf %73, %78 : vector<3x32xf32>
    %c0_83 = arith.constant 0 : index
    %c7_84 = arith.constant 7 : index
    %c0_85 = arith.constant 0 : index
    %80 = vector.load %arg2[%c0_83, %c7_84, %c0_85] : memref<1x11x32xbf16, #tpu.memory_space<vmem>>, vector<1x3x32xbf16>
    %81 = vector.shape_cast %80 : vector<1x3x32xbf16> to vector<3x32xbf16>
    %c14 = arith.constant 14 : index
    %c0_86 = arith.constant 0 : index
    %c0_87 = arith.constant 0 : index
    %82 = vector.load %arg3[%c14, %c0_86, %c0_87] : memref<16x32x32xbf16, #tpu.memory_space<vmem>>, vector<1x32x32xbf16>
    %83 = vector.shape_cast %82 : vector<1x32x32xbf16> to vector<32x32xbf16>
    %cst_88 = arith.constant dense<0.000000e+00> : vector<3x32xf32>
    %84 = tpu.matmul %81, %83, %cst_88 {dimension_numbers = #tpu.dot_dimension_numbers<[1], [0], [0], [1], [0, 0, 1, 1], [], []>} : vector<3x32xbf16>, vector<32x32xbf16>, vector<3x32xf32> -> vector<3x32xf32>
    %85 = arith.addf %79, %84 : vector<3x32xf32>
    %c0_89 = arith.constant 0 : index
    %c8_90 = arith.constant 8 : index
    %c0_91 = arith.constant 0 : index
    %86 = vector.load %arg2[%c0_89, %c8_90, %c0_91] : memref<1x11x32xbf16, #tpu.memory_space<vmem>>, vector<1x3x32xbf16>
    %87 = vector.shape_cast %86 : vector<1x3x32xbf16> to vector<3x32xbf16>
    %c15 = arith.constant 15 : index
    %c0_92 = arith.constant 0 : index
    %c0_93 = arith.constant 0 : index
    %88 = vector.load %arg3[%c15, %c0_92, %c0_93] : memref<16x32x32xbf16, #tpu.memory_space<vmem>>, vector<1x32x32xbf16>
    %89 = vector.shape_cast %88 : vector<1x32x32xbf16> to vector<32x32xbf16>
    %cst_94 = arith.constant dense<0.000000e+00> : vector<3x32xf32>
    %90 = tpu.matmul %87, %89, %cst_94 {dimension_numbers = #tpu.dot_dimension_numbers<[1], [0], [0], [1], [0, 0, 1, 1], [], []>} : vector<3x32xbf16>, vector<32x32xbf16>, vector<3x32xf32> -> vector<3x32xf32>
    %91 = arith.addf %85, %90 : vector<3x32xf32>
    %92 = tpu.iota {dimensions = array<i32: 0>} : vector<3x32xi32>
    %c3_i32 = arith.constant 3 : i32
    %c0_i32 = arith.constant 0 : i32
    %93 = arith.cmpi eq, %c3_i32, %c0_i32 : i32
    %c1_i32 = arith.constant 1 : i32
    %94 = arith.select %93, %c1_i32, %c3_i32 : i32
    %95 = vector.broadcast %94 : i32 to vector<3x32xi32>
    %96 = arith.remsi %92, %95 : vector<3x32xi32>
    %c0_i32_95 = arith.constant 0 : i32
    %97 = vector.broadcast %c0_i32_95 : i32 to vector<3x32xi32>
    %98 = arith.cmpi ne, %96, %97 : vector<3x32xi32>
    %c0_i32_96 = arith.constant 0 : i32
    %99 = vector.broadcast %c0_i32_96 : i32 to vector<3x32xi32>
    %100 = arith.cmpi slt, %96, %99 : vector<3x32xi32>
    %c0_i32_97 = arith.constant 0 : i32
    %101 = arith.cmpi slt, %94, %c0_i32_97 : i32
    %102 = vector.broadcast %101 : i1 to vector<3x32xi1>
    %103 = vector.broadcast %102 : vector<3x32xi1> to vector<3x32xi1>
    %104 = arith.xori %100, %103 : vector<3x32xi1>
    %105 = arith.andi %104, %98 : vector<3x32xi1>
    %106 = vector.broadcast %94 : i32 to vector<3x32xi32>
    %107 = arith.addi %96, %106 : vector<3x32xi32>
    %108 = arith.select %105, %107, %96 : vector<3x32xi1>, vector<3x32xi32>
    %c1_i32_98 = arith.constant 1 : i32
    %109 = vector.broadcast %c1_i32_98 : i32 to vector<3x32xi32>
    %110 = arith.cmpi slt, %108, %109 : vector<3x32xi32>
    %111 = arith.extui %110 : vector<3x32xi1> to vector<3x32xi32>
    %112 = arith.sitofp %111 : vector<3x32xi32> to vector<3x32xf32>
    %113 = arith.mulf %22, %112 : vector<3x32xf32>
    %114 = arith.mulf %45, %112 : vector<3x32xf32>
    %115 = arith.addf %113, %114 : vector<3x32xf32>
    %116 = arith.mulf %68, %112 : vector<3x32xf32>
    %117 = arith.addf %115, %116 : vector<3x32xf32>
    %118 = arith.mulf %91, %112 : vector<3x32xf32>
    %119 = arith.addf %117, %118 : vector<3x32xf32>
    %cst_99 = arith.constant dense<0.000000e+00> : vector<32xf32>
    %120 = vector.multi_reduction <add>, %119, %cst_99 [0] : vector<3x32xf32> to vector<32xf32>
    %121 = vector.shape_cast %120 : vector<32xf32> to vector<1x32xf32>
    %cst_100 = arith.constant 2.500000e-01 : f32
    %122 = vector.broadcast %cst_100 : f32 to vector<1x32xf32>
    %123 = arith.mulf %121, %122 : vector<1x32xf32>
    %124 = vector.broadcast %123 : vector<1x32xf32> to vector<3x32xf32>
    %125 = arith.subf %22, %124 : vector<3x32xf32>
    %126 = arith.mulf %125, %125 : vector<3x32xf32>
    %127 = arith.mulf %126, %112 : vector<3x32xf32>
    %128 = vector.broadcast %123 : vector<1x32xf32> to vector<3x32xf32>
    %129 = arith.subf %45, %128 : vector<3x32xf32>
    %130 = arith.mulf %129, %129 : vector<3x32xf32>
    %131 = arith.mulf %130, %112 : vector<3x32xf32>
    %132 = arith.addf %127, %131 : vector<3x32xf32>
    %133 = vector.broadcast %123 : vector<1x32xf32> to vector<3x32xf32>
    %134 = arith.subf %68, %133 : vector<3x32xf32>
    %135 = arith.mulf %134, %134 : vector<3x32xf32>
    %136 = arith.mulf %135, %112 : vector<3x32xf32>
    %137 = arith.addf %132, %136 : vector<3x32xf32>
    %138 = vector.broadcast %123 : vector<1x32xf32> to vector<3x32xf32>
    %139 = arith.subf %91, %138 : vector<3x32xf32>
    %140 = arith.mulf %139, %139 : vector<3x32xf32>
    %141 = arith.mulf %140, %112 : vector<3x32xf32>
    %142 = arith.addf %137, %141 : vector<3x32xf32>
    %cst_101 = arith.constant dense<0.000000e+00> : vector<32xf32>
    %143 = vector.multi_reduction <add>, %142, %cst_101 [0] : vector<3x32xf32> to vector<32xf32>
    %144 = vector.shape_cast %143 : vector<32xf32> to vector<1x32xf32>
    %cst_102 = arith.constant 2.500000e-01 : f32
    %145 = vector.broadcast %cst_102 : f32 to vector<1x32xf32>
    %146 = arith.mulf %144, %145 : vector<1x32xf32>
    %cst_103 = arith.constant 9.99999974E-6 : f32
    %147 = vector.broadcast %cst_103 : f32 to vector<1x32xf32>
    %148 = arith.addf %146, %147 : vector<1x32xf32>
    %149 = math.rsqrt %148 : vector<1x32xf32>
    %150 = vector.broadcast %123 : vector<1x32xf32> to vector<3x32xf32>
    %151 = arith.subf %22, %150 : vector<3x32xf32>
    %152 = vector.broadcast %149 : vector<1x32xf32> to vector<3x32xf32>
    %153 = arith.mulf %151, %152 : vector<3x32xf32>
    %154 = vector.broadcast %123 : vector<1x32xf32> to vector<3x32xf32>
    %155 = arith.subf %45, %154 : vector<3x32xf32>
    %156 = vector.broadcast %149 : vector<1x32xf32> to vector<3x32xf32>
    %157 = arith.mulf %155, %156 : vector<3x32xf32>
    %158 = vector.broadcast %123 : vector<1x32xf32> to vector<3x32xf32>
    %159 = arith.subf %68, %158 : vector<3x32xf32>
    %160 = vector.broadcast %149 : vector<1x32xf32> to vector<3x32xf32>
    %161 = arith.mulf %159, %160 : vector<3x32xf32>
    %162 = vector.broadcast %123 : vector<1x32xf32> to vector<3x32xf32>
    %163 = arith.subf %91, %162 : vector<3x32xf32>
    %164 = vector.broadcast %149 : vector<1x32xf32> to vector<3x32xf32>
    %165 = arith.mulf %163, %164 : vector<3x32xf32>
    %cst_104 = arith.constant 0.000000e+00 : f32
    %166 = vector.broadcast %cst_104 : f32 to vector<3x32xf32>
    %167 = arith.maximumf %153, %166 : vector<3x32xf32>
    %cst_105 = arith.constant 0.000000e+00 : f32
    %168 = vector.broadcast %cst_105 : f32 to vector<3x32xf32>
    %169 = arith.maximumf %157, %168 : vector<3x32xf32>
    %cst_106 = arith.constant 0.000000e+00 : f32
    %170 = vector.broadcast %cst_106 : f32 to vector<3x32xf32>
    %171 = arith.maximumf %161, %170 : vector<3x32xf32>
    %cst_107 = arith.constant 0.000000e+00 : f32
    %172 = vector.broadcast %cst_107 : f32 to vector<3x32xf32>
    %173 = arith.maximumf %165, %172 : vector<3x32xf32>
    %174 = arith.truncf %167 : vector<3x32xf32> to vector<3x32xbf16>
    %c0_108 = arith.constant 0 : index
    %c0_109 = arith.constant 0 : index
    %c0_110 = arith.constant 0 : index
    %175 = vector.load %arg5[%c0_108, %c0_109, %c0_110] : memref<1x12x32xbf16, #tpu.memory_space<vmem>>, vector<1x3x32xbf16>
    %176 = vector.shape_cast %175 : vector<1x3x32xbf16> to vector<3x32xbf16>
    %177 = vector.shape_cast %174 : vector<3x32xbf16> to vector<1x3x32xbf16>
    tpu.vector_store %arg5[%c0_108, %c0_109, %c0_110], %177 {strides = array<i32>} : memref<1x12x32xbf16, #tpu.memory_space<vmem>>, vector<1x3x32xbf16>,
    %178 = arith.truncf %169 : vector<3x32xf32> to vector<3x32xbf16>
    %c0_111 = arith.constant 0 : index
    %c3_112 = arith.constant 3 : index
    %c0_113 = arith.constant 0 : index
    %179 = vector.load %arg5[%c0_111, %c3_112, %c0_113] : memref<1x12x32xbf16, #tpu.memory_space<vmem>>, vector<1x3x32xbf16>
    %180 = vector.shape_cast %179 : vector<1x3x32xbf16> to vector<3x32xbf16>
    %181 = vector.shape_cast %178 : vector<3x32xbf16> to vector<1x3x32xbf16>
    tpu.vector_store %arg5[%c0_111, %c3_112, %c0_113], %181 {strides = array<i32>} : memref<1x12x32xbf16, #tpu.memory_space<vmem>>, vector<1x3x32xbf16>,
    %182 = arith.truncf %171 : vector<3x32xf32> to vector<3x32xbf16>
    %c0_114 = arith.constant 0 : index
    %c6_115 = arith.constant 6 : index
    %c0_116 = arith.constant 0 : index
    %183 = vector.load %arg5[%c0_114, %c6_115, %c0_116] : memref<1x12x32xbf16, #tpu.memory_space<vmem>>, vector<1x3x32xbf16>
    %184 = vector.shape_cast %183 : vector<1x3x32xbf16> to vector<3x32xbf16>
    %185 = vector.shape_cast %182 : vector<3x32xbf16> to vector<1x3x32xbf16>
    tpu.vector_store %arg5[%c0_114, %c6_115, %c0_116], %185 {strides = array<i32>} : memref<1x12x32xbf16, #tpu.memory_space<vmem>>, vector<1x3x32xbf16>,
    %186 = arith.truncf %173 : vector<3x32xf32> to vector<3x32xbf16>
    %c0_117 = arith.constant 0 : index
    %c9_118 = arith.constant 9 : index
    %c0_119 = arith.constant 0 : index
    %187 = vector.load %arg5[%c0_117, %c9_118, %c0_119] : memref<1x12x32xbf16, #tpu.memory_space<vmem>>, vector<1x3x32xbf16>
    %188 = vector.shape_cast %187 : vector<1x3x32xbf16> to vector<3x32xbf16>
    %189 = vector.shape_cast %186 : vector<3x32xbf16> to vector<1x3x32xbf16>
    tpu.vector_store %arg5[%c0_117, %c9_118, %c0_119], %189 {strides = array<i32>} : memref<1x12x32xbf16, #tpu.memory_space<vmem>>, vector<1x3x32xbf16>,
    return
  }
  func.func @transform_0(%arg0: i32, %arg1: i32) -> (i32, i32, i32) {
    %c0_i32 = arith.constant 0 : i32
    %c0_i32_0 = arith.constant 0 : i32
    %c0_i32_1 = arith.constant 0 : i32
    return %arg0, %c0_i32, %c0_i32_0 : i32, i32, i32
  }
  func.func @transform_1(%arg0: i32, %arg1: i32) -> (i32, i32, i32) {
    %c0_i32 = arith.constant 0 : i32
    %c0_i32_0 = arith.constant 0 : i32
    %c0_i32_1 = arith.constant 0 : i32
    return %c0_i32, %c0_i32_0, %arg1 : i32, i32, i32
  }
  func.func @transform_2(%arg0: i32, %arg1: i32) -> (i32, i32) {
    %c0_i32 = arith.constant 0 : i32
    %c0_i32_0 = arith.constant 0 : i32
    return %c0_i32, %arg1 : i32, i32
  }
  func.func @transform_3(%arg0: i32, %arg1: i32) -> (i32, i32, i32) {
    %c0_i32 = arith.constant 0 : i32
    %c0_i32_0 = arith.constant 0 : i32
    return %arg0, %c0_i32, %arg1 : i32, i32, i32
  }
}

module attributes {stable_mosaic.version = 11 : i64} {
  func.func @_conv_phase_kernel(%arg0: i32, %arg1: i32, %arg2: memref<1x18x64xbf16, #tpu.memory_space<vmem>>, %arg3: memref<16x64x16xbf16, #tpu.memory_space<vmem>>, %arg4: memref<1x16xf32, #tpu.memory_space<vmem>>, %arg5: memref<1x32x16xbf16, #tpu.memory_space<vmem>>) attributes {dimension_semantics = [#tpu.dimension_semantics<parallel>, #tpu.dimension_semantics<parallel>], iteration_bounds = array<i64: 2, 1>, scalar_prefetch = 0 : i64, scratch_operands = 0 : i64, tpu.core_type = #tpu.core_type<tc>, window_params = [{transform_indices = @transform_0, window_bounds = array<i64: 1, 18, 64>}, {transform_indices = @transform_1, window_bounds = array<i64: 16, 64, 16>}, {transform_indices = @transform_2, window_bounds = array<i64: 1, 16>}, {transform_indices = @transform_3, window_bounds = array<i64: 1, 32, 16>}]} {
    %c0 = arith.constant 0 : index
    %c0_0 = arith.constant 0 : index
    %c0_1 = arith.constant 0 : index
    %0 = vector.load %arg2[%c0, %c0_0, %c0_1] : memref<1x18x64xbf16, #tpu.memory_space<vmem>>, vector<1x8x64xbf16>
    %1 = vector.shape_cast %0 : vector<1x8x64xbf16> to vector<8x64xbf16>
    %c0_2 = arith.constant 0 : index
    %c0_3 = arith.constant 0 : index
    %c0_4 = arith.constant 0 : index
    %2 = vector.load %arg3[%c0_2, %c0_3, %c0_4] : memref<16x64x16xbf16, #tpu.memory_space<vmem>>, vector<1x64x16xbf16>
    %3 = vector.shape_cast %2 : vector<1x64x16xbf16> to vector<64x16xbf16>
    %cst = arith.constant dense<0.000000e+00> : vector<8x16xf32>
    %4 = tpu.matmul %1, %3, %cst {dimension_numbers = #tpu.dot_dimension_numbers<[1], [0], [0], [1], [0, 0, 1, 1], [], []>} : vector<8x64xbf16>, vector<64x16xbf16>, vector<8x16xf32> -> vector<8x16xf32>
    %c0_5 = arith.constant 0 : index
    %c1 = arith.constant 1 : index
    %c0_6 = arith.constant 0 : index
    %5 = vector.load %arg2[%c0_5, %c1, %c0_6] : memref<1x18x64xbf16, #tpu.memory_space<vmem>>, vector<1x8x64xbf16>
    %6 = vector.shape_cast %5 : vector<1x8x64xbf16> to vector<8x64xbf16>
    %c1_7 = arith.constant 1 : index
    %c0_8 = arith.constant 0 : index
    %c0_9 = arith.constant 0 : index
    %7 = vector.load %arg3[%c1_7, %c0_8, %c0_9] : memref<16x64x16xbf16, #tpu.memory_space<vmem>>, vector<1x64x16xbf16>
    %8 = vector.shape_cast %7 : vector<1x64x16xbf16> to vector<64x16xbf16>
    %cst_10 = arith.constant dense<0.000000e+00> : vector<8x16xf32>
    %9 = tpu.matmul %6, %8, %cst_10 {dimension_numbers = #tpu.dot_dimension_numbers<[1], [0], [0], [1], [0, 0, 1, 1], [], []>} : vector<8x64xbf16>, vector<64x16xbf16>, vector<8x16xf32> -> vector<8x16xf32>
    %10 = arith.addf %4, %9 : vector<8x16xf32>
    %c0_11 = arith.constant 0 : index
    %c4 = arith.constant 4 : index
    %c0_12 = arith.constant 0 : index
    %11 = vector.load %arg2[%c0_11, %c4, %c0_12] : memref<1x18x64xbf16, #tpu.memory_space<vmem>>, vector<1x8x64xbf16>
    %12 = vector.shape_cast %11 : vector<1x8x64xbf16> to vector<8x64xbf16>
    %c2 = arith.constant 2 : index
    %c0_13 = arith.constant 0 : index
    %c0_14 = arith.constant 0 : index
    %13 = vector.load %arg3[%c2, %c0_13, %c0_14] : memref<16x64x16xbf16, #tpu.memory_space<vmem>>, vector<1x64x16xbf16>
    %14 = vector.shape_cast %13 : vector<1x64x16xbf16> to vector<64x16xbf16>
    %cst_15 = arith.constant dense<0.000000e+00> : vector<8x16xf32>
    %15 = tpu.matmul %12, %14, %cst_15 {dimension_numbers = #tpu.dot_dimension_numbers<[1], [0], [0], [1], [0, 0, 1, 1], [], []>} : vector<8x64xbf16>, vector<64x16xbf16>, vector<8x16xf32> -> vector<8x16xf32>
    %16 = arith.addf %10, %15 : vector<8x16xf32>
    %c0_16 = arith.constant 0 : index
    %c5 = arith.constant 5 : index
    %c0_17 = arith.constant 0 : index
    %17 = vector.load %arg2[%c0_16, %c5, %c0_17] : memref<1x18x64xbf16, #tpu.memory_space<vmem>>, vector<1x8x64xbf16>
    %18 = vector.shape_cast %17 : vector<1x8x64xbf16> to vector<8x64xbf16>
    %c3 = arith.constant 3 : index
    %c0_18 = arith.constant 0 : index
    %c0_19 = arith.constant 0 : index
    %19 = vector.load %arg3[%c3, %c0_18, %c0_19] : memref<16x64x16xbf16, #tpu.memory_space<vmem>>, vector<1x64x16xbf16>
    %20 = vector.shape_cast %19 : vector<1x64x16xbf16> to vector<64x16xbf16>
    %cst_20 = arith.constant dense<0.000000e+00> : vector<8x16xf32>
    %21 = tpu.matmul %18, %20, %cst_20 {dimension_numbers = #tpu.dot_dimension_numbers<[1], [0], [0], [1], [0, 0, 1, 1], [], []>} : vector<8x64xbf16>, vector<64x16xbf16>, vector<8x16xf32> -> vector<8x16xf32>
    %22 = arith.addf %16, %21 : vector<8x16xf32>
    %c0_21 = arith.constant 0 : index
    %c1_22 = arith.constant 1 : index
    %c0_23 = arith.constant 0 : index
    %23 = vector.load %arg2[%c0_21, %c1_22, %c0_23] : memref<1x18x64xbf16, #tpu.memory_space<vmem>>, vector<1x8x64xbf16>
    %24 = vector.shape_cast %23 : vector<1x8x64xbf16> to vector<8x64xbf16>
    %c4_24 = arith.constant 4 : index
    %c0_25 = arith.constant 0 : index
    %c0_26 = arith.constant 0 : index
    %25 = vector.load %arg3[%c4_24, %c0_25, %c0_26] : memref<16x64x16xbf16, #tpu.memory_space<vmem>>, vector<1x64x16xbf16>
    %26 = vector.shape_cast %25 : vector<1x64x16xbf16> to vector<64x16xbf16>
    %cst_27 = arith.constant dense<0.000000e+00> : vector<8x16xf32>
    %27 = tpu.matmul %24, %26, %cst_27 {dimension_numbers = #tpu.dot_dimension_numbers<[1], [0], [0], [1], [0, 0, 1, 1], [], []>} : vector<8x64xbf16>, vector<64x16xbf16>, vector<8x16xf32> -> vector<8x16xf32>
    %c0_28 = arith.constant 0 : index
    %c2_29 = arith.constant 2 : index
    %c0_30 = arith.constant 0 : index
    %28 = vector.load %arg2[%c0_28, %c2_29, %c0_30] : memref<1x18x64xbf16, #tpu.memory_space<vmem>>, vector<1x8x64xbf16>
    %29 = vector.shape_cast %28 : vector<1x8x64xbf16> to vector<8x64xbf16>
    %c5_31 = arith.constant 5 : index
    %c0_32 = arith.constant 0 : index
    %c0_33 = arith.constant 0 : index
    %30 = vector.load %arg3[%c5_31, %c0_32, %c0_33] : memref<16x64x16xbf16, #tpu.memory_space<vmem>>, vector<1x64x16xbf16>
    %31 = vector.shape_cast %30 : vector<1x64x16xbf16> to vector<64x16xbf16>
    %cst_34 = arith.constant dense<0.000000e+00> : vector<8x16xf32>
    %32 = tpu.matmul %29, %31, %cst_34 {dimension_numbers = #tpu.dot_dimension_numbers<[1], [0], [0], [1], [0, 0, 1, 1], [], []>} : vector<8x64xbf16>, vector<64x16xbf16>, vector<8x16xf32> -> vector<8x16xf32>
    %33 = arith.addf %27, %32 : vector<8x16xf32>
    %c0_35 = arith.constant 0 : index
    %c5_36 = arith.constant 5 : index
    %c0_37 = arith.constant 0 : index
    %34 = vector.load %arg2[%c0_35, %c5_36, %c0_37] : memref<1x18x64xbf16, #tpu.memory_space<vmem>>, vector<1x8x64xbf16>
    %35 = vector.shape_cast %34 : vector<1x8x64xbf16> to vector<8x64xbf16>
    %c6 = arith.constant 6 : index
    %c0_38 = arith.constant 0 : index
    %c0_39 = arith.constant 0 : index
    %36 = vector.load %arg3[%c6, %c0_38, %c0_39] : memref<16x64x16xbf16, #tpu.memory_space<vmem>>, vector<1x64x16xbf16>
    %37 = vector.shape_cast %36 : vector<1x64x16xbf16> to vector<64x16xbf16>
    %cst_40 = arith.constant dense<0.000000e+00> : vector<8x16xf32>
    %38 = tpu.matmul %35, %37, %cst_40 {dimension_numbers = #tpu.dot_dimension_numbers<[1], [0], [0], [1], [0, 0, 1, 1], [], []>} : vector<8x64xbf16>, vector<64x16xbf16>, vector<8x16xf32> -> vector<8x16xf32>
    %39 = arith.addf %33, %38 : vector<8x16xf32>
    %c0_41 = arith.constant 0 : index
    %c6_42 = arith.constant 6 : index
    %c0_43 = arith.constant 0 : index
    %40 = vector.load %arg2[%c0_41, %c6_42, %c0_43] : memref<1x18x64xbf16, #tpu.memory_space<vmem>>, vector<1x8x64xbf16>
    %41 = vector.shape_cast %40 : vector<1x8x64xbf16> to vector<8x64xbf16>
    %c7 = arith.constant 7 : index
    %c0_44 = arith.constant 0 : index
    %c0_45 = arith.constant 0 : index
    %42 = vector.load %arg3[%c7, %c0_44, %c0_45] : memref<16x64x16xbf16, #tpu.memory_space<vmem>>, vector<1x64x16xbf16>
    %43 = vector.shape_cast %42 : vector<1x64x16xbf16> to vector<64x16xbf16>
    %cst_46 = arith.constant dense<0.000000e+00> : vector<8x16xf32>
    %44 = tpu.matmul %41, %43, %cst_46 {dimension_numbers = #tpu.dot_dimension_numbers<[1], [0], [0], [1], [0, 0, 1, 1], [], []>} : vector<8x64xbf16>, vector<64x16xbf16>, vector<8x16xf32> -> vector<8x16xf32>
    %45 = arith.addf %39, %44 : vector<8x16xf32>
    %c0_47 = arith.constant 0 : index
    %c4_48 = arith.constant 4 : index
    %c0_49 = arith.constant 0 : index
    %46 = vector.load %arg2[%c0_47, %c4_48, %c0_49] : memref<1x18x64xbf16, #tpu.memory_space<vmem>>, vector<1x8x64xbf16>
    %47 = vector.shape_cast %46 : vector<1x8x64xbf16> to vector<8x64xbf16>
    %c8 = arith.constant 8 : index
    %c0_50 = arith.constant 0 : index
    %c0_51 = arith.constant 0 : index
    %48 = vector.load %arg3[%c8, %c0_50, %c0_51] : memref<16x64x16xbf16, #tpu.memory_space<vmem>>, vector<1x64x16xbf16>
    %49 = vector.shape_cast %48 : vector<1x64x16xbf16> to vector<64x16xbf16>
    %cst_52 = arith.constant dense<0.000000e+00> : vector<8x16xf32>
    %50 = tpu.matmul %47, %49, %cst_52 {dimension_numbers = #tpu.dot_dimension_numbers<[1], [0], [0], [1], [0, 0, 1, 1], [], []>} : vector<8x64xbf16>, vector<64x16xbf16>, vector<8x16xf32> -> vector<8x16xf32>
    %c0_53 = arith.constant 0 : index
    %c5_54 = arith.constant 5 : index
    %c0_55 = arith.constant 0 : index
    %51 = vector.load %arg2[%c0_53, %c5_54, %c0_55] : memref<1x18x64xbf16, #tpu.memory_space<vmem>>, vector<1x8x64xbf16>
    %52 = vector.shape_cast %51 : vector<1x8x64xbf16> to vector<8x64xbf16>
    %c9 = arith.constant 9 : index
    %c0_56 = arith.constant 0 : index
    %c0_57 = arith.constant 0 : index
    %53 = vector.load %arg3[%c9, %c0_56, %c0_57] : memref<16x64x16xbf16, #tpu.memory_space<vmem>>, vector<1x64x16xbf16>
    %54 = vector.shape_cast %53 : vector<1x64x16xbf16> to vector<64x16xbf16>
    %cst_58 = arith.constant dense<0.000000e+00> : vector<8x16xf32>
    %55 = tpu.matmul %52, %54, %cst_58 {dimension_numbers = #tpu.dot_dimension_numbers<[1], [0], [0], [1], [0, 0, 1, 1], [], []>} : vector<8x64xbf16>, vector<64x16xbf16>, vector<8x16xf32> -> vector<8x16xf32>
    %56 = arith.addf %50, %55 : vector<8x16xf32>
    %c0_59 = arith.constant 0 : index
    %c8_60 = arith.constant 8 : index
    %c0_61 = arith.constant 0 : index
    %57 = vector.load %arg2[%c0_59, %c8_60, %c0_61] : memref<1x18x64xbf16, #tpu.memory_space<vmem>>, vector<1x8x64xbf16>
    %58 = vector.shape_cast %57 : vector<1x8x64xbf16> to vector<8x64xbf16>
    %c10 = arith.constant 10 : index
    %c0_62 = arith.constant 0 : index
    %c0_63 = arith.constant 0 : index
    %59 = vector.load %arg3[%c10, %c0_62, %c0_63] : memref<16x64x16xbf16, #tpu.memory_space<vmem>>, vector<1x64x16xbf16>
    %60 = vector.shape_cast %59 : vector<1x64x16xbf16> to vector<64x16xbf16>
    %cst_64 = arith.constant dense<0.000000e+00> : vector<8x16xf32>
    %61 = tpu.matmul %58, %60, %cst_64 {dimension_numbers = #tpu.dot_dimension_numbers<[1], [0], [0], [1], [0, 0, 1, 1], [], []>} : vector<8x64xbf16>, vector<64x16xbf16>, vector<8x16xf32> -> vector<8x16xf32>
    %62 = arith.addf %56, %61 : vector<8x16xf32>
    %c0_65 = arith.constant 0 : index
    %c9_66 = arith.constant 9 : index
    %c0_67 = arith.constant 0 : index
    %63 = vector.load %arg2[%c0_65, %c9_66, %c0_67] : memref<1x18x64xbf16, #tpu.memory_space<vmem>>, vector<1x8x64xbf16>
    %64 = vector.shape_cast %63 : vector<1x8x64xbf16> to vector<8x64xbf16>
    %c11 = arith.constant 11 : index
    %c0_68 = arith.constant 0 : index
    %c0_69 = arith.constant 0 : index
    %65 = vector.load %arg3[%c11, %c0_68, %c0_69] : memref<16x64x16xbf16, #tpu.memory_space<vmem>>, vector<1x64x16xbf16>
    %66 = vector.shape_cast %65 : vector<1x64x16xbf16> to vector<64x16xbf16>
    %cst_70 = arith.constant dense<0.000000e+00> : vector<8x16xf32>
    %67 = tpu.matmul %64, %66, %cst_70 {dimension_numbers = #tpu.dot_dimension_numbers<[1], [0], [0], [1], [0, 0, 1, 1], [], []>} : vector<8x64xbf16>, vector<64x16xbf16>, vector<8x16xf32> -> vector<8x16xf32>
    %68 = arith.addf %62, %67 : vector<8x16xf32>
    %c0_71 = arith.constant 0 : index
    %c5_72 = arith.constant 5 : index
    %c0_73 = arith.constant 0 : index
    %69 = vector.load %arg2[%c0_71, %c5_72, %c0_73] : memref<1x18x64xbf16, #tpu.memory_space<vmem>>, vector<1x8x64xbf16>
    %70 = vector.shape_cast %69 : vector<1x8x64xbf16> to vector<8x64xbf16>
    %c12 = arith.constant 12 : index
    %c0_74 = arith.constant 0 : index
    %c0_75 = arith.constant 0 : index
    %71 = vector.load %arg3[%c12, %c0_74, %c0_75] : memref<16x64x16xbf16, #tpu.memory_space<vmem>>, vector<1x64x16xbf16>
    %72 = vector.shape_cast %71 : vector<1x64x16xbf16> to vector<64x16xbf16>
    %cst_76 = arith.constant dense<0.000000e+00> : vector<8x16xf32>
    %73 = tpu.matmul %70, %72, %cst_76 {dimension_numbers = #tpu.dot_dimension_numbers<[1], [0], [0], [1], [0, 0, 1, 1], [], []>} : vector<8x64xbf16>, vector<64x16xbf16>, vector<8x16xf32> -> vector<8x16xf32>
    %c0_77 = arith.constant 0 : index
    %c6_78 = arith.constant 6 : index
    %c0_79 = arith.constant 0 : index
    %74 = vector.load %arg2[%c0_77, %c6_78, %c0_79] : memref<1x18x64xbf16, #tpu.memory_space<vmem>>, vector<1x8x64xbf16>
    %75 = vector.shape_cast %74 : vector<1x8x64xbf16> to vector<8x64xbf16>
    %c13 = arith.constant 13 : index
    %c0_80 = arith.constant 0 : index
    %c0_81 = arith.constant 0 : index
    %76 = vector.load %arg3[%c13, %c0_80, %c0_81] : memref<16x64x16xbf16, #tpu.memory_space<vmem>>, vector<1x64x16xbf16>
    %77 = vector.shape_cast %76 : vector<1x64x16xbf16> to vector<64x16xbf16>
    %cst_82 = arith.constant dense<0.000000e+00> : vector<8x16xf32>
    %78 = tpu.matmul %75, %77, %cst_82 {dimension_numbers = #tpu.dot_dimension_numbers<[1], [0], [0], [1], [0, 0, 1, 1], [], []>} : vector<8x64xbf16>, vector<64x16xbf16>, vector<8x16xf32> -> vector<8x16xf32>
    %79 = arith.addf %73, %78 : vector<8x16xf32>
    %c0_83 = arith.constant 0 : index
    %c9_84 = arith.constant 9 : index
    %c0_85 = arith.constant 0 : index
    %80 = vector.load %arg2[%c0_83, %c9_84, %c0_85] : memref<1x18x64xbf16, #tpu.memory_space<vmem>>, vector<1x8x64xbf16>
    %81 = vector.shape_cast %80 : vector<1x8x64xbf16> to vector<8x64xbf16>
    %c14 = arith.constant 14 : index
    %c0_86 = arith.constant 0 : index
    %c0_87 = arith.constant 0 : index
    %82 = vector.load %arg3[%c14, %c0_86, %c0_87] : memref<16x64x16xbf16, #tpu.memory_space<vmem>>, vector<1x64x16xbf16>
    %83 = vector.shape_cast %82 : vector<1x64x16xbf16> to vector<64x16xbf16>
    %cst_88 = arith.constant dense<0.000000e+00> : vector<8x16xf32>
    %84 = tpu.matmul %81, %83, %cst_88 {dimension_numbers = #tpu.dot_dimension_numbers<[1], [0], [0], [1], [0, 0, 1, 1], [], []>} : vector<8x64xbf16>, vector<64x16xbf16>, vector<8x16xf32> -> vector<8x16xf32>
    %85 = arith.addf %79, %84 : vector<8x16xf32>
    %c0_89 = arith.constant 0 : index
    %c10_90 = arith.constant 10 : index
    %c0_91 = arith.constant 0 : index
    %86 = vector.load %arg2[%c0_89, %c10_90, %c0_91] : memref<1x18x64xbf16, #tpu.memory_space<vmem>>, vector<1x8x64xbf16>
    %87 = vector.shape_cast %86 : vector<1x8x64xbf16> to vector<8x64xbf16>
    %c15 = arith.constant 15 : index
    %c0_92 = arith.constant 0 : index
    %c0_93 = arith.constant 0 : index
    %88 = vector.load %arg3[%c15, %c0_92, %c0_93] : memref<16x64x16xbf16, #tpu.memory_space<vmem>>, vector<1x64x16xbf16>
    %89 = vector.shape_cast %88 : vector<1x64x16xbf16> to vector<64x16xbf16>
    %cst_94 = arith.constant dense<0.000000e+00> : vector<8x16xf32>
    %90 = tpu.matmul %87, %89, %cst_94 {dimension_numbers = #tpu.dot_dimension_numbers<[1], [0], [0], [1], [0, 0, 1, 1], [], []>} : vector<8x64xbf16>, vector<64x16xbf16>, vector<8x16xf32> -> vector<8x16xf32>
    %91 = arith.addf %85, %90 : vector<8x16xf32>
    %92 = tpu.iota {dimensions = array<i32: 0>} : vector<8x16xi32>
    %c4_i32 = arith.constant 4 : i32
    %c0_i32 = arith.constant 0 : i32
    %93 = arith.cmpi eq, %c4_i32, %c0_i32 : i32
    %c1_i32 = arith.constant 1 : i32
    %94 = arith.select %93, %c1_i32, %c4_i32 : i32
    %95 = vector.broadcast %94 : i32 to vector<8x16xi32>
    %96 = arith.remsi %92, %95 : vector<8x16xi32>
    %c0_i32_95 = arith.constant 0 : i32
    %97 = vector.broadcast %c0_i32_95 : i32 to vector<8x16xi32>
    %98 = arith.cmpi ne, %96, %97 : vector<8x16xi32>
    %c0_i32_96 = arith.constant 0 : i32
    %99 = vector.broadcast %c0_i32_96 : i32 to vector<8x16xi32>
    %100 = arith.cmpi slt, %96, %99 : vector<8x16xi32>
    %c0_i32_97 = arith.constant 0 : i32
    %101 = arith.cmpi slt, %94, %c0_i32_97 : i32
    %102 = vector.broadcast %101 : i1 to vector<8x16xi1>
    %103 = vector.broadcast %102 : vector<8x16xi1> to vector<8x16xi1>
    %104 = arith.xori %100, %103 : vector<8x16xi1>
    %105 = arith.andi %104, %98 : vector<8x16xi1>
    %106 = vector.broadcast %94 : i32 to vector<8x16xi32>
    %107 = arith.addi %96, %106 : vector<8x16xi32>
    %108 = arith.select %105, %107, %96 : vector<8x16xi1>, vector<8x16xi32>
    %c2_i32 = arith.constant 2 : i32
    %109 = vector.broadcast %c2_i32 : i32 to vector<8x16xi32>
    %110 = arith.cmpi slt, %108, %109 : vector<8x16xi32>
    %111 = arith.extui %110 : vector<8x16xi1> to vector<8x16xi32>
    %112 = arith.sitofp %111 : vector<8x16xi32> to vector<8x16xf32>
    %113 = arith.mulf %22, %112 : vector<8x16xf32>
    %114 = arith.mulf %45, %112 : vector<8x16xf32>
    %115 = arith.addf %113, %114 : vector<8x16xf32>
    %116 = arith.mulf %68, %112 : vector<8x16xf32>
    %117 = arith.addf %115, %116 : vector<8x16xf32>
    %118 = arith.mulf %91, %112 : vector<8x16xf32>
    %119 = arith.addf %117, %118 : vector<8x16xf32>
    %cst_98 = arith.constant dense<0.000000e+00> : vector<16xf32>
    %120 = vector.multi_reduction <add>, %119, %cst_98 [0] : vector<8x16xf32> to vector<16xf32>
    %121 = vector.shape_cast %120 : vector<16xf32> to vector<1x16xf32>
    %cst_99 = arith.constant 6.250000e-02 : f32
    %122 = vector.broadcast %cst_99 : f32 to vector<1x16xf32>
    %123 = arith.mulf %121, %122 : vector<1x16xf32>
    %124 = vector.broadcast %123 : vector<1x16xf32> to vector<8x16xf32>
    %125 = arith.subf %22, %124 : vector<8x16xf32>
    %126 = arith.mulf %125, %125 : vector<8x16xf32>
    %127 = arith.mulf %126, %112 : vector<8x16xf32>
    %128 = vector.broadcast %123 : vector<1x16xf32> to vector<8x16xf32>
    %129 = arith.subf %45, %128 : vector<8x16xf32>
    %130 = arith.mulf %129, %129 : vector<8x16xf32>
    %131 = arith.mulf %130, %112 : vector<8x16xf32>
    %132 = arith.addf %127, %131 : vector<8x16xf32>
    %133 = vector.broadcast %123 : vector<1x16xf32> to vector<8x16xf32>
    %134 = arith.subf %68, %133 : vector<8x16xf32>
    %135 = arith.mulf %134, %134 : vector<8x16xf32>
    %136 = arith.mulf %135, %112 : vector<8x16xf32>
    %137 = arith.addf %132, %136 : vector<8x16xf32>
    %138 = vector.broadcast %123 : vector<1x16xf32> to vector<8x16xf32>
    %139 = arith.subf %91, %138 : vector<8x16xf32>
    %140 = arith.mulf %139, %139 : vector<8x16xf32>
    %141 = arith.mulf %140, %112 : vector<8x16xf32>
    %142 = arith.addf %137, %141 : vector<8x16xf32>
    %cst_100 = arith.constant dense<0.000000e+00> : vector<16xf32>
    %143 = vector.multi_reduction <add>, %142, %cst_100 [0] : vector<8x16xf32> to vector<16xf32>
    %144 = vector.shape_cast %143 : vector<16xf32> to vector<1x16xf32>
    %cst_101 = arith.constant 6.250000e-02 : f32
    %145 = vector.broadcast %cst_101 : f32 to vector<1x16xf32>
    %146 = arith.mulf %144, %145 : vector<1x16xf32>
    %cst_102 = arith.constant 9.99999974E-6 : f32
    %147 = vector.broadcast %cst_102 : f32 to vector<1x16xf32>
    %148 = arith.addf %146, %147 : vector<1x16xf32>
    %149 = math.rsqrt %148 : vector<1x16xf32>
    %150 = vector.broadcast %123 : vector<1x16xf32> to vector<8x16xf32>
    %151 = arith.subf %22, %150 : vector<8x16xf32>
    %152 = vector.broadcast %149 : vector<1x16xf32> to vector<8x16xf32>
    %153 = arith.mulf %151, %152 : vector<8x16xf32>
    %154 = vector.broadcast %123 : vector<1x16xf32> to vector<8x16xf32>
    %155 = arith.subf %45, %154 : vector<8x16xf32>
    %156 = vector.broadcast %149 : vector<1x16xf32> to vector<8x16xf32>
    %157 = arith.mulf %155, %156 : vector<8x16xf32>
    %158 = vector.broadcast %123 : vector<1x16xf32> to vector<8x16xf32>
    %159 = arith.subf %68, %158 : vector<8x16xf32>
    %160 = vector.broadcast %149 : vector<1x16xf32> to vector<8x16xf32>
    %161 = arith.mulf %159, %160 : vector<8x16xf32>
    %162 = vector.broadcast %123 : vector<1x16xf32> to vector<8x16xf32>
    %163 = arith.subf %91, %162 : vector<8x16xf32>
    %164 = vector.broadcast %149 : vector<1x16xf32> to vector<8x16xf32>
    %165 = arith.mulf %163, %164 : vector<8x16xf32>
    %cst_103 = arith.constant 0.000000e+00 : f32
    %166 = vector.broadcast %cst_103 : f32 to vector<8x16xf32>
    %167 = arith.maximumf %153, %166 : vector<8x16xf32>
    %cst_104 = arith.constant 0.000000e+00 : f32
    %168 = vector.broadcast %cst_104 : f32 to vector<8x16xf32>
    %169 = arith.maximumf %157, %168 : vector<8x16xf32>
    %cst_105 = arith.constant 0.000000e+00 : f32
    %170 = vector.broadcast %cst_105 : f32 to vector<8x16xf32>
    %171 = arith.maximumf %161, %170 : vector<8x16xf32>
    %cst_106 = arith.constant 0.000000e+00 : f32
    %172 = vector.broadcast %cst_106 : f32 to vector<8x16xf32>
    %173 = arith.maximumf %165, %172 : vector<8x16xf32>
    %174 = arith.truncf %167 : vector<8x16xf32> to vector<8x16xbf16>
    %c0_107 = arith.constant 0 : index
    %c0_108 = arith.constant 0 : index
    %c0_109 = arith.constant 0 : index
    %175 = vector.load %arg5[%c0_107, %c0_108, %c0_109] : memref<1x32x16xbf16, #tpu.memory_space<vmem>>, vector<1x8x16xbf16>
    %176 = vector.shape_cast %175 : vector<1x8x16xbf16> to vector<8x16xbf16>
    %177 = vector.shape_cast %174 : vector<8x16xbf16> to vector<1x8x16xbf16>
    tpu.vector_store %arg5[%c0_107, %c0_108, %c0_109], %177 {strides = array<i32>} : memref<1x32x16xbf16, #tpu.memory_space<vmem>>, vector<1x8x16xbf16>,
    %178 = arith.truncf %169 : vector<8x16xf32> to vector<8x16xbf16>
    %c0_110 = arith.constant 0 : index
    %c8_111 = arith.constant 8 : index
    %c0_112 = arith.constant 0 : index
    %179 = vector.load %arg5[%c0_110, %c8_111, %c0_112] : memref<1x32x16xbf16, #tpu.memory_space<vmem>>, vector<1x8x16xbf16>
    %180 = vector.shape_cast %179 : vector<1x8x16xbf16> to vector<8x16xbf16>
    %181 = vector.shape_cast %178 : vector<8x16xbf16> to vector<1x8x16xbf16>
    tpu.vector_store %arg5[%c0_110, %c8_111, %c0_112], %181 {strides = array<i32>} : memref<1x32x16xbf16, #tpu.memory_space<vmem>>, vector<1x8x16xbf16>,
    %182 = arith.truncf %171 : vector<8x16xf32> to vector<8x16xbf16>
    %c0_113 = arith.constant 0 : index
    %c16 = arith.constant 16 : index
    %c0_114 = arith.constant 0 : index
    %183 = vector.load %arg5[%c0_113, %c16, %c0_114] : memref<1x32x16xbf16, #tpu.memory_space<vmem>>, vector<1x8x16xbf16>
    %184 = vector.shape_cast %183 : vector<1x8x16xbf16> to vector<8x16xbf16>
    %185 = vector.shape_cast %182 : vector<8x16xbf16> to vector<1x8x16xbf16>
    tpu.vector_store %arg5[%c0_113, %c16, %c0_114], %185 {strides = array<i32>} : memref<1x32x16xbf16, #tpu.memory_space<vmem>>, vector<1x8x16xbf16>,
    %186 = arith.truncf %173 : vector<8x16xf32> to vector<8x16xbf16>
    %c0_115 = arith.constant 0 : index
    %c24 = arith.constant 24 : index
    %c0_116 = arith.constant 0 : index
    %187 = vector.load %arg5[%c0_115, %c24, %c0_116] : memref<1x32x16xbf16, #tpu.memory_space<vmem>>, vector<1x8x16xbf16>
    %188 = vector.shape_cast %187 : vector<1x8x16xbf16> to vector<8x16xbf16>
    %189 = vector.shape_cast %186 : vector<8x16xbf16> to vector<1x8x16xbf16>
    tpu.vector_store %arg5[%c0_115, %c24, %c0_116], %189 {strides = array<i32>} : memref<1x32x16xbf16, #tpu.memory_space<vmem>>, vector<1x8x16xbf16>,
    return
  }
  func.func @transform_0(%arg0: i32, %arg1: i32) -> (i32, i32, i32) {
    %c0_i32 = arith.constant 0 : i32
    %c0_i32_0 = arith.constant 0 : i32
    %c0_i32_1 = arith.constant 0 : i32
    return %arg0, %c0_i32, %c0_i32_0 : i32, i32, i32
  }
  func.func @transform_1(%arg0: i32, %arg1: i32) -> (i32, i32, i32) {
    %c0_i32 = arith.constant 0 : i32
    %c0_i32_0 = arith.constant 0 : i32
    %c0_i32_1 = arith.constant 0 : i32
    return %c0_i32, %c0_i32_0, %arg1 : i32, i32, i32
  }
  func.func @transform_2(%arg0: i32, %arg1: i32) -> (i32, i32) {
    %c0_i32 = arith.constant 0 : i32
    %c0_i32_0 = arith.constant 0 : i32
    return %c0_i32, %arg1 : i32, i32
  }
  func.func @transform_3(%arg0: i32, %arg1: i32) -> (i32, i32, i32) {
    %c0_i32 = arith.constant 0 : i32
    %c0_i32_0 = arith.constant 0 : i32
    return %arg0, %c0_i32, %arg1 : i32, i32, i32
  }
}

module attributes {stable_mosaic.version = 11 : i64} {
  func.func @_conv_phase_kernel(%arg0: i32, %arg1: i32, %arg2: memref<1x38x32xbf16, #tpu.memory_space<vmem>>, %arg3: memref<16x32x8xbf16, #tpu.memory_space<vmem>>, %arg4: memref<1x8xf32, #tpu.memory_space<vmem>>, %arg5: memref<1x96x8xbf16, #tpu.memory_space<vmem>>) attributes {dimension_semantics = [#tpu.dimension_semantics<parallel>, #tpu.dimension_semantics<parallel>], iteration_bounds = array<i64: 2, 1>, scalar_prefetch = 0 : i64, scratch_operands = 0 : i64, tpu.core_type = #tpu.core_type<tc>, window_params = [{transform_indices = @transform_0, window_bounds = array<i64: 1, 38, 32>}, {transform_indices = @transform_1, window_bounds = array<i64: 16, 32, 8>}, {transform_indices = @transform_2, window_bounds = array<i64: 1, 8>}, {transform_indices = @transform_3, window_bounds = array<i64: 1, 96, 8>}]} {
    %c0 = arith.constant 0 : index
    %c0_0 = arith.constant 0 : index
    %c0_1 = arith.constant 0 : index
    %0 = vector.load %arg2[%c0, %c0_0, %c0_1] : memref<1x38x32xbf16, #tpu.memory_space<vmem>>, vector<1x24x32xbf16>
    %1 = vector.shape_cast %0 : vector<1x24x32xbf16> to vector<24x32xbf16>
    %c0_2 = arith.constant 0 : index
    %c0_3 = arith.constant 0 : index
    %c0_4 = arith.constant 0 : index
    %2 = vector.load %arg3[%c0_2, %c0_3, %c0_4] : memref<16x32x8xbf16, #tpu.memory_space<vmem>>, vector<1x32x8xbf16>
    %3 = vector.shape_cast %2 : vector<1x32x8xbf16> to vector<32x8xbf16>
    %cst = arith.constant dense<0.000000e+00> : vector<24x8xf32>
    %4 = tpu.matmul %1, %3, %cst {dimension_numbers = #tpu.dot_dimension_numbers<[1], [0], [0], [1], [0, 0, 1, 1], [], []>} : vector<24x32xbf16>, vector<32x8xbf16>, vector<24x8xf32> -> vector<24x8xf32>
    %c0_5 = arith.constant 0 : index
    %c1 = arith.constant 1 : index
    %c0_6 = arith.constant 0 : index
    %5 = vector.load %arg2[%c0_5, %c1, %c0_6] : memref<1x38x32xbf16, #tpu.memory_space<vmem>>, vector<1x24x32xbf16>
    %6 = vector.shape_cast %5 : vector<1x24x32xbf16> to vector<24x32xbf16>
    %c1_7 = arith.constant 1 : index
    %c0_8 = arith.constant 0 : index
    %c0_9 = arith.constant 0 : index
    %7 = vector.load %arg3[%c1_7, %c0_8, %c0_9] : memref<16x32x8xbf16, #tpu.memory_space<vmem>>, vector<1x32x8xbf16>
    %8 = vector.shape_cast %7 : vector<1x32x8xbf16> to vector<32x8xbf16>
    %cst_10 = arith.constant dense<0.000000e+00> : vector<24x8xf32>
    %9 = tpu.matmul %6, %8, %cst_10 {dimension_numbers = #tpu.dot_dimension_numbers<[1], [0], [0], [1], [0, 0, 1, 1], [], []>} : vector<24x32xbf16>, vector<32x8xbf16>, vector<24x8xf32> -> vector<24x8xf32>
    %10 = arith.addf %4, %9 : vector<24x8xf32>
    %c0_11 = arith.constant 0 : index
    %c6 = arith.constant 6 : index
    %c0_12 = arith.constant 0 : index
    %11 = vector.load %arg2[%c0_11, %c6, %c0_12] : memref<1x38x32xbf16, #tpu.memory_space<vmem>>, vector<1x24x32xbf16>
    %12 = vector.shape_cast %11 : vector<1x24x32xbf16> to vector<24x32xbf16>
    %c2 = arith.constant 2 : index
    %c0_13 = arith.constant 0 : index
    %c0_14 = arith.constant 0 : index
    %13 = vector.load %arg3[%c2, %c0_13, %c0_14] : memref<16x32x8xbf16, #tpu.memory_space<vmem>>, vector<1x32x8xbf16>
    %14 = vector.shape_cast %13 : vector<1x32x8xbf16> to vector<32x8xbf16>
    %cst_15 = arith.constant dense<0.000000e+00> : vector<24x8xf32>
    %15 = tpu.matmul %12, %14, %cst_15 {dimension_numbers = #tpu.dot_dimension_numbers<[1], [0], [0], [1], [0, 0, 1, 1], [], []>} : vector<24x32xbf16>, vector<32x8xbf16>, vector<24x8xf32> -> vector<24x8xf32>
    %16 = arith.addf %10, %15 : vector<24x8xf32>
    %c0_16 = arith.constant 0 : index
    %c7 = arith.constant 7 : index
    %c0_17 = arith.constant 0 : index
    %17 = vector.load %arg2[%c0_16, %c7, %c0_17] : memref<1x38x32xbf16, #tpu.memory_space<vmem>>, vector<1x24x32xbf16>
    %18 = vector.shape_cast %17 : vector<1x24x32xbf16> to vector<24x32xbf16>
    %c3 = arith.constant 3 : index
    %c0_18 = arith.constant 0 : index
    %c0_19 = arith.constant 0 : index
    %19 = vector.load %arg3[%c3, %c0_18, %c0_19] : memref<16x32x8xbf16, #tpu.memory_space<vmem>>, vector<1x32x8xbf16>
    %20 = vector.shape_cast %19 : vector<1x32x8xbf16> to vector<32x8xbf16>
    %cst_20 = arith.constant dense<0.000000e+00> : vector<24x8xf32>
    %21 = tpu.matmul %18, %20, %cst_20 {dimension_numbers = #tpu.dot_dimension_numbers<[1], [0], [0], [1], [0, 0, 1, 1], [], []>} : vector<24x32xbf16>, vector<32x8xbf16>, vector<24x8xf32> -> vector<24x8xf32>
    %22 = arith.addf %16, %21 : vector<24x8xf32>
    %c0_21 = arith.constant 0 : index
    %c1_22 = arith.constant 1 : index
    %c0_23 = arith.constant 0 : index
    %23 = vector.load %arg2[%c0_21, %c1_22, %c0_23] : memref<1x38x32xbf16, #tpu.memory_space<vmem>>, vector<1x24x32xbf16>
    %24 = vector.shape_cast %23 : vector<1x24x32xbf16> to vector<24x32xbf16>
    %c4 = arith.constant 4 : index
    %c0_24 = arith.constant 0 : index
    %c0_25 = arith.constant 0 : index
    %25 = vector.load %arg3[%c4, %c0_24, %c0_25] : memref<16x32x8xbf16, #tpu.memory_space<vmem>>, vector<1x32x8xbf16>
    %26 = vector.shape_cast %25 : vector<1x32x8xbf16> to vector<32x8xbf16>
    %cst_26 = arith.constant dense<0.000000e+00> : vector<24x8xf32>
    %27 = tpu.matmul %24, %26, %cst_26 {dimension_numbers = #tpu.dot_dimension_numbers<[1], [0], [0], [1], [0, 0, 1, 1], [], []>} : vector<24x32xbf16>, vector<32x8xbf16>, vector<24x8xf32> -> vector<24x8xf32>
    %c0_27 = arith.constant 0 : index
    %c2_28 = arith.constant 2 : index
    %c0_29 = arith.constant 0 : index
    %28 = vector.load %arg2[%c0_27, %c2_28, %c0_29] : memref<1x38x32xbf16, #tpu.memory_space<vmem>>, vector<1x24x32xbf16>
    %29 = vector.shape_cast %28 : vector<1x24x32xbf16> to vector<24x32xbf16>
    %c5 = arith.constant 5 : index
    %c0_30 = arith.constant 0 : index
    %c0_31 = arith.constant 0 : index
    %30 = vector.load %arg3[%c5, %c0_30, %c0_31] : memref<16x32x8xbf16, #tpu.memory_space<vmem>>, vector<1x32x8xbf16>
    %31 = vector.shape_cast %30 : vector<1x32x8xbf16> to vector<32x8xbf16>
    %cst_32 = arith.constant dense<0.000000e+00> : vector<24x8xf32>
    %32 = tpu.matmul %29, %31, %cst_32 {dimension_numbers = #tpu.dot_dimension_numbers<[1], [0], [0], [1], [0, 0, 1, 1], [], []>} : vector<24x32xbf16>, vector<32x8xbf16>, vector<24x8xf32> -> vector<24x8xf32>
    %33 = arith.addf %27, %32 : vector<24x8xf32>
    %c0_33 = arith.constant 0 : index
    %c7_34 = arith.constant 7 : index
    %c0_35 = arith.constant 0 : index
    %34 = vector.load %arg2[%c0_33, %c7_34, %c0_35] : memref<1x38x32xbf16, #tpu.memory_space<vmem>>, vector<1x24x32xbf16>
    %35 = vector.shape_cast %34 : vector<1x24x32xbf16> to vector<24x32xbf16>
    %c6_36 = arith.constant 6 : index
    %c0_37 = arith.constant 0 : index
    %c0_38 = arith.constant 0 : index
    %36 = vector.load %arg3[%c6_36, %c0_37, %c0_38] : memref<16x32x8xbf16, #tpu.memory_space<vmem>>, vector<1x32x8xbf16>
    %37 = vector.shape_cast %36 : vector<1x32x8xbf16> to vector<32x8xbf16>
    %cst_39 = arith.constant dense<0.000000e+00> : vector<24x8xf32>
    %38 = tpu.matmul %35, %37, %cst_39 {dimension_numbers = #tpu.dot_dimension_numbers<[1], [0], [0], [1], [0, 0, 1, 1], [], []>} : vector<24x32xbf16>, vector<32x8xbf16>, vector<24x8xf32> -> vector<24x8xf32>
    %39 = arith.addf %33, %38 : vector<24x8xf32>
    %c0_40 = arith.constant 0 : index
    %c8 = arith.constant 8 : index
    %c0_41 = arith.constant 0 : index
    %40 = vector.load %arg2[%c0_40, %c8, %c0_41] : memref<1x38x32xbf16, #tpu.memory_space<vmem>>, vector<1x24x32xbf16>
    %41 = vector.shape_cast %40 : vector<1x24x32xbf16> to vector<24x32xbf16>
    %c7_42 = arith.constant 7 : index
    %c0_43 = arith.constant 0 : index
    %c0_44 = arith.constant 0 : index
    %42 = vector.load %arg3[%c7_42, %c0_43, %c0_44] : memref<16x32x8xbf16, #tpu.memory_space<vmem>>, vector<1x32x8xbf16>
    %43 = vector.shape_cast %42 : vector<1x32x8xbf16> to vector<32x8xbf16>
    %cst_45 = arith.constant dense<0.000000e+00> : vector<24x8xf32>
    %44 = tpu.matmul %41, %43, %cst_45 {dimension_numbers = #tpu.dot_dimension_numbers<[1], [0], [0], [1], [0, 0, 1, 1], [], []>} : vector<24x32xbf16>, vector<32x8xbf16>, vector<24x8xf32> -> vector<24x8xf32>
    %45 = arith.addf %39, %44 : vector<24x8xf32>
    %c0_46 = arith.constant 0 : index
    %c6_47 = arith.constant 6 : index
    %c0_48 = arith.constant 0 : index
    %46 = vector.load %arg2[%c0_46, %c6_47, %c0_48] : memref<1x38x32xbf16, #tpu.memory_space<vmem>>, vector<1x24x32xbf16>
    %47 = vector.shape_cast %46 : vector<1x24x32xbf16> to vector<24x32xbf16>
    %c8_49 = arith.constant 8 : index
    %c0_50 = arith.constant 0 : index
    %c0_51 = arith.constant 0 : index
    %48 = vector.load %arg3[%c8_49, %c0_50, %c0_51] : memref<16x32x8xbf16, #tpu.memory_space<vmem>>, vector<1x32x8xbf16>
    %49 = vector.shape_cast %48 : vector<1x32x8xbf16> to vector<32x8xbf16>
    %cst_52 = arith.constant dense<0.000000e+00> : vector<24x8xf32>
    %50 = tpu.matmul %47, %49, %cst_52 {dimension_numbers = #tpu.dot_dimension_numbers<[1], [0], [0], [1], [0, 0, 1, 1], [], []>} : vector<24x32xbf16>, vector<32x8xbf16>, vector<24x8xf32> -> vector<24x8xf32>
    %c0_53 = arith.constant 0 : index
    %c7_54 = arith.constant 7 : index
    %c0_55 = arith.constant 0 : index
    %51 = vector.load %arg2[%c0_53, %c7_54, %c0_55] : memref<1x38x32xbf16, #tpu.memory_space<vmem>>, vector<1x24x32xbf16>
    %52 = vector.shape_cast %51 : vector<1x24x32xbf16> to vector<24x32xbf16>
    %c9 = arith.constant 9 : index
    %c0_56 = arith.constant 0 : index
    %c0_57 = arith.constant 0 : index
    %53 = vector.load %arg3[%c9, %c0_56, %c0_57] : memref<16x32x8xbf16, #tpu.memory_space<vmem>>, vector<1x32x8xbf16>
    %54 = vector.shape_cast %53 : vector<1x32x8xbf16> to vector<32x8xbf16>
    %cst_58 = arith.constant dense<0.000000e+00> : vector<24x8xf32>
    %55 = tpu.matmul %52, %54, %cst_58 {dimension_numbers = #tpu.dot_dimension_numbers<[1], [0], [0], [1], [0, 0, 1, 1], [], []>} : vector<24x32xbf16>, vector<32x8xbf16>, vector<24x8xf32> -> vector<24x8xf32>
    %56 = arith.addf %50, %55 : vector<24x8xf32>
    %c0_59 = arith.constant 0 : index
    %c12 = arith.constant 12 : index
    %c0_60 = arith.constant 0 : index
    %57 = vector.load %arg2[%c0_59, %c12, %c0_60] : memref<1x38x32xbf16, #tpu.memory_space<vmem>>, vector<1x24x32xbf16>
    %58 = vector.shape_cast %57 : vector<1x24x32xbf16> to vector<24x32xbf16>
    %c10 = arith.constant 10 : index
    %c0_61 = arith.constant 0 : index
    %c0_62 = arith.constant 0 : index
    %59 = vector.load %arg3[%c10, %c0_61, %c0_62] : memref<16x32x8xbf16, #tpu.memory_space<vmem>>, vector<1x32x8xbf16>
    %60 = vector.shape_cast %59 : vector<1x32x8xbf16> to vector<32x8xbf16>
    %cst_63 = arith.constant dense<0.000000e+00> : vector<24x8xf32>
    %61 = tpu.matmul %58, %60, %cst_63 {dimension_numbers = #tpu.dot_dimension_numbers<[1], [0], [0], [1], [0, 0, 1, 1], [], []>} : vector<24x32xbf16>, vector<32x8xbf16>, vector<24x8xf32> -> vector<24x8xf32>
    %62 = arith.addf %56, %61 : vector<24x8xf32>
    %c0_64 = arith.constant 0 : index
    %c13 = arith.constant 13 : index
    %c0_65 = arith.constant 0 : index
    %63 = vector.load %arg2[%c0_64, %c13, %c0_65] : memref<1x38x32xbf16, #tpu.memory_space<vmem>>, vector<1x24x32xbf16>
    %64 = vector.shape_cast %63 : vector<1x24x32xbf16> to vector<24x32xbf16>
    %c11 = arith.constant 11 : index
    %c0_66 = arith.constant 0 : index
    %c0_67 = arith.constant 0 : index
    %65 = vector.load %arg3[%c11, %c0_66, %c0_67] : memref<16x32x8xbf16, #tpu.memory_space<vmem>>, vector<1x32x8xbf16>
    %66 = vector.shape_cast %65 : vector<1x32x8xbf16> to vector<32x8xbf16>
    %cst_68 = arith.constant dense<0.000000e+00> : vector<24x8xf32>
    %67 = tpu.matmul %64, %66, %cst_68 {dimension_numbers = #tpu.dot_dimension_numbers<[1], [0], [0], [1], [0, 0, 1, 1], [], []>} : vector<24x32xbf16>, vector<32x8xbf16>, vector<24x8xf32> -> vector<24x8xf32>
    %68 = arith.addf %62, %67 : vector<24x8xf32>
    %c0_69 = arith.constant 0 : index
    %c7_70 = arith.constant 7 : index
    %c0_71 = arith.constant 0 : index
    %69 = vector.load %arg2[%c0_69, %c7_70, %c0_71] : memref<1x38x32xbf16, #tpu.memory_space<vmem>>, vector<1x24x32xbf16>
    %70 = vector.shape_cast %69 : vector<1x24x32xbf16> to vector<24x32xbf16>
    %c12_72 = arith.constant 12 : index
    %c0_73 = arith.constant 0 : index
    %c0_74 = arith.constant 0 : index
    %71 = vector.load %arg3[%c12_72, %c0_73, %c0_74] : memref<16x32x8xbf16, #tpu.memory_space<vmem>>, vector<1x32x8xbf16>
    %72 = vector.shape_cast %71 : vector<1x32x8xbf16> to vector<32x8xbf16>
    %cst_75 = arith.constant dense<0.000000e+00> : vector<24x8xf32>
    %73 = tpu.matmul %70, %72, %cst_75 {dimension_numbers = #tpu.dot_dimension_numbers<[1], [0], [0], [1], [0, 0, 1, 1], [], []>} : vector<24x32xbf16>, vector<32x8xbf16>, vector<24x8xf32> -> vector<24x8xf32>
    %c0_76 = arith.constant 0 : index
    %c8_77 = arith.constant 8 : index
    %c0_78 = arith.constant 0 : index
    %74 = vector.load %arg2[%c0_76, %c8_77, %c0_78] : memref<1x38x32xbf16, #tpu.memory_space<vmem>>, vector<1x24x32xbf16>
    %75 = vector.shape_cast %74 : vector<1x24x32xbf16> to vector<24x32xbf16>
    %c13_79 = arith.constant 13 : index
    %c0_80 = arith.constant 0 : index
    %c0_81 = arith.constant 0 : index
    %76 = vector.load %arg3[%c13_79, %c0_80, %c0_81] : memref<16x32x8xbf16, #tpu.memory_space<vmem>>, vector<1x32x8xbf16>
    %77 = vector.shape_cast %76 : vector<1x32x8xbf16> to vector<32x8xbf16>
    %cst_82 = arith.constant dense<0.000000e+00> : vector<24x8xf32>
    %78 = tpu.matmul %75, %77, %cst_82 {dimension_numbers = #tpu.dot_dimension_numbers<[1], [0], [0], [1], [0, 0, 1, 1], [], []>} : vector<24x32xbf16>, vector<32x8xbf16>, vector<24x8xf32> -> vector<24x8xf32>
    %79 = arith.addf %73, %78 : vector<24x8xf32>
    %c0_83 = arith.constant 0 : index
    %c13_84 = arith.constant 13 : index
    %c0_85 = arith.constant 0 : index
    %80 = vector.load %arg2[%c0_83, %c13_84, %c0_85] : memref<1x38x32xbf16, #tpu.memory_space<vmem>>, vector<1x24x32xbf16>
    %81 = vector.shape_cast %80 : vector<1x24x32xbf16> to vector<24x32xbf16>
    %c14 = arith.constant 14 : index
    %c0_86 = arith.constant 0 : index
    %c0_87 = arith.constant 0 : index
    %82 = vector.load %arg3[%c14, %c0_86, %c0_87] : memref<16x32x8xbf16, #tpu.memory_space<vmem>>, vector<1x32x8xbf16>
    %83 = vector.shape_cast %82 : vector<1x32x8xbf16> to vector<32x8xbf16>
    %cst_88 = arith.constant dense<0.000000e+00> : vector<24x8xf32>
    %84 = tpu.matmul %81, %83, %cst_88 {dimension_numbers = #tpu.dot_dimension_numbers<[1], [0], [0], [1], [0, 0, 1, 1], [], []>} : vector<24x32xbf16>, vector<32x8xbf16>, vector<24x8xf32> -> vector<24x8xf32>
    %85 = arith.addf %79, %84 : vector<24x8xf32>
    %c0_89 = arith.constant 0 : index
    %c14_90 = arith.constant 14 : index
    %c0_91 = arith.constant 0 : index
    %86 = vector.load %arg2[%c0_89, %c14_90, %c0_91] : memref<1x38x32xbf16, #tpu.memory_space<vmem>>, vector<1x24x32xbf16>
    %87 = vector.shape_cast %86 : vector<1x24x32xbf16> to vector<24x32xbf16>
    %c15 = arith.constant 15 : index
    %c0_92 = arith.constant 0 : index
    %c0_93 = arith.constant 0 : index
    %88 = vector.load %arg3[%c15, %c0_92, %c0_93] : memref<16x32x8xbf16, #tpu.memory_space<vmem>>, vector<1x32x8xbf16>
    %89 = vector.shape_cast %88 : vector<1x32x8xbf16> to vector<32x8xbf16>
    %cst_94 = arith.constant dense<0.000000e+00> : vector<24x8xf32>
    %90 = tpu.matmul %87, %89, %cst_94 {dimension_numbers = #tpu.dot_dimension_numbers<[1], [0], [0], [1], [0, 0, 1, 1], [], []>} : vector<24x32xbf16>, vector<32x8xbf16>, vector<24x8xf32> -> vector<24x8xf32>
    %91 = arith.addf %85, %90 : vector<24x8xf32>
    %92 = tpu.iota {dimensions = array<i32: 0>} : vector<24x8xi32>
    %c6_i32 = arith.constant 6 : i32
    %c0_i32 = arith.constant 0 : i32
    %93 = arith.cmpi eq, %c6_i32, %c0_i32 : i32
    %c1_i32 = arith.constant 1 : i32
    %94 = arith.select %93, %c1_i32, %c6_i32 : i32
    %95 = vector.broadcast %94 : i32 to vector<24x8xi32>
    %96 = arith.remsi %92, %95 : vector<24x8xi32>
    %c0_i32_95 = arith.constant 0 : i32
    %97 = vector.broadcast %c0_i32_95 : i32 to vector<24x8xi32>
    %98 = arith.cmpi ne, %96, %97 : vector<24x8xi32>
    %c0_i32_96 = arith.constant 0 : i32
    %99 = vector.broadcast %c0_i32_96 : i32 to vector<24x8xi32>
    %100 = arith.cmpi slt, %96, %99 : vector<24x8xi32>
    %c0_i32_97 = arith.constant 0 : i32
    %101 = arith.cmpi slt, %94, %c0_i32_97 : i32
    %102 = vector.broadcast %101 : i1 to vector<24x8xi1>
    %103 = vector.broadcast %102 : vector<24x8xi1> to vector<24x8xi1>
    %104 = arith.xori %100, %103 : vector<24x8xi1>
    %105 = arith.andi %104, %98 : vector<24x8xi1>
    %106 = vector.broadcast %94 : i32 to vector<24x8xi32>
    %107 = arith.addi %96, %106 : vector<24x8xi32>
    %108 = arith.select %105, %107, %96 : vector<24x8xi1>, vector<24x8xi32>
    %c4_i32 = arith.constant 4 : i32
    %109 = vector.broadcast %c4_i32 : i32 to vector<24x8xi32>
    %110 = arith.cmpi slt, %108, %109 : vector<24x8xi32>
    %111 = arith.extui %110 : vector<24x8xi1> to vector<24x8xi32>
    %112 = arith.sitofp %111 : vector<24x8xi32> to vector<24x8xf32>
    %113 = arith.mulf %22, %112 : vector<24x8xf32>
    %114 = arith.mulf %45, %112 : vector<24x8xf32>
    %115 = arith.addf %113, %114 : vector<24x8xf32>
    %116 = arith.mulf %68, %112 : vector<24x8xf32>
    %117 = arith.addf %115, %116 : vector<24x8xf32>
    %118 = arith.mulf %91, %112 : vector<24x8xf32>
    %119 = arith.addf %117, %118 : vector<24x8xf32>
    %cst_98 = arith.constant dense<0.000000e+00> : vector<8xf32>
    %120 = vector.multi_reduction <add>, %119, %cst_98 [0] : vector<24x8xf32> to vector<8xf32>
    %121 = vector.shape_cast %120 : vector<8xf32> to vector<1x8xf32>
    %cst_99 = arith.constant 1.562500e-02 : f32
    %122 = vector.broadcast %cst_99 : f32 to vector<1x8xf32>
    %123 = arith.mulf %121, %122 : vector<1x8xf32>
    %124 = vector.broadcast %123 : vector<1x8xf32> to vector<24x8xf32>
    %125 = arith.subf %22, %124 : vector<24x8xf32>
    %126 = arith.mulf %125, %125 : vector<24x8xf32>
    %127 = arith.mulf %126, %112 : vector<24x8xf32>
    %128 = vector.broadcast %123 : vector<1x8xf32> to vector<24x8xf32>
    %129 = arith.subf %45, %128 : vector<24x8xf32>
    %130 = arith.mulf %129, %129 : vector<24x8xf32>
    %131 = arith.mulf %130, %112 : vector<24x8xf32>
    %132 = arith.addf %127, %131 : vector<24x8xf32>
    %133 = vector.broadcast %123 : vector<1x8xf32> to vector<24x8xf32>
    %134 = arith.subf %68, %133 : vector<24x8xf32>
    %135 = arith.mulf %134, %134 : vector<24x8xf32>
    %136 = arith.mulf %135, %112 : vector<24x8xf32>
    %137 = arith.addf %132, %136 : vector<24x8xf32>
    %138 = vector.broadcast %123 : vector<1x8xf32> to vector<24x8xf32>
    %139 = arith.subf %91, %138 : vector<24x8xf32>
    %140 = arith.mulf %139, %139 : vector<24x8xf32>
    %141 = arith.mulf %140, %112 : vector<24x8xf32>
    %142 = arith.addf %137, %141 : vector<24x8xf32>
    %cst_100 = arith.constant dense<0.000000e+00> : vector<8xf32>
    %143 = vector.multi_reduction <add>, %142, %cst_100 [0] : vector<24x8xf32> to vector<8xf32>
    %144 = vector.shape_cast %143 : vector<8xf32> to vector<1x8xf32>
    %cst_101 = arith.constant 1.562500e-02 : f32
    %145 = vector.broadcast %cst_101 : f32 to vector<1x8xf32>
    %146 = arith.mulf %144, %145 : vector<1x8xf32>
    %cst_102 = arith.constant 9.99999974E-6 : f32
    %147 = vector.broadcast %cst_102 : f32 to vector<1x8xf32>
    %148 = arith.addf %146, %147 : vector<1x8xf32>
    %149 = math.rsqrt %148 : vector<1x8xf32>
    %150 = vector.broadcast %123 : vector<1x8xf32> to vector<24x8xf32>
    %151 = arith.subf %22, %150 : vector<24x8xf32>
    %152 = vector.broadcast %149 : vector<1x8xf32> to vector<24x8xf32>
    %153 = arith.mulf %151, %152 : vector<24x8xf32>
    %154 = vector.broadcast %123 : vector<1x8xf32> to vector<24x8xf32>
    %155 = arith.subf %45, %154 : vector<24x8xf32>
    %156 = vector.broadcast %149 : vector<1x8xf32> to vector<24x8xf32>
    %157 = arith.mulf %155, %156 : vector<24x8xf32>
    %158 = vector.broadcast %123 : vector<1x8xf32> to vector<24x8xf32>
    %159 = arith.subf %68, %158 : vector<24x8xf32>
    %160 = vector.broadcast %149 : vector<1x8xf32> to vector<24x8xf32>
    %161 = arith.mulf %159, %160 : vector<24x8xf32>
    %162 = vector.broadcast %123 : vector<1x8xf32> to vector<24x8xf32>
    %163 = arith.subf %91, %162 : vector<24x8xf32>
    %164 = vector.broadcast %149 : vector<1x8xf32> to vector<24x8xf32>
    %165 = arith.mulf %163, %164 : vector<24x8xf32>
    %cst_103 = arith.constant 0.000000e+00 : f32
    %166 = vector.broadcast %cst_103 : f32 to vector<24x8xf32>
    %167 = arith.maximumf %153, %166 : vector<24x8xf32>
    %cst_104 = arith.constant 0.000000e+00 : f32
    %168 = vector.broadcast %cst_104 : f32 to vector<24x8xf32>
    %169 = arith.maximumf %157, %168 : vector<24x8xf32>
    %cst_105 = arith.constant 0.000000e+00 : f32
    %170 = vector.broadcast %cst_105 : f32 to vector<24x8xf32>
    %171 = arith.maximumf %161, %170 : vector<24x8xf32>
    %cst_106 = arith.constant 0.000000e+00 : f32
    %172 = vector.broadcast %cst_106 : f32 to vector<24x8xf32>
    %173 = arith.maximumf %165, %172 : vector<24x8xf32>
    %174 = arith.truncf %167 : vector<24x8xf32> to vector<24x8xbf16>
    %c0_107 = arith.constant 0 : index
    %c0_108 = arith.constant 0 : index
    %c0_109 = arith.constant 0 : index
    %175 = vector.load %arg5[%c0_107, %c0_108, %c0_109] : memref<1x96x8xbf16, #tpu.memory_space<vmem>>, vector<1x24x8xbf16>
    %176 = vector.shape_cast %175 : vector<1x24x8xbf16> to vector<24x8xbf16>
    %177 = vector.shape_cast %174 : vector<24x8xbf16> to vector<1x24x8xbf16>
    tpu.vector_store %arg5[%c0_107, %c0_108, %c0_109], %177 {strides = array<i32>} : memref<1x96x8xbf16, #tpu.memory_space<vmem>>, vector<1x24x8xbf16>,
    %178 = arith.truncf %169 : vector<24x8xf32> to vector<24x8xbf16>
    %c0_110 = arith.constant 0 : index
    %c24 = arith.constant 24 : index
    %c0_111 = arith.constant 0 : index
    %179 = vector.load %arg5[%c0_110, %c24, %c0_111] : memref<1x96x8xbf16, #tpu.memory_space<vmem>>, vector<1x24x8xbf16>
    %180 = vector.shape_cast %179 : vector<1x24x8xbf16> to vector<24x8xbf16>
    %181 = vector.shape_cast %178 : vector<24x8xbf16> to vector<1x24x8xbf16>
    tpu.vector_store %arg5[%c0_110, %c24, %c0_111], %181 {strides = array<i32>} : memref<1x96x8xbf16, #tpu.memory_space<vmem>>, vector<1x24x8xbf16>,
    %182 = arith.truncf %171 : vector<24x8xf32> to vector<24x8xbf16>
    %c0_112 = arith.constant 0 : index
    %c48 = arith.constant 48 : index
    %c0_113 = arith.constant 0 : index
    %183 = vector.load %arg5[%c0_112, %c48, %c0_113] : memref<1x96x8xbf16, #tpu.memory_space<vmem>>, vector<1x24x8xbf16>
    %184 = vector.shape_cast %183 : vector<1x24x8xbf16> to vector<24x8xbf16>
    %185 = vector.shape_cast %182 : vector<24x8xbf16> to vector<1x24x8xbf16>
    tpu.vector_store %arg5[%c0_112, %c48, %c0_113], %185 {strides = array<i32>} : memref<1x96x8xbf16, #tpu.memory_space<vmem>>, vector<1x24x8xbf16>,
    %186 = arith.truncf %173 : vector<24x8xf32> to vector<24x8xbf16>
    %c0_114 = arith.constant 0 : index
    %c72 = arith.constant 72 : index
    %c0_115 = arith.constant 0 : index
    %187 = vector.load %arg5[%c0_114, %c72, %c0_115] : memref<1x96x8xbf16, #tpu.memory_space<vmem>>, vector<1x24x8xbf16>
    %188 = vector.shape_cast %187 : vector<1x24x8xbf16> to vector<24x8xbf16>
    %189 = vector.shape_cast %186 : vector<24x8xbf16> to vector<1x24x8xbf16>
    tpu.vector_store %arg5[%c0_114, %c72, %c0_115], %189 {strides = array<i32>} : memref<1x96x8xbf16, #tpu.memory_space<vmem>>, vector<1x24x8xbf16>,
    return
  }
  func.func @transform_0(%arg0: i32, %arg1: i32) -> (i32, i32, i32) {
    %c0_i32 = arith.constant 0 : i32
    %c0_i32_0 = arith.constant 0 : i32
    %c0_i32_1 = arith.constant 0 : i32
    return %arg0, %c0_i32, %c0_i32_0 : i32, i32, i32
  }
  func.func @transform_1(%arg0: i32, %arg1: i32) -> (i32, i32, i32) {
    %c0_i32 = arith.constant 0 : i32
    %c0_i32_0 = arith.constant 0 : i32
    %c0_i32_1 = arith.constant 0 : i32
    return %c0_i32, %c0_i32_0, %arg1 : i32, i32, i32
  }
  func.func @transform_2(%arg0: i32, %arg1: i32) -> (i32, i32) {
    %c0_i32 = arith.constant 0 : i32
    %c0_i32_0 = arith.constant 0 : i32
    return %c0_i32, %arg1 : i32, i32
  }
  func.func @transform_3(%arg0: i32, %arg1: i32) -> (i32, i32, i32) {
    %c0_i32 = arith.constant 0 : i32
    %c0_i32_0 = arith.constant 0 : i32
    return %arg0, %c0_i32, %arg1 : i32, i32, i32
  }
}

module attributes {stable_mosaic.version = 11 : i64} {
  func.func @_conv_phase_kernel(%arg0: i32, %arg1: i32, %arg2: memref<1x102x16xbf16, #tpu.memory_space<vmem>>, %arg3: memref<25x16x3xbf16, #tpu.memory_space<vmem>>, %arg4: memref<1x3xf32, #tpu.memory_space<vmem>>, %arg5: memref<1x320x3xf32, #tpu.memory_space<vmem>>) attributes {dimension_semantics = [#tpu.dimension_semantics<parallel>, #tpu.dimension_semantics<parallel>], iteration_bounds = array<i64: 2, 1>, scalar_prefetch = 0 : i64, scratch_operands = 0 : i64, tpu.core_type = #tpu.core_type<tc>, window_params = [{transform_indices = @transform_0, window_bounds = array<i64: 1, 102, 16>}, {transform_indices = @transform_1, window_bounds = array<i64: 25, 16, 3>}, {transform_indices = @transform_2, window_bounds = array<i64: 1, 3>}, {transform_indices = @transform_3, window_bounds = array<i64: 1, 320, 3>}]} {
    %c0 = arith.constant 0 : index
    %c0_0 = arith.constant 0 : index
    %c0_1 = arith.constant 0 : index
    %0 = vector.load %arg2[%c0, %c0_0, %c0_1] : memref<1x102x16xbf16, #tpu.memory_space<vmem>>, vector<1x80x16xbf16>
    %1 = vector.shape_cast %0 : vector<1x80x16xbf16> to vector<80x16xbf16>
    %c0_2 = arith.constant 0 : index
    %c0_3 = arith.constant 0 : index
    %c0_4 = arith.constant 0 : index
    %2 = vector.load %arg3[%c0_2, %c0_3, %c0_4] : memref<25x16x3xbf16, #tpu.memory_space<vmem>>, vector<1x16x3xbf16>
    %3 = vector.shape_cast %2 : vector<1x16x3xbf16> to vector<16x3xbf16>
    %cst = arith.constant dense<0.000000e+00> : vector<80x3xf32>
    %4 = tpu.matmul %1, %3, %cst {dimension_numbers = #tpu.dot_dimension_numbers<[1], [0], [0], [1], [0, 0, 1, 1], [], []>} : vector<80x16xbf16>, vector<16x3xbf16>, vector<80x3xf32> -> vector<80x3xf32>
    %c0_5 = arith.constant 0 : index
    %c1 = arith.constant 1 : index
    %c0_6 = arith.constant 0 : index
    %5 = vector.load %arg2[%c0_5, %c1, %c0_6] : memref<1x102x16xbf16, #tpu.memory_space<vmem>>, vector<1x80x16xbf16>
    %6 = vector.shape_cast %5 : vector<1x80x16xbf16> to vector<80x16xbf16>
    %c1_7 = arith.constant 1 : index
    %c0_8 = arith.constant 0 : index
    %c0_9 = arith.constant 0 : index
    %7 = vector.load %arg3[%c1_7, %c0_8, %c0_9] : memref<25x16x3xbf16, #tpu.memory_space<vmem>>, vector<1x16x3xbf16>
    %8 = vector.shape_cast %7 : vector<1x16x3xbf16> to vector<16x3xbf16>
    %cst_10 = arith.constant dense<0.000000e+00> : vector<80x3xf32>
    %9 = tpu.matmul %6, %8, %cst_10 {dimension_numbers = #tpu.dot_dimension_numbers<[1], [0], [0], [1], [0, 0, 1, 1], [], []>} : vector<80x16xbf16>, vector<16x3xbf16>, vector<80x3xf32> -> vector<80x3xf32>
    %10 = arith.addf %4, %9 : vector<80x3xf32>
    %c0_11 = arith.constant 0 : index
    %c10 = arith.constant 10 : index
    %c0_12 = arith.constant 0 : index
    %11 = vector.load %arg2[%c0_11, %c10, %c0_12] : memref<1x102x16xbf16, #tpu.memory_space<vmem>>, vector<1x80x16xbf16>
    %12 = vector.shape_cast %11 : vector<1x80x16xbf16> to vector<80x16xbf16>
    %c2 = arith.constant 2 : index
    %c0_13 = arith.constant 0 : index
    %c0_14 = arith.constant 0 : index
    %13 = vector.load %arg3[%c2, %c0_13, %c0_14] : memref<25x16x3xbf16, #tpu.memory_space<vmem>>, vector<1x16x3xbf16>
    %14 = vector.shape_cast %13 : vector<1x16x3xbf16> to vector<16x3xbf16>
    %cst_15 = arith.constant dense<0.000000e+00> : vector<80x3xf32>
    %15 = tpu.matmul %12, %14, %cst_15 {dimension_numbers = #tpu.dot_dimension_numbers<[1], [0], [0], [1], [0, 0, 1, 1], [], []>} : vector<80x16xbf16>, vector<16x3xbf16>, vector<80x3xf32> -> vector<80x3xf32>
    %16 = arith.addf %10, %15 : vector<80x3xf32>
    %c0_16 = arith.constant 0 : index
    %c11 = arith.constant 11 : index
    %c0_17 = arith.constant 0 : index
    %17 = vector.load %arg2[%c0_16, %c11, %c0_17] : memref<1x102x16xbf16, #tpu.memory_space<vmem>>, vector<1x80x16xbf16>
    %18 = vector.shape_cast %17 : vector<1x80x16xbf16> to vector<80x16xbf16>
    %c3 = arith.constant 3 : index
    %c0_18 = arith.constant 0 : index
    %c0_19 = arith.constant 0 : index
    %19 = vector.load %arg3[%c3, %c0_18, %c0_19] : memref<25x16x3xbf16, #tpu.memory_space<vmem>>, vector<1x16x3xbf16>
    %20 = vector.shape_cast %19 : vector<1x16x3xbf16> to vector<16x3xbf16>
    %cst_20 = arith.constant dense<0.000000e+00> : vector<80x3xf32>
    %21 = tpu.matmul %18, %20, %cst_20 {dimension_numbers = #tpu.dot_dimension_numbers<[1], [0], [0], [1], [0, 0, 1, 1], [], []>} : vector<80x16xbf16>, vector<16x3xbf16>, vector<80x3xf32> -> vector<80x3xf32>
    %22 = arith.addf %16, %21 : vector<80x3xf32>
    %c0_21 = arith.constant 0 : index
    %c0_22 = arith.constant 0 : index
    %23 = vector.load %arg4[%c0_21, %c0_22] : memref<1x3xf32, #tpu.memory_space<vmem>>, vector<1x3xf32>
    %24 = vector.broadcast %23 : vector<1x3xf32> to vector<80x3xf32>
    %25 = arith.addf %22, %24 : vector<80x3xf32>
    %c0_23 = arith.constant 0 : index
    %c0_24 = arith.constant 0 : index
    %c0_25 = arith.constant 0 : index
    %26 = vector.load %arg2[%c0_23, %c0_24, %c0_25] : memref<1x102x16xbf16, #tpu.memory_space<vmem>>, vector<1x80x16xbf16>
    %27 = vector.shape_cast %26 : vector<1x80x16xbf16> to vector<80x16xbf16>
    %c4 = arith.constant 4 : index
    %c0_26 = arith.constant 0 : index
    %c0_27 = arith.constant 0 : index
    %28 = vector.load %arg3[%c4, %c0_26, %c0_27] : memref<25x16x3xbf16, #tpu.memory_space<vmem>>, vector<1x16x3xbf16>
    %29 = vector.shape_cast %28 : vector<1x16x3xbf16> to vector<16x3xbf16>
    %cst_28 = arith.constant dense<0.000000e+00> : vector<80x3xf32>
    %30 = tpu.matmul %27, %29, %cst_28 {dimension_numbers = #tpu.dot_dimension_numbers<[1], [0], [0], [1], [0, 0, 1, 1], [], []>} : vector<80x16xbf16>, vector<16x3xbf16>, vector<80x3xf32> -> vector<80x3xf32>
    %c0_29 = arith.constant 0 : index
    %c1_30 = arith.constant 1 : index
    %c0_31 = arith.constant 0 : index
    %31 = vector.load %arg2[%c0_29, %c1_30, %c0_31] : memref<1x102x16xbf16, #tpu.memory_space<vmem>>, vector<1x80x16xbf16>
    %32 = vector.shape_cast %31 : vector<1x80x16xbf16> to vector<80x16xbf16>
    %c5 = arith.constant 5 : index
    %c0_32 = arith.constant 0 : index
    %c0_33 = arith.constant 0 : index
    %33 = vector.load %arg3[%c5, %c0_32, %c0_33] : memref<25x16x3xbf16, #tpu.memory_space<vmem>>, vector<1x16x3xbf16>
    %34 = vector.shape_cast %33 : vector<1x16x3xbf16> to vector<16x3xbf16>
    %cst_34 = arith.constant dense<0.000000e+00> : vector<80x3xf32>
    %35 = tpu.matmul %32, %34, %cst_34 {dimension_numbers = #tpu.dot_dimension_numbers<[1], [0], [0], [1], [0, 0, 1, 1], [], []>} : vector<80x16xbf16>, vector<16x3xbf16>, vector<80x3xf32> -> vector<80x3xf32>
    %36 = arith.addf %30, %35 : vector<80x3xf32>
    %c0_35 = arith.constant 0 : index
    %c2_36 = arith.constant 2 : index
    %c0_37 = arith.constant 0 : index
    %37 = vector.load %arg2[%c0_35, %c2_36, %c0_37] : memref<1x102x16xbf16, #tpu.memory_space<vmem>>, vector<1x80x16xbf16>
    %38 = vector.shape_cast %37 : vector<1x80x16xbf16> to vector<80x16xbf16>
    %c6 = arith.constant 6 : index
    %c0_38 = arith.constant 0 : index
    %c0_39 = arith.constant 0 : index
    %39 = vector.load %arg3[%c6, %c0_38, %c0_39] : memref<25x16x3xbf16, #tpu.memory_space<vmem>>, vector<1x16x3xbf16>
    %40 = vector.shape_cast %39 : vector<1x16x3xbf16> to vector<16x3xbf16>
    %cst_40 = arith.constant dense<0.000000e+00> : vector<80x3xf32>
    %41 = tpu.matmul %38, %40, %cst_40 {dimension_numbers = #tpu.dot_dimension_numbers<[1], [0], [0], [1], [0, 0, 1, 1], [], []>} : vector<80x16xbf16>, vector<16x3xbf16>, vector<80x3xf32> -> vector<80x3xf32>
    %42 = arith.addf %36, %41 : vector<80x3xf32>
    %c0_41 = arith.constant 0 : index
    %c10_42 = arith.constant 10 : index
    %c0_43 = arith.constant 0 : index
    %43 = vector.load %arg2[%c0_41, %c10_42, %c0_43] : memref<1x102x16xbf16, #tpu.memory_space<vmem>>, vector<1x80x16xbf16>
    %44 = vector.shape_cast %43 : vector<1x80x16xbf16> to vector<80x16xbf16>
    %c7 = arith.constant 7 : index
    %c0_44 = arith.constant 0 : index
    %c0_45 = arith.constant 0 : index
    %45 = vector.load %arg3[%c7, %c0_44, %c0_45] : memref<25x16x3xbf16, #tpu.memory_space<vmem>>, vector<1x16x3xbf16>
    %46 = vector.shape_cast %45 : vector<1x16x3xbf16> to vector<16x3xbf16>
    %cst_46 = arith.constant dense<0.000000e+00> : vector<80x3xf32>
    %47 = tpu.matmul %44, %46, %cst_46 {dimension_numbers = #tpu.dot_dimension_numbers<[1], [0], [0], [1], [0, 0, 1, 1], [], []>} : vector<80x16xbf16>, vector<16x3xbf16>, vector<80x3xf32> -> vector<80x3xf32>
    %48 = arith.addf %42, %47 : vector<80x3xf32>
    %c0_47 = arith.constant 0 : index
    %c11_48 = arith.constant 11 : index
    %c0_49 = arith.constant 0 : index
    %49 = vector.load %arg2[%c0_47, %c11_48, %c0_49] : memref<1x102x16xbf16, #tpu.memory_space<vmem>>, vector<1x80x16xbf16>
    %50 = vector.shape_cast %49 : vector<1x80x16xbf16> to vector<80x16xbf16>
    %c8 = arith.constant 8 : index
    %c0_50 = arith.constant 0 : index
    %c0_51 = arith.constant 0 : index
    %51 = vector.load %arg3[%c8, %c0_50, %c0_51] : memref<25x16x3xbf16, #tpu.memory_space<vmem>>, vector<1x16x3xbf16>
    %52 = vector.shape_cast %51 : vector<1x16x3xbf16> to vector<16x3xbf16>
    %cst_52 = arith.constant dense<0.000000e+00> : vector<80x3xf32>
    %53 = tpu.matmul %50, %52, %cst_52 {dimension_numbers = #tpu.dot_dimension_numbers<[1], [0], [0], [1], [0, 0, 1, 1], [], []>} : vector<80x16xbf16>, vector<16x3xbf16>, vector<80x3xf32> -> vector<80x3xf32>
    %54 = arith.addf %48, %53 : vector<80x3xf32>
    %c0_53 = arith.constant 0 : index
    %c12 = arith.constant 12 : index
    %c0_54 = arith.constant 0 : index
    %55 = vector.load %arg2[%c0_53, %c12, %c0_54] : memref<1x102x16xbf16, #tpu.memory_space<vmem>>, vector<1x80x16xbf16>
    %56 = vector.shape_cast %55 : vector<1x80x16xbf16> to vector<80x16xbf16>
    %c9 = arith.constant 9 : index
    %c0_55 = arith.constant 0 : index
    %c0_56 = arith.constant 0 : index
    %57 = vector.load %arg3[%c9, %c0_55, %c0_56] : memref<25x16x3xbf16, #tpu.memory_space<vmem>>, vector<1x16x3xbf16>
    %58 = vector.shape_cast %57 : vector<1x16x3xbf16> to vector<16x3xbf16>
    %cst_57 = arith.constant dense<0.000000e+00> : vector<80x3xf32>
    %59 = tpu.matmul %56, %58, %cst_57 {dimension_numbers = #tpu.dot_dimension_numbers<[1], [0], [0], [1], [0, 0, 1, 1], [], []>} : vector<80x16xbf16>, vector<16x3xbf16>, vector<80x3xf32> -> vector<80x3xf32>
    %60 = arith.addf %54, %59 : vector<80x3xf32>
    %c0_58 = arith.constant 0 : index
    %c0_59 = arith.constant 0 : index
    %61 = vector.load %arg4[%c0_58, %c0_59] : memref<1x3xf32, #tpu.memory_space<vmem>>, vector<1x3xf32>
    %62 = vector.broadcast %61 : vector<1x3xf32> to vector<80x3xf32>
    %63 = arith.addf %60, %62 : vector<80x3xf32>
    %c0_60 = arith.constant 0 : index
    %c0_61 = arith.constant 0 : index
    %c0_62 = arith.constant 0 : index
    %64 = vector.load %arg2[%c0_60, %c0_61, %c0_62] : memref<1x102x16xbf16, #tpu.memory_space<vmem>>, vector<1x80x16xbf16>
    %65 = vector.shape_cast %64 : vector<1x80x16xbf16> to vector<80x16xbf16>
    %c10_63 = arith.constant 10 : index
    %c0_64 = arith.constant 0 : index
    %c0_65 = arith.constant 0 : index
    %66 = vector.load %arg3[%c10_63, %c0_64, %c0_65] : memref<25x16x3xbf16, #tpu.memory_space<vmem>>, vector<1x16x3xbf16>
    %67 = vector.shape_cast %66 : vector<1x16x3xbf16> to vector<16x3xbf16>
    %cst_66 = arith.constant dense<0.000000e+00> : vector<80x3xf32>
    %68 = tpu.matmul %65, %67, %cst_66 {dimension_numbers = #tpu.dot_dimension_numbers<[1], [0], [0], [1], [0, 0, 1, 1], [], []>} : vector<80x16xbf16>, vector<16x3xbf16>, vector<80x3xf32> -> vector<80x3xf32>
    %c0_67 = arith.constant 0 : index
    %c1_68 = arith.constant 1 : index
    %c0_69 = arith.constant 0 : index
    %69 = vector.load %arg2[%c0_67, %c1_68, %c0_69] : memref<1x102x16xbf16, #tpu.memory_space<vmem>>, vector<1x80x16xbf16>
    %70 = vector.shape_cast %69 : vector<1x80x16xbf16> to vector<80x16xbf16>
    %c11_70 = arith.constant 11 : index
    %c0_71 = arith.constant 0 : index
    %c0_72 = arith.constant 0 : index
    %71 = vector.load %arg3[%c11_70, %c0_71, %c0_72] : memref<25x16x3xbf16, #tpu.memory_space<vmem>>, vector<1x16x3xbf16>
    %72 = vector.shape_cast %71 : vector<1x16x3xbf16> to vector<16x3xbf16>
    %cst_73 = arith.constant dense<0.000000e+00> : vector<80x3xf32>
    %73 = tpu.matmul %70, %72, %cst_73 {dimension_numbers = #tpu.dot_dimension_numbers<[1], [0], [0], [1], [0, 0, 1, 1], [], []>} : vector<80x16xbf16>, vector<16x3xbf16>, vector<80x3xf32> -> vector<80x3xf32>
    %74 = arith.addf %68, %73 : vector<80x3xf32>
    %c0_74 = arith.constant 0 : index
    %c10_75 = arith.constant 10 : index
    %c0_76 = arith.constant 0 : index
    %75 = vector.load %arg2[%c0_74, %c10_75, %c0_76] : memref<1x102x16xbf16, #tpu.memory_space<vmem>>, vector<1x80x16xbf16>
    %76 = vector.shape_cast %75 : vector<1x80x16xbf16> to vector<80x16xbf16>
    %c12_77 = arith.constant 12 : index
    %c0_78 = arith.constant 0 : index
    %c0_79 = arith.constant 0 : index
    %77 = vector.load %arg3[%c12_77, %c0_78, %c0_79] : memref<25x16x3xbf16, #tpu.memory_space<vmem>>, vector<1x16x3xbf16>
    %78 = vector.shape_cast %77 : vector<1x16x3xbf16> to vector<16x3xbf16>
    %cst_80 = arith.constant dense<0.000000e+00> : vector<80x3xf32>
    %79 = tpu.matmul %76, %78, %cst_80 {dimension_numbers = #tpu.dot_dimension_numbers<[1], [0], [0], [1], [0, 0, 1, 1], [], []>} : vector<80x16xbf16>, vector<16x3xbf16>, vector<80x3xf32> -> vector<80x3xf32>
    %80 = arith.addf %74, %79 : vector<80x3xf32>
    %c0_81 = arith.constant 0 : index
    %c11_82 = arith.constant 11 : index
    %c0_83 = arith.constant 0 : index
    %81 = vector.load %arg2[%c0_81, %c11_82, %c0_83] : memref<1x102x16xbf16, #tpu.memory_space<vmem>>, vector<1x80x16xbf16>
    %82 = vector.shape_cast %81 : vector<1x80x16xbf16> to vector<80x16xbf16>
    %c13 = arith.constant 13 : index
    %c0_84 = arith.constant 0 : index
    %c0_85 = arith.constant 0 : index
    %83 = vector.load %arg3[%c13, %c0_84, %c0_85] : memref<25x16x3xbf16, #tpu.memory_space<vmem>>, vector<1x16x3xbf16>
    %84 = vector.shape_cast %83 : vector<1x16x3xbf16> to vector<16x3xbf16>
    %cst_86 = arith.constant dense<0.000000e+00> : vector<80x3xf32>
    %85 = tpu.matmul %82, %84, %cst_86 {dimension_numbers = #tpu.dot_dimension_numbers<[1], [0], [0], [1], [0, 0, 1, 1], [], []>} : vector<80x16xbf16>, vector<16x3xbf16>, vector<80x3xf32> -> vector<80x3xf32>
    %86 = arith.addf %80, %85 : vector<80x3xf32>
    %c0_87 = arith.constant 0 : index
    %c20 = arith.constant 20 : index
    %c0_88 = arith.constant 0 : index
    %87 = vector.load %arg2[%c0_87, %c20, %c0_88] : memref<1x102x16xbf16, #tpu.memory_space<vmem>>, vector<1x80x16xbf16>
    %88 = vector.shape_cast %87 : vector<1x80x16xbf16> to vector<80x16xbf16>
    %c14 = arith.constant 14 : index
    %c0_89 = arith.constant 0 : index
    %c0_90 = arith.constant 0 : index
    %89 = vector.load %arg3[%c14, %c0_89, %c0_90] : memref<25x16x3xbf16, #tpu.memory_space<vmem>>, vector<1x16x3xbf16>
    %90 = vector.shape_cast %89 : vector<1x16x3xbf16> to vector<16x3xbf16>
    %cst_91 = arith.constant dense<0.000000e+00> : vector<80x3xf32>
    %91 = tpu.matmul %88, %90, %cst_91 {dimension_numbers = #tpu.dot_dimension_numbers<[1], [0], [0], [1], [0, 0, 1, 1], [], []>} : vector<80x16xbf16>, vector<16x3xbf16>, vector<80x3xf32> -> vector<80x3xf32>
    %92 = arith.addf %86, %91 : vector<80x3xf32>
    %c0_92 = arith.constant 0 : index
    %c21 = arith.constant 21 : index
    %c0_93 = arith.constant 0 : index
    %93 = vector.load %arg2[%c0_92, %c21, %c0_93] : memref<1x102x16xbf16, #tpu.memory_space<vmem>>, vector<1x80x16xbf16>
    %94 = vector.shape_cast %93 : vector<1x80x16xbf16> to vector<80x16xbf16>
    %c15 = arith.constant 15 : index
    %c0_94 = arith.constant 0 : index
    %c0_95 = arith.constant 0 : index
    %95 = vector.load %arg3[%c15, %c0_94, %c0_95] : memref<25x16x3xbf16, #tpu.memory_space<vmem>>, vector<1x16x3xbf16>
    %96 = vector.shape_cast %95 : vector<1x16x3xbf16> to vector<16x3xbf16>
    %cst_96 = arith.constant dense<0.000000e+00> : vector<80x3xf32>
    %97 = tpu.matmul %94, %96, %cst_96 {dimension_numbers = #tpu.dot_dimension_numbers<[1], [0], [0], [1], [0, 0, 1, 1], [], []>} : vector<80x16xbf16>, vector<16x3xbf16>, vector<80x3xf32> -> vector<80x3xf32>
    %98 = arith.addf %92, %97 : vector<80x3xf32>
    %c0_97 = arith.constant 0 : index
    %c0_98 = arith.constant 0 : index
    %99 = vector.load %arg4[%c0_97, %c0_98] : memref<1x3xf32, #tpu.memory_space<vmem>>, vector<1x3xf32>
    %100 = vector.broadcast %99 : vector<1x3xf32> to vector<80x3xf32>
    %101 = arith.addf %98, %100 : vector<80x3xf32>
    %c0_99 = arith.constant 0 : index
    %c0_100 = arith.constant 0 : index
    %c0_101 = arith.constant 0 : index
    %102 = vector.load %arg2[%c0_99, %c0_100, %c0_101] : memref<1x102x16xbf16, #tpu.memory_space<vmem>>, vector<1x80x16xbf16>
    %103 = vector.shape_cast %102 : vector<1x80x16xbf16> to vector<80x16xbf16>
    %c16 = arith.constant 16 : index
    %c0_102 = arith.constant 0 : index
    %c0_103 = arith.constant 0 : index
    %104 = vector.load %arg3[%c16, %c0_102, %c0_103] : memref<25x16x3xbf16, #tpu.memory_space<vmem>>, vector<1x16x3xbf16>
    %105 = vector.shape_cast %104 : vector<1x16x3xbf16> to vector<16x3xbf16>
    %cst_104 = arith.constant dense<0.000000e+00> : vector<80x3xf32>
    %106 = tpu.matmul %103, %105, %cst_104 {dimension_numbers = #tpu.dot_dimension_numbers<[1], [0], [0], [1], [0, 0, 1, 1], [], []>} : vector<80x16xbf16>, vector<16x3xbf16>, vector<80x3xf32> -> vector<80x3xf32>
    %c0_105 = arith.constant 0 : index
    %c1_106 = arith.constant 1 : index
    %c0_107 = arith.constant 0 : index
    %107 = vector.load %arg2[%c0_105, %c1_106, %c0_107] : memref<1x102x16xbf16, #tpu.memory_space<vmem>>, vector<1x80x16xbf16>
    %108 = vector.shape_cast %107 : vector<1x80x16xbf16> to vector<80x16xbf16>
    %c17 = arith.constant 17 : index
    %c0_108 = arith.constant 0 : index
    %c0_109 = arith.constant 0 : index
    %109 = vector.load %arg3[%c17, %c0_108, %c0_109] : memref<25x16x3xbf16, #tpu.memory_space<vmem>>, vector<1x16x3xbf16>
    %110 = vector.shape_cast %109 : vector<1x16x3xbf16> to vector<16x3xbf16>
    %cst_110 = arith.constant dense<0.000000e+00> : vector<80x3xf32>
    %111 = tpu.matmul %108, %110, %cst_110 {dimension_numbers = #tpu.dot_dimension_numbers<[1], [0], [0], [1], [0, 0, 1, 1], [], []>} : vector<80x16xbf16>, vector<16x3xbf16>, vector<80x3xf32> -> vector<80x3xf32>
    %112 = arith.addf %106, %111 : vector<80x3xf32>
    %c0_111 = arith.constant 0 : index
    %c2_112 = arith.constant 2 : index
    %c0_113 = arith.constant 0 : index
    %113 = vector.load %arg2[%c0_111, %c2_112, %c0_113] : memref<1x102x16xbf16, #tpu.memory_space<vmem>>, vector<1x80x16xbf16>
    %114 = vector.shape_cast %113 : vector<1x80x16xbf16> to vector<80x16xbf16>
    %c18 = arith.constant 18 : index
    %c0_114 = arith.constant 0 : index
    %c0_115 = arith.constant 0 : index
    %115 = vector.load %arg3[%c18, %c0_114, %c0_115] : memref<25x16x3xbf16, #tpu.memory_space<vmem>>, vector<1x16x3xbf16>
    %116 = vector.shape_cast %115 : vector<1x16x3xbf16> to vector<16x3xbf16>
    %cst_116 = arith.constant dense<0.000000e+00> : vector<80x3xf32>
    %117 = tpu.matmul %114, %116, %cst_116 {dimension_numbers = #tpu.dot_dimension_numbers<[1], [0], [0], [1], [0, 0, 1, 1], [], []>} : vector<80x16xbf16>, vector<16x3xbf16>, vector<80x3xf32> -> vector<80x3xf32>
    %118 = arith.addf %112, %117 : vector<80x3xf32>
    %c0_117 = arith.constant 0 : index
    %c10_118 = arith.constant 10 : index
    %c0_119 = arith.constant 0 : index
    %119 = vector.load %arg2[%c0_117, %c10_118, %c0_119] : memref<1x102x16xbf16, #tpu.memory_space<vmem>>, vector<1x80x16xbf16>
    %120 = vector.shape_cast %119 : vector<1x80x16xbf16> to vector<80x16xbf16>
    %c19 = arith.constant 19 : index
    %c0_120 = arith.constant 0 : index
    %c0_121 = arith.constant 0 : index
    %121 = vector.load %arg3[%c19, %c0_120, %c0_121] : memref<25x16x3xbf16, #tpu.memory_space<vmem>>, vector<1x16x3xbf16>
    %122 = vector.shape_cast %121 : vector<1x16x3xbf16> to vector<16x3xbf16>
    %cst_122 = arith.constant dense<0.000000e+00> : vector<80x3xf32>
    %123 = tpu.matmul %120, %122, %cst_122 {dimension_numbers = #tpu.dot_dimension_numbers<[1], [0], [0], [1], [0, 0, 1, 1], [], []>} : vector<80x16xbf16>, vector<16x3xbf16>, vector<80x3xf32> -> vector<80x3xf32>
    %124 = arith.addf %118, %123 : vector<80x3xf32>
    %c0_123 = arith.constant 0 : index
    %c11_124 = arith.constant 11 : index
    %c0_125 = arith.constant 0 : index
    %125 = vector.load %arg2[%c0_123, %c11_124, %c0_125] : memref<1x102x16xbf16, #tpu.memory_space<vmem>>, vector<1x80x16xbf16>
    %126 = vector.shape_cast %125 : vector<1x80x16xbf16> to vector<80x16xbf16>
    %c20_126 = arith.constant 20 : index
    %c0_127 = arith.constant 0 : index
    %c0_128 = arith.constant 0 : index
    %127 = vector.load %arg3[%c20_126, %c0_127, %c0_128] : memref<25x16x3xbf16, #tpu.memory_space<vmem>>, vector<1x16x3xbf16>
    %128 = vector.shape_cast %127 : vector<1x16x3xbf16> to vector<16x3xbf16>
    %cst_129 = arith.constant dense<0.000000e+00> : vector<80x3xf32>
    %129 = tpu.matmul %126, %128, %cst_129 {dimension_numbers = #tpu.dot_dimension_numbers<[1], [0], [0], [1], [0, 0, 1, 1], [], []>} : vector<80x16xbf16>, vector<16x3xbf16>, vector<80x3xf32> -> vector<80x3xf32>
    %130 = arith.addf %124, %129 : vector<80x3xf32>
    %c0_130 = arith.constant 0 : index
    %c12_131 = arith.constant 12 : index
    %c0_132 = arith.constant 0 : index
    %131 = vector.load %arg2[%c0_130, %c12_131, %c0_132] : memref<1x102x16xbf16, #tpu.memory_space<vmem>>, vector<1x80x16xbf16>
    %132 = vector.shape_cast %131 : vector<1x80x16xbf16> to vector<80x16xbf16>
    %c21_133 = arith.constant 21 : index
    %c0_134 = arith.constant 0 : index
    %c0_135 = arith.constant 0 : index
    %133 = vector.load %arg3[%c21_133, %c0_134, %c0_135] : memref<25x16x3xbf16, #tpu.memory_space<vmem>>, vector<1x16x3xbf16>
    %134 = vector.shape_cast %133 : vector<1x16x3xbf16> to vector<16x3xbf16>
    %cst_136 = arith.constant dense<0.000000e+00> : vector<80x3xf32>
    %135 = tpu.matmul %132, %134, %cst_136 {dimension_numbers = #tpu.dot_dimension_numbers<[1], [0], [0], [1], [0, 0, 1, 1], [], []>} : vector<80x16xbf16>, vector<16x3xbf16>, vector<80x3xf32> -> vector<80x3xf32>
    %136 = arith.addf %130, %135 : vector<80x3xf32>
    %c0_137 = arith.constant 0 : index
    %c20_138 = arith.constant 20 : index
    %c0_139 = arith.constant 0 : index
    %137 = vector.load %arg2[%c0_137, %c20_138, %c0_139] : memref<1x102x16xbf16, #tpu.memory_space<vmem>>, vector<1x80x16xbf16>
    %138 = vector.shape_cast %137 : vector<1x80x16xbf16> to vector<80x16xbf16>
    %c22 = arith.constant 22 : index
    %c0_140 = arith.constant 0 : index
    %c0_141 = arith.constant 0 : index
    %139 = vector.load %arg3[%c22, %c0_140, %c0_141] : memref<25x16x3xbf16, #tpu.memory_space<vmem>>, vector<1x16x3xbf16>
    %140 = vector.shape_cast %139 : vector<1x16x3xbf16> to vector<16x3xbf16>
    %cst_142 = arith.constant dense<0.000000e+00> : vector<80x3xf32>
    %141 = tpu.matmul %138, %140, %cst_142 {dimension_numbers = #tpu.dot_dimension_numbers<[1], [0], [0], [1], [0, 0, 1, 1], [], []>} : vector<80x16xbf16>, vector<16x3xbf16>, vector<80x3xf32> -> vector<80x3xf32>
    %142 = arith.addf %136, %141 : vector<80x3xf32>
    %c0_143 = arith.constant 0 : index
    %c21_144 = arith.constant 21 : index
    %c0_145 = arith.constant 0 : index
    %143 = vector.load %arg2[%c0_143, %c21_144, %c0_145] : memref<1x102x16xbf16, #tpu.memory_space<vmem>>, vector<1x80x16xbf16>
    %144 = vector.shape_cast %143 : vector<1x80x16xbf16> to vector<80x16xbf16>
    %c23 = arith.constant 23 : index
    %c0_146 = arith.constant 0 : index
    %c0_147 = arith.constant 0 : index
    %145 = vector.load %arg3[%c23, %c0_146, %c0_147] : memref<25x16x3xbf16, #tpu.memory_space<vmem>>, vector<1x16x3xbf16>
    %146 = vector.shape_cast %145 : vector<1x16x3xbf16> to vector<16x3xbf16>
    %cst_148 = arith.constant dense<0.000000e+00> : vector<80x3xf32>
    %147 = tpu.matmul %144, %146, %cst_148 {dimension_numbers = #tpu.dot_dimension_numbers<[1], [0], [0], [1], [0, 0, 1, 1], [], []>} : vector<80x16xbf16>, vector<16x3xbf16>, vector<80x3xf32> -> vector<80x3xf32>
    %148 = arith.addf %142, %147 : vector<80x3xf32>
    %c0_149 = arith.constant 0 : index
    %c22_150 = arith.constant 22 : index
    %c0_151 = arith.constant 0 : index
    %149 = vector.load %arg2[%c0_149, %c22_150, %c0_151] : memref<1x102x16xbf16, #tpu.memory_space<vmem>>, vector<1x80x16xbf16>
    %150 = vector.shape_cast %149 : vector<1x80x16xbf16> to vector<80x16xbf16>
    %c24 = arith.constant 24 : index
    %c0_152 = arith.constant 0 : index
    %c0_153 = arith.constant 0 : index
    %151 = vector.load %arg3[%c24, %c0_152, %c0_153] : memref<25x16x3xbf16, #tpu.memory_space<vmem>>, vector<1x16x3xbf16>
    %152 = vector.shape_cast %151 : vector<1x16x3xbf16> to vector<16x3xbf16>
    %cst_154 = arith.constant dense<0.000000e+00> : vector<80x3xf32>
    %153 = tpu.matmul %150, %152, %cst_154 {dimension_numbers = #tpu.dot_dimension_numbers<[1], [0], [0], [1], [0, 0, 1, 1], [], []>} : vector<80x16xbf16>, vector<16x3xbf16>, vector<80x3xf32> -> vector<80x3xf32>
    %154 = arith.addf %148, %153 : vector<80x3xf32>
    %c0_155 = arith.constant 0 : index
    %c0_156 = arith.constant 0 : index
    %155 = vector.load %arg4[%c0_155, %c0_156] : memref<1x3xf32, #tpu.memory_space<vmem>>, vector<1x3xf32>
    %156 = vector.broadcast %155 : vector<1x3xf32> to vector<80x3xf32>
    %157 = arith.addf %154, %156 : vector<80x3xf32>
    %c0_157 = arith.constant 0 : index
    %c0_158 = arith.constant 0 : index
    %c0_159 = arith.constant 0 : index
    %158 = vector.load %arg5[%c0_157, %c0_158, %c0_159] : memref<1x320x3xf32, #tpu.memory_space<vmem>>, vector<1x80x3xf32>
    %159 = vector.shape_cast %158 : vector<1x80x3xf32> to vector<80x3xf32>
    %160 = vector.shape_cast %25 : vector<80x3xf32> to vector<1x80x3xf32>
    tpu.vector_store %arg5[%c0_157, %c0_158, %c0_159], %160 {strides = array<i32>} : memref<1x320x3xf32, #tpu.memory_space<vmem>>, vector<1x80x3xf32>,
    %c0_160 = arith.constant 0 : index
    %c80 = arith.constant 80 : index
    %c0_161 = arith.constant 0 : index
    %161 = vector.load %arg5[%c0_160, %c80, %c0_161] : memref<1x320x3xf32, #tpu.memory_space<vmem>>, vector<1x80x3xf32>
    %162 = vector.shape_cast %161 : vector<1x80x3xf32> to vector<80x3xf32>
    %163 = vector.shape_cast %63 : vector<80x3xf32> to vector<1x80x3xf32>
    tpu.vector_store %arg5[%c0_160, %c80, %c0_161], %163 {strides = array<i32>} : memref<1x320x3xf32, #tpu.memory_space<vmem>>, vector<1x80x3xf32>,
    %c0_162 = arith.constant 0 : index
    %c160 = arith.constant 160 : index
    %c0_163 = arith.constant 0 : index
    %164 = vector.load %arg5[%c0_162, %c160, %c0_163] : memref<1x320x3xf32, #tpu.memory_space<vmem>>, vector<1x80x3xf32>
    %165 = vector.shape_cast %164 : vector<1x80x3xf32> to vector<80x3xf32>
    %166 = vector.shape_cast %101 : vector<80x3xf32> to vector<1x80x3xf32>
    tpu.vector_store %arg5[%c0_162, %c160, %c0_163], %166 {strides = array<i32>} : memref<1x320x3xf32, #tpu.memory_space<vmem>>, vector<1x80x3xf32>,
    %c0_164 = arith.constant 0 : index
    %c240 = arith.constant 240 : index
    %c0_165 = arith.constant 0 : index
    %167 = vector.load %arg5[%c0_164, %c240, %c0_165] : memref<1x320x3xf32, #tpu.memory_space<vmem>>, vector<1x80x3xf32>
    %168 = vector.shape_cast %167 : vector<1x80x3xf32> to vector<80x3xf32>
    %169 = vector.shape_cast %157 : vector<80x3xf32> to vector<1x80x3xf32>
    tpu.vector_store %arg5[%c0_164, %c240, %c0_165], %169 {strides = array<i32>} : memref<1x320x3xf32, #tpu.memory_space<vmem>>, vector<1x80x3xf32>,
    return
  }
  func.func @transform_0(%arg0: i32, %arg1: i32) -> (i32, i32, i32) {
    %c0_i32 = arith.constant 0 : i32
    %c0_i32_0 = arith.constant 0 : i32
    %c0_i32_1 = arith.constant 0 : i32
    return %arg0, %c0_i32, %c0_i32_0 : i32, i32, i32
  }
  func.func @transform_1(%arg0: i32, %arg1: i32) -> (i32, i32, i32) {
    %c0_i32 = arith.constant 0 : i32
    %c0_i32_0 = arith.constant 0 : i32
    %c0_i32_1 = arith.constant 0 : i32
    return %c0_i32, %c0_i32_0, %arg1 : i32, i32, i32
  }
  func.func @transform_2(%arg0: i32, %arg1: i32) -> (i32, i32) {
    %c0_i32 = arith.constant 0 : i32
    %c0_i32_0 = arith.constant 0 : i32
    return %c0_i32, %arg1 : i32, i32
  }
  func.func @transform_3(%arg0: i32, %arg1: i32) -> (i32, i32, i32) {
    %c0_i32 = arith.constant 0 : i32
    %c0_i32_0 = arith.constant 0 : i32
    return %arg0, %c0_i32, %arg1 : i32, i32, i32
  }
}

</mosaic_0001>

<bundles_post_ra>
// kernel: generator_unet.8
= control target key start
LH: loop header
LB: loop body
LE: loop exit
PB: predicated region body
PF: predicated region fallthrough
CT: control target
= control target key end

     0   :  { %s1295_s12 = smov 0   ;;  %s1297_s13 = smov 0   ;;  %s1503_s0 = inlined_call_operand.vmem [shape: bf16[2,82,12], index: 0, kind: input, shape index: {}]   ;;  %s1504_s1 = inlined_call_operand.vmem [shape: bf16[4,12,8], index: 1, kind: input, shape index: {}]   ;;  %s1505_s2 = inlined_call_operand.vmem [shape: f32[1,8], index: 2, kind: input, shape index: {}]   ;;  %s1506_s3 = inlined_call_operand.vmem [shape: bf16[2,72,8], index: 3, kind: output, shape index: {}]  }
   0x1   :  { %s1299_s14 = smov 0  }
   0x2 LB: > { %s25_s2 = sadd.s32 1, %s1267_s13  ;;  %p979_p0 = scmp.ge.s32.totalorder %s1271_s14, 1  ;;  %s1271_s14 = sphi %s1299_s14, %s13_s14   ;;  %s1267_s13 = sphi %s1297_s13, %s1508_s13   ;;  %s1263_s12 = sphi %s1295_s12, %s1507_s12  }
   0x3   : > { %p27_p1 = scmp.ge.s32.totalorder %s25_s2, 2  ;;  %p168_p2 = scmp.lt.s32.totalorder %s1271_s14, 3 }
   0x5   : > { %s1510_s2 = smov (%p27_p1, %s25_s2), 0  ;;  %p169_p3 = pnand %p979_p0, %p168_p2 }
   0x6   : > { %vm324_vm0 = vcmask (!%p169_p3), 1045504   ;;  %v1273_v0 = vmov (!%p169_p3), 0.0   ;;  %v1233_v1 = vld [vmem:[%s1504_s1 + $0x8] sm:$0x3f] (!%p169_p3)   ;;  %v1234_v2 = vld [vmem:[%s1504_s1 + $0x10] sm:$0x3f] (!%p169_p3)  }
   0x7   : > { %172 = sbr.rel (%p169_p3) target bundleno = 321 (0x141), region = 32  ;;  %1068 = vmatprep.subr.bf16.mxu1 (!%p169_p3), %v1273_v0  ;;  %1112 = vmatprep.subr.bf16.mxu0 (!%p169_p3), %v1273_v0  ;;  %p202_p4 = scmp.lt.s32.totalorder (!%p169_p3), %s1263_s12, 1  ;;  %v326_v3 = vsel (!%p169_p3), %vm324_vm0, %v1233_v1, 0  ;;  %vm1274_vm1 = vmmov (!%p169_p3), 0   ;;  %v590_v4 = vsel (!%p169_p3), %vm324_vm0, %v1234_v2, 0  ;;  %vm308_vm3 = vcmask (!%p169_p3), 97280  }
   0x8   : > { %1070 = vmatprep.mubr.msk.bf16.mxu1 (!%p169_p3), %vm1274_vm1, %v1273_v0  ;;  %1114 = vmatprep.mubr.msk.bf16.mxu0 (!%p169_p3), %vm1274_vm1, %v1273_v0  ;;  %vm263_vm2 = vsmask.f32 (!%p169_p3), 7424  ;;  %v1237_v7 = vld [vmem:[%s1504_s1] sm:$0x3f] (!%p169_p3)   ;;  %v1240_v15 = vld [vmem:[%s1504_s1 + $0x18] sm:$0x3f] (!%p169_p3)  }
   0x9   : > { %1069 = vmatpush3.bf16.msra.mxu1 (!%p169_p3), %v326_v3  ;;  %1113 = vmatpush3.bf16.msra.mxu0 (!%p169_p3), %v590_v4  ;;  %v418_v27 = vsel (!%p169_p3), %vm324_vm0, %v1237_v7, 0  ;;  %v711_v33 = vsel (!%p169_p3), %vm324_vm0, %v1240_v15, 0  ;;  %vm680_vm4 = vcmask (!%p169_p3), 1046528   ;;  %vm858_vm6 = vcmask (!%p169_p3), 60416  }
   0xa   : > { %1090 = vmatprep.subr.bf16.mxu1 (!%p169_p3), %v1273_v0  ;;  %1134 = vmatprep.subr.bf16.mxu0 (!%p169_p3), %v1273_v0 }
   0xe   : > { %s1512_s12 = smov (!%p202_p4, %s1263_s12), 1 }
   0xf   : > { %s1205_s19 = smul.u32 44, %s1512_s12 }
  0x10   : > { %s1206_s27 = smul.u32 36, %s1512_s12 }
  0x11   : > { %s1335_s22 = scalar_lea.vmem %s1503_s0, %s1205_s19 }
  0x12   : > { %v1338_v5 = vld [vmem:[%s1335_s22] sm:$0xff]   ;;  %v1341_v6 = vld [vmem:[%s1335_s22 + $0x8] sm:$0xff]   ;;  %v1361_v16 = vld [vmem:[%s1335_s22 + $0x10] sm:$0xff]   ;;  %s1474_s30 = scalar_lea.vmem %s1506_s3, %s1206_s27 }
  0x13   : > { %v492_v8 = vld [vmem:[%s1335_s22 + $0x4] sm:$0xf]  ;;  %v1348_v9 = vld [vmem:[%s1335_s22 + $0x8] sm:$0xf]  ;;  %v265_v10 = vshrl.u32 %v1338_v5, 16  ;;  %v267_v11 = vshll.u32 %v1338_v5, 16 }
  0x14   : > { %v272_v12 = vshll.u32 %v1341_v6, 16  ;;  %v1004_v13 = vcombine.low %v492_v8, %v1348_v9  ;;  %v1355_v14 = vld [vmem:[%s1335_s22 + $0xc] sm:$0xff]   ;;  %v276_v22 = vshrl.u32 %v1341_v6, 16  ;;  %v1366_v23 = vld [vmem:[%s1335_s22 + $0x14] sm:$0xff]   ;;  %v280_v26 = vshll.u32 %v1361_v16, 16  ;;  %v1385_v40 = vld [vmem:[%s1335_s22 + $0x1c] sm:$0xff]  }
  0x15   : > { %v269_v17 = vrot.slane %v267_v11, 1  ;;  %v538_v21 = vshll.u32 %v1355_v14, 16  ;;  %v542_v31 = vshrl.u32 %v1355_v14, 16  ;;  %v546_v32 = vshll.u32 %v1366_v23, 16  ;;  %v1379_v37 = vld [vmem:[%s1335_s22 + $0x18] sm:$0xff]  }
  0x16   : > { %v274_v18 = vrot.slane %v272_v12, 1  ;;  %v531_v19 = vshrl.u32 %v1004_v13, 16  ;;  %v533_v20 = vshll.u32 %v1004_v13, 16  ;;  %v282_v36 = vrot.slane %v280_v26, 1  ;;  %v1391_v44 = vld [vmem:[%s1335_s22 + $0x20] sm:$0xf] }
  0x17   : > { %v270_v24 = vor.u32 %v269_v17, %v265_v10  ;;  %v540_v28 = vrot.slane %v538_v21, 1  ;;  %v548_v39 = vrot.slane %v546_v32, 1  ;;  %v284_v42 = vshrl.u32 %v1361_v16, 16  ;;  %v234_v45 = vld [vmem:[%s1335_s22 + $0x24] sm:$0x1] }
  0x18   : > { %v535_v25 = vrot.slane %v533_v20, 1  ;;  %v278_v35 = vor.u32 %v276_v22, %v274_v18  ;;  %v288_v43 = vshll.u32 %v1379_v37, 16  ;;  %v550_v47 = vshrl.u32 %v1366_v23, 16  ;;  %v1246_v54 = vld [vmem:[%s1335_s22 + $0x24] sm:$0x1f]  }
  0x19   : > { %v275_v29 = vsel %vm263_vm2, %v270_v24, %v274_v18  ;;  %v544_v38 = vor.u32 %v542_v31, %v540_v28  ;;  %v554_v48 = vshll.u32 %v1385_v40, 16  ;;  %v286_v49 = vor.u32 %v284_v42, %v282_v36  ;;  %v673_v10 = vld [vmem:[%s1335_s22 + $0x4] sm:$0xe] }
  0x1a   : > { %v536_v30 = vor.u32 %v535_v25, %v531_v19  ;;  %1071 = vmatmul.mubr.msk.bf16.vlgmr.msra.gmra.mrb[0].mxu1 %vm308_vm3, %v275_v29  ;;  %v283_v41 = vsel %vm263_vm2, %v278_v35, %v282_v36  ;;  %v290_v50 = vrot.slane %v288_v43, 1  ;;  %v988_v51 = vcombine.low %v1391_v44, %v234_v45 }
  0x1b   : > { %1091 = vmatpush3.bf16.msra.mxu1 %v418_v27  ;;  %1074 = vmatprep.mubr.msk.bf16.mxu1 %vm1274_vm1, %v1273_v0  ;;  %v549_v46 = vsel %vm263_vm2, %v544_v38, %v548_v39  ;;  %v552_v52 = vor.u32 %v550_v47, %v548_v39  ;;  %v556_v53 = vrot.slane %v554_v48, 1  ;;  %v292_v56 = vshrl.u32 %v1379_v37, 16 }
  0x1c   : > { %v541_v34 = vsel %vm263_vm2, %v536_v30, %v540_v28  ;;  %v291_v55 = vsel %vm263_vm2, %v286_v49, %v290_v50  ;;  %v296_v57 = vshll.u32 %v988_v51, 16  ;;  %v558_v59 = vshrl.u32 %v1385_v40, 16 }
  0x1d   : > { %1115 = vmatmul.mubr.msk.bf16.vlgmr.msra.gmra.mrb[0].mxu0 %vm308_vm3, %v541_v34  ;;  %v557_v58 = vsel %vm263_vm2, %v552_v52, %v556_v53  ;;  %v562_v60 = vshll.u32 %v1246_v54, 16  ;;  %v294_v61 = vor.u32 %v292_v56, %v290_v50  ;;  %v300_v4 = vshrl.u32 %v988_v51, 16 }
  0x1e   : > { %1135 = vmatpush3.bf16.msra.mxu0 %v711_v33  ;;  %1118 = vmatprep.mubr.msk.bf16.mxu0 %vm1274_vm1, %v1273_v0  ;;  %v298_v62 = vrot.slane %v296_v57, 1  ;;  %v560_v63 = vor.u32 %v558_v59, %v556_v53  ;;  %v566_v7 = vshrl.u32 %v1246_v54, 16  ;;  %v1017_v12 = vcombine.low %v673_v10, %v1348_v9 }
  0x1f   : > { %v564_v1 = vrot.slane %v562_v60, 1  ;;  %v682_v15 = vrot.slane %v1355_v14, 1  ;;  %v684_v9 = vrot.slane %v1366_v23, 1 }
  0x20   : > { %v299_v2 = vsel %vm263_vm2, %v294_v61, %v298_v62  ;;  %v302_v8 = vor.u32 %v300_v4, %v298_v62  ;;  %v681_v13 = vrot.slane %v1017_v12, 1 }
  0x21   : > { %v565_v3 = vsel %vm263_vm2, %v560_v63, %v564_v1  ;;  %v568_v11 = vor.u32 %v566_v7, %v564_v1  ;;  %v685_v18 = vsel %vm680_vm4, %v682_v15, %v684_v9 }
  0x22   : > { %1075 = vmatmul.mubr.msk.bf16.gmra.mrb[4].mxu1 %vm308_vm3, %v283_v41  ;;  %v683_v17 = vsel %vm680_vm4, %v681_v13, %v682_v15 }
  0x23   : > { %1078 = vmatprep.mubr.msk.bf16.mxu1 %vm1274_vm1, %v1273_v0 }
  0x25   : > { %1119 = vmatmul.mubr.msk.bf16.gmra.mrb[4].mxu0 %vm308_vm3, %v549_v46 }
  0x26   : > { %1122 = vmatprep.mubr.msk.bf16.mxu0 %vm1274_vm1, %v1273_v0 }
  0x2a   : > { %1079 = vmatmul.mubr.msk.bf16.gmra.mrb[8].mxu1 %vm308_vm3, %v291_v55 }
  0x2b   : > { %1082 = vmatprep.mubr.msk.bf16.mxu1 %vm1274_vm1, %v1273_v0 }
  0x2d   : > { %1123 = vmatmul.mubr.msk.bf16.gmra.mrb[8].mxu0 %vm308_vm3, %v557_v58 }
  0x2e   : > { %1126 = vmatprep.mubr.msk.bf16.mxu0 %vm1274_vm1, %v1273_v0 }
  0x32   : > { %1083 = vmatmul.mubr.msk.bf16.gmra.mrb[12].mxu1 %vm308_vm3, %v299_v2 }
  0x33   : > { %1086 = vmatprep.mubr.msk.bf16.mxu1 %vm1274_vm1, %v1273_v0 }
  0x35   : > { %1127 = vmatmul.mubr.msk.bf16.gmra.mrb[12].mxu0 %vm308_vm3, %v565_v3 }
  0x36   : > { %1130 = vmatprep.mubr.msk.bf16.mxu0 %vm1274_vm1, %v1273_v0 }
  0x3a   : > { %1087 = vmatmul.mubr.msk.bf16.gmra.mrb[16].mxu1 %vm308_vm3, %v302_v8 }
  0x3b   : > { %1092 = vmatprep.mubr.msk.bf16.mxu1 %vm1274_vm1, %v1273_v0 }
  0x3d   : > { %1131 = vmatmul.mubr.msk.bf16.gmra.mrb[16].mxu0 %vm308_vm3, %v568_v11 }
  0x3e   : > { %1136 = vmatprep.mubr.msk.bf16.mxu0 %vm1274_vm1, %v1273_v0 }
  0x42   : > { %1093 = vmatmul.mubr.msk.bf16.vlgmr.msra.gmra.mrb[0].mxu1 %vm308_vm3, %v1338_v5  ;;  %v686_v5 = vrot.slane %v1385_v40, 1 }
  0x43   : > { %1096 = vmatprep.mubr.msk.bf16.mxu1 %vm1274_vm1, %v1273_v0 }
  0x44   : > { %v687_v14 = vsel %vm680_vm4, %v684_v9, %v686_v5 }
  0x45   : > { %1137 = vmatmul.mubr.msk.bf16.vlgmr.msra.gmra.mrb[0].mxu0 %vm308_vm3, %v683_v17 }
  0x46   : > { %1140 = vmatprep.mubr.msk.bf16.mxu0 %vm1274_vm1, %v1273_v0 }
  0x4a   : > { %1097 = vmatmul.mubr.msk.bf16.gmra.mrb[4].mxu1 %vm308_vm3, %v1341_v6  ;;  %v688_v6 = vrot.slane %v1246_v54, 1 }
  0x4b   : > { %1100 = vmatprep.mubr.msk.bf16.mxu1 %vm1274_vm1, %v1273_v0 }
  0x4c   : > { %v689_v19 = vsel %vm680_vm4, %v686_v5, %v688_v6 }
  0x4d   : > { %1141 = vmatmul.mubr.msk.bf16.gmra.mrb[4].mxu0 %vm308_vm3, %v685_v18 }
  0x4e   : > { %1144 = vmatprep.mubr.msk.bf16.mxu0 %vm1274_vm1, %v1273_v0 }
  0x52   : > { %1101 = vmatmul.mubr.msk.bf16.gmra.mrb[8].mxu1 %vm308_vm3, %v1361_v16  ;;  %v995_v16 = vcombine.low %v1391_v44, %v1391_v44 }
  0x53   : > { %1104 = vmatprep.mubr.msk.bf16.mxu1 %vm1274_vm1, %v1273_v0 }
  0x55   : > { %1145 = vmatmul.mubr.msk.bf16.gmra.mrb[8].mxu0 %vm308_vm3, %v687_v14 }
  0x56   : > { %1148 = vmatprep.mubr.msk.bf16.mxu0 %vm1274_vm1, %v1273_v0 }
  0x5a   : > { %1105 = vmatmul.mubr.msk.bf16.gmra.mrb[12].mxu1 %vm308_vm3, %v1379_v37 }
  0x5b   : > { %1108 = vmatprep.mubr.msk.bf16.mxu1 %vm1274_vm1, %v1273_v0 }
  0x5d   : > { %1149 = vmatmul.mubr.msk.bf16.gmra.mrb[12].mxu0 %vm308_vm3, %v689_v19 }
  0x5e   : > { %1152 = vmatprep.mubr.msk.bf16.mxu0 %vm1274_vm1, %v1273_v0 }
  0x62   : > { %1109 = vmatmul.mubr.msk.bf16.gmra.mrb[16].mxu1 %vm308_vm3, %v995_v16 }
  0x65   : > { %1153 = vmatmul.mubr.msk.bf16.gmra.mrb[16].mxu0 %vm308_vm3, %v688_v6 }
 0x115   : > { %v454_v20 = vpop.f32.mrb[0].mxu1 }
 0x116   : > { %v1094_v21 = vpop.f32.mrb[1].mxu1 }
 0x117   : > { %v457_v23 = vpop.f32.mrb[2].mxu1 }
 0x118   : > { %v747_v22 = vpop.f32.mrb[0].mxu0  ;;  %v1095_v26 = vpop.f32.mrb[3].mxu1 }
 0x119   : > { %v1156_v24 = vadd.f32 %v747_v22, %v454_v20  ;;  %v1138_v25 = vpop.f32.mrb[1].mxu0 }
 0x11a   : > { %v750_v27 = vpop.f32.mrb[2].mxu0 }
 0x11b   : > { %vm794_vm5 = vcmp.ge.f32.partialorder %v1156_v24, 0.0  ;;  %v803_v28 = vmul.f32 0.2, %v1156_v24  ;;  %v1157_v29 = vadd.f32 %v750_v27, %v457_v23  ;;  %v1139_v0 = vpop.f32.mrb[3].mxu0 }
 0x11d   : > { %v812_v30 = vsel %vm794_vm5, %v1156_v24, %v803_v28  ;;  %vm795_vm7 = vcmp.ge.f32.partialorder %v1157_v29, 0.0  ;;  %v804_v31 = vmul.f32 0.2, %v1157_v29  ;;  %v462_v33 = vpop.f32.mrb[4].mxu1 }
 0x11e   : > { %v1035_v32 = vpack.c.bf16 %v812_v30, %v812_v30  ;;  %v1098_v35 = vpop.f32.mrb[5].mxu1 }
 0x11f   : > { %v813_v34 = vsel %vm795_vm7, %v1157_v29, %v804_v31  ;;  %v465_v38 = vpop.f32.mrb[6].mxu1 }
 0x120   : > { %859 = vst.msk [vmem:[%s1474_s30] sm:$0xf] %vm858_vm6, %v1035_v32  ;;  %v1036_v36 = vpack.c.bf16 %v813_v34, %v813_v34  ;;  %v755_v37 = vpop.f32.mrb[4].mxu0  ;;  %v1099_v41 = vpop.f32.mrb[7].mxu1 }
 0x121   : > { %v1158_v39 = vadd.f32 %v755_v37, %v462_v33  ;;  %v1142_v40 = vpop.f32.mrb[5].mxu0 }
 0x122   : > { %860 = vst.msk [vmem:[%s1474_s30 + $0x4] sm:$0xf] %vm858_vm6, %v1036_v36  ;;  %v758_v42 = vpop.f32.mrb[6].mxu0 }
 0x123   : > { %vm796_vm8 = vcmp.ge.f32.partialorder %v1158_v39, 0.0  ;;  %v805_v43 = vmul.f32 0.2, %v1158_v39  ;;  %v1159_v44 = vadd.f32 %v758_v42, %v465_v38  ;;  %v1143_v45 = vpop.f32.mrb[7].mxu0 }
 0x125   : > { %v814_v46 = vsel %vm796_vm8, %v1158_v39, %v805_v43  ;;  %vm797_vm9 = vcmp.ge.f32.partialorder %v1159_v44, 0.0  ;;  %v806_v47 = vmul.f32 0.2, %v1159_v44  ;;  %v470_v49 = vpop.f32.mrb[8].mxu1 }
 0x126   : > { %v1037_v48 = vpack.c.bf16 %v814_v46, %v814_v46  ;;  %v1102_v51 = vpop.f32.mrb[9].mxu1 }
 0x127   : > { %v815_v50 = vsel %vm797_vm9, %v1159_v44, %v806_v47  ;;  %v473_v54 = vpop.f32.mrb[10].mxu1 }
 0x128   : > { %861 = vst.msk [vmem:[%s1474_s30 + $0x8] sm:$0xf] %vm858_vm6, %v1037_v48  ;;  %v1038_v52 = vpack.c.bf16 %v815_v50, %v815_v50  ;;  %v763_v53 = vpop.f32.mrb[8].mxu0  ;;  %v1103_v57 = vpop.f32.mrb[11].mxu1 }
 0x129   : > { %v1160_v55 = vadd.f32 %v763_v53, %v470_v49  ;;  %v1146_v56 = vpop.f32.mrb[9].mxu0 }
 0x12a   : > { %862 = vst.msk [vmem:[%s1474_s30 + $0xc] sm:$0xf] %vm858_vm6, %v1038_v52  ;;  %v766_v58 = vpop.f32.mrb[10].mxu0 }
 0x12b   : > { %vm798_vm10 = vcmp.ge.f32.partialorder %v1160_v55, 0.0  ;;  %v807_v59 = vmul.f32 0.2, %v1160_v55  ;;  %v1161_v60 = vadd.f32 %v766_v58, %v473_v54  ;;  %v1147_v61 = vpop.f32.mrb[11].mxu0 }
 0x12d   : > { %v816_v62 = vsel %vm798_vm10, %v1160_v55, %v807_v59  ;;  %vm799_vm11 = vcmp.ge.f32.partialorder %v1161_v60, 0.0  ;;  %v808_v63 = vmul.f32 0.2, %v1161_v60  ;;  %v478_v2 = vpop.f32.mrb[12].mxu1 }
 0x12e   : > { %v1039_v1 = vpack.c.bf16 %v816_v62, %v816_v62  ;;  %v1106_v4 = vpop.f32.mrb[13].mxu1 }
 0x12f   : > { %v817_v3 = vsel %vm799_vm11, %v1161_v60, %v808_v63  ;;  %v481_v10 = vpop.f32.mrb[14].mxu1 }
 0x130   : > { %863 = vst.msk [vmem:[%s1474_s30 + $0x10] sm:$0xf] %vm858_vm6, %v1039_v1  ;;  %v1040_v7 = vpack.c.bf16 %v817_v3, %v817_v3  ;;  %v771_v8 = vpop.f32.mrb[12].mxu0  ;;  %v1107_v13 = vpop.f32.mrb[15].mxu1 }
 0x131   : > { %v1162_v11 = vadd.f32 %v771_v8, %v478_v2  ;;  %v1150_v12 = vpop.f32.mrb[13].mxu0 }
 0x132   : > { %864 = vst.msk [vmem:[%s1474_s30 + $0x14] sm:$0xf] %vm858_vm6, %v1040_v7  ;;  %v774_v15 = vpop.f32.mrb[14].mxu0 }
 0x133   : > { %vm800_vm12 = vcmp.ge.f32.partialorder %v1162_v11, 0.0  ;;  %v809_v17 = vmul.f32 0.2, %v1162_v11  ;;  %v1163_v9 = vadd.f32 %v774_v15, %v481_v10  ;;  %v1151_v18 = vpop.f32.mrb[15].mxu0 }
 0x135   : > { %v818_v5 = vsel %vm800_vm12, %v1162_v11, %v809_v17  ;;  %vm801_vm13 = vcmp.ge.f32.partialorder %v1163_v9, 0.0  ;;  %v810_v14 = vmul.f32 0.2, %v1163_v9  ;;  %v486_v19 = vpop.f32.mrb[16].mxu1 }
 0x136   : > { %v1041_v6 = vpack.c.bf16 %v818_v5, %v818_v5  ;;  %v1110_v20 = vpop.f32.mrb[17].mxu1 }
 0x137   : > { %v819_v16 = vsel %vm801_vm13, %v1163_v9, %v810_v14  ;;  %v489_v23 = vpop.f32.mrb[18].mxu1 }
 0x138   : > { %865 = vst.msk [vmem:[%s1474_s30 + $0x18] sm:$0xf] %vm858_vm6, %v1041_v6  ;;  %v1042_v21 = vpack.c.bf16 %v819_v16, %v819_v16  ;;  %v779_v22 = vpop.f32.mrb[16].mxu0  ;;  %v1111_v26 = vpop.f32.mrb[19].mxu1 }
 0x139   : > { %v1164_v24 = vadd.f32 %v779_v22, %v486_v19  ;;  %v1154_v25 = vpop.f32.mrb[17].mxu0 }
 0x13a   : > { %866 = vst.msk [vmem:[%s1474_s30 + $0x1c] sm:$0xf] %vm858_vm6, %v1042_v21  ;;  %v782_v27 = vpop.f32.mrb[18].mxu0 }
 0x13b   : > { %vm802_vm14 = vcmp.ge.f32.partialorder %v1164_v24, 0.0  ;;  %v811_v28 = vmul.f32 0.2, %v1164_v24  ;;  %v1155_v29 = vpop.f32.mrb[19].mxu0 }
 0x13d   : > { %v820_v0 = vsel %vm802_vm14, %v1164_v24, %v811_v28 }
 0x13e   : > { %v1043_v30 = vpack.c.bf16 %v820_v0, %v820_v0 }
 0x140   : > { %867 = vst.msk [vmem:[%s1474_s30 + $0x20] sm:$0xf] %vm858_vm6, %v1043_v30 }
 0x141 PF: > { %s13_s14 = sadd.s32 1, %s1271_s14   ;;  %s1507_s12 = smov %s1267_s13 }
 0x142   : > { %p10_p5 = scmp.ge.s32.totalorder %s13_s14, 4   ;;  %s1508_s13 = smov %s1510_s2 }
 0x144   :  { %12 = sbr.rel (!%p10_p5) target bundleno = 2 (0x2), region = 71 }

// kernel: generator_unet.9
= control target key start
LH: loop header
LB: loop body
LE: loop exit
PB: predicated region body
PF: predicated region fallthrough
CT: control target
= control target key end

     0   :  { %s1026_s12 = smov 0   ;;  %s1028_s13 = smov 0   ;;  %s1124_s0 = inlined_call_operand.vmem [shape: bf16[2,26,32], index: 0, kind: input, shape index: {}]   ;;  %s1125_s1 = inlined_call_operand.vmem [shape: bf16[4,32,16], index: 1, kind: input, shape index: {}]   ;;  %s1126_s2 = inlined_call_operand.vmem [shape: f32[1,16], index: 2, kind: input, shape index: {}]   ;;  %s1127_s3 = inlined_call_operand.vmem [shape: bf16[2,20,16], index: 3, kind: output, shape index: {}]  }
   0x1   :  { %s1030_s14 = smov 0  }
   0x2 LB: > { %s25_s2 = sadd.s32 1, %s999_s13  ;;  %p824_p0 = scmp.ge.s32.totalorder %s1003_s14, 1  ;;  %s1003_s14 = sphi %s1030_s14, %s13_s14   ;;  %s999_s13 = sphi %s1028_s13, %s1129_s13   ;;  %s995_s12 = sphi %s1026_s12, %s1128_s12  }
   0x3   : > { %p27_p1 = scmp.ge.s32.totalorder %s25_s2, 2  ;;  %p168_p2 = scmp.lt.s32.totalorder %s1003_s14, 3 }
   0x5   : > { %s1131_s2 = smov (%p27_p1, %s25_s2), 0  ;;  %p169_p3 = pnand %p824_p0, %p168_p2 }
   0x6   : > { %v965_v0 = vld [vmem:[%s1125_s1 + $0x10] sm:$0xff] (!%p169_p3)   ;;  %p202_p4 = scmp.lt.s32.totalorder (!%p169_p3), %s995_s12, 1  ;;  %v966_v1 = vld [vmem:[%s1125_s1 + $0x20] sm:$0xff] (!%p169_p3)   ;;  %v967_v2 = vld [vmem:[%s1125_s1 + $0x18] sm:$0xff] (!%p169_p3)   ;;  %vm272_vm0 = vcmask (!%p169_p3), 261120   ;;  %vm510_vm3 = vcmask (!%p169_p3), 1044480   ;;  %v583_v40 = vlaneseq (!%p169_p3) }
   0x7   : > { %172 = sbr.rel (%p169_p3) target bundleno = 327 (0x147), region = 32  ;;  %890 = vmatprep.subr.bf16.mxu1 (!%p169_p3), %v965_v0  ;;  %906 = vmatprep.subr.bf16.mxu0 (!%p169_p3), %v966_v1  ;;  %v968_v3 = vld [vmem:[%s1125_s1 + $0x28] sm:$0xff] (!%p169_p3)   ;;  %v971_v4 = vld [vmem:[%s1125_s1] sm:$0xff] (!%p169_p3)   ;;  %v974_v15 = vld [vmem:[%s1125_s1 + $0x30] sm:$0xff] (!%p169_p3)   ;;  %vm244_vm1 = vsmask.f32 (!%p169_p3), 7424 }
   0x8   : > { %891 = vmatpush3.bf16.msra.mxu1 (!%p169_p3), %v965_v0  ;;  %907 = vmatpush3.bf16.msra.mxu0 (!%p169_p3), %v966_v1  ;;  %vm414_vm2 = vsmask.f32 (!%p169_p3), 5376  ;;  %v975_v33 = vld [vmem:[%s1125_s1 + $0x8] sm:$0xff] (!%p169_p3)   ;;  %v976_v37 = vld [vmem:[%s1125_s1 + $0x38] sm:$0xff] (!%p169_p3)   ;;  %v584_v41 = vshrl.u32 (!%p169_p3), %v583_v40, 7 }
   0x9   : > { %892 = vmatprep.subr.bf16.mxu1 (!%p169_p3), %v967_v2  ;;  %908 = vmatprep.subr.bf16.mxu0 (!%p169_p3), %v968_v3 }
   0xa   : > { %v586_v42 = vadd.s32 (!%p169_p3), 16, %v584_v41  ;;  %v585_v43 = vadd.s32 (!%p169_p3), 8, %v584_v41  ;;  %v1091_v44 = vmul.u32.u64.low (!%p169_p3), 3435973837, %v584_v41  ;;  %v1092_v45 = vmul.u32.u64.high 3435973837, %v584_v41, %v1091_v44 }
   0xc   : > { %893 = vmatpush3.bf16.msra.mxu1 (!%p169_p3), %v967_v2  ;;  %909 = vmatpush3.bf16.msra.mxu0 (!%p169_p3), %v968_v3  ;;  %v1094_v46 = vmul.u32.u64.low (!%p169_p3), 3435973837, %v586_v42  ;;  %v1095_v47 = vmul.u32.u64.high 3435973837, %v586_v42, %v1094_v46  ;;  %v1097_v48 = vmul.u32.u64.low (!%p169_p3), 3435973837, %v585_v43  ;;  %v1098_v49 = vmul.u32.u64.high 3435973837, %v585_v43, %v1097_v48 }
   0xd   : > { %898 = vmatprep.subr.bf16.mxu1 (!%p169_p3), %v971_v4  ;;  %914 = vmatprep.subr.bf16.mxu0 (!%p169_p3), %v974_v15  ;;  %v593_v50 = vshrl.u32 (!%p169_p3), %v1092_v45, 2 }
   0xe   : > { %s1133_s12 = smov (!%p202_p4, %s995_s12), 1  ;;  %v615_v51 = vshrl.u32 %v1095_v47, 2  ;;  %v604_v52 = vshrl.u32 %v1098_v49, 2 }
   0xf   : > { %s870_s23 = sshll.u32 %s1133_s12, 4  ;;  %v594_v53 = vmul.u32 5, %v593_v50  ;;  %s933_s8 = smul.u32 12, %s1133_s12 }
  0x10   : > { %s1065_s28 = scalar_lea.vmem %s1124_s0, %s870_s23  ;;  %v616_v54 = vmul.u32 5, %v615_v51  ;;  %v605_v55 = vmul.u32 5, %v604_v52 }
  0x11   : > { %v969_v5 = vld [vmem:[%s1065_s28] sm:$0xff]   ;;  %v970_v6 = vld [vmem:[%s1065_s28 + $0x8] ss:$0 sps:$4 sm:$0x77]   ;;  %v595_v56 = vsub.s32 %v584_v41, %v594_v53  ;;  %s221_s11 = scalar_lea.vmem %s1127_s3, %s933_s8 }
  0x12   : > { %v395_v7 = vld [vmem:[%s1065_s28] sm:$0xc]  ;;  %v396_v8 = vld [vmem:[%s1065_s28 + $0x4] sm:$0xf]  ;;  %v246_v9 = vshrl.u32 %v969_v5, 16  ;;  %v248_v10 = vshll.u32 %v969_v5, 16  ;;  %v617_v57 = vsub.s32 %v586_v42, %v616_v54  ;;  %v606_v58 = vsub.s32 %v585_v43, %v605_v55 }
  0x13   : > { %v253_v11 = vshll.u32 %v970_v6, 16  ;;  %v257_v12 = vshrl.u32 %v970_v6, 16  ;;  %v973_v13 = vld [vmem:[%s1065_s28 + $0x8] sm:$0x1f]   ;;  %v847_v14 = vcombine.low %v395_v7, %v396_v8  ;;  %v501_v26 = vld [vmem:[%s1065_s28] sm:$0x8] }
  0x14   : > { %v250_v16 = vrot.slane %v248_v10, 1  ;;  %v424_v18 = vshrl.u32 %v973_v13, 16  ;;  %v427_v19 = vshll.u32 %v973_v13, 16  ;;  %v857_v29 = vcombine.low %v501_v26, %v396_v8  ;;  %v978_v39 = vld [vmem:[%s1065_s28 + $0x8] ss:$0 sps:$4 sm:$0x33]  }
  0x15   : > { %v255_v17 = vrot.slane %v253_v11, 1  ;;  %v416_v20 = vshrl.u32 %v847_v14, 16  ;;  %v419_v21 = vshll.u32 %v847_v14, 16  ;;  %v512_v30 = vrot.slane %v973_v13, 3 }
  0x16   : > { %v251_v22 = vor.u32 %v250_v16, %v246_v9  ;;  %v426_v24 = vrot.slane %v424_v18, 2  ;;  %v429_v25 = vrot.slane %v427_v19, 3  ;;  %v511_v35 = vrot.slane %v857_v29, 3 }
  0x17   : > { %v259_v23 = vor.u32 %v257_v12, %v255_v17  ;;  %v418_v27 = vrot.slane %v416_v20, 2  ;;  %v421_v28 = vrot.slane %v419_v21, 3  ;;  %vm620_vm4 = vcmp.ne.s32.totalorder %v595_v56, 0 }
  0x18   : > { %v256_v31 = vsel %vm244_vm1, %v251_v22, %v255_v17  ;;  %v430_v32 = vor.u32 %v429_v25, %v426_v24  ;;  %v513_v38 = vsel %vm510_vm3, %v511_v35, %v512_v30  ;;  %vm623_vm5 = vcmp.lt.s32.totalorder %v595_v56, 0 }
  0x19   : > { %894 = vmatprep.mubr.msk.bf16.mxu1 %vm272_vm0, %v256_v31  ;;  %v422_v34 = vor.u32 %v421_v28, %v418_v27  ;;  %vm622_vm6 = vcmp.ne.s32.totalorder %v617_v57, 0  ;;  %vm625_vm7 = vcmp.lt.s32.totalorder %v617_v57, 0  ;;  %v629_v59 = vadd.s32 5, %v595_v56  ;;  %vm626_vm10 = vmand %vm623_vm5, %vm620_vm4 }
  0x1a   : > { %895 = vmatmul.mubr.msk.bf16.vlgmr.msra.gmra.mrb[0].mxu1 %vm272_vm0, %v259_v23  ;;  %vm621_vm8 = vcmp.ne.s32.totalorder %v606_v58, 0  ;;  %vm624_vm9 = vcmp.lt.s32.totalorder %v606_v58, 0  ;;  %vm628_vm11 = vmand %vm625_vm7, %vm622_vm6  ;;  %v631_v60 = vadd.s32 5, %v617_v57  ;;  %v630_v61 = vadd.s32 5, %v606_v58 }
  0x1b   : > { %v431_v36 = vsel %vm414_vm2, %v422_v34, %v430_v32  ;;  %899 = vmatpush3.bf16.msra.mxu1 %v971_v4  ;;  %902 = vmatprep.mubr.msk.bf16.mxu1 %vm272_vm0, %v969_v5  ;;  %vm627_vm12 = vmand %vm624_vm9, %vm621_vm8  ;;  %v632_v62 = vsel %vm626_vm10, %v629_v59, %v595_v56  ;;  %v1005_v8 = vmov 0.0   ;;  %vm651_vm1 = vcmask 125952  }
  0x1c   : > { %910 = vmatprep.mubr.msk.bf16.mxu0 %vm272_vm0, %v431_v36  ;;  %900 = vmatprep.subr.bf16.mxu1 %v975_v33  ;;  %v634_v0 = vsel %vm628_vm11, %v631_v60, %v617_v57  ;;  %v633_v1 = vsel %vm627_vm12, %v630_v61, %v606_v58  ;;  %vm635_vm13 = vcmp.lt.s32.totalorder %v632_v62, 4  ;;  %vm711_vm5 = vcmask 123904  }
  0x1d   : > { %911 = vmatmul.mubr.msk.bf16.vlgmr.msra.gmra.mrb[0].mxu0 %vm272_vm0, %v430_v32  ;;  %vm637_vm14 = vcmp.lt.s32.totalorder %v634_v0, 4  ;;  %vm636_vm15 = vcmp.lt.s32.totalorder %v633_v1, 4  ;;  %v862_v9 = vsel %vm635_vm13, 1.0, %v1005_v8 }
  0x1e   : > { %915 = vmatpush3.bf16.msra.mxu0 %v974_v15  ;;  %918 = vmatprep.mubr.msk.bf16.mxu0 %vm272_vm0, %v513_v38  ;;  %v864_v12 = vsel %vm637_vm14, 1.0, %v1005_v8  ;;  %v863_v14 = vsel %vm636_vm15, 1.0, %v1005_v8 }
  0x1f   : > { %916 = vmatprep.subr.bf16.mxu0 %v976_v37  ;;  %901 = vmatpush3.bf16.msra.mxu1 %v975_v33 }
  0x22   : > { %917 = vmatpush3.bf16.msra.mxu0 %v976_v37 }
  0x26   : > { %903 = vmatmul.mubr.msk.bf16.vlgmr.msra.gmra.mrb[0].mxu1 %vm272_vm0, %v978_v39 }
  0x29   : > { %919 = vmatmul.mubr.msk.bf16.vlgmr.msra.gmra.mrb[0].mxu0 %vm272_vm0, %v512_v30  ;;  %vm647_vm0 = vcmask 130048  }
  0xf9   : > { %v904_v63 = vpop.f32.mrb[0].mxu1 }
  0xfa   : > { %v381_v2 = vpop.f32.mrb[1].mxu1 }
  0xfb   : > { %v905_v3 = vpop.f32.mrb[2].mxu1 }
  0xfc   : > { %v920_v4 = vpop.f32.mrb[0].mxu0  ;;  %v384_v5 = vpop.f32.mrb[3].mxu1 }
  0xfd   : > { %v922_v6 = vadd.f32 %v920_v4, %v904_v63  ;;  %v566_v7 = vpop.f32.mrb[1].mxu0 }
  0xfe   : > { %v923_v10 = vadd.f32 %v566_v7, %v381_v2  ;;  %v921_v11 = vpop.f32.mrb[2].mxu0 }
  0xff   : > { %v569_v13 = vpop.f32.mrb[3].mxu0  ;;  %v646_v17 = vmul.f32 %v922_v6, %v864_v12 }
 0x100   : > { %v644_v15 = vmul.f32 %v923_v10, %v862_v9  ;;  %v924_v16 = vadd.f32 %v569_v13, %v384_v5 }
 0x101   : > { %v652_v22 = vsel %vm651_vm1, %v646_v17, 0.0 }
 0x102   : > { %v645_v18 = vmul.f32 %v924_v16, %v863_v14  ;;  %v648_v19 = vsel %vm647_vm0, %v644_v15, 0.0 }
 0x104   : > { %v649_v20 = vsel %vm647_vm0, %v645_v18, 0.0 }
 0x105   : > { %v650_v21 = vadd.f32 %v649_v20, %v648_v19 }
 0x107   : > { %v653_v23 = vadd.f32 %v652_v22, %v650_v21 }
 0x109   : > { %v654_v24 = vrot.slane %v653_v23, 4 }
 0x10b   : > { %v655_v25 = vadd.f32 %v654_v24, %v653_v23 }
 0x10d   : > { %v656_v26 = vrot.slane %v655_v25, 2 }
 0x10f   : > { %v657_v27 = vadd.f32 %v656_v26, %v655_v25 }
 0x111   : > { %v658_v28 = vrot.slane %v657_v27, 1 }
 0x113   : > { %v659_v29 = vadd.f32 %v658_v28, %v657_v27 }
 0x115   : > { %v660_v30 = vmul.f32 0.0625, %v659_v29 }
 0x117   : > { %v661_v31 = vsub.f32 %v923_v10, %v660_v30  ;;  %v662_v32 = vsub.f32 %v924_v16, %v660_v30  ;;  %v663_v33 = vsub.f32 %v922_v6, %v660_v30 }
 0x119   : > { %v664_v34 = vmul.f32 %v661_v31, %v661_v31  ;;  %v665_v35 = vmul.f32 %v662_v32, %v662_v32  ;;  %v666_v36 = vmul.f32 %v663_v33, %v663_v33 }
 0x11b   : > { %v667_v37 = vmul.f32 %v862_v9, %v664_v34  ;;  %v668_v38 = vmul.f32 %v863_v14, %v665_v35  ;;  %v669_v39 = vmul.f32 %v864_v12, %v666_v36 }
 0x11d   : > { %v670_v40 = vsel %vm647_vm0, %v667_v37, 0.0  ;;  %v671_v41 = vsel %vm647_vm0, %v668_v38, 0.0  ;;  %v673_v43 = vsel %vm651_vm1, %v669_v39, 0.0 }
 0x11e   : > { %v672_v42 = vadd.f32 %v671_v41, %v670_v40 }
 0x120   : > { %v674_v44 = vadd.f32 %v673_v43, %v672_v42 }
 0x122   : > { %v675_v45 = vrot.slane %v674_v44, 4 }
 0x124   : > { %v676_v46 = vadd.f32 %v675_v45, %v674_v44 }
 0x126   : > { %v677_v47 = vrot.slane %v676_v46, 2 }
 0x128   : > { %v678_v48 = vadd.f32 %v677_v47, %v676_v46 }
 0x12a   : > { %v679_v49 = vrot.slane %v678_v48, 1 }
 0x12c   : > { %v680_v50 = vadd.f32 %v679_v49, %v678_v48 }
 0x12e   : > { %v681_v51 = vmul.f32 0.0625, %v680_v50 }
 0x130   : > { %v682_v52 = vadd.f32 1e-05, %v681_v51 }
 0x132   : > { %979 = vrsqrt.f32 %v682_v52 }
 0x13c   : > { %v980_v53 = vpop.eup %979 }
 0x13d   : > { %v684_v54 = vmul.f32 %v980_v53, %v661_v31  ;;  %v685_v55 = vmul.f32 %v980_v53, %v662_v32  ;;  %v686_v56 = vmul.f32 %v980_v53, %v663_v33 }
 0x13f   : > { %vm687_vm2 = vcmp.ge.f32.partialorder %v684_v54, 0.0  ;;  %vm688_vm3 = vcmp.ge.f32.partialorder %v685_v55, 0.0  ;;  %vm689_vm4 = vcmp.ge.f32.partialorder %v686_v56, 0.0  ;;  %v690_v57 = vmul.f32 0.2, %v684_v54 }
 0x140   : > { %v691_v58 = vmul.f32 0.2, %v685_v55  ;;  %v692_v59 = vmul.f32 0.2, %v686_v56 }
 0x141   : > { %v693_v60 = vsel %vm687_vm2, %v684_v54, %v690_v57 }
 0x142   : > { %v694_v61 = vsel %vm688_vm3, %v685_v55, %v691_v58  ;;  %v695_v62 = vsel %vm689_vm4, %v686_v56, %v692_v59  ;;  %v871_v63 = vpack.c.bf16 %v693_v60, %v693_v60 }
 0x143   : > { %v872_v0 = vpack.c.bf16 %v694_v61, %v694_v61  ;;  %v873_v1 = vpack.c.bf16 %v695_v62, %v695_v62 }
 0x144   : > { %709 = vst.msk [vmem:[%s221_s11] sm:$0xf] %vm651_vm1, %v871_v63 }
 0x145   : > { %710 = vst.msk [vmem:[%s221_s11 + $0x4] sm:$0xf] %vm651_vm1, %v872_v0 }
 0x146   : > { %712 = vst.msk [vmem:[%s221_s11 + $0x8] sm:$0x3] %vm711_vm5, %v873_v1 }
 0x147 PF: > { %s13_s14 = sadd.s32 1, %s1003_s14   ;;  %s1128_s12 = smov %s999_s13 }
 0x148   : > { %p10_p5 = scmp.ge.s32.totalorder %s13_s14, 4   ;;  %s1129_s13 = smov %s1131_s2 }
 0x14a   :  { %12 = sbr.rel (!%p10_p5) target bundleno = 2 (0x2), region = 71 }

// kernel: generator_unet.10
= control target key start
LH: loop header
LB: loop body
LE: loop exit
PB: predicated region body
PF: predicated region fallthrough
CT: control target
= control target key end

     0   :  { %s942_s12 = smov 0   ;;  %s944_s13 = smov 0   ;;  %s1067_s0 = inlined_call_operand.vmem [shape: bf16[2,10,64], index: 0, kind: input, shape index: {}]   ;;  %s1068_s1 = inlined_call_operand.vmem [shape: bf16[4,64,32], index: 1, kind: input, shape index: {}]   ;;  %s1069_s2 = inlined_call_operand.vmem [shape: f32[1,32], index: 2, kind: input, shape index: {}]   ;;  %s1070_s3 = inlined_call_operand.vmem [shape: bf16[2,6,32], index: 3, kind: output, shape index: {}]  }
   0x1   :  { %s946_s14 = smov 0  }
   0x2 LB: > { %s25_s2 = sadd.s32 1, %s914_s13  ;;  %p715_p0 = scmp.ge.s32.totalorder %s918_s14, 1  ;;  %s918_s14 = sphi %s946_s14, %s13_s14   ;;  %s914_s13 = sphi %s944_s13, %s1072_s13   ;;  %s910_s12 = sphi %s942_s12, %s1071_s12  }
   0x3   : > { %p27_p1 = scmp.ge.s32.totalorder %s25_s2, 2  ;;  %p168_p2 = scmp.lt.s32.totalorder %s918_s14, 3 }
   0x5   : > { %s1074_s2 = smov (%p27_p1, %s25_s2), 0  ;;  %p169_p3 = pnand %p715_p0, %p168_p2 }
   0x6   : > { %v875_v0 = vld [vmem:[%s1068_s1 + $0x20] sm:$0xff] (!%p169_p3)   ;;  %v920_v1 = vmov (!%p169_p3), 0.0   ;;  %v877_v3 = vld [vmem:[%s1068_s1 + $0x28] sm:$0xff] (!%p169_p3)   ;;  %vm921_vm0 = vmmov (!%p169_p3), 0   ;;  %p201_p4 = scmp.lt.s32.totalorder (!%p169_p3), %s910_s12, 1  ;;  %v879_v5 = vld [vmem:[%s1068_s1 + $0x30] sm:$0xff] (!%p169_p3)   ;;  %v559_v34 = vlaneseq (!%p169_p3) }
   0x7   : > { %172 = sbr.rel (%p169_p3) target bundleno = 315 (0x13b), region = 32  ;;  %790 = vmatprep.subr.bf16.mxu1 (!%p169_p3), %v920_v1  ;;  %814 = vmatprep.subr.bf16.mxu0 (!%p169_p3), %v920_v1  ;;  %v876_v2 = vld [vmem:[%s1068_s1 + $0x40] sm:$0xff] (!%p169_p3)   ;;  %v878_v4 = vld [vmem:[%s1068_s1 + $0x48] sm:$0xff] (!%p169_p3)   ;;  %v880_v6 = vld [vmem:[%s1068_s1 + $0x50] sm:$0xff] (!%p169_p3)   ;;  %vm274_vm1 = vcmask (!%p169_p3), 523264   ;;  %vm581_vm6 = vcmask (!%p169_p3), 259072  }
   0x8   : > { %791 = vmatpush3.bf16.msra.mxu1 (!%p169_p3), %v875_v0  ;;  %798 = vmatprep.mubr.msk.bf16.mxu1 (!%p169_p3), %vm921_vm0, %v920_v1  ;;  %v881_v8 = vld [vmem:[%s1068_s1 + $0x38] sm:$0xff] (!%p169_p3)   ;;  %v884_v16 = vld [vmem:[%s1068_s1] sm:$0xff] (!%p169_p3)   ;;  %v887_v24 = vld [vmem:[%s1068_s1 + $0x8] sm:$0xff] (!%p169_p3)   ;;  %v560_v35 = vshrl.u32 (!%p169_p3), %v559_v34, 7  ;;  %vm608_vm8 = vcmask (!%p169_p3), 256000  }
   0x9   : > { %815 = vmatpush3.bf16.msra.mxu0 (!%p169_p3), %v876_v2  ;;  %792 = vmatprep.subr.bf16.mxu1 (!%p169_p3), %v920_v1  ;;  %v882_v13 = vld [vmem:[%s1068_s1 + $0x58] sm:$0xff] (!%p169_p3)   ;;  %v886_v22 = vld [vmem:[%s1068_s1 + $0x60] sm:$0xff] (!%p169_p3)   ;;  %v888_v25 = vld [vmem:[%s1068_s1 + $0x68] sm:$0xff] (!%p169_p3)  }
   0xa   : > { %816 = vmatprep.subr.bf16.mxu0 (!%p169_p3), %v920_v1  ;;  %822 = vmatprep.mubr.msk.bf16.mxu0 (!%p169_p3), %vm921_vm0, %v920_v1  ;;  %v889_v26 = vld [vmem:[%s1068_s1 + $0x10] sm:$0xff] (!%p169_p3)   ;;  %v891_v29 = vld [vmem:[%s1068_s1 + $0x18] sm:$0xff] (!%p169_p3)   ;;  %v1049_v36 = vmul.u32.u64.low (!%p169_p3), 2863311531, %v560_v35  ;;  %v1050_v37 = vmul.u32.u64.high 2863311531, %v560_v35, %v1049_v36 }
   0xb   : > { %v890_v27 = vld [vmem:[%s1068_s1 + $0x70] sm:$0xff] (!%p169_p3)   ;;  %v892_v31 = vld [vmem:[%s1068_s1 + $0x78] sm:$0xff] (!%p169_p3)  }
   0xc   : > { %793 = vmatpush3.bf16.msra.mxu1 (!%p169_p3), %v877_v3  ;;  %v567_v38 = vshrl.u32 (!%p169_p3), %v1050_v37, 1 }
   0xd   : > { %817 = vmatpush3.bf16.msra.mxu0 (!%p169_p3), %v878_v4  ;;  %794 = vmatprep.subr.bf16.mxu1 (!%p169_p3), %v920_v1 }
   0xe   : > { %s1076_s12 = smov (!%p201_p4, %s910_s12), 1  ;;  %818 = vmatprep.subr.bf16.mxu0 %v920_v1  ;;  %v568_v39 = vmul.u32 3, %v567_v38 }
   0xf   : > { %s769_s25 = sshll.u32 %s1076_s12, 3  ;;  %s718_s27 = sshll.u32 %s1076_s12, 2 }
  0x10   : > { %s993_s30 = scalar_lea.vmem %s1067_s0, %s769_s25  ;;  %795 = vmatpush3.bf16.msra.mxu1 %v879_v5  ;;  %v569_v40 = vsub.s32 %v560_v35, %v568_v39 }
  0x11   : > { %v883_v7 = vld [vmem:[%s993_s30] ss:$0 sps:$4 sm:$0xff]   ;;  %v385_v9 = vld [vmem:[%s993_s30] sm:$0xe]  ;;  %v386_v12 = vld [vmem:[%s993_s30 + $0x4] sm:$0x1]  ;;  %819 = vmatpush3.bf16.msra.mxu0 %v880_v6  ;;  %796 = vmatprep.subr.bf16.mxu1 %v920_v1 }
  0x12   : > { %v244_v10 = vshrl.u32 %v883_v7, 16  ;;  %v246_v11 = vshll.u32 %v883_v7, 16  ;;  %v746_v14 = vcombine.low %v385_v9, %v386_v12  ;;  %820 = vmatprep.subr.bf16.mxu0 %v920_v1  ;;  %v477_v28 = vld [vmem:[%s993_s30] sm:$0xc]  ;;  %vm572_vm2 = vcmp.ne.s32.totalorder %v569_v40, 0 }
  0x13   : > { %v760_v30 = vcombine.low %v477_v28, %v386_v12  ;;  %v221_v32 = vld [vmem:[%s993_s30] sm:$0x7]  ;;  %vm573_vm3 = vcmp.lt.s32.totalorder %v569_v40, 0  ;;  %v575_v41 = vadd.s32 3, %v569_v40  ;;  %s219_s30 = scalar_lea.vmem %s1070_s3, %s718_s27 }
  0x14   : > { %v248_v15 = vrot.slane %v246_v11, 1  ;;  %v402_v17 = vshrl.u32 %v746_v14, 16  ;;  %v405_v18 = vshll.u32 %v746_v14, 16  ;;  %797 = vmatpush3.bf16.msra.mxu1 %v881_v8  ;;  %vm574_vm4 = vmand %vm573_vm3, %vm572_vm2 }
  0x15   : > { %821 = vmatpush3.bf16.msra.mxu0 %v882_v13  ;;  %802 = vmatprep.subr.bf16.mxu1 %v920_v1  ;;  %v490_v33 = vrot.slane %v760_v30, 2  ;;  %v576_v42 = vsel %vm574_vm4, %v575_v41, %v569_v40 }
  0x16   : > { %v249_v19 = vor.u32 %v248_v15, %v244_v10  ;;  %v404_v20 = vrot.slane %v402_v17, 1  ;;  %v407_v21 = vrot.slane %v405_v18, 2  ;;  %826 = vmatprep.subr.bf16.mxu0 %v920_v1  ;;  %vm577_vm5 = vcmp.lt.s32.totalorder %v576_v42, 2 }
  0x17   : > { %v766_v46 = vsel %vm577_vm5, 1.0, %v920_v1 }
  0x18   : > { %799 = vmatmul.mubr.msk.bf16.vlgmr.msra.gmra.mrb[0].mxu1 %vm274_vm1, %v249_v19  ;;  %v408_v23 = vor.u32 %v407_v21, %v404_v20 }
  0x19   : > { %803 = vmatpush3.bf16.msra.mxu1 %v884_v16  ;;  %810 = vmatprep.mubr.msk.bf16.mxu1 %vm921_vm0, %v920_v1 }
  0x1a   : > { %823 = vmatmul.mubr.msk.bf16.vlgmr.msra.gmra.mrb[0].mxu0 %vm274_vm1, %v408_v23  ;;  %804 = vmatprep.subr.bf16.mxu1 %v920_v1 }
  0x1b   : > { %827 = vmatpush3.bf16.msra.mxu0 %v886_v22  ;;  %834 = vmatprep.mubr.msk.bf16.mxu0 %vm921_vm0, %v920_v1 }
  0x1c   : > { %828 = vmatprep.subr.bf16.mxu0 %v920_v1 }
  0x1d   : > { %805 = vmatpush3.bf16.msra.mxu1 %v887_v24 }
  0x1e   : > { %806 = vmatprep.subr.bf16.mxu1 %v920_v1 }
  0x1f   : > { %829 = vmatpush3.bf16.msra.mxu0 %v888_v25 }
  0x20   : > { %830 = vmatprep.subr.bf16.mxu0 %v920_v1 }
  0x21   : > { %807 = vmatpush3.bf16.msra.mxu1 %v889_v26 }
  0x22   : > { %808 = vmatprep.subr.bf16.mxu1 %v920_v1 }
  0x23   : > { %831 = vmatpush3.bf16.msra.mxu0 %v890_v27 }
  0x24   : > { %832 = vmatprep.subr.bf16.mxu0 %v920_v1 }
  0x25   : > { %809 = vmatpush3.bf16.msra.mxu1 %v891_v29 }
  0x27   : > { %833 = vmatpush3.bf16.msra.mxu0 %v892_v31 }
  0x28   : > { %811 = vmatmul.mubr.msk.bf16.vlgmr.msra.gmra.mrb[0].mxu1 %vm274_vm1, %v221_v32 }
  0x2a   : > { %835 = vmatmul.mubr.msk.bf16.vlgmr.msra.gmra.mrb[0].mxu0 %vm274_vm1, %v490_v33 }
  0xfb   : > { %v379_v43 = vpop.f32.mrb[0].mxu1 }
  0xfc   : > { %v812_v44 = vpop.f32.mrb[1].mxu1 }
  0xfd   : > { %v552_v45 = vpop.f32.mrb[0].mxu0  ;;  %v382_v47 = vpop.f32.mrb[2].mxu1 }
  0xfe   : > { %v838_v48 = vadd.f32 %v552_v45, %v379_v43  ;;  %v836_v49 = vpop.f32.mrb[1].mxu0  ;;  %v813_v50 = vpop.f32.mrb[3].mxu1 }
  0xff   : > { %v555_v51 = vpop.f32.mrb[2].mxu0 }
 0x100   : > { %v580_v52 = vmul.f32 %v838_v48, %v766_v46  ;;  %v837_v53 = vpop.f32.mrb[3].mxu0 }
 0x102   : > { %v582_v54 = vsel %vm581_vm6, %v580_v52, 0.0 }
 0x103   : > { %v583_v55 = vrot.slane %v582_v54, 4 }
 0x105   : > { %v584_v56 = vadd.f32 %v583_v55, %v582_v54 }
 0x107   : > { %v585_v57 = vrot.slane %v584_v56, 2 }
 0x109   : > { %v586_v58 = vadd.f32 %v585_v57, %v584_v56 }
 0x10b   : > { %v587_v59 = vrot.slane %v586_v58, 1 }
 0x10d   : > { %v588_v60 = vadd.f32 %v587_v59, %v586_v58 }
 0x10f   : > { %v589_v61 = vmul.f32 0.25, %v588_v60 }
 0x111   : > { %v590_v62 = vsub.f32 %v838_v48, %v589_v61 }
 0x113   : > { %v591_v63 = vmul.f32 %v590_v62, %v590_v62 }
 0x115   : > { %v592_v0 = vmul.f32 %v766_v46, %v591_v63 }
 0x117   : > { %v593_v1 = vsel %vm581_vm6, %v592_v0, 0.0 }
 0x118   : > { %v594_v2 = vrot.slane %v593_v1, 4 }
 0x11a   : > { %v595_v3 = vadd.f32 %v594_v2, %v593_v1 }
 0x11c   : > { %v596_v4 = vrot.slane %v595_v3, 2 }
 0x11e   : > { %v597_v5 = vadd.f32 %v596_v4, %v595_v3 }
 0x120   : > { %v598_v6 = vrot.slane %v597_v5, 1 }
 0x122   : > { %v599_v7 = vadd.f32 %v598_v6, %v597_v5 }
 0x124   : > { %v600_v8 = vmul.f32 0.25, %v599_v7 }
 0x126   : > { %v601_v9 = vadd.f32 1e-05, %v600_v8 }
 0x128   : > { %894 = vrsqrt.f32 %v601_v9 }
 0x132   : > { %v895_v10 = vpop.eup %894 }
 0x133   : > { %v603_v11 = vmul.f32 %v895_v10, %v590_v62 }
 0x135   : > { %vm604_vm7 = vcmp.ge.f32.partialorder %v603_v11, 0.0  ;;  %v605_v12 = vmul.f32 0.2, %v603_v11 }
 0x137   : > { %v606_v13 = vsel %vm604_vm7, %v603_v11, %v605_v12 }
 0x138   : > { %v607_v14 = vpack.c.bf16 %v606_v13, %v606_v13 }
 0x13a   : > { %609 = vst.msk [vmem:[%s219_s30] sm:$0x7] %vm608_vm8, %v607_v14 }
 0x13b PF: > { %s13_s14 = sadd.s32 1, %s918_s14   ;;  %s1071_s12 = smov %s914_s13 }
 0x13c   : > { %p10_p5 = scmp.ge.s32.totalorder %s13_s14, 4   ;;  %s1072_s13 = smov %s1074_s2 }
 0x13e   :  { %12 = sbr.rel (!%p10_p5) target bundleno = 2 (0x2), region = 71 }

// kernel: generator_unet.11
= control target key start
LH: loop header
LB: loop body
LE: loop exit
PB: predicated region body
PF: predicated region fallthrough
CT: control target
= control target key end

     0   :  { %s1093_s12 = smov 0   ;;  %s1095_s13 = smov 0   ;;  %s1272_s0 = inlined_call_operand.vmem [shape: bf16[2,5,128], index: 0, kind: input, shape index: {}]   ;;  %s1273_s1 = inlined_call_operand.vmem [shape: bf16[4,128,32], index: 1, kind: input, shape index: {}]   ;;  %s1274_s2 = inlined_call_operand.vmem [shape: f32[1,32], index: 2, kind: input, shape index: {}]   ;;  %s1275_s3 = inlined_call_operand.vmem [shape: bf16[2,2,32], index: 3, kind: output, shape index: {}]  }
   0x1   :  { %s1097_s14 = smov 0  }
   0x2 LB: > { %s25_s2 = sadd.s32 1, %s1065_s13  ;;  %p774_p0 = scmp.ge.s32.totalorder %s1069_s14, 1  ;;  %s1069_s14 = sphi %s1097_s14, %s13_s14   ;;  %s1065_s13 = sphi %s1095_s13, %s1277_s13   ;;  %s1061_s12 = sphi %s1093_s12, %s1276_s12  }
   0x3   : > { %p27_p1 = scmp.ge.s32.totalorder %s25_s2, 2  ;;  %p167_p2 = scmp.lt.s32.totalorder %s1069_s14, 3 }
   0x5   : > { %s1279_s2 = smov (%p27_p1, %s25_s2), 0  ;;  %p168_p3 = pnand %p774_p0, %p167_p2 }
   0x6   : > { %v1012_v0 = vld [vmem:[%s1273_s1 + $0x40] sm:$0xff] (!%p168_p3)   ;;  %v1071_v1 = vmov (!%p168_p3), 0.0   ;;  %v1014_v3 = vld [vmem:[%s1273_s1 + $0x48] sm:$0xff] (!%p168_p3)   ;;  %vm1072_vm0 = vmmov (!%p168_p3), 0   ;;  %p198_p4 = scmp.lt.s32.totalorder (!%p168_p3), %s1061_s12, 1  ;;  %v1016_v5 = vld [vmem:[%s1273_s1 + $0x50] sm:$0xff] (!%p168_p3)  }
   0x7   : > { %171 = sbr.rel (%p168_p3) target bundleno = 292 (0x124), region = 32  ;;  %897 = vmatprep.subr.bf16.mxu1 (!%p168_p3), %v1071_v1  ;;  %937 = vmatprep.subr.bf16.mxu0 (!%p168_p3), %v1071_v1  ;;  %v1013_v2 = vld [vmem:[%s1273_s1 + $0x80] sm:$0xff] (!%p168_p3)   ;;  %v1015_v4 = vld [vmem:[%s1273_s1 + $0x88] sm:$0xff] (!%p168_p3)   ;;  %v1017_v6 = vld [vmem:[%s1273_s1 + $0x90] sm:$0xff] (!%p168_p3)   ;;  %vm673_vm2 = vcmask (!%p168_p3), 253952  }
   0x8   : > { %898 = vmatpush3.bf16.msra.mxu1 (!%p168_p3), %v1012_v0  ;;  %913 = vmatprep.mubr.msk.bf16.mxu1 (!%p168_p3), %vm1072_vm0, %v1071_v1  ;;  %v1018_v7 = vld [vmem:[%s1273_s1 + $0x58] sm:$0xff] (!%p168_p3)   ;;  %v1020_v9 = vld [vmem:[%s1273_s1 + $0x60] sm:$0xff] (!%p168_p3)   ;;  %v1022_v12 = vld [vmem:[%s1273_s1 + $0x68] sm:$0xff] (!%p168_p3)  }
   0x9   : > { %938 = vmatpush3.bf16.msra.mxu0 (!%p168_p3), %v1013_v2  ;;  %899 = vmatprep.subr.bf16.mxu1 (!%p168_p3), %v1071_v1  ;;  %v1019_v8 = vld [vmem:[%s1273_s1 + $0x98] sm:$0xff] (!%p168_p3)   ;;  %v1021_v10 = vld [vmem:[%s1273_s1 + $0xa0] sm:$0xff] (!%p168_p3)   ;;  %v1023_v13 = vld [vmem:[%s1273_s1 + $0xa8] sm:$0xff] (!%p168_p3)  }
   0xa   : > { %939 = vmatprep.subr.bf16.mxu0 (!%p168_p3), %v1071_v1  ;;  %953 = vmatprep.mubr.msk.bf16.mxu0 (!%p168_p3), %vm1072_vm0, %v1071_v1  ;;  %v1024_v15 = vld [vmem:[%s1273_s1 + $0x70] sm:$0xff] (!%p168_p3)   ;;  %v1026_v20 = vld [vmem:[%s1273_s1 + $0x78] sm:$0xff] (!%p168_p3)   ;;  %v1029_v23 = vld [vmem:[%s1273_s1] sm:$0xff] (!%p168_p3)  }
   0xb   : > { %v1025_v16 = vld [vmem:[%s1273_s1 + $0xb0] sm:$0xff] (!%p168_p3)   ;;  %v1027_v21 = vld [vmem:[%s1273_s1 + $0xb8] sm:$0xff] (!%p168_p3)   ;;  %v1031_v25 = vld [vmem:[%s1273_s1 + $0xc0] sm:$0xff] (!%p168_p3)  }
   0xc   : > { %900 = vmatpush3.bf16.msra.mxu1 (!%p168_p3), %v1014_v3  ;;  %v1032_v26 = vld [vmem:[%s1273_s1 + $0x8] sm:$0xff] (!%p168_p3)   ;;  %v1034_v28 = vld [vmem:[%s1273_s1 + $0x10] sm:$0xff] (!%p168_p3)   ;;  %v1036_v30 = vld [vmem:[%s1273_s1 + $0x18] sm:$0xff] (!%p168_p3)  }
   0xd   : > { %940 = vmatpush3.bf16.msra.mxu0 (!%p168_p3), %v1015_v4  ;;  %901 = vmatprep.subr.bf16.mxu1 (!%p168_p3), %v1071_v1  ;;  %v1033_v27 = vld [vmem:[%s1273_s1 + $0xc8] sm:$0xff] (!%p168_p3)   ;;  %v1035_v29 = vld [vmem:[%s1273_s1 + $0xd0] sm:$0xff] (!%p168_p3)   ;;  %v1037_v31 = vld [vmem:[%s1273_s1 + $0xd8] sm:$0xff] (!%p168_p3)  }
   0xe   : > { %s1281_s12 = smov (!%p198_p4, %s1061_s12), 1  ;;  %941 = vmatprep.subr.bf16.mxu0 %v1071_v1  ;;  %v1038_v32 = vld [vmem:[%s1273_s1 + $0x20] sm:$0xff]   ;;  %v1040_v34 = vld [vmem:[%s1273_s1 + $0x28] sm:$0xff]   ;;  %v1042_v37 = vld [vmem:[%s1273_s1 + $0x30] sm:$0xff]  }
   0xf   : > { %s775_s29 = sshll.u32 %s1281_s12, 2  ;;  %v1039_v33 = vld [vmem:[%s1273_s1 + $0xe0] sm:$0xff]   ;;  %v1041_v36 = vld [vmem:[%s1273_s1 + $0xe8] sm:$0xff]   ;;  %v1043_v40 = vld [vmem:[%s1273_s1 + $0xf0] sm:$0xff]  }
  0x10   : > { %902 = vmatpush3.bf16.msra.mxu1 %v1016_v5  ;;  %s1153_s7 = scalar_lea.vmem %s1272_s0, %s775_s29  ;;  %v1044_v41 = vld [vmem:[%s1273_s1 + $0x38] sm:$0xff]  }
  0x11   : > { %942 = vmatpush3.bf16.msra.mxu0 %v1017_v6  ;;  %903 = vmatprep.subr.bf16.mxu1 %v1071_v1  ;;  %v1028_v11 = vld [vmem:[%s1153_s7] ss:$0 sps:$4 sm:$0x33]   ;;  %v1045_v44 = vld [vmem:[%s1273_s1 + $0xf8] sm:$0xff]  }
  0x12   : > { %943 = vmatprep.subr.bf16.mxu0 %v1071_v1  ;;  %v257_v14 = vshll.u32 %v1028_v11, 16  ;;  %v1030_v17 = vld [vmem:[%s1153_s7] ss:$0 sps:$4 sm:$0x22]   ;;  %v255_v18 = vshrl.u32 %v1028_v11, 16 }
  0x13   : > { %v459_v24 = vrot.slane %v1030_v17, 1  ;;  %v1046_v35 = vld [vmem:[%s1153_s7] ss:$0 sps:$4 sm:$0x66]  }
  0x14   : > { %904 = vmatpush3.bf16.msra.mxu1 %v1018_v7  ;;  %v259_v19 = vrot.slane %v257_v14, 1  ;;  %v572_v38 = vshrl.u32 %v1046_v35, 16  ;;  %v575_v39 = vshll.u32 %v1046_v35, 16  ;;  %v216_v45 = vld [vmem:[%s1153_s7] sm:$0x1]  ;;  %s214_s7 = scalar_lea.vmem %s1275_s3, %s1281_s12 }
  0x15   : > { %944 = vmatpush3.bf16.msra.mxu0 %v1019_v8  ;;  %905 = vmatprep.subr.bf16.mxu1 %v1071_v1 }
  0x16   : > { %945 = vmatprep.subr.bf16.mxu0 %v1071_v1  ;;  %v260_v22 = vor.u32 %v259_v19, %v255_v18  ;;  %v574_v42 = vrot.slane %v572_v38, 1  ;;  %v577_v43 = vrot.slane %v575_v39, 2 }
  0x18   : > { %906 = vmatpush3.bf16.msra.mxu1 %v1020_v9  ;;  %v578_v46 = vor.u32 %v577_v43, %v574_v42 }
  0x19   : > { %946 = vmatpush3.bf16.msra.mxu0 %v1021_v10  ;;  %907 = vmatprep.subr.bf16.mxu1 %v1071_v1 }
  0x1a   : > { %947 = vmatprep.subr.bf16.mxu0 %v1071_v1 }
  0x1c   : > { %908 = vmatpush3.bf16.msra.mxu1 %v1022_v12 }
  0x1d   : > { %948 = vmatpush3.bf16.msra.mxu0 %v1023_v13  ;;  %909 = vmatprep.subr.bf16.mxu1 %v1071_v1 }
  0x1e   : > { %949 = vmatprep.subr.bf16.mxu0 %v1071_v1 }
  0x20   : > { %910 = vmatpush3.bf16.msra.mxu1 %v1024_v15 }
  0x21   : > { %950 = vmatpush3.bf16.msra.mxu0 %v1025_v16  ;;  %911 = vmatprep.subr.bf16.mxu1 %v1071_v1 }
  0x22   : > { %951 = vmatprep.subr.bf16.mxu0 %v1071_v1 }
  0x24   : > { %912 = vmatpush3.bf16.msra.mxu1 %v1026_v20 }
  0x25   : > { %952 = vmatpush3.bf16.msra.mxu0 %v1027_v21  ;;  %917 = vmatprep.subr.bf16.mxu1 %v1071_v1 }
  0x26   : > { %957 = vmatprep.subr.bf16.mxu0 %v1071_v1 }
  0x27   : > { %914 = vmatmul.mubr.bf16.vlgmr.msra.gmra.mrb[0].mxu1 %v260_v22 }
  0x28   : > { %918 = vmatpush3.bf16.msra.mxu1 %v1029_v23  ;;  %954 = vmatmul.mubr.bf16.vlgmr.msra.gmra.mrb[0].mxu0 %v459_v24 }
  0x29   : > { %958 = vmatpush3.bf16.msra.mxu0 %v1031_v25  ;;  %919 = vmatprep.subr.bf16.mxu1 %v1071_v1 }
  0x2a   : > { %959 = vmatprep.subr.bf16.mxu0 %v1071_v1  ;;  %933 = vmatprep.mubr.msk.bf16.mxu1 %vm1072_vm0, %v1071_v1 }
  0x2b   : > { %973 = vmatprep.mubr.msk.bf16.mxu0 %vm1072_vm0, %v1071_v1 }
  0x2c   : > { %920 = vmatpush3.bf16.msra.mxu1 %v1032_v26 }
  0x2d   : > { %960 = vmatpush3.bf16.msra.mxu0 %v1033_v27  ;;  %921 = vmatprep.subr.bf16.mxu1 %v1071_v1 }
  0x2e   : > { %961 = vmatprep.subr.bf16.mxu0 %v1071_v1 }
  0x30   : > { %922 = vmatpush3.bf16.msra.mxu1 %v1034_v28 }
  0x31   : > { %962 = vmatpush3.bf16.msra.mxu0 %v1035_v29  ;;  %923 = vmatprep.subr.bf16.mxu1 %v1071_v1 }
  0x32   : > { %963 = vmatprep.subr.bf16.mxu0 %v1071_v1 }
  0x34   : > { %924 = vmatpush3.bf16.msra.mxu1 %v1036_v30 }
  0x35   : > { %964 = vmatpush3.bf16.msra.mxu0 %v1037_v31  ;;  %925 = vmatprep.subr.bf16.mxu1 %v1071_v1 }
  0x36   : > { %965 = vmatprep.subr.bf16.mxu0 %v1071_v1 }
  0x38   : > { %926 = vmatpush3.bf16.msra.mxu1 %v1038_v32 }
  0x39   : > { %966 = vmatpush3.bf16.msra.mxu0 %v1039_v33  ;;  %927 = vmatprep.subr.bf16.mxu1 %v1071_v1 }
  0x3a   : > { %967 = vmatprep.subr.bf16.mxu0 %v1071_v1 }
  0x3c   : > { %928 = vmatpush3.bf16.msra.mxu1 %v1040_v34 }
  0x3d   : > { %968 = vmatpush3.bf16.msra.mxu0 %v1041_v36  ;;  %929 = vmatprep.subr.bf16.mxu1 %v1071_v1 }
  0x3e   : > { %969 = vmatprep.subr.bf16.mxu0 %v1071_v1 }
  0x40   : > { %930 = vmatpush3.bf16.msra.mxu1 %v1042_v37 }
  0x41   : > { %970 = vmatpush3.bf16.msra.mxu0 %v1043_v40  ;;  %931 = vmatprep.subr.bf16.mxu1 %v1071_v1 }
  0x42   : > { %971 = vmatprep.subr.bf16.mxu0 %v1071_v1 }
  0x44   : > { %932 = vmatpush3.bf16.msra.mxu1 %v1044_v41 }
  0x45   : > { %972 = vmatpush3.bf16.msra.mxu0 %v1045_v44 }
  0x47   : > { %934 = vmatmul.mubr.bf16.vlgmr.msra.gmra.mrb[0].mxu1 %v216_v45 }
  0x48   : > { %974 = vmatmul.mubr.bf16.vlgmr.msra.gmra.mrb[0].mxu0 %v578_v46 }
 0x11a   : > { %v432_v47 = vpop.f32.mrb[0].mxu1 }
 0x11b   : > { %v662_v48 = vpop.f32.mrb[0].mxu0  ;;  %v935_v49 = vpop.f32.mrb[1].mxu1 }
 0x11c   : > { %v977_v50 = vadd.f32 %v662_v48, %v432_v47  ;;  %v975_v51 = vpop.f32.mrb[1].mxu0  ;;  %v435_v52 = vpop.f32.mrb[2].mxu1 }
 0x11d   : > { %v665_v53 = vpop.f32.mrb[2].mxu0  ;;  %v936_v54 = vpop.f32.mrb[3].mxu1 }
 0x11e   : > { %vm669_vm1 = vcmp.ge.f32.partialorder %v977_v50, 0.0  ;;  %v670_v55 = vmul.f32 0.2, %v977_v50  ;;  %v976_v56 = vpop.f32.mrb[3].mxu0 }
 0x120   : > { %v671_v57 = vsel %vm669_vm1, %v977_v50, %v670_v55 }
 0x121   : > { %v672_v58 = vpack.c.bf16 %v671_v57, %v671_v57 }
 0x123   : > { %674 = vst.msk [vmem:[%s214_s7] sm:$0x1] %vm673_vm2, %v672_v58 }
 0x124 PF: > { %s13_s14 = sadd.s32 1, %s1069_s14   ;;  %s1276_s12 = smov %s1065_s13 }
 0x125   : > { %p10_p5 = scmp.ge.s32.totalorder %s13_s14, 4   ;;  %s1277_s13 = smov %s1279_s2 }
 0x127   :  { %12 = sbr.rel (!%p10_p5) target bundleno = 2 (0x2), region = 71 }

// kernel: generator_unet.12
= control target key start
LH: loop header
LB: loop body
LE: loop exit
PB: predicated region body
PF: predicated region fallthrough
CT: control target
= control target key end

     0   :  { %s1928_s12 = smov 0   ;;  %s1930_s13 = smov 0   ;;  %s2171_s0 = inlined_call_operand.vmem [shape: bf16[2,11,32], index: 0, kind: input, shape index: {}]   ;;  %s2172_s1 = inlined_call_operand.vmem [shape: bf16[16,32,32], index: 1, kind: input, shape index: {}]   ;;  %s2173_s2 = inlined_call_operand.vmem [shape: f32[1,32], index: 2, kind: input, shape index: {}]   ;;  %s2174_s3 = inlined_call_operand.vmem [shape: bf16[2,12,32], index: 3, kind: output, shape index: {}]  }
   0x1   :  { %s1932_s14 = smov 0  }
   0x2 LB: > { %s25_s2 = sadd.s32 1, %s1900_s13  ;;  %p1464_p0 = scmp.ge.s32.totalorder %s1904_s14, 1  ;;  %s1904_s14 = sphi %s1932_s14, %s13_s14   ;;  %s1900_s13 = sphi %s1930_s13, %s2176_s13   ;;  %s1896_s12 = sphi %s1928_s12, %s2175_s12  }
   0x3   : > { %p27_p1 = scmp.ge.s32.totalorder %s25_s2, 2  ;;  %p168_p2 = scmp.lt.s32.totalorder %s1904_s14, 3 }
   0x5   : > { %s2178_s2 = smov (%p27_p1, %s25_s2), 0  ;;  %p169_p3 = pnand %p1464_p0, %p168_p2 }
   0x6   : > { %v1844_v0 = vld [vmem:[%s2172_s1 + $0x50] sm:$0xff] (!%p169_p3)   ;;  %v1906_v1 = vmov (!%p169_p3), 0.0   ;;  %v1846_v3 = vld [vmem:[%s2172_s1 + $0x58] sm:$0xff] (!%p169_p3)   ;;  %vm1907_vm0 = vmmov (!%p169_p3), 0   ;;  %p202_p4 = scmp.lt.s32.totalorder (!%p169_p3), %s1896_s12, 1  ;;  %vm255_vm1 = vcmask (!%p169_p3), 261120   ;;  %v1224_v61 = vlaneseq (!%p169_p3) }
   0x7   : > { %172 = sbr.rel (%p169_p3) target bundleno = 401 (0x191), region = 32  ;;  %1672 = vmatprep.subr.bf16.mxu1 (!%p169_p3), %v1906_v1  ;;  %1640 = vmatprep.subr.bf16.mxu0 (!%p169_p3), %v1906_v1  ;;  %v1845_v2 = vld [vmem:[%s2172_s1 + $0x10] sm:$0xff] (!%p169_p3)   ;;  %v1847_v4 = vld [vmem:[%s2172_s1 + $0x18] sm:$0xff] (!%p169_p3)   ;;  %v1851_v6 = vld [vmem:[%s2172_s1 + $0x40] sm:$0xff] (!%p169_p3)   ;;  %vm1252_vm6 = vcmask (!%p169_p3), 256000   ;;  %vm1295_vm7 = vcmask (!%p169_p3), 254976  }
   0x8   : > { %1673 = vmatpush3.bf16.msra.mxu1 (!%p169_p3), %v1844_v0  ;;  %1676 = vmatprep.mubr.msk.bf16.mxu1 (!%p169_p3), %vm1907_vm0, %v1906_v1  ;;  %v1852_v12 = vld [vmem:[%s2172_s1 + $0x48] sm:$0xff] (!%p169_p3)   ;;  %v1850_v14 = vld [vmem:[%s2172_s1] sm:$0xff] (!%p169_p3)   ;;  %v1860_v25 = vld [vmem:[%s2172_s1 + $0x70] sm:$0xff] (!%p169_p3)   ;;  %v1225_v62 = vshrl.u32 (!%p169_p3), %v1224_v61, 7  ;;  %vm1296_vm8 = vsmask.f32 (!%p169_p3), 1280 }
   0x9   : > { %1641 = vmatpush3.bf16.msra.mxu0 (!%p169_p3), %v1845_v2  ;;  %1674 = vmatprep.subr.bf16.mxu1 (!%p169_p3), %v1906_v1  ;;  %v1853_v16 = vld [vmem:[%s2172_s1 + $0x8] sm:$0xff] (!%p169_p3)   ;;  %v1855_v17 = vld [vmem:[%s2172_s1 + $0x60] sm:$0xff] (!%p169_p3)   ;;  %v1861_v30 = vld [vmem:[%s2172_s1 + $0x78] sm:$0xff] (!%p169_p3)   ;;  %vm1330_vm10 = vcmask (!%p169_p3), 253952   ;;  %vm1331_vm11 = vsmask.f32 (!%p169_p3), 256 }
   0xa   : > { %1642 = vmatprep.subr.bf16.mxu0 (!%p169_p3), %v1906_v1  ;;  %1644 = vmatprep.mubr.msk.bf16.mxu0 (!%p169_p3), %vm1907_vm0, %v1906_v1  ;;  %v1856_v18 = vld [vmem:[%s2172_s1 + $0x68] sm:$0xff] (!%p169_p3)   ;;  %v1854_v20 = vld [vmem:[%s2172_s1 + $0x20] sm:$0xff] (!%p169_p3)   ;;  %v1859_v32 = vld [vmem:[%s2172_s1 + $0x30] sm:$0xff] (!%p169_p3)   ;;  %v2137_v63 = vmul.u32.u64.low (!%p169_p3), 2863311531, %v1225_v62  ;;  %v2138_v0 = vmul.u32.u64.high 2863311531, %v1225_v62, %v2137_v63  ;;  %vm1328_vm12 = vcmask (!%p169_p3), 257027  }
   0xb   : > { %v1857_v23 = vld [vmem:[%s2172_s1 + $0x28] sm:$0xff] (!%p169_p3)   ;;  %v1862_v35 = vld [vmem:[%s2172_s1 + $0x38] sm:$0xff] (!%p169_p3)   ;;  %v1863_v37 = vld [vmem:[%s2172_s1 + $0xd0] sm:$0xff] (!%p169_p3)   ;;  %vm1314_vm14 = vcmask (!%p169_p3), 256001   ;;  %vm1315_vm15 = vsmask.f32 (!%p169_p3), 7942 }
   0xc   : > { %1675 = vmatpush3.bf16.msra.mxu1 (!%p169_p3), %v1846_v3  ;;  %v1865_v38 = vld [vmem:[%s2172_s1 + $0xd8] sm:$0xff] (!%p169_p3)   ;;  %v1864_v39 = vld [vmem:[%s2172_s1 + $0x90] sm:$0xff] (!%p169_p3)   ;;  %v1868_v40 = vld [vmem:[%s2172_s1 + $0xc0] sm:$0xff] (!%p169_p3)   ;;  %v1232_v2 = vshrl.u32 (!%p169_p3), %v2138_v0, 1 }
   0xd   : > { %1643 = vmatpush3.bf16.msra.mxu0 (!%p169_p3), %v1847_v4  ;;  %1680 = vmatprep.subr.bf16.mxu1 (!%p169_p3), %v1906_v1  ;;  %v1866_v41 = vld [vmem:[%s2172_s1 + $0x98] sm:$0xff] (!%p169_p3)   ;;  %v1869_v42 = vld [vmem:[%s2172_s1 + $0xc8] sm:$0xff] (!%p169_p3)   ;;  %v1867_v43 = vld [vmem:[%s2172_s1 + $0x80] sm:$0xff] (!%p169_p3)  }
   0xe   : > { %s2180_s12 = smov (!%p202_p4, %s1896_s12), 1  ;;  %1648 = vmatprep.subr.bf16.mxu0 %v1906_v1  ;;  %v1870_v44 = vld [vmem:[%s2172_s1 + $0x88] sm:$0xff]   ;;  %v1872_v46 = vld [vmem:[%s2172_s1 + $0xe0] sm:$0xff]   ;;  %v1877_v55 = vld [vmem:[%s2172_s1 + $0xf0] sm:$0xff]   ;;  %v1233_v3 = vmul.u32 3, %v1232_v2 }
   0xf   : > { %s1587_s23 = sshll.u32 %s2180_s12, 3  ;;  %v1873_v49 = vld [vmem:[%s2172_s1 + $0xe8] sm:$0xff]   ;;  %v1871_v50 = vld [vmem:[%s2172_s1 + $0xa0] sm:$0xff]   ;;  %v1878_v56 = vld [vmem:[%s2172_s1 + $0xf8] sm:$0xff]  }
  0x10   : > { %s1974_s26 = scalar_lea.vmem %s2171_s0, %s1587_s23  ;;  %v1874_v53 = vld [vmem:[%s2172_s1 + $0xa8] sm:$0xff]   ;;  %v1876_v58 = vld [vmem:[%s2172_s1 + $0xb0] sm:$0xff]   ;;  %v1879_v59 = vld [vmem:[%s2172_s1 + $0xb8] sm:$0xff]   ;;  %v1234_v4 = vsub.s32 %v1225_v62, %v1233_v3  ;;  %s2149_s16 = scalar_lea.vmem %s2174_s3, %s1587_s23 }
  0x11   : > { %v1848_v5 = vld [vmem:[%s1974_s26] ss:$0 sps:$4 sm:$0x66]   ;;  %v1875_v45 = vld [vmem:[%s1974_s26] sm:$0x18]   ;;  %vm1297_vm9 = vmand %vm1295_vm7, %vm1296_vm8 }
  0x12   : > { %v223_v7 = vld [vmem:[%s1974_s26] sm:$0x3]  ;;  %v503_v8 = vrot.slane %v1848_v5, 1  ;;  %v364_v21 = vshrl.u32 %v1848_v5, 16  ;;  %v367_v22 = vshll.u32 %v1848_v5, 16  ;;  %v927_v47 = vshrl.u32 %v1875_v45, 16  ;;  %vm1332_vm13 = vmand %vm1330_vm10, %vm1331_vm11 }
  0x13   : > { %v1473_v9 = vcombine.low %v223_v7, %v223_v7  ;;  %v1858_v19 = vld [vmem:[%s1974_s26] ss:$0 sps:$4 sm:$0xcc]   ;;  %v930_v48 = vshll.u32 %v1875_v45, 16  ;;  %v864_v57 = vrot.slane %v1875_v45, 3  ;;  %vm1237_vm2 = vcmp.ne.s32.totalorder %v1234_v4, 0 }
  0x14   : > { %1677 = vmatmul.mubr.msk.bf16.vlgmr.msra.gmra.mrb[0].mxu1 %vm255_vm1, %v503_v8  ;;  %v436_v24 = vrot.slane %v1858_v19, 2  ;;  %v366_v26 = vrot.slane %v364_v21, 1  ;;  %v369_v27 = vrot.slane %v367_v22, 2  ;;  %v675_v28 = vshrl.u32 %v1858_v19, 16  ;;  %v1162_v60 = vld [vmem:[%s1974_s26 + $0x4] sm:$0x3] }
  0x15   : > { %v237_v10 = vshrl.u32 %v1473_v9, 16  ;;  %v239_v11 = vshll.u32 %v1473_v9, 16  ;;  %1681 = vmatpush3.bf16.msra.mxu1 %v1851_v6  ;;  %1684 = vmatprep.mubr.msk.bf16.mxu1 %vm1907_vm0, %v1906_v1  ;;  %v678_v29 = vshll.u32 %v1858_v19, 16  ;;  %v929_v51 = vrot.slane %v927_v47, 3 }
  0x16   : > { %1682 = vmatprep.subr.bf16.mxu1 %v1906_v1  ;;  %v370_v31 = vor.u32 %v369_v27, %v366_v26  ;;  %v677_v33 = vrot.slane %v675_v28, 2  ;;  %v932_v52 = vrot.slane %v930_v48, 4  ;;  %vm1238_vm3 = vcmp.lt.s32.totalorder %v1234_v4, 0 }
  0x17   : > { %v241_v13 = vrot.slane %v239_v11, 1  ;;  %v680_v34 = vrot.slane %v678_v29, 3  ;;  %v1240_v5 = vadd.s32 3, %v1234_v4  ;;  %vm1239_vm4 = vmand %vm1238_vm3, %vm1237_vm2 }
  0x18   : > { %v933_v54 = vor.u32 %v932_v52, %v929_v51 }
  0x19   : > { %v242_v15 = vor.u32 %v241_v13, %v237_v10  ;;  %1683 = vmatpush3.bf16.msra.mxu1 %v1852_v12  ;;  %v681_v36 = vor.u32 %v680_v34, %v677_v33  ;;  %v1241_v6 = vsel %vm1239_vm4, %v1240_v5, %v1234_v4 }
  0x1a   : > { %1688 = vmatprep.subr.bf16.mxu1 %v1906_v1  ;;  %vm1242_vm5 = vcmp.lt.s32.totalorder %v1241_v6, 1 }
  0x1b   : > { %1645 = vmatmul.mubr.msk.bf16.vlgmr.msra.gmra.mrb[0].mxu0 %vm255_vm1, %v242_v15  ;;  %v1581_v11 = vsel %vm1242_vm5, 1.0, %v1906_v1 }
  0x1c   : > { %1649 = vmatpush3.bf16.msra.mxu0 %v1850_v14  ;;  %1652 = vmatprep.mubr.msk.bf16.mxu0 %vm1907_vm0, %v1906_v1 }
  0x1d   : > { %1650 = vmatprep.subr.bf16.mxu0 %v1906_v1 }
  0x20   : > { %1651 = vmatpush3.bf16.msra.mxu0 %v1853_v16  ;;  %1685 = vmatmul.mubr.msk.bf16.vlgmr.msra.gmra.mrb[0].mxu1 %vm255_vm1, %v242_v15 }
  0x21   : > { %1656 = vmatprep.subr.bf16.mxu0 %v1906_v1  ;;  %1689 = vmatpush3.bf16.msra.mxu1 %v1855_v17 }
  0x22   : > { %1692 = vmatprep.mubr.msk.bf16.mxu1 %vm1907_vm0, %v1906_v1  ;;  %1690 = vmatprep.subr.bf16.mxu1 %v1906_v1 }
  0x25   : > { %1691 = vmatpush3.bf16.msra.mxu1 %v1856_v18 }
  0x26   : > { %1696 = vmatprep.subr.bf16.mxu1 %v1906_v1 }
  0x27   : > { %1653 = vmatmul.mubr.msk.bf16.vlgmr.msra.gmra.mrb[0].mxu0 %vm255_vm1, %v223_v7 }
  0x28   : > { %1657 = vmatpush3.bf16.msra.mxu0 %v1854_v20  ;;  %1660 = vmatprep.mubr.msk.bf16.mxu0 %vm1907_vm0, %v1906_v1 }
  0x29   : > { %1658 = vmatprep.subr.bf16.mxu0 %v1906_v1 }
  0x2c   : > { %1659 = vmatpush3.bf16.msra.mxu0 %v1857_v23  ;;  %1693 = vmatmul.mubr.msk.bf16.vlgmr.msra.gmra.mrb[0].mxu1 %vm255_vm1, %v436_v24 }
  0x2d   : > { %1664 = vmatprep.subr.bf16.mxu0 %v1906_v1  ;;  %1697 = vmatpush3.bf16.msra.mxu1 %v1860_v25 }
  0x2e   : > { %1700 = vmatprep.mubr.msk.bf16.mxu1 %vm1907_vm0, %v1906_v1  ;;  %1698 = vmatprep.subr.bf16.mxu1 %v1906_v1 }
  0x31   : > { %1699 = vmatpush3.bf16.msra.mxu1 %v1861_v30 }
  0x32   : > { %1736 = vmatprep.subr.bf16.mxu1 %v1906_v1 }
  0x33   : > { %1661 = vmatmul.mubr.msk.bf16.vlgmr.msra.gmra.mrb[0].mxu0 %vm255_vm1, %v370_v31 }
  0x34   : > { %1665 = vmatpush3.bf16.msra.mxu0 %v1859_v32  ;;  %1668 = vmatprep.mubr.msk.bf16.mxu0 %vm1907_vm0, %v1906_v1 }
  0x35   : > { %1666 = vmatprep.subr.bf16.mxu0 %v1906_v1 }
  0x38   : > { %1667 = vmatpush3.bf16.msra.mxu0 %v1862_v35  ;;  %1701 = vmatmul.mubr.msk.bf16.vlgmr.msra.gmra.mrb[0].mxu1 %vm255_vm1, %v681_v36 }
  0x39   : > { %1704 = vmatprep.subr.bf16.mxu0 %v1906_v1  ;;  %1737 = vmatpush3.bf16.msra.mxu1 %v1863_v37 }
  0x3a   : > { %1740 = vmatprep.mubr.msk.bf16.mxu1 %vm1907_vm0, %v1906_v1  ;;  %1738 = vmatprep.subr.bf16.mxu1 %v1906_v1 }
  0x3d   : > { %1739 = vmatpush3.bf16.msra.mxu1 %v1865_v38 }
  0x3e   : > { %1744 = vmatprep.subr.bf16.mxu1 %v1906_v1 }
  0x3f   : > { %1669 = vmatmul.mubr.msk.bf16.vlgmr.msra.gmra.mrb[0].mxu0 %vm255_vm1, %v436_v24 }
  0x40   : > { %1705 = vmatpush3.bf16.msra.mxu0 %v1864_v39  ;;  %1708 = vmatprep.mubr.msk.bf16.mxu0 %vm1907_vm0, %v1906_v1 }
  0x41   : > { %1706 = vmatprep.subr.bf16.mxu0 %v1906_v1  ;;  %1741 = vmatmul.mubr.msk.bf16.vlgmr.msra.gmra.mrb[4].mxu1 %vm255_vm1, %v681_v36 }
  0x42   : > { %1745 = vmatpush3.bf16.msra.mxu1 %v1868_v40  ;;  %1748 = vmatprep.mubr.msk.bf16.mxu1 %vm1907_vm0, %v1906_v1 }
  0x43   : > { %1746 = vmatprep.subr.bf16.mxu1 %v1906_v1 }
  0x44   : > { %1707 = vmatpush3.bf16.msra.mxu0 %v1866_v41 }
  0x45   : > { %1712 = vmatprep.subr.bf16.mxu0 %v1906_v1 }
  0x46   : > { %1747 = vmatpush3.bf16.msra.mxu1 %v1869_v42 }
  0x47   : > { %1709 = vmatmul.mubr.msk.bf16.vlgmr.msra.gmra.mrb[4].mxu0 %vm255_vm1, %v436_v24  ;;  %1752 = vmatprep.subr.bf16.mxu1 %v1906_v1 }
  0x48   : > { %1713 = vmatpush3.bf16.msra.mxu0 %v1867_v43  ;;  %1716 = vmatprep.mubr.msk.bf16.mxu0 %vm1907_vm0, %v1906_v1 }
  0x49   : > { %1714 = vmatprep.subr.bf16.mxu0 %v1906_v1 }
  0x4c   : > { %1715 = vmatpush3.bf16.msra.mxu0 %v1870_v44 }
  0x4d   : > { %1749 = vmatmul.mubr.msk.bf16.vlgmr.msra.gmra.mrb[4].mxu1 %vm255_vm1, %v436_v24  ;;  %1720 = vmatprep.subr.bf16.mxu0 %v1906_v1 }
  0x4e   : > { %1753 = vmatpush3.bf16.msra.mxu1 %v1872_v46  ;;  %1756 = vmatprep.mubr.msk.bf16.mxu1 %vm1907_vm0, %v1906_v1 }
  0x4f   : > { %1754 = vmatprep.subr.bf16.mxu1 %v1906_v1 }
  0x52   : > { %1755 = vmatpush3.bf16.msra.mxu1 %v1873_v49 }
  0x53   : > { %1717 = vmatmul.mubr.msk.bf16.vlgmr.msra.gmra.mrb[4].mxu0 %vm255_vm1, %v370_v31  ;;  %1760 = vmatprep.subr.bf16.mxu1 %v1906_v1 }
  0x54   : > { %1721 = vmatpush3.bf16.msra.mxu0 %v1871_v50  ;;  %1724 = vmatprep.mubr.msk.bf16.mxu0 %vm1907_vm0, %v1906_v1 }
  0x55   : > { %1722 = vmatprep.subr.bf16.mxu0 %v1906_v1 }
  0x58   : > { %1723 = vmatpush3.bf16.msra.mxu0 %v1874_v53 }
  0x59   : > { %1757 = vmatmul.mubr.msk.bf16.vlgmr.msra.gmra.mrb[4].mxu1 %vm255_vm1, %v933_v54  ;;  %1728 = vmatprep.subr.bf16.mxu0 %v1906_v1 }
  0x5a   : > { %1761 = vmatpush3.bf16.msra.mxu1 %v1877_v55  ;;  %1764 = vmatprep.mubr.msk.bf16.mxu1 %vm1907_vm0, %v1906_v1 }
  0x5b   : > { %1762 = vmatprep.subr.bf16.mxu1 %v1906_v1 }
  0x5e   : > { %1763 = vmatpush3.bf16.msra.mxu1 %v1878_v56 }
  0x5f   : > { %1725 = vmatmul.mubr.msk.bf16.vlgmr.msra.gmra.mrb[4].mxu0 %vm255_vm1, %v864_v57 }
  0x60   : > { %1729 = vmatpush3.bf16.msra.mxu0 %v1876_v58  ;;  %1732 = vmatprep.mubr.msk.bf16.mxu0 %vm1907_vm0, %v1906_v1  ;;  %vm1316_vm0 = vmand %vm1314_vm14, %vm1315_vm15 }
  0x61   : > { %1730 = vmatprep.subr.bf16.mxu0 %v1906_v1 }
  0x64   : > { %1731 = vmatpush3.bf16.msra.mxu0 %v1879_v59 }
  0x65   : > { %1765 = vmatmul.mubr.msk.bf16.vlgmr.msra.gmra.mrb[4].mxu1 %vm255_vm1, %v1162_v60 }
  0x6b   : > { %1733 = vmatmul.mubr.msk.bf16.vlgmr.msra.gmra.mrb[4].mxu0 %vm255_vm1, %v933_v54  ;;  %vm1348_vm1 = vsmask.f32 7938 }
  0x6c   : > { %vm1349_vm2 = vmand %vm1295_vm7, %vm1348_vm1 }
 0x10b   : > { %v731_v7 = vpop.f32.mrb[0].mxu1 }
 0x10c   : > { %v1702_v8 = vpop.f32.mrb[1].mxu1  ;;  %v1246_v13 = vmul.f32 %v1581_v11, %v731_v7 }
 0x10d   : > { %v734_v9 = vpop.f32.mrb[2].mxu1  ;;  %v1298_v8 = vld [vmem:[%s2149_s16] sm:$0x3] }
 0x10e   : > { %v1703_v10 = vpop.f32.mrb[3].mxu1 }
 0x112   : > { %v486_v12 = vpop.f32.mrb[0].mxu0 }
 0x113   : > { %v1245_v14 = vmul.f32 %v1581_v11, %v486_v12  ;;  %v1670_v15 = vpop.f32.mrb[1].mxu0 }
 0x114   : > { %v489_v16 = vpop.f32.mrb[2].mxu0 }
 0x115   : > { %v1247_v17 = vadd.f32 %v1246_v13, %v1245_v14  ;;  %v1671_v18 = vpop.f32.mrb[3].mxu0 }
 0x138   : > { %v1217_v19 = vpop.f32.mrb[4].mxu1 }
 0x139   : > { %v1766_v20 = vpop.f32.mrb[5].mxu1  ;;  %v1250_v27 = vmul.f32 %v1581_v11, %v1217_v19 }
 0x13a   : > { %v1220_v21 = vpop.f32.mrb[6].mxu1 }
 0x13b   : > { %v1767_v22 = vpop.f32.mrb[7].mxu1 }
 0x13e   : > { %v983_v23 = vpop.f32.mrb[4].mxu0 }
 0x13f   : > { %v1248_v24 = vmul.f32 %v1581_v11, %v983_v23  ;;  %v1734_v25 = vpop.f32.mrb[5].mxu0 }
 0x140   : > { %v986_v26 = vpop.f32.mrb[6].mxu0 }
 0x141   : > { %v1249_v28 = vadd.f32 %v1248_v24, %v1247_v17  ;;  %v1735_v29 = vpop.f32.mrb[7].mxu0  ;;  %v1333_v17 = vld [vmem:[%s2149_s16 + $0x4] sm:$0x1] }
 0x143   : > { %v1251_v1 = vadd.f32 %v1250_v27, %v1249_v28 }
 0x145   : > { %v1253_v30 = vsel %vm1252_vm6, %v1251_v1, 0.0 }
 0x146   : > { %v1254_v31 = vrot.slane %v1253_v30, 4 }
 0x148   : > { %v1255_v32 = vadd.f32 %v1254_v31, %v1253_v30 }
 0x14a   : > { %v1256_v33 = vrot.slane %v1255_v32, 2 }
 0x14c   : > { %v1257_v34 = vadd.f32 %v1256_v33, %v1255_v32 }
 0x14e   : > { %v1258_v35 = vrot.slane %v1257_v34, 1 }
 0x150   : > { %v1259_v36 = vadd.f32 %v1258_v35, %v1257_v34 }
 0x152   : > { %v1260_v37 = vmul.f32 0.25, %v1259_v36 }
 0x154   : > { %v1261_v38 = vsub.f32 %v486_v12, %v1260_v37  ;;  %v1264_v39 = vsub.f32 %v731_v7, %v1260_v37  ;;  %v1268_v40 = vsub.f32 %v983_v23, %v1260_v37  ;;  %v1272_v41 = vsub.f32 %v1217_v19, %v1260_v37 }
 0x156   : > { %v1262_v42 = vmul.f32 %v1261_v38, %v1261_v38  ;;  %v1265_v43 = vmul.f32 %v1264_v39, %v1264_v39  ;;  %v1269_v44 = vmul.f32 %v1268_v40, %v1268_v40  ;;  %v1273_v47 = vmul.f32 %v1272_v41, %v1272_v41 }
 0x158   : > { %v1263_v45 = vmul.f32 %v1581_v11, %v1262_v42  ;;  %v1266_v46 = vmul.f32 %v1581_v11, %v1265_v43  ;;  %v1270_v49 = vmul.f32 %v1581_v11, %v1269_v44  ;;  %v1274_v51 = vmul.f32 %v1581_v11, %v1273_v47 }
 0x15a   : > { %v1267_v48 = vadd.f32 %v1266_v46, %v1263_v45 }
 0x15c   : > { %v1271_v50 = vadd.f32 %v1270_v49, %v1267_v48 }
 0x15e   : > { %v1275_v52 = vadd.f32 %v1274_v51, %v1271_v50 }
 0x160   : > { %v1276_v53 = vsel %vm1252_vm6, %v1275_v52, 0.0 }
 0x161   : > { %v1277_v54 = vrot.slane %v1276_v53, 4 }
 0x163   : > { %v1278_v55 = vadd.f32 %v1277_v54, %v1276_v53 }
 0x165   : > { %v1279_v56 = vrot.slane %v1278_v55, 2 }
 0x167   : > { %v1280_v57 = vadd.f32 %v1279_v56, %v1278_v55 }
 0x169   : > { %v1281_v58 = vrot.slane %v1280_v57, 1 }
 0x16b   : > { %v1282_v59 = vadd.f32 %v1281_v58, %v1280_v57 }
 0x16d   : > { %v1283_v60 = vmul.f32 0.25, %v1282_v59 }
 0x16f   : > { %v1284_v61 = vadd.f32 1e-05, %v1283_v60 }
 0x171   : > { %1880 = vrsqrt.f32 %v1284_v61 }
 0x17b   : > { %v1881_v62 = vpop.eup %1880 }
 0x17c   : > { %v1286_v63 = vmul.f32 %v1881_v62, %v1261_v38  ;;  %v1287_v0 = vmul.f32 %v1881_v62, %v1264_v39  ;;  %v1288_v2 = vmul.f32 %v1881_v62, %v1268_v40  ;;  %v1289_v3 = vmul.f32 %v1881_v62, %v1272_v41 }
 0x17e   : > { %v1290_v4 = vmax.f32 %v1286_v63, 0.0  ;;  %v1291_v5 = vmax.f32 %v1287_v0, 0.0  ;;  %v1292_v6 = vmax.f32 %v1288_v2, 0.0  ;;  %v1293_v7 = vmax.f32 %v1289_v3, 0.0 }
 0x180   : > { %v1294_v9 = vpack.c.bf16 %v1290_v4, %v1290_v4  ;;  %v1589_v10 = vpack.c.bf16 %v1291_v5, %v1291_v5  ;;  %v1590_v11 = vpack.c.bf16 %v1292_v6, %v1292_v6  ;;  %v1591_v12 = vpack.c.bf16 %v1293_v7, %v1293_v7 }
 0x182   : > { %v1299_v13 = vsel %vm1297_vm9, %v1294_v9, %v1298_v8  ;;  %v1306_v14 = vshrl.u32 %v1589_v10, 16  ;;  %v1309_v15 = vshll.u32 %v1589_v10, 16  ;;  %v1324_v16 = vrot.slane %v1590_v11, 5 }
 0x183   : > { %1300 = vst [vmem:[%s2149_s16] sm:$0x3] %v1299_v13  ;;  %v1341_v21 = vshrl.u32 %v1591_v12, 16  ;;  %v1344_v27 = vshll.u32 %v1591_v12, 16 }
 0x184   : > { %v1325_v18 = vrot.slane %v1324_v16, 4  ;;  %1329 = vst.msk [vmem:[%s2149_s16] sm:$0x8] %vm1328_vm12, %v1324_v16  ;;  %v1308_v19 = vrot.slane %v1306_v14, 6  ;;  %v1311_v20 = vrot.slane %v1309_v15, 7 }
 0x185   : > { %v1343_v24 = vrot.slane %v1341_v21, 7 }
 0x186   : > { %v1334_v22 = vsel %vm1332_vm13, %v1325_v18, %v1333_v17  ;;  %v1312_v23 = vor.u32 %v1311_v20, %v1308_v19 }
 0x187   : > { %1335 = vst [vmem:[%s2149_s16 + $0x4] sm:$0x1] %v1334_v22  ;;  %v1346_v28 = vor.u32 %v1344_v27, %v1343_v24 }
 0x18a   : > { %v1317_v25 = vld [vmem:[%s2149_s16] sm:$0x6] }
 0x18b   : > { %v1318_v26 = vsel %vm1316_vm0, %v1312_v23, %v1317_v25 }
 0x18c   : > { %1319 = vst [vmem:[%s2149_s16] sm:$0x6] %v1318_v26 }
 0x18e   : > { %v1350_v29 = vld [vmem:[%s2149_s16 + $0x4] sm:$0x3] }
 0x18f   : > { %v1351_v1 = vsel %vm1349_vm2, %v1346_v28, %v1350_v29 }
 0x190   : > { %1352 = vst [vmem:[%s2149_s16 + $0x4] sm:$0x3] %v1351_v1 }
 0x191 PF: > { %s13_s14 = sadd.s32 1, %s1904_s14   ;;  %s2175_s12 = smov %s1900_s13 }
 0x192   : > { %p10_p5 = scmp.ge.s32.totalorder %s13_s14, 4   ;;  %s2176_s13 = smov %s2178_s2 }
 0x194   :  { %12 = sbr.rel (!%p10_p5) target bundleno = 2 (0x2), region = 83 }

// kernel: generator_unet.13
= control target key start
LH: loop header
LB: loop body
LE: loop exit
PB: predicated region body
PF: predicated region fallthrough
CT: control target
= control target key end

     0   :  { %s2357_s12 = smov 0   ;;  %s2359_s13 = smov 0   ;;  %s2728_s0 = inlined_call_operand.vmem [shape: bf16[2,18,64], index: 0, kind: input, shape index: {}]   ;;  %s2729_s1 = inlined_call_operand.vmem [shape: bf16[16,64,16], index: 1, kind: input, shape index: {}]   ;;  %s2730_s2 = inlined_call_operand.vmem [shape: f32[1,16], index: 2, kind: input, shape index: {}]   ;;  %s2731_s3 = inlined_call_operand.vmem [shape: bf16[2,32,16], index: 3, kind: output, shape index: {}]  }
   0x1   :  { %s2361_s14 = smov 0  }
   0x2 LB: > { %s25_s2 = sadd.s32 1, %s2329_s13  ;;  %p1676_p0 = scmp.ge.s32.totalorder %s2333_s14, 1  ;;  %s2333_s14 = sphi %s2361_s14, %s13_s14   ;;  %s2329_s13 = sphi %s2359_s13, %s2733_s13   ;;  %s2325_s12 = sphi %s2357_s12, %s2732_s12  }
   0x3   : > { %p27_p1 = scmp.ge.s32.totalorder %s25_s2, 2  ;;  %p168_p2 = scmp.lt.s32.totalorder %s2333_s14, 3 }
   0x5   : > { %s2735_s2 = smov (%p27_p1, %s25_s2), 0  ;;  %p169_p3 = pnand %p1676_p0, %p168_p2 }
   0x6   : > { %v2238_v0 = vld [vmem:[%s2729_s1 + $0x20] sm:$0xff] (!%p169_p3)   ;;  %v2335_v1 = vmov (!%p169_p3), 0.0   ;;  %v2240_v3 = vld [vmem:[%s2729_s1 + $0x28] sm:$0xff] (!%p169_p3)   ;;  %vm2336_vm0 = vmmov (!%p169_p3), 0   ;;  %p202_p4 = scmp.lt.s32.totalorder (!%p169_p3), %s2325_s12, 1  ;;  %v2242_v5 = vld [vmem:[%s2729_s1 + $0x30] sm:$0xff] (!%p169_p3)  }
   0x7   : > { %172 = sbr.rel (%p169_p3) target bundleno = 420 (0x1a4), region = 32  ;;  %1971 = vmatprep.subr.bf16.mxu0 (!%p169_p3), %v2335_v1  ;;  %2019 = vmatprep.subr.bf16.mxu1 (!%p169_p3), %v2335_v1  ;;  %v2239_v2 = vld [vmem:[%s2729_s1 + $0xa0] sm:$0xff] (!%p169_p3)   ;;  %v2241_v4 = vld [vmem:[%s2729_s1 + $0xa8] sm:$0xff] (!%p169_p3)   ;;  %v2243_v6 = vld [vmem:[%s2729_s1 + $0xb0] sm:$0xff] (!%p169_p3)   ;;  %vm278_vm1 = vcmask (!%p169_p3), 523264   ;;  %vm1514_vm3 = vcmask (!%p169_p3), 130048  }
   0x8   : > { %1972 = vmatpush3.bf16.msra.mxu0 (!%p169_p3), %v2238_v0  ;;  %1979 = vmatprep.mubr.msk.bf16.mxu0 (!%p169_p3), %vm2336_vm0, %v2335_v1  ;;  %v2244_v10 = vld [vmem:[%s2729_s1 + $0x38] sm:$0xff] (!%p169_p3)   ;;  %v2247_v16 = vld [vmem:[%s2729_s1] sm:$0xff] (!%p169_p3)   ;;  %v2250_v21 = vld [vmem:[%s2729_s1 + $0x8] sm:$0xff] (!%p169_p3)   ;;  %vm1557_vm4 = vcmask (!%p169_p3), 125952  }
   0x9   : > { %2020 = vmatpush3.bf16.msra.mxu1 (!%p169_p3), %v2239_v2  ;;  %1973 = vmatprep.subr.bf16.mxu0 (!%p169_p3), %v2335_v1  ;;  %v2245_v13 = vld [vmem:[%s2729_s1 + $0xb8] sm:$0xff] (!%p169_p3)   ;;  %v2249_v19 = vld [vmem:[%s2729_s1 + $0x80] sm:$0xff] (!%p169_p3)   ;;  %v2251_v22 = vld [vmem:[%s2729_s1 + $0x88] sm:$0xff] (!%p169_p3)  }
   0xa   : > { %2021 = vmatprep.subr.bf16.mxu1 (!%p169_p3), %v2335_v1  ;;  %2027 = vmatprep.mubr.msk.bf16.mxu1 (!%p169_p3), %vm2336_vm0, %v2335_v1  ;;  %v2252_v23 = vld [vmem:[%s2729_s1 + $0x10] sm:$0xff] (!%p169_p3)   ;;  %v2254_v25 = vld [vmem:[%s2729_s1 + $0x18] sm:$0xff] (!%p169_p3)   ;;  %v2256_v27 = vld [vmem:[%s2729_s1 + $0x40] sm:$0xff] (!%p169_p3)  }
   0xb   : > { %v2253_v24 = vld [vmem:[%s2729_s1 + $0x90] sm:$0xff] (!%p169_p3)   ;;  %v2255_v26 = vld [vmem:[%s2729_s1 + $0x98] sm:$0xff] (!%p169_p3)   ;;  %v2257_v28 = vld [vmem:[%s2729_s1 + $0xc0] sm:$0xff] (!%p169_p3)  }
   0xc   : > { %1974 = vmatpush3.bf16.msra.mxu0 (!%p169_p3), %v2240_v3  ;;  %v2258_v31 = vld [vmem:[%s2729_s1 + $0x48] sm:$0xff] (!%p169_p3)   ;;  %v2260_v34 = vld [vmem:[%s2729_s1 + $0x50] sm:$0xff] (!%p169_p3)   ;;  %v2262_v39 = vld [vmem:[%s2729_s1 + $0x58] sm:$0xff] (!%p169_p3)  }
   0xd   : > { %2022 = vmatpush3.bf16.msra.mxu1 (!%p169_p3), %v2241_v4  ;;  %1975 = vmatprep.subr.bf16.mxu0 (!%p169_p3), %v2335_v1  ;;  %v2259_v33 = vld [vmem:[%s2729_s1 + $0xc8] sm:$0xff] (!%p169_p3)   ;;  %v2261_v35 = vld [vmem:[%s2729_s1 + $0xd0] sm:$0xff] (!%p169_p3)   ;;  %v2263_v43 = vld [vmem:[%s2729_s1 + $0xd8] sm:$0xff] (!%p169_p3)  }
   0xe   : > { %s2737_s12 = smov (!%p202_p4, %s2325_s12), 1  ;;  %2023 = vmatprep.subr.bf16.mxu1 %v2335_v1  ;;  %v2266_v45 = vld [vmem:[%s2729_s1 + $0x60] sm:$0xff]   ;;  %v2268_v48 = vld [vmem:[%s2729_s1 + $0x68] sm:$0xff]   ;;  %v2270_v50 = vld [vmem:[%s2729_s1 + $0x70] sm:$0xff]  }
   0xf   : > { %s2211_s25 = smul.u32 12, %s2737_s12  ;;  %v2267_v47 = vld [vmem:[%s2729_s1 + $0xe0] sm:$0xff]   ;;  %v2269_v49 = vld [vmem:[%s2729_s1 + $0xe8] sm:$0xff]   ;;  %v2271_v51 = vld [vmem:[%s2729_s1 + $0xf0] sm:$0xff]  }
  0x10   : > { %1976 = vmatpush3.bf16.msra.mxu0 %v2242_v5  ;;  %v2272_v53 = vld [vmem:[%s2729_s1 + $0x78] sm:$0xff]   ;;  %v2275_v57 = vld [vmem:[%s2729_s1 + $0x120] sm:$0xff]   ;;  %v2277_v59 = vld [vmem:[%s2729_s1 + $0x128] sm:$0xff]  }
  0x11   : > { %s2409_s30 = scalar_lea.vmem %s2728_s0, %s2211_s25  ;;  %2024 = vmatpush3.bf16.msra.mxu1 %v2243_v6  ;;  %1977 = vmatprep.subr.bf16.mxu0 %v2335_v1  ;;  %v2273_v55 = vld [vmem:[%s2729_s1 + $0xf8] sm:$0xff]   ;;  %v2276_v58 = vld [vmem:[%s2729_s1 + $0x1a0] sm:$0xff]   ;;  %v2278_v60 = vld [vmem:[%s2729_s1 + $0x1a8] sm:$0xff]  }
  0x12   : > { %v223_v7 = vld [vmem:[%s2409_s30] sm:$0xf]  ;;  %v232_v8 = vld [vmem:[%s2409_s30 + $0x4] sm:$0x1]  ;;  %2025 = vmatprep.subr.bf16.mxu1 %v2335_v1  ;;  %v2279_v61 = vld [vmem:[%s2729_s1 + $0x130] sm:$0xff]  }
  0x13   : > { %v572_v9 = vld [vmem:[%s2409_s30] sm:$0xe]  ;;  %v1688_v11 = vcombine.low %v223_v7, %v232_v8  ;;  %v2468_v30 = vld [vmem:[%s2409_s30 + $0x4] sm:$0x7]  ;;  %v2280_v62 = vld [vmem:[%s2729_s1 + $0x1b0] sm:$0xff]  }
  0x14   : > { %v1743_v12 = vcombine.low %v572_v9, %v232_v8  ;;  %1978 = vmatpush3.bf16.msra.mxu0 %v2244_v10  ;;  %v389_v29 = vld [vmem:[%s2409_s30] sm:$0xc]  ;;  %v390_v38 = vld [vmem:[%s2409_s30 + $0x4] sm:$0x3]  ;;  %v2281_v63 = vld [vmem:[%s2729_s1 + $0x138] sm:$0xff]  }
  0x15   : > { %v248_v14 = vshrl.u32 %v1688_v11, 16  ;;  %v250_v15 = vshll.u32 %v1688_v11, 16  ;;  %2026 = vmatpush3.bf16.msra.mxu1 %v2245_v13  ;;  %1983 = vmatprep.subr.bf16.mxu0 %v2335_v1  ;;  %v1721_v32 = vcombine.low %v389_v29, %v2468_v30  ;;  %v1707_v40 = vcombine.low %v389_v29, %v390_v38  ;;  %v791_v52 = vld [vmem:[%s2409_s30] sm:$0x8]  ;;  %v2282_v0 = vld [vmem:[%s2729_s1 + $0x1b8] sm:$0xff]   ;;  %v2285_v4 = vld [vmem:[%s2729_s1 + $0x108] sm:$0xff]  }
  0x16   : > { %v585_v18 = vrot.slane %v1743_v12, 1  ;;  %2031 = vmatprep.subr.bf16.mxu1 %v2335_v1  ;;  %v1775_v54 = vcombine.low %v791_v52, %v2468_v30  ;;  %v2283_v2 = vld [vmem:[%s2729_s1 + $0x100] sm:$0xff]   ;;  %v2286_v5 = vld [vmem:[%s2729_s1 + $0x188] sm:$0xff]   ;;  %v2287_v6 = vld [vmem:[%s2729_s1 + $0x110] sm:$0xff]  }
  0x17   : > { %v252_v17 = vrot.slane %v250_v15, 1  ;;  %v488_v36 = vshrl.u32 %v1721_v32, 16  ;;  %v491_v37 = vshll.u32 %v1721_v32, 16  ;;  %v2504_v44 = vrot.slane %v1707_v40, 2  ;;  %v2284_v3 = vld [vmem:[%s2729_s1 + $0x180] sm:$0xff]   ;;  %v2289_v8 = vld [vmem:[%s2729_s1 + $0x118] sm:$0xff]  }
  0x18   : > { %2028 = vmatmul.mubr.msk.bf16.vlgmr.msra.gmra.mrb[0].mxu1 %vm278_vm1, %v585_v18  ;;  %v804_v56 = vrot.slane %v1775_v54, 3  ;;  %v2290_v9 = vld [vmem:[%s2729_s1 + $0x198] sm:$0xff]   ;;  %v2291_v10 = vld [vmem:[%s2729_s1 + $0x140] sm:$0xff]   ;;  %v1098_v13 = vld [vmem:[%s2409_s30 + $0x8] sm:$0x1] }
  0x19   : > { %v253_v20 = vor.u32 %v252_v17, %v248_v14  ;;  %2032 = vmatpush3.bf16.msra.mxu1 %v2249_v19  ;;  %2039 = vmatprep.mubr.msk.bf16.mxu1 %vm2336_vm0, %v2335_v1  ;;  %v490_v41 = vrot.slane %v488_v36, 2  ;;  %v493_v42 = vrot.slane %v491_v37, 3  ;;  %v2292_v11 = vld [vmem:[%s2729_s1 + $0x1c0] sm:$0xff]   ;;  %v2293_v15 = vld [vmem:[%s2729_s1 + $0x148] sm:$0xff]   ;;  %v2295_v18 = vld [vmem:[%s2729_s1 + $0x150] sm:$0xff]   ;;  %v1490_v37 = vlaneseq }
  0x1a   : > { %2033 = vmatprep.subr.bf16.mxu1 %v2335_v1  ;;  %v1097_v12 = vld [vmem:[%s2409_s30 + $0x4] sm:$0xf]  ;;  %v2296_v19 = vld [vmem:[%s2729_s1 + $0x1d0] sm:$0xff]   ;;  %v2303_v29 = vld [vmem:[%s2729_s1 + $0x1e8] sm:$0xff]  }
  0x1b   : > { %1980 = vmatmul.mubr.msk.bf16.vlgmr.msra.gmra.mrb[0].mxu0 %vm278_vm1, %v253_v20  ;;  %v2509_v46 = vor.u32 %v493_v42, %v490_v41  ;;  %v1828_v14 = vcombine.low %v1097_v12, %v1098_v13  ;;  %v2304_v30 = vld [vmem:[%s2729_s1 + $0x170] sm:$0xff]   ;;  %v1408_v32 = vld [vmem:[%s2409_s30 + $0x4] sm:$0xe]  ;;  %v1491_v38 = vshrl.u32 %v1490_v37, 7 }
  0x1c   : > { %1984 = vmatpush3.bf16.msra.mxu0 %v2247_v16  ;;  %1991 = vmatprep.mubr.msk.bf16.mxu0 %vm2336_vm0, %v2335_v1  ;;  %v2294_v16 = vld [vmem:[%s2729_s1 + $0x1c8] sm:$0xff]  }
  0x1d   : > { %1985 = vmatprep.subr.bf16.mxu0 %v2335_v1  ;;  %2034 = vmatpush3.bf16.msra.mxu1 %v2251_v22  ;;  %v1116_v17 = vshll.u32 %v1828_v14, 16  ;;  %v2297_v22 = vld [vmem:[%s2729_s1 + $0x158] sm:$0xff]  }
  0x1e   : > { %2035 = vmatprep.subr.bf16.mxu1 %v2335_v1 }
  0x20   : > { %1986 = vmatpush3.bf16.msra.mxu0 %v2250_v21  ;;  %v1118_v21 = vrot.slane %v1116_v17, 1 }
  0x21   : > { %1987 = vmatprep.subr.bf16.mxu0 %v2335_v1  ;;  %2036 = vmatpush3.bf16.msra.mxu1 %v2253_v24 }
  0x22   : > { %2037 = vmatprep.subr.bf16.mxu1 %v2335_v1 }
  0x24   : > { %1988 = vmatpush3.bf16.msra.mxu0 %v2252_v23  ;;  %v2298_v23 = vld [vmem:[%s2729_s1 + $0x1d8] sm:$0xff]  }
  0x25   : > { %1989 = vmatprep.subr.bf16.mxu0 %v2335_v1  ;;  %2038 = vmatpush3.bf16.msra.mxu1 %v2255_v26  ;;  %v2299_v26 = vld [vmem:[%s2729_s1 + $0x160] sm:$0xff]  }
  0x26   : > { %2043 = vmatprep.subr.bf16.mxu1 %v2335_v1 }
  0x28   : > { %1990 = vmatpush3.bf16.msra.mxu0 %v2254_v25  ;;  %2040 = vmatmul.mubr.msk.bf16.vlgmr.msra.gmra.mrb[0].mxu1 %vm278_vm1, %v253_v20  ;;  %v1114_v20 = vshrl.u32 %v1828_v14, 16  ;;  %v1019_v25 = vld [vmem:[%s2409_s30 + $0x4] sm:$0xf]  ;;  %s1890_s30 = sshll.u32 %s2737_s12, 4 }
  0x29   : > { %1995 = vmatprep.subr.bf16.mxu0 %v2335_v1  ;;  %2044 = vmatpush3.bf16.msra.mxu1 %v2257_v28  ;;  %v2302_v28 = vld [vmem:[%s2729_s1 + $0x168] sm:$0xff]   ;;  %s221_s7 = scalar_lea.vmem %s2731_s3, %s1890_s30 }
  0x2a   : > { %2045 = vmatprep.subr.bf16.mxu1 %v2335_v1  ;;  %2051 = vmatprep.mubr.msk.bf16.mxu1 %vm2336_vm0, %v2335_v1  ;;  %v1119_v24 = vor.u32 %v1118_v21, %v1114_v20 }
  0x2b   : > { %1992 = vmatmul.mubr.msk.bf16.vlgmr.msra.gmra.mrb[0].mxu0 %vm278_vm1, %v223_v7  ;;  %v2288_v7 = vld [vmem:[%s2729_s1 + $0x190] sm:$0xff]  }
  0x2c   : > { %1996 = vmatpush3.bf16.msra.mxu0 %v2256_v27  ;;  %2003 = vmatprep.mubr.msk.bf16.mxu0 %vm2336_vm0, %v2335_v1  ;;  %v2301_v27 = vld [vmem:[%s2729_s1 + $0x1e0] sm:$0xff]  }
  0x2d   : > { %1997 = vmatprep.subr.bf16.mxu0 %v2335_v1  ;;  %2046 = vmatpush3.bf16.msra.mxu1 %v2259_v33  ;;  %v1881_v33 = vcombine.low %v1408_v32, %v1098_v13 }
  0x2e   : > { %2047 = vmatprep.subr.bf16.mxu1 %v2335_v1 }
  0x2f   : > { %v1421_v36 = vrot.slane %v1881_v33, 1 }
  0x30   : > { %1998 = vmatpush3.bf16.msra.mxu0 %v2258_v31  ;;  %v2305_v31 = vld [vmem:[%s2729_s1 + $0x1f0] sm:$0xff]  }
  0x31   : > { %1999 = vmatprep.subr.bf16.mxu0 %v2335_v1  ;;  %2048 = vmatpush3.bf16.msra.mxu1 %v2261_v35  ;;  %v2307_v35 = vld [vmem:[%s2729_s1 + $0x1f8] sm:$0xff]  }
  0x32   : > { %2049 = vmatprep.subr.bf16.mxu1 %v2335_v1 }
  0x34   : > { %2000 = vmatpush3.bf16.msra.mxu0 %v2260_v34  ;;  %v2306_v34 = vld [vmem:[%s2729_s1 + $0x178] sm:$0xff]  }
  0x35   : > { %2001 = vmatprep.subr.bf16.mxu0 %v2335_v1  ;;  %2050 = vmatpush3.bf16.msra.mxu1 %v2263_v43 }
  0x36   : > { %2055 = vmatprep.subr.bf16.mxu1 %v2335_v1 }
  0x38   : > { %2002 = vmatpush3.bf16.msra.mxu0 %v2262_v39  ;;  %2052 = vmatmul.mubr.msk.bf16.vlgmr.msra.gmra.mrb[0].mxu1 %vm278_vm1, %v2509_v46  ;;  %v1496_v39 = vand.u32 3, %v1491_v38 }
  0x39   : > { %2007 = vmatprep.subr.bf16.mxu0 %v2335_v1  ;;  %2056 = vmatpush3.bf16.msra.mxu1 %v2267_v47 }
  0x3a   : > { %2057 = vmatprep.subr.bf16.mxu1 %v2335_v1  ;;  %2063 = vmatprep.mubr.msk.bf16.mxu1 %vm2336_vm0, %v2335_v1  ;;  %vm1504_vm2 = vcmp.lt.s32.totalorder %v1496_v39, 2 }
  0x3b   : > { %2004 = vmatmul.mubr.msk.bf16.vlgmr.msra.gmra.mrb[0].mxu0 %vm278_vm1, %v2504_v44  ;;  %v1887_v40 = vsel %vm1504_vm2, 1.0, %v2335_v1 }
  0x3c   : > { %2008 = vmatpush3.bf16.msra.mxu0 %v2266_v45  ;;  %2015 = vmatprep.mubr.msk.bf16.mxu0 %vm2336_vm0, %v2335_v1 }
  0x3d   : > { %2009 = vmatprep.subr.bf16.mxu0 %v2335_v1  ;;  %2058 = vmatpush3.bf16.msra.mxu1 %v2269_v49 }
  0x3e   : > { %2059 = vmatprep.subr.bf16.mxu1 %v2335_v1 }
  0x40   : > { %2010 = vmatpush3.bf16.msra.mxu0 %v2268_v48 }
  0x41   : > { %2011 = vmatprep.subr.bf16.mxu0 %v2335_v1  ;;  %2060 = vmatpush3.bf16.msra.mxu1 %v2271_v51 }
  0x42   : > { %2061 = vmatprep.subr.bf16.mxu1 %v2335_v1 }
  0x44   : > { %2012 = vmatpush3.bf16.msra.mxu0 %v2270_v50 }
  0x45   : > { %2013 = vmatprep.subr.bf16.mxu0 %v2335_v1  ;;  %2062 = vmatpush3.bf16.msra.mxu1 %v2273_v55 }
  0x46   : > { %2115 = vmatprep.subr.bf16.mxu1 %v2335_v1 }
  0x48   : > { %2014 = vmatpush3.bf16.msra.mxu0 %v2272_v53  ;;  %2064 = vmatmul.mubr.msk.bf16.vlgmr.msra.gmra.mrb[0].mxu1 %vm278_vm1, %v804_v56 }
  0x49   : > { %2067 = vmatprep.subr.bf16.mxu0 %v2335_v1  ;;  %2116 = vmatpush3.bf16.msra.mxu1 %v2276_v58 }
  0x4a   : > { %2117 = vmatprep.subr.bf16.mxu1 %v2335_v1  ;;  %2123 = vmatprep.mubr.msk.bf16.mxu1 %vm2336_vm0, %v2335_v1 }
  0x4b   : > { %2016 = vmatmul.mubr.msk.bf16.vlgmr.msra.gmra.mrb[0].mxu0 %vm278_vm1, %v2509_v46 }
  0x4c   : > { %2068 = vmatpush3.bf16.msra.mxu0 %v2275_v57  ;;  %2075 = vmatprep.mubr.msk.bf16.mxu0 %vm2336_vm0, %v2335_v1 }
  0x4d   : > { %2069 = vmatprep.subr.bf16.mxu0 %v2335_v1  ;;  %2118 = vmatpush3.bf16.msra.mxu1 %v2278_v60 }
  0x4e   : > { %2119 = vmatprep.subr.bf16.mxu1 %v2335_v1 }
  0x50   : > { %2070 = vmatpush3.bf16.msra.mxu0 %v2277_v59 }
  0x51   : > { %2071 = vmatprep.subr.bf16.mxu0 %v2335_v1  ;;  %2120 = vmatpush3.bf16.msra.mxu1 %v2280_v62 }
  0x52   : > { %2121 = vmatprep.subr.bf16.mxu1 %v2335_v1 }
  0x54   : > { %2072 = vmatpush3.bf16.msra.mxu0 %v2279_v61 }
  0x55   : > { %2073 = vmatprep.subr.bf16.mxu0 %v2335_v1  ;;  %2122 = vmatpush3.bf16.msra.mxu1 %v2282_v0 }
  0x56   : > { %2127 = vmatprep.subr.bf16.mxu1 %v2335_v1 }
  0x58   : > { %2074 = vmatpush3.bf16.msra.mxu0 %v2281_v63  ;;  %2124 = vmatmul.mubr.msk.bf16.vlgmr.msra.gmra.mrb[4].mxu1 %vm278_vm1, %v804_v56 }
  0x59   : > { %2079 = vmatprep.subr.bf16.mxu0 %v2335_v1  ;;  %2128 = vmatpush3.bf16.msra.mxu1 %v2284_v3 }
  0x5a   : > { %2129 = vmatprep.subr.bf16.mxu1 %v2335_v1  ;;  %2135 = vmatprep.mubr.msk.bf16.mxu1 %vm2336_vm0, %v2335_v1 }
  0x5b   : > { %2076 = vmatmul.mubr.msk.bf16.vlgmr.msra.gmra.mrb[4].mxu0 %vm278_vm1, %v2509_v46 }
  0x5c   : > { %2080 = vmatpush3.bf16.msra.mxu0 %v2283_v2  ;;  %2087 = vmatprep.mubr.msk.bf16.mxu0 %vm2336_vm0, %v2335_v1 }
  0x5d   : > { %2081 = vmatprep.subr.bf16.mxu0 %v2335_v1  ;;  %2130 = vmatpush3.bf16.msra.mxu1 %v2286_v5 }
  0x5e   : > { %2131 = vmatprep.subr.bf16.mxu1 %v2335_v1 }
  0x60   : > { %2082 = vmatpush3.bf16.msra.mxu0 %v2285_v4 }
  0x61   : > { %2083 = vmatprep.subr.bf16.mxu0 %v2335_v1  ;;  %2132 = vmatpush3.bf16.msra.mxu1 %v2288_v7 }
  0x62   : > { %2133 = vmatprep.subr.bf16.mxu1 %v2335_v1 }
  0x64   : > { %2084 = vmatpush3.bf16.msra.mxu0 %v2287_v6 }
  0x65   : > { %2085 = vmatprep.subr.bf16.mxu0 %v2335_v1  ;;  %2134 = vmatpush3.bf16.msra.mxu1 %v2290_v9 }
  0x66   : > { %2139 = vmatprep.subr.bf16.mxu1 %v2335_v1 }
  0x68   : > { %2086 = vmatpush3.bf16.msra.mxu0 %v2289_v8  ;;  %2136 = vmatmul.mubr.msk.bf16.vlgmr.msra.gmra.mrb[4].mxu1 %vm278_vm1, %v2509_v46 }
  0x69   : > { %2091 = vmatprep.subr.bf16.mxu0 %v2335_v1  ;;  %2140 = vmatpush3.bf16.msra.mxu1 %v2292_v11 }
  0x6a   : > { %2141 = vmatprep.subr.bf16.mxu1 %v2335_v1  ;;  %2147 = vmatprep.mubr.msk.bf16.mxu1 %vm2336_vm0, %v2335_v1 }
  0x6b   : > { %2088 = vmatmul.mubr.msk.bf16.vlgmr.msra.gmra.mrb[4].mxu0 %vm278_vm1, %v2504_v44 }
  0x6c   : > { %2092 = vmatpush3.bf16.msra.mxu0 %v2291_v10  ;;  %2099 = vmatprep.mubr.msk.bf16.mxu0 %vm2336_vm0, %v2335_v1 }
  0x6d   : > { %2093 = vmatprep.subr.bf16.mxu0 %v2335_v1  ;;  %2142 = vmatpush3.bf16.msra.mxu1 %v2294_v16 }
  0x6e   : > { %2143 = vmatprep.subr.bf16.mxu1 %v2335_v1 }
  0x70   : > { %2094 = vmatpush3.bf16.msra.mxu0 %v2293_v15 }
  0x71   : > { %2095 = vmatprep.subr.bf16.mxu0 %v2335_v1  ;;  %2144 = vmatpush3.bf16.msra.mxu1 %v2296_v19 }
  0x72   : > { %2145 = vmatprep.subr.bf16.mxu1 %v2335_v1 }
  0x74   : > { %2096 = vmatpush3.bf16.msra.mxu0 %v2295_v18 }
  0x75   : > { %2097 = vmatprep.subr.bf16.mxu0 %v2335_v1  ;;  %2146 = vmatpush3.bf16.msra.mxu1 %v2298_v23 }
  0x76   : > { %2151 = vmatprep.subr.bf16.mxu1 %v2335_v1 }
  0x78   : > { %2098 = vmatpush3.bf16.msra.mxu0 %v2297_v22  ;;  %2148 = vmatmul.mubr.msk.bf16.vlgmr.msra.gmra.mrb[4].mxu1 %vm278_vm1, %v1119_v24 }
  0x79   : > { %2103 = vmatprep.subr.bf16.mxu0 %v2335_v1  ;;  %2152 = vmatpush3.bf16.msra.mxu1 %v2301_v27 }
  0x7a   : > { %2153 = vmatprep.subr.bf16.mxu1 %v2335_v1  ;;  %2159 = vmatprep.mubr.msk.bf16.mxu1 %vm2336_vm0, %v2335_v1 }
  0x7b   : > { %2100 = vmatmul.mubr.msk.bf16.vlgmr.msra.gmra.mrb[4].mxu0 %vm278_vm1, %v1019_v25 }
  0x7c   : > { %2104 = vmatpush3.bf16.msra.mxu0 %v2299_v26  ;;  %2111 = vmatprep.mubr.msk.bf16.mxu0 %vm2336_vm0, %v2335_v1 }
  0x7d   : > { %2105 = vmatprep.subr.bf16.mxu0 %v2335_v1  ;;  %2154 = vmatpush3.bf16.msra.mxu1 %v2303_v29 }
  0x7e   : > { %2155 = vmatprep.subr.bf16.mxu1 %v2335_v1 }
  0x80   : > { %2106 = vmatpush3.bf16.msra.mxu0 %v2302_v28 }
  0x81   : > { %2107 = vmatprep.subr.bf16.mxu0 %v2335_v1  ;;  %2156 = vmatpush3.bf16.msra.mxu1 %v2305_v31 }
  0x82   : > { %2157 = vmatprep.subr.bf16.mxu1 %v2335_v1 }
  0x84   : > { %2108 = vmatpush3.bf16.msra.mxu0 %v2304_v30 }
  0x85   : > { %2109 = vmatprep.subr.bf16.mxu0 %v2335_v1  ;;  %2158 = vmatpush3.bf16.msra.mxu1 %v2307_v35 }
  0x88   : > { %2110 = vmatpush3.bf16.msra.mxu0 %v2306_v34  ;;  %2160 = vmatmul.mubr.msk.bf16.vlgmr.msra.gmra.mrb[4].mxu1 %vm278_vm1, %v1421_v36 }
  0x8b   : > { %2112 = vmatmul.mubr.msk.bf16.vlgmr.msra.gmra.mrb[4].mxu0 %vm278_vm1, %v1119_v24 }
 0x11b   : > { %v866_v42 = vpop.f32.mrb[0].mxu1 }
 0x11c   : > { %v1508_v44 = vmul.f32 %v1887_v40, %v866_v42  ;;  %v2065_v46 = vpop.f32.mrb[1].mxu1 }
 0x11d   : > { %v869_v48 = vpop.f32.mrb[2].mxu1 }
 0x11e   : > { %v556_v41 = vpop.f32.mrb[0].mxu0  ;;  %v2066_v51 = vpop.f32.mrb[3].mxu1 }
 0x11f   : > { %v1507_v43 = vmul.f32 %v1887_v40, %v556_v41  ;;  %v2017_v45 = vpop.f32.mrb[1].mxu0 }
 0x120   : > { %v559_v47 = vpop.f32.mrb[2].mxu0 }
 0x121   : > { %v1509_v49 = vadd.f32 %v1508_v44, %v1507_v43  ;;  %v2018_v50 = vpop.f32.mrb[3].mxu0 }
 0x15b   : > { %v1483_v53 = vpop.f32.mrb[4].mxu1 }
 0x15c   : > { %v2161_v56 = vpop.f32.mrb[5].mxu1  ;;  %v1512_v1 = vmul.f32 %v1887_v40, %v1483_v53 }
 0x15d   : > { %v1486_v58 = vpop.f32.mrb[6].mxu1 }
 0x15e   : > { %v1181_v52 = vpop.f32.mrb[4].mxu0  ;;  %v2162_v61 = vpop.f32.mrb[7].mxu1 }
 0x15f   : > { %v1510_v54 = vmul.f32 %v1887_v40, %v1181_v52  ;;  %v2113_v55 = vpop.f32.mrb[5].mxu0 }
 0x160   : > { %v1184_v57 = vpop.f32.mrb[6].mxu0 }
 0x161   : > { %v1511_v59 = vadd.f32 %v1510_v54, %v1509_v49  ;;  %v2114_v60 = vpop.f32.mrb[7].mxu0 }
 0x163   : > { %v1513_v62 = vadd.f32 %v1512_v1, %v1511_v59 }
 0x165   : > { %v1515_v63 = vsel %vm1514_vm3, %v1513_v62, 0.0 }
 0x166   : > { %v1516_v0 = vrot.slane %v1515_v63, 4 }
 0x168   : > { %v1517_v2 = vadd.f32 %v1516_v0, %v1515_v63 }
 0x16a   : > { %v1518_v3 = vrot.slane %v1517_v2, 2 }
 0x16c   : > { %v1519_v4 = vadd.f32 %v1518_v3, %v1517_v2 }
 0x16e   : > { %v1520_v5 = vrot.slane %v1519_v4, 1 }
 0x170   : > { %v1521_v6 = vadd.f32 %v1520_v5, %v1519_v4 }
 0x172   : > { %v1522_v7 = vmul.f32 0.0625, %v1521_v6 }
 0x174   : > { %v1523_v8 = vsub.f32 %v556_v41, %v1522_v7  ;;  %v1526_v9 = vsub.f32 %v866_v42, %v1522_v7  ;;  %v1530_v10 = vsub.f32 %v1181_v52, %v1522_v7  ;;  %v1534_v11 = vsub.f32 %v1483_v53, %v1522_v7 }
 0x176   : > { %v1524_v12 = vmul.f32 %v1523_v8, %v1523_v8  ;;  %v1527_v13 = vmul.f32 %v1526_v9, %v1526_v9  ;;  %v1531_v14 = vmul.f32 %v1530_v10, %v1530_v10  ;;  %v1535_v17 = vmul.f32 %v1534_v11, %v1534_v11 }
 0x178   : > { %v1525_v15 = vmul.f32 %v1887_v40, %v1524_v12  ;;  %v1528_v16 = vmul.f32 %v1887_v40, %v1527_v13  ;;  %v1532_v19 = vmul.f32 %v1887_v40, %v1531_v14  ;;  %v1536_v21 = vmul.f32 %v1887_v40, %v1535_v17 }
 0x17a   : > { %v1529_v18 = vadd.f32 %v1528_v16, %v1525_v15 }
 0x17c   : > { %v1533_v20 = vadd.f32 %v1532_v19, %v1529_v18 }
 0x17e   : > { %v1537_v22 = vadd.f32 %v1536_v21, %v1533_v20 }
 0x180   : > { %v1538_v23 = vsel %vm1514_vm3, %v1537_v22, 0.0 }
 0x181   : > { %v1539_v24 = vrot.slane %v1538_v23, 4 }
 0x183   : > { %v1540_v25 = vadd.f32 %v1539_v24, %v1538_v23 }
 0x185   : > { %v1541_v26 = vrot.slane %v1540_v25, 2 }
 0x187   : > { %v1542_v27 = vadd.f32 %v1541_v26, %v1540_v25 }
 0x189   : > { %v1543_v28 = vrot.slane %v1542_v27, 1 }
 0x18b   : > { %v1544_v29 = vadd.f32 %v1543_v28, %v1542_v27 }
 0x18d   : > { %v1545_v30 = vmul.f32 0.0625, %v1544_v29 }
 0x18f   : > { %v1546_v31 = vadd.f32 1e-05, %v1545_v30 }
 0x191   : > { %2309 = vrsqrt.f32 %v1546_v31 }
 0x19b   : > { %v2310_v32 = vpop.eup %2309 }
 0x19c   : > { %v1548_v33 = vmul.f32 %v2310_v32, %v1523_v8  ;;  %v1549_v34 = vmul.f32 %v2310_v32, %v1526_v9  ;;  %v1550_v35 = vmul.f32 %v2310_v32, %v1530_v10  ;;  %v1551_v36 = vmul.f32 %v2310_v32, %v1534_v11 }
 0x19e   : > { %v1552_v37 = vmax.f32 %v1548_v33, 0.0  ;;  %v1553_v38 = vmax.f32 %v1549_v34, 0.0  ;;  %v1554_v39 = vmax.f32 %v1550_v35, 0.0  ;;  %v1555_v40 = vmax.f32 %v1551_v36, 0.0 }
 0x1a0   : > { %v1556_v41 = vpack.c.bf16 %v1552_v37, %v1552_v37  ;;  %v1559_v42 = vpack.c.bf16 %v1553_v38, %v1553_v38  ;;  %v1561_v43 = vpack.c.bf16 %v1554_v39, %v1554_v39  ;;  %v1563_v44 = vpack.c.bf16 %v1555_v40, %v1555_v40 }
 0x1a2   : > { %1558 = vst.msk [vmem:[%s221_s7] sm:$0xf] %vm1557_vm4, %v1556_v41  ;;  %1560 = vst.msk [vmem:[%s221_s7 + $0x4] sm:$0xf] %vm1557_vm4, %v1559_v42 }
 0x1a3   : > { %1562 = vst.msk [vmem:[%s221_s7 + $0x8] sm:$0xf] %vm1557_vm4, %v1561_v43  ;;  %1564 = vst.msk [vmem:[%s221_s7 + $0xc] sm:$0xf] %vm1557_vm4, %v1563_v44 }
 0x1a4 PF: > { %s13_s14 = sadd.s32 1, %s2333_s14   ;;  %s2732_s12 = smov %s2329_s13 }
 0x1a5   : > { %p10_p5 = scmp.ge.s32.totalorder %s13_s14, 4   ;;  %s2733_s13 = smov %s2735_s2 }
 0x1a7   :  { %12 = sbr.rel (!%p10_p5) target bundleno = 2 (0x2), region = 83 }

// kernel: generator_unet.14
= control target key start
LH: loop header
LB: loop body
LE: loop exit
PB: predicated region body
PF: predicated region fallthrough
CT: control target
= control target key end

     0   :  { %s2350_s12 = smov 0   ;;  %s2352_s13 = smov 0   ;;  %s2648_s0 = inlined_call_operand.vmem [shape: bf16[2,38,32], index: 0, kind: input, shape index: {}]   ;;  %s2649_s1 = inlined_call_operand.vmem [shape: bf16[16,32,8], index: 1, kind: input, shape index: {}]   ;;  %s2650_s2 = inlined_call_operand.vmem [shape: f32[1,8], index: 2, kind: input, shape index: {}]   ;;  %s2651_s3 = inlined_call_operand.vmem [shape: bf16[2,96,8], index: 3, kind: output, shape index: {}]  }
   0x1   :  { %s2354_s14 = smov 0  }
   0x2 LB: > { %s25_s2 = sadd.s32 1, %s2323_s13  ;;  %p1816_p0 = scmp.ge.s32.totalorder %s2327_s14, 1  ;;  %s2327_s14 = sphi %s2354_s14, %s13_s14   ;;  %s2323_s13 = sphi %s2352_s13, %s2653_s13   ;;  %s2319_s12 = sphi %s2350_s12, %s2652_s12  }
   0x3   : > { %p27_p1 = scmp.ge.s32.totalorder %s25_s2, 2  ;;  %p168_p2 = scmp.lt.s32.totalorder %s2327_s14, 3 }
   0x5   : > { %s2655_s2 = smov (%p27_p1, %s25_s2), 0  ;;  %p169_p3 = pnand %p1816_p0, %p168_p2 }
   0x6   : > { %v2258_v0 = vld [vmem:[%s2649_s1 + $0x50] sm:$0xff] (!%p169_p3)   ;;  %p202_p4 = scmp.lt.s32.totalorder (!%p169_p3), %s2319_s12, 1  ;;  %v2260_v2 = vld [vmem:[%s2649_s1 + $0x58] sm:$0xff] (!%p169_p3)   ;;  %v2266_v4 = vld [vmem:[%s2649_s1] sm:$0xff] (!%p169_p3)   ;;  %vm274_vm0 = vcmask (!%p169_p3), 261120   ;;  %vm591_vm1 = vcmask (!%p169_p3), 1046528  }
   0x7   : > { %172 = sbr.rel (%p169_p3) target bundleno = 412 (0x19c), region = 32  ;;  %v2259_v1 = vld [vmem:[%s2649_s1 + $0x10] sm:$0xff] (!%p169_p3)   ;;  %2081 = vmatprep.subr.bf16.mxu1 (!%p169_p3), %v2258_v0  ;;  %v2261_v3 = vld [vmem:[%s2649_s1 + $0x18] sm:$0xff] (!%p169_p3)   ;;  %v2267_v5 = vld [vmem:[%s2649_s1 + $0x40] sm:$0xff] (!%p169_p3)   ;;  %vm246_vm2 = vsmask.f32 (!%p169_p3), 7424 }
   0x8   : > { %2082 = vmatpush3.bf16.msra.mxu1 (!%p169_p3), %v2258_v0  ;;  %2049 = vmatprep.subr.bf16.mxu0 (!%p169_p3), %v2259_v1  ;;  %v2268_v25 = vld [vmem:[%s2649_s1 + $0x48] sm:$0xff] (!%p169_p3)   ;;  %v2272_v32 = vld [vmem:[%s2649_s1 + $0x60] sm:$0xff] (!%p169_p3)   ;;  %vm490_vm3 = vsmask.f32 (!%p169_p3), 4352  ;;  %vm408_vm4 = vcmask (!%p169_p3), 1044480   ;;  %v2278_v53 = vld [vmem:[%s2649_s1 + $0x70] sm:$0xff] (!%p169_p3)  }
   0x9   : > { %2050 = vmatpush3.bf16.msra.mxu0 (!%p169_p3), %v2259_v1  ;;  %2083 = vmatprep.subr.bf16.mxu1 (!%p169_p3), %v2260_v2  ;;  %v2269_v31 = vld [vmem:[%s2649_s1 + $0x8] sm:$0xff] (!%p169_p3)   ;;  %v2270_v40 = vld [vmem:[%s2649_s1 + $0x20] sm:$0xff] (!%p169_p3)   ;;  %v2277_v54 = vld [vmem:[%s2649_s1 + $0x30] sm:$0xff] (!%p169_p3)   ;;  %vm1096_vm5 = vsmask.f32 (!%p169_p3), 5376  ;;  %vm1014_vm6 = vcmask (!%p169_p3), 1045504  }
   0xa   : > { %2051 = vmatprep.subr.bf16.mxu0 (!%p169_p3), %v2261_v3  ;;  %v2273_v46 = vld [vmem:[%s2649_s1 + $0x68] sm:$0xff] (!%p169_p3)   ;;  %v2279_v56 = vld [vmem:[%s2649_s1 + $0x78] sm:$0xff] (!%p169_p3)   ;;  %v2283_v58 = vld [vmem:[%s2649_s1 + $0xd0] sm:$0xff] (!%p169_p3)  }
   0xb   : > { %v2274_v51 = vld [vmem:[%s2649_s1 + $0x28] sm:$0xff] (!%p169_p3)   ;;  %v2280_v57 = vld [vmem:[%s2649_s1 + $0x38] sm:$0xff] (!%p169_p3)   ;;  %v2284_v59 = vld [vmem:[%s2649_s1 + $0x90] sm:$0xff] (!%p169_p3)  }
   0xc   : > { %2084 = vmatpush3.bf16.msra.mxu1 (!%p169_p3), %v2260_v2  ;;  %v2285_v61 = vld [vmem:[%s2649_s1 + $0xd8] sm:$0xff] (!%p169_p3)  }
   0xd   : > { %2052 = vmatpush3.bf16.msra.mxu0 (!%p169_p3), %v2261_v3  ;;  %2089 = vmatprep.subr.bf16.mxu1 (!%p169_p3), %v2267_v5  ;;  %v2286_v2 = vld [vmem:[%s2649_s1 + $0x98] sm:$0xff] (!%p169_p3)  }
   0xe   : > { %s2657_s12 = smov (!%p202_p4, %s2319_s12), 1  ;;  %2057 = vmatprep.subr.bf16.mxu0 %v2266_v4 }
   0xf   : > { %s2225_s23 = smul.u32 20, %s2657_s12 }
  0x10   : > { %s2226_s9 = smul.u32 48, %s2657_s12 }
  0x11   : > { %s2389_s28 = scalar_lea.vmem %s2648_s0, %s2225_s23 }
  0x12   : > { %v2395_v6 = vld [vmem:[%s2389_s28 + $0x4] sm:$0xf]  ;;  %v2398_v7 = vld [vmem:[%s2389_s28 + $0x8] sm:$0xf]  ;;  %v230_v8 = vld [vmem:[%s2389_s28 + $0xc] sm:$0x1]  ;;  %s221_s12 = scalar_lea.vmem %s2651_s3, %s2226_s9 }
  0x13   : > { %v1824_v9 = vcombine.low %v2398_v7, %v230_v8  ;;  %v395_v10 = vld [vmem:[%s2389_s28] sm:$0x8]  ;;  %v2414_v29 = vld [vmem:[%s2389_s28 + $0xc] sm:$0xf]  ;;  %v1829_v50 = vcombine.low %v2398_v7, %v2398_v7  ;;  %v1882_v55 = vcombine.low %v2395_v6, %v2398_v7  ;;  %v995_v62 = vld [vmem:[%s2389_s28 + $0x4] sm:$0xc] }
  0x14   : > { %v582_v11 = vld [vmem:[%s2389_s28] sm:$0xe]  ;;  %v1838_v15 = vcombine.low %v395_v10, %v2395_v6  ;;  %v1848_v33 = vcombine.low %v2398_v7, %v2414_v29  ;;  %v396_v39 = vld [vmem:[%s2389_s28 + $0xc] sm:$0x7]  ;;  %v1883_v60 = vcombine.low %v2414_v29, %v2414_v29  ;;  %v2493_v63 = vld [vmem:[%s2389_s28 + $0x8] sm:$0xf] }
  0x15   : > { %v223_v12 = vld [vmem:[%s2389_s28] sm:$0xf]  ;;  %v1861_v13 = vcombine.low %v582_v11, %v2395_v6  ;;  %v593_v16 = vrot.slane %v1824_v9, 1  ;;  %v255_v17 = vshll.u32 %v1824_v9, 16  ;;  %v259_v21 = vshrl.u32 %v1824_v9, 16 }
  0x16   : > { %v1823_v14 = vcombine.low %v223_v12, %v2395_v6  ;;  %v492_v26 = vshrl.u32 %v1838_v15, 16  ;;  %v495_v30 = vshll.u32 %v1838_v15, 16  ;;  %v500_v37 = vshrl.u32 %v1848_v33, 16  ;;  %v997_v0 = vld [vmem:[%s2389_s28 + $0xc] sm:$0xf]  ;;  %v2287_v6 = vld [vmem:[%s2649_s1 + $0x80] sm:$0xff]  }
  0x17   : > { %v592_v18 = vrot.slane %v1861_v13, 1  ;;  %v257_v22 = vrot.slane %v255_v17, 1  ;;  %v503_v38 = vshll.u32 %v1848_v33, 16  ;;  %v1839_v45 = vcombine.low %v2398_v7, %v396_v39  ;;  %v1087_v1 = vld [vmem:[%s2389_s28 + $0x10] sm:$0x7]  ;;  %v2289_v7 = vld [vmem:[%s2649_s1 + $0xc8] sm:$0xff]  }
  0x18   : > { %v248_v19 = vshrl.u32 %v1823_v14, 16  ;;  %v250_v20 = vshll.u32 %v1823_v14, 16  ;;  %v494_v35 = vrot.slane %v492_v26, 3  ;;  %v497_v36 = vrot.slane %v495_v30, 4  ;;  %v2290_v12 = vld [vmem:[%s2649_s1 + $0x88] sm:$0xff]   ;;  %v2292_v17 = vld [vmem:[%s2649_s1 + $0xe0] sm:$0xff]  }
  0x19   : > { %v594_v23 = vsel %vm591_vm1, %v592_v18, %v593_v16  ;;  %v261_v28 = vor.u32 %v259_v21, %v257_v22  ;;  %v502_v41 = vrot.slane %v500_v37, 3  ;;  %v505_v42 = vrot.slane %v503_v38, 4  ;;  %v998_v18 = vld [vmem:[%s2389_s28 + $0x10] sm:$0x3]  ;;  %v2301_v37 = vld [vmem:[%s2649_s1 + $0xb8] sm:$0xff]  }
  0x1a   : > { %v252_v24 = vrot.slane %v250_v20, 1  ;;  %2085 = vmatprep.mubr.msk.bf16.mxu1 %vm274_vm0, %v594_v23  ;;  %v498_v43 = vor.u32 %v497_v36, %v494_v35  ;;  %v409_v48 = vrot.slane %v1838_v15, 3  ;;  %v2442_v49 = vrot.slane %v1839_v45, 3  ;;  %v2293_v23 = vld [vmem:[%s2649_s1 + $0xe8] sm:$0xff]   ;;  %v2300_v35 = vld [vmem:[%s2649_s1 + $0xf8] sm:$0xff]  }
  0x1b   : > { %2086 = vmatmul.mubr.msk.bf16.vlgmr.msra.gmra.mrb[0].mxu1 %vm274_vm0, %v593_v16  ;;  %v2433_v44 = vor.u32 %v505_v42, %v502_v41  ;;  %v1908_v3 = vcombine.low %v995_v62, %v2493_v63  ;;  %v1462_v38 = vlaneseq }
  0x1c   : > { %v253_v27 = vor.u32 %v252_v24, %v248_v19  ;;  %2090 = vmatpush3.bf16.msra.mxu1 %v2267_v5  ;;  %v2454_v52 = vsel %vm408_vm4, %v409_v48, %v2442_v49  ;;  %v2288_v5 = vld [vmem:[%s2649_s1 + $0xc0] sm:$0xff]  }
  0x1d   : > { %2091 = vmatprep.subr.bf16.mxu1 %v2268_v25  ;;  %v2440_v47 = vsel %vm490_vm3, %v498_v43, %v2433_v44  ;;  %v1098_v8 = vshrl.u32 %v1908_v3, 16  ;;  %v1101_v9 = vshll.u32 %v1908_v3, 16  ;;  %v2291_v19 = vld [vmem:[%s2649_s1 + $0xa0] sm:$0xff]   ;;  %v1463_v39 = vshrl.u32 %v1462_v38, 7 }
  0x1e   : > { %v258_v34 = vsel %vm246_vm2, %v253_v27, %v257_v22  ;;  %v1909_v22 = vcombine.low %v997_v0, %v998_v18  ;;  %v1381_v27 = vld [vmem:[%s2389_s28 + $0x4] sm:$0x8]  ;;  %vm1544_vm3 = vcmask 64512  }
  0x1f   : > { %2053 = vmatprep.mubr.msk.bf16.mxu0 %vm274_vm0, %v258_v34  ;;  %2093 = vmatprep.mubr.msk.bf16.mxu1 %vm274_vm0, %v258_v34  ;;  %v1100_v13 = vrot.slane %v1098_v8, 2  ;;  %v1951_v29 = vcombine.low %v1381_v27, %v2493_v63  ;;  %v1464_v41 = vadd.s32 8, %v1463_v39 }
  0x20   : > { %2054 = vmatmul.mubr.msk.bf16.vlgmr.msra.gmra.mrb[0].mxu0 %vm274_vm0, %v261_v28  ;;  %2092 = vmatpush3.bf16.msra.mxu1 %v2268_v25  ;;  %v1015_v25 = vrot.slane %v1908_v3, 2  ;;  %v1016_v26 = vrot.slane %v1909_v22, 2 }
  0x21   : > { %2058 = vmatpush3.bf16.msra.mxu0 %v2266_v4  ;;  %2061 = vmatprep.mubr.msk.bf16.mxu0 %vm274_vm0, %v1823_v14  ;;  %v2503_v4 = vcombine.low %v997_v0, %v1087_v1  ;;  %v1103_v14 = vrot.slane %v1101_v9, 3  ;;  %v1390_v33 = vrot.slane %v1951_v29, 3  ;;  %v2329_v1 = vmov 0.0  }
  0x22   : > { %2059 = vmatprep.subr.bf16.mxu0 %v2269_v31  ;;  %2097 = vmatprep.subr.bf16.mxu1 %v2272_v32  ;;  %v1017_v30 = vsel %vm1014_vm6, %v1015_v25, %v1016_v26 }
  0x23   : > { %v1106_v10 = vshrl.u32 %v2503_v4, 16  ;;  %v1109_v11 = vshll.u32 %v2503_v4, 16  ;;  %v1104_v20 = vor.u32 %v1103_v14, %v1100_v13  ;;  %v1391_v34 = vrot.slane %v2503_v4, 3 }
  0x25   : > { %2060 = vmatpush3.bf16.msra.mxu0 %v2269_v31  ;;  %v1108_v15 = vrot.slane %v1106_v10, 2  ;;  %v1111_v16 = vrot.slane %v1109_v11, 3  ;;  %v2299_v31 = vld [vmem:[%s2649_s1 + $0xf0] sm:$0xff]   ;;  %v1392_v36 = vsel %vm408_vm4, %v1390_v33, %v1391_v34  ;;  %vm1653_vm4 = vcmask 60416  }
  0x26   : > { %2065 = vmatprep.subr.bf16.mxu0 %v2270_v40 }
  0x27   : > { %2094 = vmatmul.mubr.msk.bf16.vlgmr.msra.gmra.mrb[0].mxu1 %vm274_vm0, %v261_v28  ;;  %v1112_v21 = vor.u32 %v1111_v16, %v1108_v15  ;;  %v2294_v28 = vld [vmem:[%s2649_s1 + $0xa8] sm:$0xff]  }
  0x28   : > { %2098 = vmatpush3.bf16.msra.mxu1 %v2272_v32  ;;  %2101 = vmatprep.mubr.msk.bf16.mxu1 %vm274_vm0, %v2440_v47  ;;  %v2298_v32 = vld [vmem:[%s2649_s1 + $0xb0] sm:$0xff]  }
  0x29   : > { %2099 = vmatprep.subr.bf16.mxu1 %v2273_v46  ;;  %v1113_v24 = vsel %vm1096_vm5, %v1104_v20, %v1112_v21 }
  0x2c   : > { %2062 = vmatmul.mubr.msk.bf16.vlgmr.msra.gmra.mrb[0].mxu0 %vm274_vm0, %v1829_v50  ;;  %2100 = vmatpush3.bf16.msra.mxu1 %v2273_v46 }
  0x2d   : > { %2066 = vmatpush3.bf16.msra.mxu0 %v2270_v40  ;;  %2069 = vmatprep.mubr.msk.bf16.mxu0 %vm274_vm0, %v2454_v52  ;;  %v1465_v40 = vadd.s32 16, %v1463_v39 }
  0x2e   : > { %2067 = vmatprep.subr.bf16.mxu0 %v2274_v51  ;;  %2105 = vmatprep.subr.bf16.mxu1 %v2278_v53 }
  0x2f   : > { %v2571_v42 = vmul.u32.u64.low 2863311531, %v1465_v40  ;;  %v2572_v43 = vmul.u32.u64.high 2863311531, %v1465_v40, %v2571_v42 }
  0x31   : > { %2068 = vmatpush3.bf16.msra.mxu0 %v2274_v51  ;;  %v1494_v48 = vshrl.u32 %v2572_v43, 2 }
  0x32   : > { %2073 = vmatprep.subr.bf16.mxu0 %v2277_v54 }
  0x33   : > { %2102 = vmatmul.mubr.msk.bf16.vlgmr.msra.gmra.mrb[0].mxu1 %vm274_vm0, %v2433_v44  ;;  %v1495_v51 = vmul.u32 6, %v1494_v48 }
  0x34   : > { %2106 = vmatpush3.bf16.msra.mxu1 %v2278_v53  ;;  %2109 = vmatprep.mubr.msk.bf16.mxu1 %vm274_vm0, %v1882_v55 }
  0x35   : > { %2107 = vmatprep.subr.bf16.mxu1 %v2279_v56 }
  0x38   : > { %2070 = vmatmul.mubr.msk.bf16.vlgmr.msra.gmra.mrb[0].mxu0 %vm274_vm0, %v2442_v49  ;;  %2108 = vmatpush3.bf16.msra.mxu1 %v2279_v56 }
  0x39   : > { %2074 = vmatpush3.bf16.msra.mxu0 %v2277_v54  ;;  %2145 = vmatprep.subr.bf16.mxu1 %v2283_v58  ;;  %v1496_v54 = vsub.s32 %v1465_v40, %v1495_v51 }
  0x3a   : > { %2075 = vmatprep.subr.bf16.mxu0 %v2280_v57  ;;  %2077 = vmatprep.mubr.msk.bf16.mxu0 %vm274_vm0, %v2440_v47 }
  0x3b   : > { %vm1501_vm7 = vcmp.ne.s32.totalorder %v1496_v54, 0  ;;  %vm1504_vm8 = vcmp.lt.s32.totalorder %v1496_v54, 0 }
  0x3c   : > { %vm1507_vm11 = vmand %vm1504_vm8, %vm1501_vm7 }
  0x3d   : > { %2076 = vmatpush3.bf16.msra.mxu0 %v2280_v57  ;;  %v1510_v57 = vadd.s32 6, %v1496_v54 }
  0x3e   : > { %2113 = vmatprep.subr.bf16.mxu0 %v2284_v59 }
  0x3f   : > { %2110 = vmatmul.mubr.msk.bf16.vlgmr.msra.gmra.mrb[0].mxu1 %vm274_vm0, %v1883_v60 }
  0x40   : > { %2146 = vmatpush3.bf16.msra.mxu1 %v2283_v58  ;;  %2149 = vmatprep.mubr.msk.bf16.mxu1 %vm274_vm0, %v1882_v55 }
  0x41   : > { %2147 = vmatprep.subr.bf16.mxu1 %v2285_v61 }
  0x44   : > { %2078 = vmatmul.mubr.msk.bf16.vlgmr.msra.gmra.mrb[0].mxu0 %vm274_vm0, %v2433_v44  ;;  %2148 = vmatpush3.bf16.msra.mxu1 %v2285_v61 }
  0x45   : > { %2114 = vmatpush3.bf16.msra.mxu0 %v2284_v59  ;;  %2117 = vmatprep.mubr.msk.bf16.mxu0 %vm274_vm0, %v2440_v47 }
  0x46   : > { %2115 = vmatprep.subr.bf16.mxu0 %v2286_v2  ;;  %2153 = vmatprep.subr.bf16.mxu1 %v2288_v5 }
  0x47   : > { %2150 = vmatmul.mubr.msk.bf16.vlgmr.msra.gmra.mrb[4].mxu1 %vm274_vm0, %v1883_v60  ;;  %v1513_v60 = vsel %vm1507_vm11, %v1510_v57, %v1496_v54 }
  0x48   : > { %2154 = vmatpush3.bf16.msra.mxu1 %v2288_v5  ;;  %2157 = vmatprep.mubr.msk.bf16.mxu1 %vm274_vm0, %v2440_v47  ;;  %v2577_v46 = vmul.u32.u64.low 2863311531, %v1464_v41  ;;  %v2578_v47 = vmul.u32.u64.high 2863311531, %v1464_v41, %v2577_v46 }
  0x49   : > { %2116 = vmatpush3.bf16.msra.mxu0 %v2286_v2  ;;  %2155 = vmatprep.subr.bf16.mxu1 %v2289_v7 }
  0x4a   : > { %2121 = vmatprep.subr.bf16.mxu0 %v2287_v6  ;;  %v1483_v50 = vshrl.u32 %v2578_v47, 2 }
  0x4c   : > { %2118 = vmatmul.mubr.msk.bf16.vlgmr.msra.gmra.mrb[4].mxu0 %vm274_vm0, %v2433_v44  ;;  %2156 = vmatpush3.bf16.msra.mxu1 %v2289_v7  ;;  %v1484_v53 = vmul.u32 6, %v1483_v50 }
  0x4d   : > { %2122 = vmatpush3.bf16.msra.mxu0 %v2287_v6  ;;  %2125 = vmatprep.mubr.msk.bf16.mxu0 %vm274_vm0, %v2454_v52 }
  0x4e   : > { %2123 = vmatprep.subr.bf16.mxu0 %v2290_v12  ;;  %2161 = vmatprep.subr.bf16.mxu1 %v2292_v17  ;;  %v1485_v56 = vsub.s32 %v1464_v41, %v1484_v53 }
  0x50   : > { %vm1500_vm12 = vcmp.ne.s32.totalorder %v1485_v56, 0  ;;  %vm1503_vm13 = vcmp.lt.s32.totalorder %v1485_v56, 0  ;;  %v1509_v59 = vadd.s32 6, %v1485_v56 }
  0x51   : > { %2124 = vmatpush3.bf16.msra.mxu0 %v2290_v12  ;;  %vm1506_vm15 = vmand %vm1503_vm13, %vm1500_vm12 }
  0x52   : > { %2129 = vmatprep.subr.bf16.mxu0 %v2291_v19  ;;  %v1512_v62 = vsel %vm1506_vm15, %v1509_v59, %v1485_v56 }
  0x53   : > { %2158 = vmatmul.mubr.msk.bf16.vlgmr.msra.gmra.mrb[4].mxu1 %vm274_vm0, %v2433_v44  ;;  %v2574_v44 = vmul.u32.u64.low 2863311531, %v1463_v39  ;;  %v2575_v45 = vmul.u32.u64.high 2863311531, %v1463_v39, %v2574_v44  ;;  %vm1515_vm2 = vcmp.lt.s32.totalorder %v1512_v62, 4 }
  0x54   : > { %2162 = vmatpush3.bf16.msra.mxu1 %v2292_v17  ;;  %2165 = vmatprep.mubr.msk.bf16.mxu1 %vm274_vm0, %v1113_v24  ;;  %v2588_v8 = vsel %vm1515_vm2, 1.0, %v2329_v1 }
  0x55   : > { %2163 = vmatprep.subr.bf16.mxu1 %v2293_v23 }
  0x58   : > { %2126 = vmatmul.mubr.msk.bf16.vlgmr.msra.gmra.mrb[4].mxu0 %vm274_vm0, %v2442_v49  ;;  %2164 = vmatpush3.bf16.msra.mxu1 %v2293_v23  ;;  %v1472_v49 = vshrl.u32 %v2575_v45, 2 }
  0x59   : > { %2130 = vmatpush3.bf16.msra.mxu0 %v2291_v19  ;;  %2133 = vmatprep.mubr.msk.bf16.mxu0 %vm274_vm0, %v1017_v30 }
  0x5a   : > { %2131 = vmatprep.subr.bf16.mxu0 %v2294_v28  ;;  %2169 = vmatprep.subr.bf16.mxu1 %v2299_v31  ;;  %v1473_v52 = vmul.u32 6, %v1472_v49 }
  0x5c   : > { %v1474_v55 = vsub.s32 %v1463_v39, %v1473_v52 }
  0x5d   : > { %2132 = vmatpush3.bf16.msra.mxu0 %v2294_v28 }
  0x5e   : > { %2137 = vmatprep.subr.bf16.mxu0 %v2298_v32  ;;  %vm1499_vm9 = vcmp.ne.s32.totalorder %v1474_v55, 0  ;;  %vm1502_vm10 = vcmp.lt.s32.totalorder %v1474_v55, 0  ;;  %v1508_v58 = vadd.s32 6, %v1474_v55 }
  0x5f   : > { %2166 = vmatmul.mubr.msk.bf16.vlgmr.msra.gmra.mrb[4].mxu1 %vm274_vm0, %v1112_v21  ;;  %vm1505_vm14 = vmand %vm1502_vm10, %vm1499_vm9 }
  0x60   : > { %2170 = vmatpush3.bf16.msra.mxu1 %v2299_v31  ;;  %2173 = vmatprep.mubr.msk.bf16.mxu1 %vm274_vm0, %v1392_v36  ;;  %v1511_v61 = vsel %vm1505_vm14, %v1508_v58, %v1474_v55 }
  0x61   : > { %2171 = vmatprep.subr.bf16.mxu1 %v2300_v35  ;;  %vm1514_vm1 = vcmp.lt.s32.totalorder %v1511_v61, 4 }
  0x62   : > { %v2585_v4 = vsel %vm1514_vm1, 1.0, %v2329_v1 }
  0x64   : > { %2134 = vmatmul.mubr.msk.bf16.vlgmr.msra.gmra.mrb[4].mxu0 %vm274_vm0, %v1016_v26  ;;  %2172 = vmatpush3.bf16.msra.mxu1 %v2300_v35 }
  0x65   : > { %2138 = vmatpush3.bf16.msra.mxu0 %v2298_v32  ;;  %2141 = vmatprep.mubr.msk.bf16.mxu0 %vm274_vm0, %v1113_v24 }
  0x66   : > { %2139 = vmatprep.subr.bf16.mxu0 %v2301_v37 }
  0x69   : > { %2140 = vmatpush3.bf16.msra.mxu0 %v2301_v37 }
  0x6b   : > { %2174 = vmatmul.mubr.msk.bf16.vlgmr.msra.gmra.mrb[4].mxu1 %vm274_vm0, %v1391_v34 }
  0x70   : > { %2142 = vmatmul.mubr.msk.bf16.vlgmr.msra.gmra.mrb[4].mxu0 %vm274_vm0, %v1112_v21  ;;  %vm1516_vm0 = vcmp.lt.s32.totalorder %v1513_v60, 4 }
  0x71   : > { %v2583_v2 = vsel %vm1516_vm0, 1.0, %v2329_v1 }
 0x112   : > { %v2111_v63 = vpop.f32.mrb[0].mxu1 }
 0x113   : > { %v848_v0 = vpop.f32.mrb[1].mxu1  ;;  %v1528_v7 = vmul.f32 %v2111_v63, %v2583_v2 }
 0x114   : > { %v2112_v3 = vpop.f32.mrb[2].mxu1  ;;  %v1526_v11 = vmul.f32 %v2585_v4, %v848_v0 }
 0x115   : > { %v851_v5 = vpop.f32.mrb[3].mxu1 }
 0x116   : > { %v1527_v16 = vmul.f32 %v2588_v8, %v851_v5 }
 0x117   : > { %v2079_v6 = vpop.f32.mrb[0].mxu0 }
 0x118   : > { %v1525_v9 = vmul.f32 %v2079_v6, %v2583_v2  ;;  %v560_v10 = vpop.f32.mrb[1].mxu0 }
 0x119   : > { %v1523_v12 = vmul.f32 %v2585_v4, %v560_v10  ;;  %v2080_v13 = vpop.f32.mrb[2].mxu0 }
 0x11a   : > { %v1531_v14 = vadd.f32 %v1528_v7, %v1525_v9  ;;  %v563_v15 = vpop.f32.mrb[3].mxu0 }
 0x11b   : > { %v1529_v17 = vadd.f32 %v1526_v11, %v1523_v12  ;;  %v1524_v18 = vmul.f32 %v2588_v8, %v563_v15 }
 0x11d   : > { %v1530_v19 = vadd.f32 %v1527_v16, %v1524_v18 }
 0x13e   : > { %v2595_v20 = vpop.f32.mrb[4].mxu1 }
 0x13f   : > { %v1445_v21 = vpop.f32.mrb[5].mxu1  ;;  %v1540_v29 = vmul.f32 %v2595_v20, %v2583_v2 }
 0x140   : > { %v2176_v22 = vpop.f32.mrb[6].mxu1  ;;  %v1538_v32 = vmul.f32 %v2585_v4, %v1445_v21 }
 0x141   : > { %v1448_v23 = vpop.f32.mrb[7].mxu1 }
 0x142   : > { %v1539_v36 = vmul.f32 %v2588_v8, %v1448_v23 }
 0x143   : > { %v2143_v24 = vpop.f32.mrb[4].mxu0 }
 0x144   : > { %v1534_v25 = vmul.f32 %v2143_v24, %v2583_v2  ;;  %v1166_v26 = vpop.f32.mrb[5].mxu0 }
 0x145   : > { %v1532_v27 = vmul.f32 %v2585_v4, %v1166_v26  ;;  %v2144_v28 = vpop.f32.mrb[6].mxu0 }
 0x146   : > { %v1537_v30 = vadd.f32 %v1534_v25, %v1531_v14  ;;  %v1169_v31 = vpop.f32.mrb[7].mxu0 }
 0x147   : > { %v1535_v33 = vadd.f32 %v1532_v27, %v1529_v17  ;;  %v1533_v34 = vmul.f32 %v2588_v8, %v1169_v31 }
 0x148   : > { %v1543_v35 = vadd.f32 %v1540_v29, %v1537_v30 }
 0x149   : > { %v1541_v37 = vadd.f32 %v1538_v32, %v1535_v33  ;;  %v1536_v38 = vadd.f32 %v1533_v34, %v1530_v19 }
 0x14a   : > { %v1548_v43 = vsel %vm1544_vm3, %v1543_v35, 0.0 }
 0x14b   : > { %v1542_v39 = vadd.f32 %v1539_v36, %v1536_v38  ;;  %v1545_v40 = vsel %vm1544_vm3, %v1541_v37, 0.0 }
 0x14d   : > { %v1546_v41 = vsel %vm1544_vm3, %v1542_v39, 0.0 }
 0x14e   : > { %v1547_v42 = vadd.f32 %v1546_v41, %v1545_v40 }
 0x150   : > { %v1549_v44 = vadd.f32 %v1548_v43, %v1547_v42 }
 0x152   : > { %v1550_v45 = vrot.slane %v1549_v44, 4 }
 0x154   : > { %v1551_v46 = vadd.f32 %v1550_v45, %v1549_v44 }
 0x156   : > { %v1552_v47 = vrot.slane %v1551_v46, 2 }
 0x158   : > { %v1553_v48 = vadd.f32 %v1552_v47, %v1551_v46 }
 0x15a   : > { %v1554_v49 = vrot.slane %v1553_v48, 1 }
 0x15c   : > { %v1555_v50 = vadd.f32 %v1554_v49, %v1553_v48 }
 0x15e   : > { %v1556_v51 = vmul.f32 0.015625, %v1555_v50 }
 0x160   : > { %v1557_v52 = vsub.f32 %v560_v10, %v1556_v51  ;;  %v1558_v53 = vsub.f32 %v563_v15, %v1556_v51  ;;  %v1559_v54 = vsub.f32 %v2079_v6, %v1556_v51  ;;  %v1566_v55 = vsub.f32 %v848_v0, %v1556_v51 }
 0x161   : > { %v1567_v56 = vsub.f32 %v851_v5, %v1556_v51  ;;  %v1568_v57 = vsub.f32 %v2111_v63, %v1556_v51  ;;  %v1578_v58 = vsub.f32 %v1166_v26, %v1556_v51  ;;  %v1579_v59 = vsub.f32 %v1169_v31, %v1556_v51 }
 0x162   : > { %v1560_v60 = vmul.f32 %v1557_v52, %v1557_v52  ;;  %v1561_v61 = vmul.f32 %v1558_v53, %v1558_v53  ;;  %v1562_v62 = vmul.f32 %v1559_v54, %v1559_v54  ;;  %v1569_v1 = vmul.f32 %v1566_v55, %v1566_v55 }
 0x163   : > { %v1570_v3 = vmul.f32 %v1567_v56, %v1567_v56  ;;  %v1571_v7 = vmul.f32 %v1568_v57, %v1568_v57  ;;  %v1580_v9 = vsub.f32 %v2143_v24, %v1556_v51  ;;  %v1581_v11 = vmul.f32 %v1578_v58, %v1578_v58 }
 0x164   : > { %v1563_v12 = vmul.f32 %v2585_v4, %v1560_v60  ;;  %v1564_v13 = vmul.f32 %v2588_v8, %v1561_v61  ;;  %v1565_v10 = vmul.f32 %v2583_v2, %v1562_v62  ;;  %v1572_v0 = vmul.f32 %v2585_v4, %v1569_v1 }
 0x165   : > { %v1573_v63 = vmul.f32 %v2588_v8, %v1570_v3  ;;  %v1574_v5 = vmul.f32 %v2583_v2, %v1571_v7  ;;  %v1582_v6 = vmul.f32 %v1579_v59, %v1579_v59  ;;  %v1583_v14 = vmul.f32 %v1580_v9, %v1580_v9 }
 0x166   : > { %v1575_v15 = vadd.f32 %v1572_v0, %v1563_v12  ;;  %v1584_v16 = vmul.f32 %v2585_v4, %v1581_v11  ;;  %v1590_v17 = vsub.f32 %v1445_v21, %v1556_v51  ;;  %v1591_v18 = vsub.f32 %v1448_v23, %v1556_v51 }
 0x167   : > { %v1576_v19 = vadd.f32 %v1573_v63, %v1564_v13  ;;  %v1577_v22 = vadd.f32 %v1574_v5, %v1565_v10  ;;  %v1585_v24 = vmul.f32 %v2588_v8, %v1582_v6  ;;  %v1586_v25 = vmul.f32 %v2583_v2, %v1583_v14 }
 0x168   : > { %v1587_v26 = vadd.f32 %v1584_v16, %v1575_v15  ;;  %v1592_v27 = vsub.f32 %v2595_v20, %v1556_v51  ;;  %v1593_v28 = vmul.f32 %v1590_v17, %v1590_v17  ;;  %v1594_v29 = vmul.f32 %v1591_v18, %v1591_v18 }
 0x169   : > { %v1588_v30 = vadd.f32 %v1585_v24, %v1576_v19  ;;  %v1589_v31 = vadd.f32 %v1586_v25, %v1577_v22 }
 0x16a   : > { %v1595_v32 = vmul.f32 %v1592_v27, %v1592_v27  ;;  %v1596_v33 = vmul.f32 %v2585_v4, %v1593_v28  ;;  %v1597_v34 = vmul.f32 %v2588_v8, %v1594_v29 }
 0x16c   : > { %v1598_v21 = vmul.f32 %v2583_v2, %v1595_v32  ;;  %v1599_v23 = vadd.f32 %v1596_v33, %v1587_v26  ;;  %v1600_v35 = vadd.f32 %v1597_v34, %v1588_v30 }
 0x16e   : > { %v1601_v36 = vadd.f32 %v1598_v21, %v1589_v31  ;;  %v1602_v37 = vsel %vm1544_vm3, %v1599_v23, 0.0  ;;  %v1603_v38 = vsel %vm1544_vm3, %v1600_v35, 0.0 }
 0x16f   : > { %v1604_v39 = vadd.f32 %v1603_v38, %v1602_v37 }
 0x170   : > { %v1605_v20 = vsel %vm1544_vm3, %v1601_v36, 0.0 }
 0x171   : > { %v1606_v40 = vadd.f32 %v1605_v20, %v1604_v39 }
 0x173   : > { %v1607_v41 = vrot.slane %v1606_v40, 4 }
 0x175   : > { %v1608_v42 = vadd.f32 %v1607_v41, %v1606_v40 }
 0x177   : > { %v1609_v43 = vrot.slane %v1608_v42, 2 }
 0x179   : > { %v1610_v4 = vadd.f32 %v1609_v43, %v1608_v42 }
 0x17b   : > { %v1611_v44 = vrot.slane %v1610_v4, 1 }
 0x17d   : > { %v1612_v8 = vadd.f32 %v1611_v44, %v1610_v4 }
 0x17f   : > { %v1613_v45 = vmul.f32 0.015625, %v1612_v8 }
 0x181   : > { %v1614_v2 = vadd.f32 1e-05, %v1613_v45 }
 0x183   : > { %2303 = vrsqrt.f32 %v1614_v2 }
 0x18d   : > { %v2304_v46 = vpop.eup %2303 }
 0x18e   : > { %v1616_v47 = vmul.f32 %v2304_v46, %v1557_v52  ;;  %v1617_v48 = vmul.f32 %v2304_v46, %v1558_v53  ;;  %v1618_v49 = vmul.f32 %v2304_v46, %v1559_v54  ;;  %v1619_v50 = vmul.f32 %v2304_v46, %v1566_v55 }
 0x18f   : > { %v1620_v51 = vmul.f32 %v2304_v46, %v1567_v56  ;;  %v1621_v60 = vmul.f32 %v2304_v46, %v1568_v57  ;;  %v1622_v61 = vmul.f32 %v2304_v46, %v1578_v58  ;;  %v1623_v62 = vmul.f32 %v2304_v46, %v1579_v59 }
 0x190   : > { %v1624_v1 = vmul.f32 %v2304_v46, %v1580_v9  ;;  %v1625_v3 = vmul.f32 %v2304_v46, %v1590_v17  ;;  %v1626_v7 = vmul.f32 %v2304_v46, %v1591_v18  ;;  %v1627_v11 = vmul.f32 %v2304_v46, %v1592_v27 }
 0x191   : > { %v1628_v12 = vmax.f32 %v1616_v47, 0.0  ;;  %v1629_v13 = vmax.f32 %v1617_v48, 0.0  ;;  %v1630_v10 = vmax.f32 %v1618_v49, 0.0  ;;  %v1631_v0 = vmax.f32 %v1619_v50, 0.0 }
 0x192   : > { %v1632_v63 = vmax.f32 %v1620_v51, 0.0  ;;  %v1633_v5 = vmax.f32 %v1621_v60, 0.0  ;;  %v1634_v6 = vmax.f32 %v1622_v61, 0.0  ;;  %v1635_v52 = vmax.f32 %v1623_v62, 0.0 }
 0x193   : > { %v1636_v53 = vmax.f32 %v1624_v1, 0.0  ;;  %v1637_v54 = vmax.f32 %v1625_v3, 0.0  ;;  %v1638_v55 = vmax.f32 %v1626_v7, 0.0  ;;  %v1639_v56 = vmax.f32 %v1627_v11, 0.0 }
 0x194   : > { %v1973_v57 = vpack.c.bf16 %v1628_v12, %v1628_v12  ;;  %v1974_v58 = vpack.c.bf16 %v1629_v13, %v1629_v13  ;;  %v1975_v59 = vpack.c.bf16 %v1630_v10, %v1630_v10  ;;  %v1976_v9 = vpack.c.bf16 %v1631_v0, %v1631_v0 }
 0x195   : > { %v1977_v14 = vpack.c.bf16 %v1632_v63, %v1632_v63  ;;  %v1978_v15 = vpack.c.bf16 %v1633_v5, %v1633_v5  ;;  %v1979_v16 = vpack.c.bf16 %v1634_v6, %v1634_v6  ;;  %v1980_v17 = vpack.c.bf16 %v1635_v52, %v1635_v52 }
 0x196   : > { %1654 = vst.msk [vmem:[%s221_s12] sm:$0xf] %vm1653_vm4, %v1973_v57  ;;  %1655 = vst.msk [vmem:[%s221_s12 + $0x4] sm:$0xf] %vm1653_vm4, %v1974_v58  ;;  %v1981_v18 = vpack.c.bf16 %v1636_v53, %v1636_v53  ;;  %v1982_v19 = vpack.c.bf16 %v1637_v54, %v1637_v54  ;;  %v1983_v22 = vpack.c.bf16 %v1638_v55, %v1638_v55 }
 0x197   : > { %1656 = vst.msk [vmem:[%s221_s12 + $0x8] sm:$0xf] %vm1653_vm4, %v1975_v59  ;;  %1670 = vst.msk [vmem:[%s221_s12 + $0xc] sm:$0xf] %vm1653_vm4, %v1976_v9  ;;  %v1984_v24 = vpack.c.bf16 %v1639_v56, %v1639_v56 }
 0x198   : > { %1671 = vst.msk [vmem:[%s221_s12 + $0x10] sm:$0xf] %vm1653_vm4, %v1977_v14  ;;  %1672 = vst.msk [vmem:[%s221_s12 + $0x14] sm:$0xf] %vm1653_vm4, %v1978_v15 }
 0x199   : > { %1686 = vst.msk [vmem:[%s221_s12 + $0x18] sm:$0xf] %vm1653_vm4, %v1979_v16  ;;  %1687 = vst.msk [vmem:[%s221_s12 + $0x1c] sm:$0xf] %vm1653_vm4, %v1980_v17 }
 0x19a   : > { %1688 = vst.msk [vmem:[%s221_s12 + $0x20] sm:$0xf] %vm1653_vm4, %v1981_v18  ;;  %1702 = vst.msk [vmem:[%s221_s12 + $0x24] sm:$0xf] %vm1653_vm4, %v1982_v19 }
 0x19b   : > { %1703 = vst.msk [vmem:[%s221_s12 + $0x28] sm:$0xf] %vm1653_vm4, %v1983_v22  ;;  %1704 = vst.msk [vmem:[%s221_s12 + $0x2c] sm:$0xf] %vm1653_vm4, %v1984_v24 }
 0x19c PF: > { %s13_s14 = sadd.s32 1, %s2327_s14   ;;  %s2652_s12 = smov %s2323_s13 }
 0x19d   : > { %p10_p5 = scmp.ge.s32.totalorder %s13_s14, 4   ;;  %s2653_s13 = smov %s2655_s2 }
 0x19f   :  { %12 = sbr.rel (!%p10_p5) target bundleno = 2 (0x2), region = 83 }

// kernel: generator_unet.15
= control target key start
LH: loop header
LB: loop body
LE: loop exit
PB: predicated region body
PF: predicated region fallthrough
CT: control target
= control target key end

     0   :  { %s4178_s12 = smov 0   ;;  %s4180_s13 = smov 0   ;;  %s5392_s0 = inlined_call_operand.vmem [shape: bf16[2,102,16], index: 0, kind: input, shape index: {}]   ;;  %s5393_s1 = inlined_call_operand.vmem [shape: bf16[25,16,3], index: 1, kind: input, shape index: {}]   ;;  %s5394_s2 = inlined_call_operand.vmem [shape: f32[1,3], index: 2, kind: input, shape index: {}]   ;;  %s5395_s3 = inlined_call_operand.vmem [shape: f32[2,320,3], index: 3, kind: output, shape index: {}]  }
   0x1   :  { %s4182_s14 = smov 0  }
   0x2 LB: > { %s25_s15 = sadd.s32 1, %s4150_s13  ;;  %p3120_p0 = scmp.ge.s32.totalorder %s4154_s14, 1  ;;  %s4154_s14 = sphi %s4182_s14, %s13_s14   ;;  %s4150_s13 = sphi %s4180_s13, %s5400_s13   ;;  %s4146_s12 = sphi %s4178_s12, %s5399_s12  }
   0x3   : > { %p27_p1 = scmp.ge.s32.totalorder %s25_s15, 2  ;;  %p168_p2 = scmp.lt.s32.totalorder %s4154_s14, 3 }
   0x5   : > { %s5402_s15 = smov (%p27_p1, %s25_s15), 0  ;;  %p169_p3 = pnand %p3120_p0, %p168_p2 }
   0x6   : > { %v4077_v0 = vld [vmem:[%s5393_s1 + $0x8] sm:$0xff] (!%p169_p3)   ;;  %v5396_v1 = vmov (!%p169_p3), 0.0   ;;  %p202_p4 = scmp.lt.s32.totalorder (!%p169_p3), %s4146_s12, 1  ;;  %vm4157_vm0 = vmmov (!%p169_p3), 0   ;;  %vm267_vm1 = vsmask.f32 (!%p169_p3), 7424 }
   0x7   : > { %172 = sbr.rel (%p169_p3) target bundleno = 743 (0x2e7), region = 32  ;;  %3497 = vmatprep.subr.bf16.mxu0 (!%p169_p3), %v5396_v1  ;;  %4047 = vmatprep.subr.bf16.mxu1 (!%p169_p3), %v5396_v1  ;;  %vm318_vm2 = vcmask (!%p169_p3), 130048   ;;  %v4082_v20 = vld [vmem:[%s5393_s1 + $0x10] sm:$0xff] (!%p169_p3)   ;;  %v4083_v24 = vld [vmem:[%s5393_s1] sm:$0xff] (!%p169_p3)   ;;  %vm538_vm3 = vcmask (!%p169_p3), 1046528   ;;  %v4086_v48 = vld [vmem:[%s5393_s1 + $0x18] sm:$0xff] (!%p169_p3)  }
   0x8   : > { %3498 = vmatpush3.bf16.msra.mxu0 (!%p169_p3), %v4077_v0  ;;  %4048 = vmatpush3.bf16.msra.mxu1 (!%p169_p3), %v4077_v0  ;;  %v4089_v56 = vld [vmem:[%s5393_s1 + $0x28] sm:$0xff] (!%p169_p3)   ;;  %vm1313_vm4 = vcmask (!%p169_p3), 1045504   ;;  %vm661_vm5 = vsmask.f32 (!%p169_p3), 6400  ;;  %vm2968_vm6 = vcmask (!%p169_p3), 23552   ;;  %vm2842_vm8 = vcmask (!%p169_p3), 1044480  }
   0x9   : > { %3499 = vmatprep.mubr.msk.bf16.mxu0 (!%p169_p3), %vm4157_vm0, %v5396_v1  ;;  %3511 = vmatprep.mubr.msk.bf16.mxu1 (!%p169_p3), %vm4157_vm0, %v5396_v1  ;;  %vm1951_vm7 = vsmask.f32 (!%p169_p3), 5376 }
   0xa   : > { %3541 = vmatprep.subr.bf16.mxu0 (!%p169_p3), %v5396_v1  ;;  %3519 = vmatprep.subr.bf16.mxu1 (!%p169_p3), %v5396_v1 }
   0xe   : > { %s5404_s12 = smov (!%p202_p4, %s4146_s12), 1 }
   0xf   : > { %s4049_s18 = smul.u32 52, %s5404_s12 }
  0x10   : > { %s4050_s5 = smul.u32 320, %s5404_s12 }
  0x11   : > { %s4213_s21 = scalar_lea.vmem %s5392_s0, %s4049_s18 }
  0x12   : > { %v223_v2 = vld [vmem:[%s4213_s21] sm:$0xf]  ;;  %v224_v3 = vld [vmem:[%s4213_s21 + $0x4] sm:$0xf]  ;;  %v4220_v5 = vld [vmem:[%s4213_s21 + $0x8] sm:$0xff]   ;;  %s4776_s9 = scalar_lea.vmem %s5395_s3, %s4050_s5 }
  0x13   : > { %v4217_v4 = vcombine.low %v223_v2, %v224_v3  ;;  %v276_v8 = vshll.u32 %v4220_v5, 16  ;;  %v4226_v9 = vld [vmem:[%s4213_s21 + $0x18] sm:$0xff]   ;;  %v4229_v10 = vld [vmem:[%s4213_s21 + $0x20] sm:$0xff]   ;;  %v4232_v11 = vld [vmem:[%s4213_s21 + $0x10] sm:$0xff]   ;;  %v280_v21 = vshrl.u32 %v4220_v5, 16  ;;  %v1008_v46 = vrot.slane %v4220_v5, 1 }
  0x14   : > { %v292_v14 = vshll.u32 %v4226_v9, 16  ;;  %v296_v15 = vshrl.u32 %v4226_v9, 16  ;;  %v300_v16 = vshll.u32 %v4229_v10, 16  ;;  %v4085_v17 = vld [vmem:[%s4213_s21 + $0x28] ss:$0 sps:$4 sm:$0x11]  }
  0x15   : > { %v269_v6 = vshrl.u32 %v4217_v4, 16  ;;  %v271_v7 = vshll.u32 %v4217_v4, 16  ;;  %v278_v13 = vrot.slane %v276_v8, 1  ;;  %v284_v22 = vshll.u32 %v4232_v11, 16  ;;  %v496_v36 = vld [vmem:[%s4213_s21 + $0x4] sm:$0xe] }
  0x16   : > { %v294_v19 = vrot.slane %v292_v14, 1  ;;  %v302_v23 = vrot.slane %v300_v16, 1  ;;  %v304_v27 = vshrl.u32 %v4229_v10, 16  ;;  %v308_v28 = vshll.u32 %v4085_v17, 16  ;;  %v4269_v37 = vld [vmem:[%s4213_s21 + $0x8] sm:$0xf] }
  0x17   : > { %v273_v12 = vrot.slane %v271_v7, 1  ;;  %v282_v30 = vor.u32 %v280_v21, %v278_v13  ;;  %v286_v31 = vrot.slane %v284_v22, 1  ;;  %v288_v35 = vshrl.u32 %v4232_v11, 16  ;;  %v1000_v39 = vld [vmem:[%s4213_s21] sm:$0xe]  ;;  %v4281_v42 = vld [vmem:[%s4213_s21 + $0xc] sm:$0xff]  }
  0x18   : > { %v298_v26 = vor.u32 %v296_v15, %v294_v19  ;;  %v306_v32 = vor.u32 %v304_v27, %v302_v23  ;;  %v310_v33 = vrot.slane %v308_v28, 1  ;;  %v3145_v41 = vcombine.low %v496_v36, %v4269_v37  ;;  %v4288_v44 = vld [vmem:[%s4213_s21 + $0x14] sm:$0xff]   ;;  %v4338_v59 = vld [vmem:[%s4213_s21 + $0x1c] sm:$0xff]   ;;  %v4353_v62 = vld [vmem:[%s4213_s21 + $0x24] sm:$0xff]  }
  0x19   : > { %v274_v18 = vor.u32 %v273_v12, %v269_v6  ;;  %v4264_v34 = vsel %vm267_vm1, %v282_v30, %v286_v31  ;;  %v290_v40 = vor.u32 %v288_v35, %v286_v31  ;;  %v3185_v43 = vcombine.low %v1000_v39, %v224_v3  ;;  %v1306_v7 = vld [vmem:[%s4213_s21 + $0x4] sm:$0xc]  ;;  %v4093_v12 = vld [vmem:[%s4213_s21 + $0x2c] ss:$0 sps:$4 sm:$0x11]  }
  0x1a   : > { %v4253_v29 = vsel %vm267_vm1, %v298_v26, %v302_v23  ;;  %v4272_v38 = vsel %vm267_vm1, %v306_v32, %v310_v33  ;;  %v539_v49 = vrot.slane %v3145_v41, 1  ;;  %v540_v50 = vrot.slane %v4281_v42, 1  ;;  %v4094_v32 = vld [vmem:[%s5393_s1 + $0x20] sm:$0xff]  }
  0x1b   : > { %v4247_v25 = vsel %vm267_vm1, %v274_v18, %v278_v13  ;;  %3512 = vmatmul.mubr.msk.bf16.vlgmr.msra.gmra.mrb[0].mxu1 %vm318_vm2, %v4253_v29  ;;  %v1007_v45 = vrot.slane %v3185_v43, 1  ;;  %v4292_v47 = vsel %vm267_vm1, %v290_v40, %v294_v19  ;;  %v1014_v52 = vrot.slane %v4229_v10, 1 }
  0x1c   : > { %3500 = vmatmul.mubr.msk.bf16.vlgmr.msra.gmra.mrb[0].mxu0 %vm318_vm2, %v4247_v25  ;;  %3520 = vmatpush3.bf16.msra.mxu1 %v4083_v24  ;;  %v1016_v53 = vrot.slane %v4085_v17, 1  ;;  %v542_v55 = vrot.slane %v4288_v44, 1  ;;  %v4323_v57 = vsel %vm538_vm3, %v539_v49, %v540_v50  ;;  %v544_v60 = vrot.slane %v4338_v59, 1 }
  0x1d   : > { %3542 = vmatpush3.bf16.msra.mxu0 %v4082_v20  ;;  %3503 = vmatprep.mubr.msk.bf16.mxu0 %vm4157_vm0, %v5396_v1  ;;  %v4301_v51 = vsel %vm538_vm3, %v1007_v45, %v1008_v46  ;;  %v546_v63 = vrot.slane %v4353_v62, 1  ;;  %v663_v0 = vshrl.u32 %v3145_v41, 16  ;;  %v666_v2 = vshll.u32 %v3145_v41, 16  ;;  %v4095_v41 = vld [vmem:[%s5393_s1 + $0x30] sm:$0xff]  }
  0x1e   : > { %3585 = vmatprep.subr.bf16.mxu0 %v5396_v1  ;;  %3515 = vmatprep.mubr.msk.bf16.mxu1 %vm4157_vm0, %v5396_v1  ;;  %v4309_v54 = vsel %vm538_vm3, %v1014_v52, %v1016_v53  ;;  %v4335_v58 = vsel %vm538_vm3, %v540_v50, %v542_v55  ;;  %v4350_v61 = vsel %vm538_vm3, %v542_v55, %v544_v60  ;;  %v671_v3 = vshrl.u32 %v4281_v42, 16 }
  0x1f   : > { %3563 = vmatprep.subr.bf16.mxu1 %v5396_v1  ;;  %v674_v6 = vshll.u32 %v4281_v42, 16  ;;  %v4368_v8 = vsel %vm538_vm3, %v544_v60, %v546_v63  ;;  %v3210_v13 = vcombine.low %v1306_v7, %v4269_v37  ;;  %v665_v14 = vrot.slane %v663_v0, 1  ;;  %v4437_v60 = vld [vmem:[%s4213_s21 + $0x2c] ss:$0 sps:$4 sm:$0x33]  }
  0x20   : > { %v668_v15 = vrot.slane %v666_v2, 2  ;;  %v673_v16 = vrot.slane %v671_v3, 1  ;;  %v1315_v19 = vrot.slane %v4281_v42, 2  ;;  %v548_v20 = vrot.slane %v4093_v12, 1 }
  0x21   : > { %v676_v17 = vrot.slane %v674_v6, 2  ;;  %v1314_v18 = vrot.slane %v3210_v13, 2  ;;  %v680_v22 = vshrl.u32 %v4288_v44, 16  ;;  %v683_v26 = vshll.u32 %v4288_v44, 16 }
  0x22   : > { %v669_v23 = vor.u32 %v668_v15, %v665_v14  ;;  %v1317_v27 = vrot.slane %v4288_v44, 2  ;;  %v4388_v28 = vsel %vm538_vm3, %v546_v63, %v548_v20  ;;  %v689_v37 = vshrl.u32 %v4338_v59, 16  ;;  %v4097_v14 = vld [vmem:[%s5393_s1 + $0x38] sm:$0xff]   ;;  %v4099_v15 = vld [vmem:[%s5393_s1 + $0x40] sm:$0xff]   ;;  %v4100_v20 = vld [vmem:[%s5393_s1 + $0x48] sm:$0xff]  }
  0x23   : > { %3516 = vmatmul.mubr.msk.bf16.gmra.mrb[4].mxu1 %vm318_vm2, %v4272_v38  ;;  %v4378_v21 = vsel %vm1313_vm4, %v1314_v18, %v1315_v19  ;;  %v677_v24 = vor.u32 %v676_v17, %v673_v16  ;;  %v682_v33 = vrot.slane %v680_v22, 1  ;;  %v685_v35 = vrot.slane %v683_v26, 2  ;;  %v4103_v22 = vld [vmem:[%s5393_s1 + $0x50] sm:$0xff]  }
  0x24   : > { %3504 = vmatmul.mubr.msk.bf16.gmra.mrb[4].mxu0 %vm318_vm2, %v4264_v34  ;;  %3521 = vmatprep.mubr.msk.bf16.mxu1 %vm4157_vm0, %v5396_v1  ;;  %v4391_v30 = vsel %vm1313_vm4, %v1315_v19, %v1317_v27  ;;  %v692_v39 = vshll.u32 %v4338_v59, 16  ;;  %v1319_v40 = vrot.slane %v4338_v59, 2  ;;  %v691_v44 = vrot.slane %v689_v37, 1 }
  0x25   : > { %3507 = vmatprep.mubr.msk.bf16.mxu0 %vm4157_vm0, %v5396_v1  ;;  %v4394_v31 = vsel %vm661_vm5, %v669_v23, %v677_v24  ;;  %v686_v36 = vor.u32 %v685_v35, %v682_v33  ;;  %v698_v49 = vshrl.u32 %v4353_v62, 16  ;;  %v701_v50 = vshll.u32 %v4353_v62, 16  ;;  %v4104_v23 = vld [vmem:[%s5393_s1 + $0x60] sm:$0xff]  }
  0x26   : > { %v4417_v42 = vsel %vm1313_vm4, %v1317_v27, %v1319_v40  ;;  %v694_v45 = vrot.slane %v692_v39, 2  ;;  %v707_v0 = vshrl.u32 %v4437_v60, 16  ;;  %v710_v2 = vshll.u32 %v4437_v60, 16 }
  0x27   : > { %v4420_v43 = vsel %vm661_vm5, %v677_v24, %v686_v36  ;;  %v700_v55 = vrot.slane %v698_v49, 1  ;;  %v1010_v16 = vrot.slane %v4232_v11, 1  ;;  %v1012_v18 = vrot.slane %v4226_v9, 1 }
  0x28   : > { %v709_v6 = vrot.slane %v707_v0, 1  ;;  %v712_v7 = vrot.slane %v710_v2, 2  ;;  %v1321_v24 = vrot.slane %v4353_v62, 2  ;;  %v1323_v27 = vrot.slane %v4437_v60, 2 }
  0x29   : > { %v4499_v17 = vsel %vm538_vm3, %v1008_v46, %v1010_v16  ;;  %v4511_v19 = vsel %vm538_vm3, %v1010_v16, %v1012_v18  ;;  %v4524_v46 = vsel %vm538_vm3, %v1012_v18, %v1014_v52  ;;  %v4101_v52 = vld [vmem:[%s5393_s1 + $0x58] sm:$0xff]  }
  0x2a   : > { %v713_v12 = vor.u32 %v712_v7, %v709_v6  ;;  %v4618_v26 = vsel %vm1313_vm4, %v1319_v40, %v1321_v24  ;;  %v4630_v62 = vsel %vm1313_vm4, %v1321_v24, %v1323_v27  ;;  %v4105_v40 = vld [vmem:[%s5393_s1 + $0x68] sm:$0xff]  }
  0x2b   : > { %3522 = vmatmul.mubr.msk.bf16.vlgmr.msra.gmra.mrb[8].mxu1 %vm318_vm2, %v4217_v4 }
  0x2c   : > { %3508 = vmatmul.mubr.msk.bf16.gmra.mrb[8].mxu0 %vm318_vm2, %v4292_v47  ;;  %3564 = vmatpush3.bf16.msra.mxu1 %v4086_v48  ;;  %v695_v48 = vor.u32 %v694_v45, %v691_v44 }
  0x2d   : > { %3543 = vmatprep.mubr.msk.bf16.mxu0 %vm4157_vm0, %v5396_v1  ;;  %3525 = vmatprep.mubr.msk.bf16.mxu1 %vm4157_vm0, %v5396_v1 }
  0x2e   : > { %3607 = vmatprep.subr.bf16.mxu1 %v5396_v1  ;;  %v4434_v53 = vsel %vm661_vm5, %v686_v36, %v695_v48 }
  0x33   : > { %3526 = vmatmul.mubr.msk.bf16.gmra.mrb[12].mxu1 %vm318_vm2, %v4220_v5 }
  0x34   : > { %3544 = vmatmul.mubr.msk.bf16.vlgmr.msra.gmra.mrb[12].mxu0 %vm318_vm2, %v4323_v57  ;;  %3529 = vmatprep.mubr.msk.bf16.mxu1 %vm4157_vm0, %v5396_v1 }
  0x35   : > { %3586 = vmatpush3.bf16.msra.mxu0 %v4089_v56  ;;  %3547 = vmatprep.mubr.msk.bf16.mxu0 %vm4157_vm0, %v5396_v1  ;;  %v703_v56 = vrot.slane %v701_v50, 2  ;;  %v4106_v50 = vld [vmem:[%s5393_s1 + $0x70] sm:$0xff]  }
  0x36   : > { %3629 = vmatprep.subr.bf16.mxu0 %v5396_v1 }
  0x37   : > { %v704_v63 = vor.u32 %v703_v56, %v700_v55 }
  0x39   : > { %v4450_v3 = vsel %vm661_vm5, %v695_v48, %v704_v63  ;;  %v4461_v13 = vsel %vm661_vm5, %v704_v63, %v713_v12 }
  0x3b   : > { %3530 = vmatmul.mubr.msk.bf16.gmra.mrb[16].mxu1 %vm318_vm2, %v4232_v11 }
  0x3c   : > { %3548 = vmatmul.mubr.msk.bf16.gmra.mrb[16].mxu0 %vm318_vm2, %v4335_v58  ;;  %3533 = vmatprep.mubr.msk.bf16.mxu1 %vm4157_vm0, %v5396_v1 }
  0x3d   : > { %3551 = vmatprep.mubr.msk.bf16.mxu0 %vm4157_vm0, %v5396_v1 }
  0x43   : > { %3534 = vmatmul.mubr.msk.bf16.gmra.mrb[20].mxu1 %vm318_vm2, %v4226_v9 }
  0x44   : > { %3552 = vmatmul.mubr.msk.bf16.gmra.mrb[20].mxu0 %vm318_vm2, %v4350_v61  ;;  %3537 = vmatprep.mubr.msk.bf16.mxu1 %vm4157_vm0, %v5396_v1 }
  0x45   : > { %3555 = vmatprep.mubr.msk.bf16.mxu0 %vm4157_vm0, %v5396_v1 }
  0x4b   : > { %3538 = vmatmul.mubr.msk.bf16.gmra.mrb[24].mxu1 %vm318_vm2, %v4229_v10 }
  0x4c   : > { %3556 = vmatmul.mubr.msk.bf16.gmra.mrb[24].mxu0 %vm318_vm2, %v4368_v8  ;;  %3565 = vmatprep.mubr.msk.bf16.mxu1 %vm4157_vm0, %v5396_v1 }
  0x4d   : > { %3559 = vmatprep.mubr.msk.bf16.mxu0 %vm4157_vm0, %v5396_v1 }
  0x53   : > { %3566 = vmatmul.mubr.msk.bf16.vlgmr.msra.gmra.mrb[28].mxu1 %vm318_vm2, %v4394_v31 }
  0x54   : > { %3560 = vmatmul.mubr.msk.bf16.gmra.mrb[28].mxu0 %vm318_vm2, %v4388_v28  ;;  %3608 = vmatpush3.bf16.msra.mxu1 %v4094_v32 }
  0x55   : > { %3587 = vmatprep.mubr.msk.bf16.mxu0 %vm4157_vm0, %v5396_v1  ;;  %3569 = vmatprep.mubr.msk.bf16.mxu1 %vm4157_vm0, %v5396_v1 }
  0x56   : > { %3651 = vmatprep.subr.bf16.mxu1 %v5396_v1 }
  0x5b   : > { %3570 = vmatmul.mubr.msk.bf16.gmra.mrb[32].mxu1 %vm318_vm2, %v4420_v43 }
  0x5c   : > { %3588 = vmatmul.mubr.msk.bf16.vlgmr.msra.gmra.mrb[32].mxu0 %vm318_vm2, %v4247_v25  ;;  %3573 = vmatprep.mubr.msk.bf16.mxu1 %vm4157_vm0, %v5396_v1 }
  0x5d   : > { %3630 = vmatpush3.bf16.msra.mxu0 %v4095_v41  ;;  %3591 = vmatprep.mubr.msk.bf16.mxu0 %vm4157_vm0, %v5396_v1 }
  0x5e   : > { %3673 = vmatprep.subr.bf16.mxu0 %v5396_v1 }
  0x63   : > { %3574 = vmatmul.mubr.msk.bf16.gmra.mrb[36].mxu1 %vm318_vm2, %v4434_v53 }
  0x64   : > { %3592 = vmatmul.mubr.msk.bf16.gmra.mrb[36].mxu0 %vm318_vm2, %v4264_v34  ;;  %3577 = vmatprep.mubr.msk.bf16.mxu1 %vm4157_vm0, %v5396_v1 }
  0x65   : > { %3595 = vmatprep.mubr.msk.bf16.mxu0 %vm4157_vm0, %v5396_v1 }
  0x6b   : > { %3578 = vmatmul.mubr.msk.bf16.gmra.mrb[40].mxu1 %vm318_vm2, %v4450_v3 }
  0x6c   : > { %3596 = vmatmul.mubr.msk.bf16.gmra.mrb[40].mxu0 %vm318_vm2, %v4292_v47  ;;  %3581 = vmatprep.mubr.msk.bf16.mxu1 %vm4157_vm0, %v5396_v1 }
  0x6d   : > { %3599 = vmatprep.mubr.msk.bf16.mxu0 %vm4157_vm0, %v5396_v1 }
  0x73   : > { %3582 = vmatmul.mubr.msk.bf16.gmra.mrb[44].mxu1 %vm318_vm2, %v4461_v13 }
  0x74   : > { %3600 = vmatmul.mubr.msk.bf16.gmra.mrb[44].mxu0 %vm318_vm2, %v4253_v29  ;;  %3609 = vmatprep.mubr.msk.bf16.mxu1 %vm4157_vm0, %v5396_v1 }
  0x75   : > { %3603 = vmatprep.mubr.msk.bf16.mxu0 %vm4157_vm0, %v5396_v1 }
  0x7b   : > { %3610 = vmatmul.mubr.msk.bf16.vlgmr.msra.gmra.mrb[48].mxu1 %vm318_vm2, %v4217_v4 }
  0x7c   : > { %3604 = vmatmul.mubr.msk.bf16.gmra.mrb[48].mxu0 %vm318_vm2, %v4272_v38  ;;  %3652 = vmatpush3.bf16.msra.mxu1 %v4097_v14 }
  0x7d   : > { %3631 = vmatprep.mubr.msk.bf16.mxu0 %vm4157_vm0, %v5396_v1  ;;  %3613 = vmatprep.mubr.msk.bf16.mxu1 %vm4157_vm0, %v5396_v1 }
  0x7e   : > { %3695 = vmatprep.subr.bf16.mxu1 %v5396_v1 }
  0x83   : > { %3614 = vmatmul.mubr.msk.bf16.gmra.mrb[52].mxu1 %vm318_vm2, %v4220_v5 }
  0x84   : > { %3632 = vmatmul.mubr.msk.bf16.vlgmr.msra.gmra.mrb[52].mxu0 %vm318_vm2, %v4301_v51  ;;  %3617 = vmatprep.mubr.msk.bf16.mxu1 %vm4157_vm0, %v5396_v1 }
  0x85   : > { %3674 = vmatpush3.bf16.msra.mxu0 %v4099_v15  ;;  %3635 = vmatprep.mubr.msk.bf16.mxu0 %vm4157_vm0, %v5396_v1 }
  0x86   : > { %3717 = vmatprep.subr.bf16.mxu0 %v5396_v1 }
  0x8b   : > { %3618 = vmatmul.mubr.msk.bf16.gmra.mrb[56].mxu1 %vm318_vm2, %v4232_v11 }
  0x8c   : > { %3636 = vmatmul.mubr.msk.bf16.gmra.mrb[56].mxu0 %vm318_vm2, %v4499_v17  ;;  %3621 = vmatprep.mubr.msk.bf16.mxu1 %vm4157_vm0, %v5396_v1 }
  0x8d   : > { %3639 = vmatprep.mubr.msk.bf16.mxu0 %vm4157_vm0, %v5396_v1 }
  0x93   : > { %3622 = vmatmul.mubr.msk.bf16.gmra.mrb[60].mxu1 %vm318_vm2, %v4226_v9 }
  0x94   : > { %3640 = vmatmul.mubr.msk.bf16.gmra.mrb[60].mxu0 %vm318_vm2, %v4511_v19  ;;  %3625 = vmatprep.mubr.msk.bf16.mxu1 %vm4157_vm0, %v5396_v1 }
  0x95   : > { %3643 = vmatprep.mubr.msk.bf16.mxu0 %vm4157_vm0, %v5396_v1 }
  0x9b   : > { %3626 = vmatmul.mubr.msk.bf16.gmra.mrb[64].mxu1 %vm318_vm2, %v4229_v10 }
  0x9c   : > { %3644 = vmatmul.mubr.msk.bf16.gmra.mrb[64].mxu0 %vm318_vm2, %v4524_v46  ;;  %3653 = vmatprep.mubr.msk.bf16.mxu1 %vm4157_vm0, %v5396_v1 }
  0x9d   : > { %3647 = vmatprep.mubr.msk.bf16.mxu0 %vm4157_vm0, %v5396_v1 }
  0xa3   : > { %3654 = vmatmul.mubr.msk.bf16.vlgmr.msra.gmra.mrb[68].mxu1 %vm318_vm2, %v4323_v57 }
  0xa4   : > { %3648 = vmatmul.mubr.msk.bf16.gmra.mrb[68].mxu0 %vm318_vm2, %v4309_v54  ;;  %3696 = vmatpush3.bf16.msra.mxu1 %v4100_v20 }
  0xa5   : > { %3675 = vmatprep.mubr.msk.bf16.mxu0 %vm4157_vm0, %v5396_v1  ;;  %3657 = vmatprep.mubr.msk.bf16.mxu1 %vm4157_vm0, %v5396_v1 }
  0xa6   : > { %3739 = vmatprep.subr.bf16.mxu1 %v5396_v1 }
  0xab   : > { %3658 = vmatmul.mubr.msk.bf16.gmra.mrb[72].mxu1 %vm318_vm2, %v4335_v58 }
  0xac   : > { %3676 = vmatmul.mubr.msk.bf16.vlgmr.msra.gmra.mrb[72].mxu0 %vm318_vm2, %v4394_v31  ;;  %3661 = vmatprep.mubr.msk.bf16.mxu1 %vm4157_vm0, %v5396_v1 }
  0xad   : > { %3718 = vmatpush3.bf16.msra.mxu0 %v4101_v52  ;;  %3679 = vmatprep.mubr.msk.bf16.mxu0 %vm4157_vm0, %v5396_v1 }
  0xae   : > { %3761 = vmatprep.subr.bf16.mxu0 %v5396_v1 }
  0xb3   : > { %3662 = vmatmul.mubr.msk.bf16.gmra.mrb[76].mxu1 %vm318_vm2, %v4350_v61 }
  0xb4   : > { %3680 = vmatmul.mubr.msk.bf16.gmra.mrb[76].mxu0 %vm318_vm2, %v4420_v43  ;;  %3665 = vmatprep.mubr.msk.bf16.mxu1 %vm4157_vm0, %v5396_v1 }
  0xb5   : > { %3683 = vmatprep.mubr.msk.bf16.mxu0 %vm4157_vm0, %v5396_v1 }
  0xbb   : > { %3666 = vmatmul.mubr.msk.bf16.gmra.mrb[80].mxu1 %vm318_vm2, %v4368_v8 }
  0xbc   : > { %3684 = vmatmul.mubr.msk.bf16.gmra.mrb[80].mxu0 %vm318_vm2, %v4434_v53  ;;  %3669 = vmatprep.mubr.msk.bf16.mxu1 %vm4157_vm0, %v5396_v1 }
  0xbd   : > { %3687 = vmatprep.mubr.msk.bf16.mxu0 %vm4157_vm0, %v5396_v1 }
  0xc3   : > { %3670 = vmatmul.mubr.msk.bf16.gmra.mrb[84].mxu1 %vm318_vm2, %v4388_v28 }
  0xc4   : > { %3688 = vmatmul.mubr.msk.bf16.gmra.mrb[84].mxu0 %vm318_vm2, %v4450_v3  ;;  %3697 = vmatprep.mubr.msk.bf16.mxu1 %vm4157_vm0, %v5396_v1 }
  0xc5   : > { %3691 = vmatprep.mubr.msk.bf16.mxu0 %vm4157_vm0, %v5396_v1 }
  0xcb   : > { %3698 = vmatmul.mubr.msk.bf16.vlgmr.msra.gmra.mrb[88].mxu1 %vm318_vm2, %v4378_v21 }
  0xcc   : > { %3692 = vmatmul.mubr.msk.bf16.gmra.mrb[88].mxu0 %vm318_vm2, %v4461_v13  ;;  %3740 = vmatpush3.bf16.msra.mxu1 %v4103_v22 }
  0xcd   : > { %3719 = vmatprep.mubr.msk.bf16.mxu0 %vm4157_vm0, %v5396_v1  ;;  %3701 = vmatprep.mubr.msk.bf16.mxu1 %vm4157_vm0, %v5396_v1 }
  0xce   : > { %3783 = vmatprep.subr.bf16.mxu1 %v5396_v1 }
  0xd3   : > { %3702 = vmatmul.mubr.msk.bf16.gmra.mrb[92].mxu1 %vm318_vm2, %v4391_v30 }
  0xd4   : > { %3720 = vmatmul.mubr.msk.bf16.vlgmr.msra.gmra.mrb[92].mxu0 %vm318_vm2, %v4247_v25  ;;  %3705 = vmatprep.mubr.msk.bf16.mxu1 %vm4157_vm0, %v5396_v1 }
  0xd5   : > { %3762 = vmatpush3.bf16.msra.mxu0 %v4104_v23  ;;  %3723 = vmatprep.mubr.msk.bf16.mxu0 %vm4157_vm0, %v5396_v1 }
  0xd6   : > { %3805 = vmatprep.subr.bf16.mxu0 %v5396_v1 }
  0xdb   : > { %3706 = vmatmul.mubr.msk.bf16.gmra.mrb[96].mxu1 %vm318_vm2, %v4417_v42 }
  0xdc   : > { %3724 = vmatmul.mubr.msk.bf16.gmra.mrb[96].mxu0 %vm318_vm2, %v4264_v34  ;;  %3709 = vmatprep.mubr.msk.bf16.mxu1 %vm4157_vm0, %v5396_v1 }
  0xdd   : > { %3727 = vmatprep.mubr.msk.bf16.mxu0 %vm4157_vm0, %v5396_v1 }
  0xe3   : > { %3710 = vmatmul.mubr.msk.bf16.gmra.mrb[100].mxu1 %vm318_vm2, %v4618_v26 }
  0xe4   : > { %3728 = vmatmul.mubr.msk.bf16.gmra.mrb[100].mxu0 %vm318_vm2, %v4292_v47  ;;  %3713 = vmatprep.mubr.msk.bf16.mxu1 %vm4157_vm0, %v5396_v1 }
  0xe5   : > { %3731 = vmatprep.mubr.msk.bf16.mxu0 %vm4157_vm0, %v5396_v1 }
  0xeb   : > { %3714 = vmatmul.mubr.msk.bf16.gmra.mrb[104].mxu1 %vm318_vm2, %v4630_v62 }
  0xec   : > { %3732 = vmatmul.mubr.msk.bf16.gmra.mrb[104].mxu0 %vm318_vm2, %v4253_v29  ;;  %3741 = vmatprep.mubr.msk.bf16.mxu1 %vm4157_vm0, %v5396_v1 }
  0xed   : > { %3735 = vmatprep.mubr.msk.bf16.mxu0 %vm4157_vm0, %v5396_v1 }
  0xee   : > { %v4640_v35 = vpop.f32.mrb[0].mxu1 }
  0xef   : > { %v368_v59 = vpop.f32.mrb[0].mxu0  ;;  %v3513_v37 = vpop.f32.mrb[1].mxu1 }
  0xf0   : > { %v3501_v32 = vpop.f32.mrb[1].mxu0  ;;  %v4642_v39 = vpop.f32.mrb[2].mxu1 }
  0xf1   : > { %v371_v33 = vpop.f32.mrb[2].mxu0  ;;  %v3514_v41 = vpop.f32.mrb[3].mxu1 }
  0xf2   : > { %v3502_v36 = vpop.f32.mrb[3].mxu0 }
  0xf3   : > { %3742 = vmatmul.mubr.msk.bf16.vlgmr.msra.gmra.mrb[108].mxu1 %vm318_vm2, %v4217_v4 }
  0xf4   : > { %3736 = vmatmul.mubr.msk.bf16.gmra.mrb[108].mxu0 %vm318_vm2, %v4272_v38  ;;  %3784 = vmatpush3.bf16.msra.mxu1 %v4105_v40 }
  0xf5   : > { %3763 = vmatprep.mubr.msk.bf16.mxu0 %vm4157_vm0, %v5396_v1  ;;  %3745 = vmatprep.mubr.msk.bf16.mxu1 %vm4157_vm0, %v5396_v1 }
  0xf6   : > { %3827 = vmatprep.subr.bf16.mxu1 %v5396_v1  ;;  %v4656_v49 = vpop.f32.mrb[4].mxu1 }
  0xf7   : > { %v376_v44 = vpop.f32.mrb[4].mxu0  ;;  %v3517_v56 = vpop.f32.mrb[5].mxu1 }
  0xf8   : > { %v3505_v45 = vpop.f32.mrb[5].mxu0  ;;  %v4661_v60 = vpop.f32.mrb[6].mxu1 }
  0xf9   : > { %v379_v48 = vpop.f32.mrb[6].mxu0  ;;  %v3518_v63 = vpop.f32.mrb[7].mxu1 }
  0xfa   : > { %v3506_v55 = vpop.f32.mrb[7].mxu0 }
  0xfb   : > { %3746 = vmatmul.mubr.msk.bf16.gmra.mrb[112].mxu1 %vm318_vm2, %v4220_v5 }
  0xfc   : > { %3764 = vmatmul.mubr.msk.bf16.vlgmr.msra.gmra.mrb[112].mxu0 %vm318_vm2, %v4323_v57  ;;  %3749 = vmatprep.mubr.msk.bf16.mxu1 %vm4157_vm0, %v5396_v1 }
  0xfd   : > { %3806 = vmatpush3.bf16.msra.mxu0 %v4106_v50  ;;  %3767 = vmatprep.mubr.msk.bf16.mxu0 %vm4157_vm0, %v5396_v1 }
  0xfe   : > { %3849 = vmatprep.subr.bf16.mxu0 %v5396_v1  ;;  %v457_v6 = vpop.f32.mrb[8].mxu1 }
  0xff   : > { %v384_v0 = vpop.f32.mrb[8].mxu0  ;;  %v458_v12 = vadd.f32 %v457_v6, %v368_v59  ;;  %v3523_v14 = vpop.f32.mrb[9].mxu1 }
 0x100   : > { %v3509_v2 = vpop.f32.mrb[9].mxu0  ;;  %v460_v16 = vpop.f32.mrb[10].mxu1  ;;  %v1788_v14 = vld [vmem:[%s4213_s21 + $0xc] sm:$0xf] }
 0x101   : > { %v387_v7 = vpop.f32.mrb[10].mxu0  ;;  %v461_v18 = vadd.f32 %v460_v16, %v371_v33  ;;  %v3524_v20 = vpop.f32.mrb[11].mxu1 }
 0x102   : > { %v3510_v15 = vpop.f32.mrb[11].mxu0 }
 0x103   : > { %3750 = vmatmul.mubr.msk.bf16.gmra.mrb[116].mxu1 %vm318_vm2, %v4232_v11 }
 0x104   : > { %3768 = vmatmul.mubr.msk.bf16.gmra.mrb[116].mxu0 %vm318_vm2, %v4335_v58  ;;  %3753 = vmatprep.mubr.msk.bf16.mxu1 %vm4157_vm0, %v5396_v1 }
 0x105   : > { %3771 = vmatprep.mubr.msk.bf16.mxu0 %vm4157_vm0, %v5396_v1 }
 0x106   : > { %v465_v23 = vpop.f32.mrb[12].mxu1 }
 0x107   : > { %v605_v5 = vpop.f32.mrb[12].mxu0  ;;  %v466_v27 = vadd.f32 %v465_v23, %v376_v44  ;;  %v3527_v59 = vpop.f32.mrb[13].mxu1 }
 0x108   : > { %v4680_v52 = vadd.f32 %v605_v5, %v458_v12  ;;  %v3545_v22 = vpop.f32.mrb[13].mxu0  ;;  %v468_v36 = vpop.f32.mrb[14].mxu1  ;;  %v1787_v12 = vld [vmem:[%s4213_s21 + $0x8] sm:$0xc]  ;;  %v4711_v5 = vld [vmem:[%s4213_s21 + $0x10] sm:$0xff]   ;;  %v4107_v59 = vld [vmem:[%s5393_s1 + $0x78] sm:$0xff]  }
 0x109   : > { %v608_v24 = vpop.f32.mrb[14].mxu0  ;;  %v469_v37 = vadd.f32 %v468_v36, %v379_v48  ;;  %v3528_v11 = vpop.f32.mrb[15].mxu1  ;;  %v4708_v20 = vcombine.low %v1787_v12, %v1788_v14 }
 0x10a   : > { %v4682_v32 = vadd.f32 %v608_v24, %v461_v18  ;;  %v3546_v33 = vpop.f32.mrb[15].mxu0 }
 0x10b   : > { %3754 = vmatmul.mubr.msk.bf16.gmra.mrb[120].mxu1 %vm318_vm2, %v4226_v9 }
 0x10c   : > { %3772 = vmatmul.mubr.msk.bf16.gmra.mrb[120].mxu0 %vm318_vm2, %v4350_v61  ;;  %3757 = vmatprep.mubr.msk.bf16.mxu1 %vm4157_vm0, %v5396_v1 }
 0x10d   : > { %3775 = vmatprep.mubr.msk.bf16.mxu0 %vm4157_vm0, %v5396_v1 }
 0x10e   : > { %v473_v45 = vpop.f32.mrb[16].mxu1 }
 0x10f   : > { %v613_v40 = vpop.f32.mrb[16].mxu0  ;;  %v474_v50 = vadd.f32 %v473_v45, %v384_v0  ;;  %v3531_v55 = vpop.f32.mrb[17].mxu1 }
 0x110   : > { %v4692_v41 = vadd.f32 %v613_v40, %v466_v27  ;;  %v3549_v44 = vpop.f32.mrb[17].mxu0  ;;  %v476_v2 = vpop.f32.mrb[18].mxu1  ;;  %v4740_v55 = vld [vmem:[%s4213_s21 + $0x18] sm:$0xff]  }
 0x111   : > { %v616_v48 = vpop.f32.mrb[18].mxu0  ;;  %v477_v6 = vadd.f32 %v476_v2, %v387_v7  ;;  %v3532_v9 = vpop.f32.mrb[19].mxu1 }
 0x112   : > { %v4694_v56 = vadd.f32 %v616_v48, %v469_v37  ;;  %v3550_v63 = vpop.f32.mrb[19].mxu0  ;;  %v1830_v37 = vrot.slane %v4711_v5, 2 }
 0x113   : > { %3758 = vmatmul.mubr.msk.bf16.gmra.mrb[124].mxu1 %vm318_vm2, %v4229_v10 }
 0x114   : > { %3776 = vmatmul.mubr.msk.bf16.gmra.mrb[124].mxu0 %vm318_vm2, %v4368_v8  ;;  %3785 = vmatprep.mubr.msk.bf16.mxu1 %vm4157_vm0, %v5396_v1 }
 0x115   : > { %3779 = vmatprep.mubr.msk.bf16.mxu0 %vm4157_vm0, %v5396_v1 }
 0x116   : > { %v481_v7 = vpop.f32.mrb[20].mxu1 }
 0x117   : > { %v621_v0 = vpop.f32.mrb[20].mxu0  ;;  %v482_v22 = vadd.f32 %v481_v7, %v4640_v35  ;;  %v3535_v23 = vpop.f32.mrb[21].mxu1  ;;  %v1829_v35 = vrot.slane %v4708_v20, 2 }
 0x118   : > { %v4706_v15 = vadd.f32 %v621_v0, %v474_v50  ;;  %v3553_v16 = vpop.f32.mrb[21].mxu0  ;;  %v484_v27 = vpop.f32.mrb[22].mxu1  ;;  %v4110_v50 = vld [vmem:[%s5393_s1 + $0x88] sm:$0xff]  }
 0x119   : > { %v624_v18 = vpop.f32.mrb[22].mxu0  ;;  %v485_v33 = vadd.f32 %v484_v27, %v4642_v39  ;;  %v3536_v36 = vpop.f32.mrb[23].mxu1  ;;  %v4734_v48 = vsel %vm1313_vm4, %v1829_v35, %v1830_v37  ;;  %v1832_v16 = vrot.slane %v4740_v55, 2  ;;  %v4768_v27 = vld [vmem:[%s4213_s21 + $0x20] sm:$0xff]  }
 0x11a   : > { %v4714_v24 = vadd.f32 %v624_v18, %v477_v6  ;;  %v3554_v10 = vpop.f32.mrb[23].mxu0 }
 0x11b   : > { %3786 = vmatmul.mubr.msk.bf16.vlgmr.msra.gmra.mrb[128].mxu1 %vm318_vm2, %v4394_v31  ;;  %v4765_v10 = vsel %vm1313_vm4, %v1830_v37, %v1832_v16 }
 0x11c   : > { %3780 = vmatmul.mubr.msk.bf16.gmra.mrb[128].mxu0 %vm318_vm2, %v4388_v28  ;;  %3828 = vmatpush3.bf16.msra.mxu1 %v4107_v59 }
 0x11d   : > { %3807 = vmatprep.mubr.msk.bf16.mxu0 %vm4157_vm0, %v5396_v1  ;;  %3789 = vmatprep.mubr.msk.bf16.mxu1 %vm4157_vm0, %v5396_v1 }
 0x11e   : > { %3871 = vmatprep.subr.bf16.mxu1 %v5396_v1  ;;  %v489_v44 = vpop.f32.mrb[24].mxu1 }
 0x11f   : > { %v629_v11 = vpop.f32.mrb[24].mxu0  ;;  %v490_v63 = vadd.f32 %v489_v44, %v4656_v49  ;;  %v3539_v2 = vpop.f32.mrb[25].mxu1  ;;  %v1834_v44 = vrot.slane %v4768_v27, 2 }
 0x120   : > { %v4730_v39 = vadd.f32 %v629_v11, %v482_v22  ;;  %v3557_v40 = vpop.f32.mrb[25].mxu0  ;;  %v492_v12 = vpop.f32.mrb[26].mxu1  ;;  %v4762_v22 = vld [vmem:[%s5394_s2] ss:$0 sm:$0xff] }
 0x121   : > { %v632_v45 = vpop.f32.mrb[26].mxu0  ;;  %v493_v14 = vadd.f32 %v492_v12, %v4661_v60  ;;  %v3540_v0 = vpop.f32.mrb[27].mxu1  ;;  %v4802_v12 = vld [vmem:[%s4213_s21 + $0x28] sm:$0xff]  }
 0x122   : > { %v4743_v6 = vadd.f32 %v632_v45, %v485_v33  ;;  %v3558_v9 = vpop.f32.mrb[27].mxu0 }
 0x123   : > { %3790 = vmatmul.mubr.msk.bf16.gmra.mrb[132].mxu1 %vm318_vm2, %v4420_v43  ;;  %v4799_v9 = vsel %vm1313_vm4, %v1832_v16, %v1834_v44  ;;  %v1836_v16 = vrot.slane %v4802_v12, 2 }
 0x124   : > { %3808 = vmatmul.mubr.msk.bf16.vlgmr.msra.gmra.mrb[132].mxu0 %vm318_vm2, %v4734_v48  ;;  %3793 = vmatprep.mubr.msk.bf16.mxu1 %vm4157_vm0, %v5396_v1 }
 0x125   : > { %3850 = vmatpush3.bf16.msra.mxu0 %v4110_v50  ;;  %3811 = vmatprep.mubr.msk.bf16.mxu0 %vm4157_vm0, %v5396_v1 }
 0x126   : > { %3893 = vmatprep.subr.bf16.mxu0 %v5396_v1  ;;  %v770_v18 = vpop.f32.mrb[28].mxu1 }
 0x127   : > { %v637_v49 = vpop.f32.mrb[28].mxu0  ;;  %v809_v59 = vadd.f32 %v770_v18, %v4680_v52  ;;  %v3567_v33 = vpop.f32.mrb[29].mxu1 }
 0x128   : > { %v4757_v60 = vadd.f32 %v637_v49, %v490_v63  ;;  %v3561_v7 = vpop.f32.mrb[29].mxu0  ;;  %v773_v11 = vpop.f32.mrb[30].mxu1 }
 0x129   : > { %v640_v23 = vpop.f32.mrb[30].mxu0  ;;  %v826_v37 = vadd.f32 %v4762_v22, %v809_v59  ;;  %v810_v40 = vadd.f32 %v773_v11, %v4682_v32  ;;  %v3568_v52 = vpop.f32.mrb[31].mxu1  ;;  %v1961_v11 = vshrl.u32 %v4711_v5, 16 }
 0x12a   : > { %v4771_v36 = vadd.f32 %v640_v23, %v493_v14  ;;  %v3562_v35 = vpop.f32.mrb[31].mxu0 }
 0x12b   : > { %2969 = vst.msk [vmem:[%s4776_s9] sm:$0xff] %vm2968_vm6, %v826_v37  ;;  %v827_v45 = vadd.f32 %v4762_v22, %v810_v40  ;;  %3794 = vmatmul.mubr.msk.bf16.gmra.mrb[136].mxu1 %vm318_vm2, %v4434_v53  ;;  %v1956_v35 = vshll.u32 %v4708_v20, 16  ;;  %v1964_v37 = vshll.u32 %v4711_v5, 16 }
 0x12c   : > { %3812 = vmatmul.mubr.msk.bf16.gmra.mrb[136].mxu0 %vm318_vm2, %v4765_v10  ;;  %3797 = vmatprep.mubr.msk.bf16.mxu1 %vm4157_vm0, %v5396_v1 }
 0x12d   : > { %3815 = vmatprep.mubr.msk.bf16.mxu0 %vm4157_vm0, %v5396_v1  ;;  %2970 = vst.msk [vmem:[%s4776_s9 + $0x8] sm:$0xff] %vm2968_vm6, %v827_v45  ;;  %v1966_v5 = vrot.slane %v1964_v37, 3  ;;  %v1970_v37 = vshrl.u32 %v4740_v55, 16 }
 0x12e   : > { %v778_v63 = vpop.f32.mrb[32].mxu1 }
 0x12f   : > { %v4790_v50 = vpop.f32.mrb[32].mxu0  ;;  %v811_v14 = vadd.f32 %v778_v63, %v4692_v41  ;;  %v3571_v0 = vpop.f32.mrb[33].mxu1  ;;  %v4114_v63 = vld [vmem:[%s4213_s21 + $0x30] ss:$0 sps:$4 sm:$0x33]  }
 0x130   : > { %v3589_v32 = vpop.f32.mrb[33].mxu0  ;;  %v781_v7 = vpop.f32.mrb[34].mxu1 }
 0x131   : > { %v4796_v2 = vpop.f32.mrb[34].mxu0  ;;  %v828_v18 = vadd.f32 %v4762_v22, %v811_v14  ;;  %v812_v23 = vadd.f32 %v781_v7, %v4694_v56  ;;  %v3572_v59 = vpop.f32.mrb[35].mxu1  ;;  %v1953_v56 = vshrl.u32 %v4708_v20, 16  ;;  %v4830_v32 = vsel %vm1313_vm4, %v1834_v44, %v1836_v16 }
 0x132   : > { %v3590_v49 = vpop.f32.mrb[35].mxu0 }
 0x133   : > { %2971 = vst.msk [vmem:[%s4776_s9 + $0x10] sm:$0xff] %vm2968_vm6, %v828_v18  ;;  %v829_v41 = vadd.f32 %v4762_v22, %v812_v23  ;;  %3798 = vmatmul.mubr.msk.bf16.gmra.mrb[140].mxu1 %vm318_vm2, %v4450_v3  ;;  %v1955_v7 = vrot.slane %v1953_v56, 2  ;;  %v1958_v18 = vrot.slane %v1956_v35, 3  ;;  %v1963_v23 = vrot.slane %v1961_v11, 2 }
 0x134   : > { %3816 = vmatmul.mubr.msk.bf16.gmra.mrb[140].mxu0 %vm318_vm2, %v4799_v9  ;;  %3801 = vmatprep.mubr.msk.bf16.mxu1 %vm4157_vm0, %v5396_v1 }
 0x135   : > { %3819 = vmatprep.mubr.msk.bf16.mxu0 %vm4157_vm0, %v5396_v1  ;;  %2972 = vst.msk [vmem:[%s4776_s9 + $0x18] sm:$0xff] %vm2968_vm6, %v829_v41  ;;  %v1967_v11 = vor.u32 %v1966_v5, %v1963_v23  ;;  %v1972_v5 = vrot.slane %v1970_v37, 2 }
 0x136   : > { %v786_v52 = vpop.f32.mrb[36].mxu1 }
 0x137   : > { %v4817_v33 = vpop.f32.mrb[36].mxu0  ;;  %v813_v14 = vadd.f32 %v786_v52, %v4706_v15  ;;  %v3575_v0 = vpop.f32.mrb[37].mxu1  ;;  %v1838_v15 = vrot.slane %v4114_v63, 2 }
 0x138   : > { %v3593_v40 = vpop.f32.mrb[37].mxu0  ;;  %v789_v20 = vpop.f32.mrb[38].mxu1 }
 0x139   : > { %v4827_v45 = vpop.f32.mrb[38].mxu0  ;;  %v830_v59 = vadd.f32 %v4762_v22, %v813_v14  ;;  %v814_v41 = vadd.f32 %v789_v20, %v4714_v24  ;;  %v3576_v44 = vpop.f32.mrb[39].mxu1  ;;  %v1959_v24 = vor.u32 %v1958_v18, %v1955_v7  ;;  %v1973_v40 = vshll.u32 %v4740_v55, 16  ;;  %v4115_v55 = vld [vmem:[%s5393_s1 + $0x80] sm:$0xff]  }
 0x13a   : > { %v3594_v49 = vpop.f32.mrb[39].mxu0  ;;  %v4856_v0 = vsel %vm1313_vm4, %v1836_v16, %v1838_v15 }
 0x13b   : > { %2973 = vst.msk [vmem:[%s4776_s9 + $0x20] sm:$0xff] %vm2968_vm6, %v830_v59  ;;  %v831_v56 = vadd.f32 %v4762_v22, %v814_v41  ;;  %3802 = vmatmul.mubr.msk.bf16.gmra.mrb[144].mxu1 %vm318_vm2, %v4461_v13  ;;  %v4860_v23 = vsel %vm1951_vm7, %v1959_v24, %v1967_v11  ;;  %v1975_v59 = vrot.slane %v1973_v40, 3  ;;  %v1982_v24 = vshll.u32 %v4768_v27, 16 }
 0x13c   : > { %3820 = vmatmul.mubr.msk.bf16.gmra.mrb[144].mxu0 %vm318_vm2, %v4830_v32  ;;  %3829 = vmatprep.mubr.msk.bf16.mxu1 %vm4157_vm0, %v5396_v1 }
 0x13d   : > { %3823 = vmatprep.mubr.msk.bf16.mxu0 %vm4157_vm0, %v5396_v1  ;;  %2974 = vst.msk [vmem:[%s4776_s9 + $0x28] sm:$0xff] %vm2968_vm6, %v831_v56  ;;  %v1979_v56 = vshrl.u32 %v4768_v27, 16 }
 0x13e   : > { %v794_v63 = vpop.f32.mrb[40].mxu1 }
 0x13f   : > { %v4845_v35 = vpop.f32.mrb[40].mxu0  ;;  %v815_v49 = vadd.f32 %v794_v63, %v4730_v39  ;;  %v3579_v20 = vpop.f32.mrb[41].mxu1  ;;  %v4116_v63 = vld [vmem:[%s5393_s1 + $0x90] sm:$0xff]  }
 0x140   : > { %v3597_v52 = vpop.f32.mrb[41].mxu0  ;;  %v797_v18 = vpop.f32.mrb[42].mxu1 }
 0x141   : > { %v4853_v14 = vpop.f32.mrb[42].mxu0  ;;  %v832_v41 = vadd.f32 %v4762_v22, %v815_v49  ;;  %v816_v16 = vadd.f32 %v797_v18, %v4743_v6  ;;  %v3580_v39 = vpop.f32.mrb[43].mxu1  ;;  %v1976_v6 = vor.u32 %v1975_v59, %v1972_v5  ;;  %v1981_v5 = vrot.slane %v1979_v56, 2 }
 0x142   : > { %v3598_v7 = vpop.f32.mrb[43].mxu0  ;;  %v1984_v59 = vrot.slane %v1982_v24, 3 }
 0x143   : > { %2975 = vst.msk [vmem:[%s4776_s9 + $0x30] sm:$0xff] %vm2968_vm6, %v832_v41  ;;  %v833_v44 = vadd.f32 %v4762_v22, %v816_v16  ;;  %3830 = vmatmul.mubr.msk.bf16.vlgmr.msra.gmra.mrb[148].mxu1 %vm318_vm2, %v4860_v23 }
 0x144   : > { %3824 = vmatmul.mubr.msk.bf16.gmra.mrb[148].mxu0 %vm318_vm2, %v4856_v0  ;;  %3872 = vmatpush3.bf16.msra.mxu1 %v4115_v55  ;;  %v4892_v55 = vsel %vm1951_vm7, %v1967_v11, %v1976_v6 }
 0x145   : > { %3851 = vmatprep.mubr.msk.bf16.mxu0 %vm4157_vm0, %v5396_v1  ;;  %3833 = vmatprep.mubr.msk.bf16.mxu1 %vm4157_vm0, %v5396_v1  ;;  %2976 = vst.msk [vmem:[%s4776_s9 + $0x38] sm:$0xff] %vm2968_vm6, %v833_v44  ;;  %v1991_v44 = vshll.u32 %v4802_v12, 16 }
 0x146   : > { %3915 = vmatprep.subr.bf16.mxu1 %v5396_v1  ;;  %v802_v40 = vpop.f32.mrb[44].mxu1 }
 0x147   : > { %v4876_v15 = vpop.f32.mrb[44].mxu0  ;;  %v817_v49 = vadd.f32 %v802_v40, %v4757_v60  ;;  %v3583_v20 = vpop.f32.mrb[45].mxu1 }
 0x148   : > { %v3601_v37 = vpop.f32.mrb[45].mxu0  ;;  %v805_v18 = vpop.f32.mrb[46].mxu1 }
 0x149   : > { %v4885_v52 = vpop.f32.mrb[46].mxu0  ;;  %v834_v41 = vadd.f32 %v4762_v22, %v817_v49  ;;  %v818_v16 = vadd.f32 %v805_v18, %v4771_v36  ;;  %v3584_v39 = vpop.f32.mrb[47].mxu1  ;;  %v1988_v36 = vshrl.u32 %v4802_v12, 16 }
 0x14a   : > { %v3602_v7 = vpop.f32.mrb[47].mxu0 }
 0x14b   : > { %2977 = vst.msk [vmem:[%s4776_s9 + $0x40] sm:$0xff] %vm2968_vm6, %v834_v41  ;;  %v835_v60 = vadd.f32 %v4762_v22, %v818_v16  ;;  %3834 = vmatmul.mubr.msk.bf16.gmra.mrb[152].mxu1 %vm318_vm2, %v4892_v55  ;;  %v1990_v18 = vrot.slane %v1988_v36, 2 }
 0x14c   : > { %3852 = vmatmul.mubr.msk.bf16.vlgmr.msra.gmra.mrb[152].mxu0 %vm318_vm2, %v4247_v25  ;;  %3837 = vmatprep.mubr.msk.bf16.mxu1 %vm4157_vm0, %v5396_v1  ;;  %v1985_v25 = vor.u32 %v1984_v59, %v1981_v5  ;;  %v1993_v5 = vrot.slane %v1991_v44, 3  ;;  %v4921_v59 = vld [vmem:[%s4213_s21 + $0x30] ss:$0 sps:$4 sm:$0x77]  }
 0x14d   : > { %3894 = vmatpush3.bf16.msra.mxu0 %v4116_v63  ;;  %3855 = vmatprep.mubr.msk.bf16.mxu0 %vm4157_vm0, %v5396_v1  ;;  %2978 = vst.msk [vmem:[%s4776_s9 + $0x48] sm:$0xff] %vm2968_vm6, %v835_v60  ;;  %v1997_v39 = vshrl.u32 %v4921_v59, 16  ;;  %v2000_v60 = vshll.u32 %v4921_v59, 16 }
 0x14e   : > { %3937 = vmatprep.subr.bf16.mxu0 %v5396_v1  ;;  %v961_v24 = vpop.f32.mrb[48].mxu1  ;;  %v4918_v7 = vsel %vm1951_vm7, %v1976_v6, %v1985_v25  ;;  %v1994_v6 = vor.u32 %v1993_v5, %v1990_v18 }
 0x14f   : > { %v4906_v11 = vpop.f32.mrb[48].mxu0  ;;  %v962_v40 = vadd.f32 %v961_v24, %v4790_v50  ;;  %v3611_v63 = vpop.f32.mrb[49].mxu1  ;;  %v1999_v18 = vrot.slane %v1997_v39, 2  ;;  %v2002_v5 = vrot.slane %v2000_v60, 3 }
 0x150   : > { %v3605_v56 = vpop.f32.mrb[49].mxu0  ;;  %v964_v20 = vpop.f32.mrb[50].mxu1 }
 0x151   : > { %v4914_v37 = vpop.f32.mrb[50].mxu0  ;;  %v965_v41 = vadd.f32 %v964_v20, %v4796_v2  ;;  %v3612_v16 = vpop.f32.mrb[51].mxu1 }
 0x152   : > { %v3606_v49 = vpop.f32.mrb[51].mxu0  ;;  %v4940_v16 = vsel %vm1951_vm7, %v1985_v25, %v1994_v6  ;;  %v2003_v25 = vor.u32 %v2002_v5, %v1999_v18 }
 0x153   : > { %3838 = vmatmul.mubr.msk.bf16.gmra.mrb[156].mxu1 %vm318_vm2, %v4918_v7 }
 0x154   : > { %3856 = vmatmul.mubr.msk.bf16.gmra.mrb[156].mxu0 %vm318_vm2, %v4264_v34  ;;  %3841 = vmatprep.mubr.msk.bf16.mxu1 %vm4157_vm0, %v5396_v1 }
 0x155   : > { %3859 = vmatprep.mubr.msk.bf16.mxu0 %vm4157_vm0, %v5396_v1 }
 0x156   : > { %v969_v34 = vpop.f32.mrb[52].mxu1 }
 0x157   : > { %v1073_v50 = vpop.f32.mrb[52].mxu0  ;;  %v970_v56 = vadd.f32 %v969_v34, %v4817_v33  ;;  %v3615_v24 = vpop.f32.mrb[53].mxu1 }
 0x158   : > { %v4934_v2 = vadd.f32 %v1073_v50, %v962_v40  ;;  %v3633_v36 = vpop.f32.mrb[53].mxu0  ;;  %v972_v20 = vpop.f32.mrb[54].mxu1  ;;  %v5398_v50 = vmov 0.0  }
 0x159   : > { %v1076_v44 = vpop.f32.mrb[54].mxu0  ;;  %v973_v1 = vadd.f32 %v972_v20, %v4827_v45  ;;  %v3616_v40 = vpop.f32.mrb[55].mxu1 }
 0x15a   : > { %v4937_v63 = vadd.f32 %v1076_v44, %v965_v41  ;;  %v3634_v49 = vpop.f32.mrb[55].mxu0 }
 0x15b   : > { %3842 = vmatmul.mubr.msk.bf16.gmra.mrb[160].mxu1 %vm318_vm2, %v4940_v16  ;;  %v4957_v49 = vsel %vm1951_vm7, %v1994_v6, %v2003_v25 }
 0x15c   : > { %3860 = vmatmul.mubr.msk.bf16.gmra.mrb[160].mxu0 %vm318_vm2, %v4292_v47  ;;  %3845 = vmatprep.mubr.msk.bf16.mxu1 %vm4157_vm0, %v5398_v50 }
 0x15d   : > { %3863 = vmatprep.mubr.msk.bf16.mxu0 %vm4157_vm0, %v5398_v50 }
 0x15e   : > { %v977_v60 = vpop.f32.mrb[56].mxu1 }
 0x15f   : > { %v1081_v33 = vpop.f32.mrb[56].mxu0  ;;  %v978_v36 = vadd.f32 %v977_v60, %v4845_v35  ;;  %v3619_v47 = vpop.f32.mrb[57].mxu1 }
 0x160   : > { %v4951_v41 = vadd.f32 %v1081_v33, %v970_v56  ;;  %v3637_v39 = vpop.f32.mrb[57].mxu0  ;;  %v980_v24 = vpop.f32.mrb[58].mxu1 }
 0x161   : > { %v1084_v45 = vpop.f32.mrb[58].mxu0  ;;  %v981_v20 = vadd.f32 %v980_v24, %v4853_v14  ;;  %v3620_v56 = vpop.f32.mrb[59].mxu1  ;;  %v4118_v39 = vld [vmem:[%s5393_s1 + $0x98] sm:$0xff]  }
 0x162   : > { %v4954_v34 = vadd.f32 %v1084_v45, %v973_v1  ;;  %v3638_v44 = vpop.f32.mrb[59].mxu0 }
 0x163   : > { %3846 = vmatmul.mubr.msk.bf16.gmra.mrb[164].mxu1 %vm318_vm2, %v4957_v49  ;;  %v4119_v44 = vld [vmem:[%s5393_s1 + $0xa0] sm:$0xff]  }
 0x164   : > { %3864 = vmatmul.mubr.msk.bf16.gmra.mrb[164].mxu0 %vm318_vm2, %v4253_v29  ;;  %3873 = vmatprep.mubr.msk.bf16.mxu1 %vm4157_vm0, %v5398_v50 }
 0x165   : > { %3867 = vmatprep.mubr.msk.bf16.mxu0 %vm4157_vm0, %v5398_v50 }
 0x166   : > { %v985_v18 = vpop.f32.mrb[60].mxu1 }
 0x167   : > { %v1089_v35 = vpop.f32.mrb[60].mxu0  ;;  %v986_v14 = vadd.f32 %v985_v18, %v4876_v15  ;;  %v3623_v40 = vpop.f32.mrb[61].mxu1 }
 0x168   : > { %v4968_v1 = vadd.f32 %v1089_v35, %v978_v36  ;;  %v3641_v6 = vpop.f32.mrb[61].mxu0  ;;  %v988_v25 = vpop.f32.mrb[62].mxu1 }
 0x169   : > { %v1092_v5 = vpop.f32.mrb[62].mxu0  ;;  %v989_v60 = vadd.f32 %v988_v25, %v4885_v52  ;;  %v3624_v45 = vpop.f32.mrb[63].mxu1 }
 0x16a   : > { %v4971_v29 = vadd.f32 %v1092_v5, %v981_v20  ;;  %v3642_v33 = vpop.f32.mrb[63].mxu0  ;;  %v4124_v5 = vld [vmem:[%s4213_s21 + $0x8] sm:$0xff]  }
 0x16b   : > { %3874 = vmatmul.mubr.msk.bf16.vlgmr.msra.gmra.mrb[168].mxu1 %vm318_vm2, %v4217_v4 }
 0x16c   : > { %3868 = vmatmul.mubr.msk.bf16.gmra.mrb[168].mxu0 %vm318_vm2, %v4272_v38  ;;  %3916 = vmatpush3.bf16.msra.mxu1 %v4118_v39 }
 0x16d   : > { %3895 = vmatprep.mubr.msk.bf16.mxu0 %vm4157_vm0, %v5398_v50  ;;  %3877 = vmatprep.mubr.msk.bf16.mxu1 %vm4157_vm0, %v5398_v50 }
 0x16e   : > { %3959 = vmatprep.subr.bf16.mxu1 %v5398_v50  ;;  %v993_v52 = vpop.f32.mrb[64].mxu1 }
 0x16f   : > { %v1097_v15 = vpop.f32.mrb[64].mxu0  ;;  %v994_v24 = vadd.f32 %v993_v52, %v4906_v11  ;;  %v3627_v4 = vpop.f32.mrb[65].mxu1  ;;  %v4125_v52 = vld [vmem:[%s4213_s21 + $0x10] sm:$0xff]  }
 0x170   : > { %v4985_v36 = vadd.f32 %v1097_v15, %v986_v14  ;;  %v3645_v47 = vpop.f32.mrb[65].mxu0  ;;  %v996_v35 = vpop.f32.mrb[66].mxu1 }
 0x171   : > { %v1100_v38 = vpop.f32.mrb[66].mxu0  ;;  %v997_v6 = vadd.f32 %v996_v35, %v4914_v37  ;;  %v3628_v18 = vpop.f32.mrb[67].mxu1 }
 0x172   : > { %v4992_v20 = vadd.f32 %v1100_v38, %v989_v60  ;;  %v3646_v56 = vpop.f32.mrb[67].mxu0 }
 0x173   : > { %3878 = vmatmul.mubr.msk.bf16.gmra.mrb[172].mxu1 %vm318_vm2, %v4124_v5 }
 0x174   : > { %3896 = vmatmul.mubr.msk.bf16.vlgmr.msra.gmra.mrb[172].mxu0 %vm318_vm2, %v4301_v51  ;;  %3881 = vmatprep.mubr.msk.bf16.mxu1 %vm4157_vm0, %v5398_v50 }
 0x175   : > { %3938 = vmatpush3.bf16.msra.mxu0 %v4119_v44  ;;  %3899 = vmatprep.mubr.msk.bf16.mxu0 %vm4157_vm0, %v5398_v50 }
 0x176   : > { %3981 = vmatprep.subr.bf16.mxu0 %v5398_v50  ;;  %v1165_v40 = vpop.f32.mrb[68].mxu1 }
 0x177   : > { %v1105_v11 = vpop.f32.mrb[68].mxu0  ;;  %v1204_v33 = vadd.f32 %v1165_v40, %v4934_v2  ;;  %v3655_v25 = vpop.f32.mrb[69].mxu1 }
 0x178   : > { %v5004_v14 = vadd.f32 %v1105_v11, %v994_v24  ;;  %v3649_v37 = vpop.f32.mrb[69].mxu0  ;;  %v1168_v45 = vpop.f32.mrb[70].mxu1  ;;  %v4126_v11 = vld [vmem:[%s4213_s21 + $0x18] sm:$0xff]  }
 0x179   : > { %v1108_v51 = vpop.f32.mrb[70].mxu0  ;;  %v1205_v15 = vadd.f32 %v1168_v45, %v4937_v63  ;;  %v3656_v47 = vpop.f32.mrb[71].mxu1 }
 0x17a   : > { %v5007_v39 = vadd.f32 %v1108_v51, %v997_v6  ;;  %v3650_v60 = vpop.f32.mrb[71].mxu0 }
 0x17b   : > { %3882 = vmatmul.mubr.msk.bf16.gmra.mrb[176].mxu1 %vm318_vm2, %v4125_v52  ;;  %v4127_v52 = vld [vmem:[%s4213_s21 + $0x20] sm:$0xff]  }
 0x17c   : > { %3900 = vmatmul.mubr.msk.bf16.gmra.mrb[176].mxu0 %vm318_vm2, %v4499_v17  ;;  %3885 = vmatprep.mubr.msk.bf16.mxu1 %vm4157_vm0, %v5398_v50 }
 0x17d   : > { %3903 = vmatprep.mubr.msk.bf16.mxu0 %vm4157_vm0, %v5398_v50 }
 0x17e   : > { %v1173_v24 = vpop.f32.mrb[72].mxu1 }
 0x17f   : > { %v1257_v38 = vpop.f32.mrb[72].mxu0  ;;  %v1206_v4 = vadd.f32 %v1173_v24, %v4951_v41  ;;  %v3659_v17 = vpop.f32.mrb[73].mxu1 }
 0x180   : > { %v5018_v2 = vadd.f32 %v1257_v38, %v1204_v33  ;;  %v3677_v44 = vpop.f32.mrb[73].mxu0  ;;  %v1176_v6 = vpop.f32.mrb[74].mxu1 }
 0x181   : > { %v1260_v63 = vpop.f32.mrb[74].mxu0  ;;  %v1207_v18 = vadd.f32 %v1176_v6, %v4954_v34  ;;  %v3660_v5 = vpop.f32.mrb[75].mxu1  ;;  %v4120_v6 = vld [vmem:[%s5393_s1 + $0xa8] sm:$0xff]  }
 0x182   : > { %v5021_v56 = vadd.f32 %v1260_v63, %v1205_v15  ;;  %v3678_v35 = vpop.f32.mrb[75].mxu0 }
 0x183   : > { %3886 = vmatmul.mubr.msk.bf16.gmra.mrb[180].mxu1 %vm318_vm2, %v4126_v11 }
 0x184   : > { %3904 = vmatmul.mubr.msk.bf16.gmra.mrb[180].mxu0 %vm318_vm2, %v4511_v19  ;;  %3889 = vmatprep.mubr.msk.bf16.mxu1 %vm4157_vm0, %v5398_v50 }
 0x185   : > { %3907 = vmatprep.mubr.msk.bf16.mxu0 %vm4157_vm0, %v5398_v50 }
 0x186   : > { %v1181_v51 = vpop.f32.mrb[76].mxu1 }
 0x187   : > { %v1265_v37 = vpop.f32.mrb[76].mxu0  ;;  %v1208_v33 = vadd.f32 %v1181_v51, %v4968_v1  ;;  %v3663_v19 = vpop.f32.mrb[77].mxu1 }
 0x188   : > { %v5032_v41 = vadd.f32 %v1265_v37, %v1206_v4  ;;  %v3681_v40 = vpop.f32.mrb[77].mxu0  ;;  %v1184_v45 = vpop.f32.mrb[78].mxu1 }
 0x189   : > { %v1268_v34 = vpop.f32.mrb[78].mxu0  ;;  %v1209_v15 = vadd.f32 %v1184_v45, %v4971_v29  ;;  %v3664_v47 = vpop.f32.mrb[79].mxu1 }
 0x18a   : > { %v5035_v25 = vadd.f32 %v1268_v34, %v1207_v18  ;;  %v3682_v60 = vpop.f32.mrb[79].mxu0 }
 0x18b   : > { %3890 = vmatmul.mubr.msk.bf16.gmra.mrb[184].mxu1 %vm318_vm2, %v4127_v52 }
 0x18c   : > { %3908 = vmatmul.mubr.msk.bf16.gmra.mrb[184].mxu0 %vm318_vm2, %v4524_v46  ;;  %3917 = vmatprep.mubr.msk.bf16.mxu1 %vm4157_vm0, %v5398_v50 }
 0x18d   : > { %3911 = vmatprep.mubr.msk.bf16.mxu0 %vm4157_vm0, %v5398_v50 }
 0x18e   : > { %v1189_v24 = vpop.f32.mrb[80].mxu1 }
 0x18f   : > { %v1273_v38 = vpop.f32.mrb[80].mxu0  ;;  %v1210_v29 = vadd.f32 %v1189_v24, %v4985_v36  ;;  %v3667_v4 = vpop.f32.mrb[81].mxu1 }
 0x190   : > { %v5046_v1 = vadd.f32 %v1273_v38, %v1208_v33  ;;  %v3685_v44 = vpop.f32.mrb[81].mxu0  ;;  %v1192_v35 = vpop.f32.mrb[82].mxu1 }
 0x191   : > { %v1276_v63 = vpop.f32.mrb[82].mxu0  ;;  %v1211_v18 = vadd.f32 %v1192_v35, %v4992_v20  ;;  %v3668_v5 = vpop.f32.mrb[83].mxu1 }
 0x192   : > { %v5049_v46 = vadd.f32 %v1276_v63, %v1209_v15  ;;  %v3686_v17 = vpop.f32.mrb[83].mxu0 }
 0x193   : > { %3918 = vmatmul.mubr.msk.bf16.vlgmr.msra.gmra.mrb[188].mxu1 %vm318_vm2, %v4323_v57 }
 0x194   : > { %3912 = vmatmul.mubr.msk.bf16.gmra.mrb[188].mxu0 %vm318_vm2, %v4309_v54  ;;  %3960 = vmatpush3.bf16.msra.mxu1 %v4120_v6  ;;  %v4121_v54 = vld [vmem:[%s5393_s1 + $0xb0] sm:$0xff]  }
 0x195   : > { %3939 = vmatprep.mubr.msk.bf16.mxu0 %vm4157_vm0, %v5398_v50  ;;  %3921 = vmatprep.mubr.msk.bf16.mxu1 %vm4157_vm0, %v5398_v50 }
 0x196   : > { %4003 = vmatprep.subr.bf16.mxu1 %v5398_v50  ;;  %v1197_v20 = vpop.f32.mrb[84].mxu1 }
 0x197   : > { %v1281_v36 = vpop.f32.mrb[84].mxu0  ;;  %v1212_v51 = vadd.f32 %v1197_v20, %v5004_v14  ;;  %v3671_v34 = vpop.f32.mrb[85].mxu1 }
 0x198   : > { %v5063_v11 = vadd.f32 %v1281_v36, %v1210_v29  ;;  %v3689_v37 = vpop.f32.mrb[85].mxu0  ;;  %v1200_v19 = vpop.f32.mrb[86].mxu1 }
 0x199   : > { %v1284_v40 = vpop.f32.mrb[86].mxu0  ;;  %v1213_v60 = vadd.f32 %v1200_v19, %v5007_v39  ;;  %v3672_v45 = vpop.f32.mrb[87].mxu1 }
 0x19a   : > { %v5070_v57 = vadd.f32 %v1284_v40, %v1211_v18  ;;  %v3690_v33 = vpop.f32.mrb[87].mxu0 }
 0x19b   : > { %3922 = vmatmul.mubr.msk.bf16.gmra.mrb[192].mxu1 %vm318_vm2, %v4335_v58 }
 0x19c   : > { %3940 = vmatmul.mubr.msk.bf16.vlgmr.msra.gmra.mrb[192].mxu0 %vm318_vm2, %v4394_v31  ;;  %3925 = vmatprep.mubr.msk.bf16.mxu1 %vm4157_vm0, %v5398_v50 }
 0x19d   : > { %3982 = vmatpush3.bf16.msra.mxu0 %v4121_v54  ;;  %3943 = vmatprep.mubr.msk.bf16.mxu0 %vm4157_vm0, %v5398_v50 }
 0x19e   : > { %4025 = vmatprep.subr.bf16.mxu0 %v5398_v50  ;;  %v1380_v47 = vpop.f32.mrb[88].mxu1 }
 0x19f   : > { %v1289_v14 = vpop.f32.mrb[88].mxu0  ;;  %v1419_v52 = vadd.f32 %v1380_v47, %v5018_v2  ;;  %v3699_v38 = vpop.f32.mrb[89].mxu1 }
 0x1a0   : > { %v5082_v15 = vadd.f32 %v1289_v14, %v1212_v51  ;;  %v3693_v39 = vpop.f32.mrb[89].mxu0  ;;  %v1383_v58 = vpop.f32.mrb[90].mxu1 }
 0x1a1   : > { %v1292_v31 = vpop.f32.mrb[90].mxu0  ;;  %v1429_v63 = vadd.f32 %v4762_v22, %v1419_v52  ;;  %v1420_v29 = vadd.f32 %v1383_v58, %v5021_v56  ;;  %v3700_v4 = vpop.f32.mrb[91].mxu1 }
 0x1a2   : > { %v5085_v44 = vadd.f32 %v1292_v31, %v1213_v60  ;;  %v3694_v24 = vpop.f32.mrb[91].mxu0 }
 0x1a3   : > { %2979 = vst.msk [vmem:[%s4776_s9 + $0x50] sm:$0xff] %vm2968_vm6, %v1429_v63  ;;  %v1430_v2 = vadd.f32 %v4762_v22, %v1420_v29  ;;  %3926 = vmatmul.mubr.msk.bf16.gmra.mrb[196].mxu1 %vm318_vm2, %v4350_v61 }
 0x1a4   : > { %3944 = vmatmul.mubr.msk.bf16.gmra.mrb[196].mxu0 %vm318_vm2, %v4420_v43  ;;  %3929 = vmatprep.mubr.msk.bf16.mxu1 %vm4157_vm0, %v5398_v50 }
 0x1a5   : > { %3947 = vmatprep.mubr.msk.bf16.mxu0 %vm4157_vm0, %v5398_v50  ;;  %2980 = vst.msk [vmem:[%s4776_s9 + $0x58] sm:$0xff] %vm2968_vm6, %v1430_v2  ;;  %v4123_v2 = vld [vmem:[%s5393_s1 + $0xc0] sm:$0xff]  }
 0x1a6   : > { %v1388_v56 = vpop.f32.mrb[92].mxu1 }
 0x1a7   : > { %v5098_v17 = vpop.f32.mrb[92].mxu0  ;;  %v1421_v6 = vadd.f32 %v1388_v56, %v5032_v41  ;;  %v3703_v18 = vpop.f32.mrb[93].mxu1 }
 0x1a8   : > { %v3721_v43 = vpop.f32.mrb[93].mxu0  ;;  %v1391_v36 = vpop.f32.mrb[94].mxu1 }
 0x1a9   : > { %v5104_v35 = vpop.f32.mrb[94].mxu0  ;;  %v1431_v61 = vadd.f32 %v4762_v22, %v1421_v6  ;;  %v1422_v37 = vadd.f32 %v1391_v36, %v5035_v25  ;;  %v3704_v20 = vpop.f32.mrb[95].mxu1 }
 0x1aa   : > { %v3722_v5 = vpop.f32.mrb[95].mxu0 }
 0x1ab   : > { %2981 = vst.msk [vmem:[%s4776_s9 + $0x60] sm:$0xff] %vm2968_vm6, %v1431_v61  ;;  %v1432_v40 = vadd.f32 %v4762_v22, %v1422_v37  ;;  %3930 = vmatmul.mubr.msk.bf16.gmra.mrb[200].mxu1 %vm318_vm2, %v4368_v8 }
 0x1ac   : > { %3948 = vmatmul.mubr.msk.bf16.gmra.mrb[200].mxu0 %vm318_vm2, %v4434_v53  ;;  %3933 = vmatprep.mubr.msk.bf16.mxu1 %vm4157_vm0, %v5398_v50 }
 0x1ad   : > { %3951 = vmatprep.mubr.msk.bf16.mxu0 %vm4157_vm0, %v5398_v50  ;;  %2982 = vst.msk [vmem:[%s4776_s9 + $0x68] sm:$0xff] %vm2968_vm6, %v1432_v40 }
 0x1ae   : > { %v1396_v25 = vpop.f32.mrb[96].mxu1 }
 0x1af   : > { %v5118_v41 = vpop.f32.mrb[96].mxu0  ;;  %v1423_v51 = vadd.f32 %v1396_v25, %v5046_v1  ;;  %v3707_v34 = vpop.f32.mrb[97].mxu1 }
 0x1b0   : > { %v3725_v53 = vpop.f32.mrb[97].mxu0  ;;  %v1399_v19 = vpop.f32.mrb[98].mxu1 }
 0x1b1   : > { %v5124_v54 = vpop.f32.mrb[98].mxu0  ;;  %v1433_v8 = vadd.f32 %v4762_v22, %v1423_v51  ;;  %v1424_v60 = vadd.f32 %v1399_v19, %v5049_v46  ;;  %v3708_v45 = vpop.f32.mrb[99].mxu1 }
 0x1b2   : > { %v3726_v33 = vpop.f32.mrb[99].mxu0 }
 0x1b3   : > { %2983 = vst.msk [vmem:[%s4776_s9 + $0x70] sm:$0xff] %vm2968_vm6, %v1433_v8  ;;  %v1434_v14 = vadd.f32 %v4762_v22, %v1424_v60  ;;  %3934 = vmatmul.mubr.msk.bf16.gmra.mrb[204].mxu1 %vm318_vm2, %v4388_v28  ;;  %v4122_v28 = vld [vmem:[%s5393_s1 + $0xb8] sm:$0xff]  }
 0x1b4   : > { %3952 = vmatmul.mubr.msk.bf16.gmra.mrb[204].mxu0 %vm318_vm2, %v4450_v3  ;;  %3961 = vmatprep.mubr.msk.bf16.mxu1 %vm4157_vm0, %v5398_v50 }
 0x1b5   : > { %3955 = vmatprep.mubr.msk.bf16.mxu0 %vm4157_vm0, %v5398_v50  ;;  %2984 = vst.msk [vmem:[%s4776_s9 + $0x78] sm:$0xff] %vm2968_vm6, %v1434_v14 }
 0x1b6   : > { %v1404_v46 = vpop.f32.mrb[100].mxu1 }
 0x1b7   : > { %v5138_v1 = vpop.f32.mrb[100].mxu0  ;;  %v1425_v47 = vadd.f32 %v1404_v46, %v5063_v11  ;;  %v3711_v31 = vpop.f32.mrb[101].mxu1 }
 0x1b8   : > { %v3729_v3 = vpop.f32.mrb[101].mxu0  ;;  %v1407_v38 = vpop.f32.mrb[102].mxu1 }
 0x1b9   : > { %v5144_v39 = vpop.f32.mrb[102].mxu0  ;;  %v1435_v24 = vadd.f32 %v4762_v22, %v1425_v47  ;;  %v1426_v58 = vadd.f32 %v1407_v38, %v5070_v57  ;;  %v3712_v63 = vpop.f32.mrb[103].mxu1 }
 0x1ba   : > { %v3730_v52 = vpop.f32.mrb[103].mxu0 }
 0x1bb   : > { %2985 = vst.msk [vmem:[%s4776_s9 + $0x80] sm:$0xff] %vm2968_vm6, %v1435_v24  ;;  %v1436_v11 = vadd.f32 %v4762_v22, %v1426_v58  ;;  %3962 = vmatmul.mubr.msk.bf16.vlgmr.msra.gmra.mrb[208].mxu1 %vm318_vm2, %v4378_v21  ;;  %v2835_v58 = vld [vmem:[%s4213_s21 + $0x8] sm:$0x8] }
 0x1bc   : > { %3956 = vmatmul.mubr.msk.bf16.gmra.mrb[208].mxu0 %vm318_vm2, %v4461_v13  ;;  %4004 = vmatpush3.bf16.msra.mxu1 %v4122_v28 }
 0x1bd   : > { %3983 = vmatprep.mubr.msk.bf16.mxu0 %vm4157_vm0, %v5398_v50  ;;  %3965 = vmatprep.mubr.msk.bf16.mxu1 %vm4157_vm0, %v5398_v50  ;;  %2986 = vst.msk [vmem:[%s4776_s9 + $0x88] sm:$0xff] %vm2968_vm6, %v1436_v11 }
 0x1be   : > { %v1412_v57 = vpop.f32.mrb[104].mxu1 }
 0x1bf   : > { %v5161_v29 = vpop.f32.mrb[104].mxu0  ;;  %v1427_v21 = vadd.f32 %v1412_v57, %v5082_v15  ;;  %v3715_v43 = vpop.f32.mrb[105].mxu1  ;;  %v4128_v57 = vld [vmem:[%s4213_s21 + $0xc] sm:$0xf] }
 0x1c0   : > { %v3733_v13 = vpop.f32.mrb[105].mxu0  ;;  %v1415_v6 = vpop.f32.mrb[106].mxu1 }
 0x1c1   : > { %v5167_v4 = vpop.f32.mrb[106].mxu0  ;;  %v1437_v18 = vadd.f32 %v4762_v22, %v1427_v21  ;;  %v1428_v5 = vadd.f32 %v1415_v6, %v5085_v44  ;;  %v3716_v36 = vpop.f32.mrb[107].mxu1 }
 0x1c2   : > { %v3734_v56 = vpop.f32.mrb[107].mxu0  ;;  %v4129_v36 = vld [vmem:[%s4213_s21 + $0x10] sm:$0xff]  }
 0x1c3   : > { %2987 = vst.msk [vmem:[%s4776_s9 + $0x90] sm:$0xff] %vm2968_vm6, %v1437_v18  ;;  %v1438_v61 = vadd.f32 %v4762_v22, %v1428_v5  ;;  %3966 = vmatmul.mubr.msk.bf16.gmra.mrb[212].mxu1 %vm318_vm2, %v4391_v30 }
 0x1c4   : > { %3984 = vmatmul.mubr.msk.bf16.vlgmr.msra.gmra.mrb[212].mxu0 %vm318_vm2, %v4734_v48  ;;  %3969 = vmatprep.mubr.msk.bf16.mxu1 %vm4157_vm0, %v5398_v50 }
 0x1c5   : > { %4026 = vmatpush3.bf16.msra.mxu0 %v4123_v2  ;;  %3987 = vmatprep.mubr.msk.bf16.mxu0 %vm4157_vm0, %v5398_v50  ;;  %2988 = vst.msk [vmem:[%s4776_s9 + $0x98] sm:$0xff] %vm2968_vm6, %v1438_v61  ;;  %v2844_v61 = vrot.slane %v4129_v36, 3 }
 0x1c6   : > { %v1564_v44 = vpop.f32.mrb[108].mxu1 }
 0x1c7   : > { %v5184_v15 = vpop.f32.mrb[108].mxu0  ;;  %v1565_v20 = vadd.f32 %v1564_v44, %v5098_v17  ;;  %v3743_v40 = vpop.f32.mrb[109].mxu1 }
 0x1c8   : > { %v3737_v48 = vpop.f32.mrb[109].mxu0  ;;  %v1567_v25 = vpop.f32.mrb[110].mxu1 }
 0x1c9   : > { %v5190_v37 = vpop.f32.mrb[110].mxu0  ;;  %v1568_v22 = vadd.f32 %v1567_v25, %v5104_v35  ;;  %v3744_v30 = vpop.f32.mrb[111].mxu1 }
 0x1ca   : > { %v3738_v53 = vpop.f32.mrb[111].mxu0 }
 0x1cb   : > { %3970 = vmatmul.mubr.msk.bf16.gmra.mrb[216].mxu1 %vm318_vm2, %v4417_v42 }
 0x1cc   : > { %3988 = vmatmul.mubr.msk.bf16.gmra.mrb[216].mxu0 %vm318_vm2, %v4765_v10  ;;  %3973 = vmatprep.mubr.msk.bf16.mxu1 %vm4157_vm0, %v5398_v50 }
 0x1cd   : > { %3991 = vmatprep.mubr.msk.bf16.mxu0 %vm4157_vm0, %v5398_v50 }
 0x1ce   : > { %v1572_v33 = vpop.f32.mrb[112].mxu1 }
 0x1cf   : > { %v1646_v51 = vpop.f32.mrb[112].mxu0  ;;  %v1573_v35 = vadd.f32 %v1572_v33, %v5118_v41  ;;  %v3747_v8 = vpop.f32.mrb[113].mxu1 }
 0x1d0   : > { %v5202_v17 = vadd.f32 %v1646_v51, %v1565_v20  ;;  %v3765_v34 = vpop.f32.mrb[113].mxu0  ;;  %v1575_v45 = vpop.f32.mrb[114].mxu1 }
 0x1d1   : > { %v1649_v19 = vpop.f32.mrb[114].mxu0  ;;  %v1576_v14 = vadd.f32 %v1575_v45, %v5124_v54  ;;  %v3748_v42 = vpop.f32.mrb[115].mxu1  ;;  %v4130_v34 = vld [vmem:[%s4213_s21 + $0x18] sm:$0xff]  }
 0x1d2   : > { %v5205_v10 = vadd.f32 %v1649_v19, %v1568_v22  ;;  %v3766_v60 = vpop.f32.mrb[115].mxu0  ;;  %v2846_v33 = vrot.slane %v4130_v34, 3 }
 0x1d3   : > { %3974 = vmatmul.mubr.msk.bf16.gmra.mrb[220].mxu1 %vm318_vm2, %v4618_v26 }
 0x1d4   : > { %3992 = vmatmul.mubr.msk.bf16.gmra.mrb[220].mxu0 %vm318_vm2, %v4799_v9  ;;  %3977 = vmatprep.mubr.msk.bf16.mxu1 %vm4157_vm0, %v5398_v50  ;;  %v2847_v60 = vsel %vm2842_vm8, %v2844_v61, %v2846_v33 }
 0x1d5   : > { %3995 = vmatprep.mubr.msk.bf16.mxu0 %vm4157_vm0, %v5398_v50 }
 0x1d6   : > { %v1580_v47 = vpop.f32.mrb[116].mxu1 }
 0x1d7   : > { %v1654_v3 = vpop.f32.mrb[116].mxu0  ;;  %v1581_v31 = vadd.f32 %v1580_v47, %v5138_v1  ;;  %v3751_v9 = vpop.f32.mrb[117].mxu1 }
 0x1d8   : > { %v5216_v41 = vadd.f32 %v1654_v3, %v1573_v35  ;;  %v3769_v46 = vpop.f32.mrb[117].mxu0  ;;  %v1583_v28 = vpop.f32.mrb[118].mxu1 }
 0x1d9   : > { %v1657_v54 = vpop.f32.mrb[118].mxu0  ;;  %v1584_v26 = vadd.f32 %v1583_v28, %v5144_v39  ;;  %v3752_v24 = vpop.f32.mrb[119].mxu1 }
 0x1da   : > { %v5219_v52 = vadd.f32 %v1657_v54, %v1576_v14  ;;  %v3770_v38 = vpop.f32.mrb[119].mxu0  ;;  %v2848_v54 = vrot.slane %v4768_v27, 3 }
 0x1db   : > { %3978 = vmatmul.mubr.msk.bf16.gmra.mrb[224].mxu1 %vm318_vm2, %v4630_v62 }
 0x1dc   : > { %3996 = vmatmul.mubr.msk.bf16.gmra.mrb[224].mxu0 %vm318_vm2, %v4830_v32  ;;  %4005 = vmatprep.mubr.msk.bf16.mxu1 %vm4157_vm0, %v5398_v50  ;;  %v3338_v32 = vcombine.low %v2835_v58, %v4128_v57  ;;  %v2849_v28 = vsel %vm2842_vm8, %v2846_v33, %v2848_v54 }
 0x1dd   : > { %3999 = vmatprep.mubr.msk.bf16.mxu0 %vm4157_vm0, %v5398_v50 }
 0x1de   : > { %v1588_v39 = vpop.f32.mrb[120].mxu1  ;;  %v2843_v5 = vrot.slane %v3338_v32, 3 }
 0x1df   : > { %v1662_v1 = vpop.f32.mrb[120].mxu0  ;;  %v1589_v2 = vadd.f32 %v1588_v39, %v5161_v29  ;;  %v3755_v21 = vpop.f32.mrb[121].mxu1  ;;  %v2850_v39 = vrot.slane %v4802_v12, 3 }
 0x1e0   : > { %v5231_v63 = vadd.f32 %v1662_v1, %v1581_v31  ;;  %v3773_v11 = vpop.f32.mrb[121].mxu0  ;;  %v1591_v62 = vpop.f32.mrb[122].mxu1  ;;  %v2845_v20 = vsel %vm2842_vm8, %v2843_v5, %v2844_v61  ;;  %v2852_v5 = vrot.slane %v4921_v59, 3 }
 0x1e1   : > { %v1665_v13 = vpop.f32.mrb[122].mxu0  ;;  %v1592_v6 = vadd.f32 %v1591_v62, %v5167_v4  ;;  %v3756_v18 = vpop.f32.mrb[123].mxu1 }
 0x1e2   : > { %v5235_v43 = vadd.f32 %v1665_v13, %v1584_v26  ;;  %v3774_v56 = vpop.f32.mrb[123].mxu0 }
 0x1e3   : > { %4006 = vmatmul.mubr.msk.bf16.vlgmr.msra.gmra.mrb[228].mxu1 %vm318_vm2, %v4860_v23 }
 0x1e4   : > { %4000 = vmatmul.mubr.msk.bf16.gmra.mrb[228].mxu0 %vm318_vm2, %v4856_v0  ;;  %4009 = vmatprep.mubr.msk.bf16.mxu1 %vm4157_vm0, %v5398_v50 }
 0x1e5   : > { %4027 = vmatprep.mubr.msk.bf16.mxu0 %vm4157_vm0, %v5398_v50 }
 0x1e6   : > { %v1596_v0 = vpop.f32.mrb[124].mxu1 }
 0x1e7   : > { %v1670_v29 = vpop.f32.mrb[124].mxu0  ;;  %v1597_v40 = vadd.f32 %v1596_v0, %v5184_v15  ;;  %v3759_v53 = vpop.f32.mrb[125].mxu1  ;;  %v2853_v0 = vsel %vm2842_vm8, %v2850_v39, %v2852_v5 }
 0x1e8   : > { %v5247_v4 = vadd.f32 %v1670_v29, %v1589_v2  ;;  %v3777_v48 = vpop.f32.mrb[125].mxu0  ;;  %v1599_v23 = vpop.f32.mrb[126].mxu1  ;;  %v2851_v2 = vsel %vm2842_vm8, %v2848_v54, %v2850_v39 }
 0x1e9   : > { %v1673_v44 = vpop.f32.mrb[126].mxu0  ;;  %v1600_v30 = vadd.f32 %v1599_v23, %v5190_v37  ;;  %v3760_v51 = vpop.f32.mrb[127].mxu1 }
 0x1ea   : > { %v5251_v25 = vadd.f32 %v1673_v44, %v1592_v6  ;;  %v3778_v22 = vpop.f32.mrb[127].mxu0 }
 0x1eb   : > { %4010 = vmatmul.mubr.msk.bf16.gmra.mrb[232].mxu1 %vm318_vm2, %v4892_v55 }
 0x1ec   : > { %4028 = vmatmul.mubr.msk.bf16.vlgmr.msra.gmra.mrb[232].mxu0 %vm318_vm2, %v2845_v20  ;;  %4013 = vmatprep.mubr.msk.bf16.mxu1 %vm4157_vm0, %v5398_v50 }
 0x1ed   : > { %4031 = vmatprep.mubr.msk.bf16.mxu0 %vm4157_vm0, %v5398_v50 }
 0x1ee   : > { %v1738_v8 = vpop.f32.mrb[128].mxu1 }
 0x1ef   : > { %v1678_v19 = vpop.f32.mrb[128].mxu0  ;;  %v1777_v45 = vadd.f32 %v1738_v8, %v5202_v17  ;;  %v3787_v14 = vpop.f32.mrb[129].mxu1 }
 0x1f0   : > { %v5262_v15 = vadd.f32 %v1678_v19, %v1597_v40  ;;  %v3781_v35 = vpop.f32.mrb[129].mxu0  ;;  %v1741_v46 = vpop.f32.mrb[130].mxu1 }
 0x1f1   : > { %v1681_v37 = vpop.f32.mrb[130].mxu0  ;;  %v1778_v55 = vadd.f32 %v1741_v46, %v5205_v10  ;;  %v3788_v47 = vpop.f32.mrb[131].mxu1 }
 0x1f2   : > { %v5266_v42 = vadd.f32 %v1681_v37, %v1600_v30  ;;  %v3782_v3 = vpop.f32.mrb[131].mxu0 }
 0x1f3   : > { %4014 = vmatmul.mubr.msk.bf16.gmra.mrb[236].mxu1 %vm318_vm2, %v4918_v7 }
 0x1f4   : > { %4032 = vmatmul.mubr.msk.bf16.gmra.mrb[236].mxu0 %vm318_vm2, %v2847_v60  ;;  %4017 = vmatprep.mubr.msk.bf16.mxu1 %vm4157_vm0, %v5398_v50 }
 0x1f5   : > { %4035 = vmatprep.mubr.msk.bf16.mxu0 %vm4157_vm0, %v5398_v50 }
 0x1f6   : > { %v1746_v38 = vpop.f32.mrb[132].mxu1 }
 0x1f7   : > { %v1895_v31 = vpop.f32.mrb[132].mxu0  ;;  %v1779_v26 = vadd.f32 %v1746_v38, %v5216_v41  ;;  %v3791_v24 = vpop.f32.mrb[133].mxu1 }
 0x1f8   : > { %v5277_v17 = vadd.f32 %v1895_v31, %v1777_v45  ;;  %v3809_v9 = vpop.f32.mrb[133].mxu0  ;;  %v1749_v1 = vpop.f32.mrb[134].mxu1  ;;  %v5313_v31 = vld [vmem:[%s5394_s2] ss:$0 sm:$0xff] }
 0x1f9   : > { %v1898_v10 = vpop.f32.mrb[134].mxu0  ;;  %v1780_v7 = vadd.f32 %v1749_v1, %v5219_v52  ;;  %v3792_v11 = vpop.f32.mrb[135].mxu1 }
 0x1fa   : > { %v5281_v58 = vadd.f32 %v1898_v10, %v1778_v55  ;;  %v3810_v27 = vpop.f32.mrb[135].mxu0 }
 0x1fb   : > { %4018 = vmatmul.mubr.msk.bf16.gmra.mrb[240].mxu1 %vm318_vm2, %v4940_v16 }
 0x1fc   : > { %4036 = vmatmul.mubr.msk.bf16.gmra.mrb[240].mxu0 %vm318_vm2, %v2849_v28  ;;  %4021 = vmatprep.mubr.msk.bf16.mxu1 %vm4157_vm0, %v5398_v50 }
 0x1fd   : > { %4039 = vmatprep.mubr.msk.bf16.mxu0 %vm4157_vm0, %v5398_v50 }
 0x1fe   : > { %v1754_v32 = vpop.f32.mrb[136].mxu1 }
 0x1ff   : > { %v1903_v13 = vpop.f32.mrb[136].mxu0  ;;  %v1781_v21 = vadd.f32 %v1754_v32, %v5231_v63  ;;  %v3795_v56 = vpop.f32.mrb[137].mxu1 }
 0x200   : > { %v5292_v41 = vadd.f32 %v1903_v13, %v1779_v26  ;;  %v3813_v57 = vpop.f32.mrb[137].mxu0  ;;  %v1757_v12 = vpop.f32.mrb[138].mxu1 }
 0x201   : > { %v1906_v52 = vpop.f32.mrb[138].mxu0  ;;  %v1782_v18 = vadd.f32 %v1757_v12, %v5235_v43  ;;  %v3796_v16 = vpop.f32.mrb[139].mxu1 }
 0x202   : > { %v1937_v62 = vadd.f32 %v1906_v52, %v1780_v7  ;;  %v3814_v6 = vpop.f32.mrb[139].mxu0 }
 0x203   : > { %4022 = vmatmul.mubr.msk.bf16.gmra.mrb[244].mxu1 %vm318_vm2, %v4957_v49 }
 0x204   : > { %4040 = vmatmul.mubr.msk.bf16.gmra.mrb[244].mxu0 %vm318_vm2, %v2851_v2 }
 0x205   : > { %4043 = vmatprep.mubr.msk.bf16.mxu0 %vm4157_vm0, %v5398_v50 }
 0x206   : > { %v1762_v29 = vpop.f32.mrb[140].mxu1 }
 0x207   : > { %v1911_v36 = vpop.f32.mrb[140].mxu0  ;;  %v1783_v43 = vadd.f32 %v1762_v29, %v5247_v4  ;;  %v3799_v44 = vpop.f32.mrb[141].mxu1 }
 0x208   : > { %v1938_v61 = vadd.f32 %v1911_v36, %v1781_v21  ;;  %v3817_v63 = vpop.f32.mrb[141].mxu0  ;;  %v1765_v53 = vpop.f32.mrb[142].mxu1 }
 0x209   : > { %v1914_v48 = vpop.f32.mrb[142].mxu0  ;;  %v1784_v50 = vadd.f32 %v1765_v53, %v5251_v25  ;;  %v3800_v59 = vpop.f32.mrb[143].mxu1 }
 0x20a   : > { %v1939_v20 = vadd.f32 %v1914_v48, %v1782_v18  ;;  %v3818_v40 = vpop.f32.mrb[143].mxu0 }
 0x20c   : > { %4044 = vmatmul.mubr.msk.bf16.gmra.mrb[248].mxu0 %vm318_vm2, %v2853_v0 }
 0x20e   : > { %v1770_v30 = vpop.f32.mrb[144].mxu1 }
 0x20f   : > { %v1919_v22 = vpop.f32.mrb[144].mxu0  ;;  %v1785_v34 = vadd.f32 %v1770_v30, %v5262_v15  ;;  %v3803_v33 = vpop.f32.mrb[145].mxu1 }
 0x210   : > { %v1940_v49 = vadd.f32 %v1919_v22, %v1783_v43  ;;  %v3821_v23 = vpop.f32.mrb[145].mxu0  ;;  %v1773_v4 = vpop.f32.mrb[146].mxu1 }
 0x211   : > { %v1922_v51 = vpop.f32.mrb[146].mxu0  ;;  %v1786_v8 = vadd.f32 %v1773_v4, %v5266_v42  ;;  %v3804_v37 = vpop.f32.mrb[147].mxu1 }
 0x212   : > { %v1941_v19 = vadd.f32 %v1922_v51, %v1784_v50  ;;  %v3822_v35 = vpop.f32.mrb[147].mxu0 }
 0x216   : > { %v2060_v14 = vpop.f32.mrb[148].mxu1 }
 0x217   : > { %v1927_v60 = vpop.f32.mrb[148].mxu0  ;;  %v2099_v46 = vadd.f32 %v2060_v14, %v5277_v17  ;;  %v3831_v55 = vpop.f32.mrb[149].mxu1 }
 0x218   : > { %v1942_v25 = vadd.f32 %v1927_v60, %v1785_v34  ;;  %v3825_v45 = vpop.f32.mrb[149].mxu0  ;;  %v2063_v15 = vpop.f32.mrb[150].mxu1 }
 0x219   : > { %v1930_v3 = vpop.f32.mrb[150].mxu0  ;;  %v2109_v42 = vadd.f32 %v5313_v31, %v2099_v46  ;;  %v2100_v9 = vadd.f32 %v2063_v15, %v5281_v58  ;;  %v3832_v38 = vpop.f32.mrb[151].mxu1 }
 0x21a   : > { %v1943_v47 = vadd.f32 %v1930_v3, %v1786_v8  ;;  %v3826_v54 = vpop.f32.mrb[151].mxu0 }
 0x21b   : > { %2989 = vst.msk [vmem:[%s4776_s9 + $0xa0] sm:$0xff] %vm2968_vm6, %v2109_v42  ;;  %v2110_v10 = vadd.f32 %v5313_v31, %v2100_v9 }
 0x21d   : > { %2990 = vst.msk [vmem:[%s4776_s9 + $0xa8] sm:$0xff] %vm2968_vm6, %v2110_v10 }
 0x21e   : > { %v2068_v26 = vpop.f32.mrb[152].mxu1 }
 0x21f   : > { %v2165_v17 = vpop.f32.mrb[152].mxu0  ;;  %v2101_v27 = vadd.f32 %v2068_v26, %v5292_v41  ;;  %v3835_v1 = vpop.f32.mrb[153].mxu1 }
 0x220   : > { %v3853_v28 = vpop.f32.mrb[153].mxu0  ;;  %v2071_v11 = vpop.f32.mrb[154].mxu1 }
 0x221   : > { %v2168_v24 = vpop.f32.mrb[154].mxu0  ;;  %v2111_v58 = vadd.f32 %v5313_v31, %v2101_v27  ;;  %v2102_v39 = vadd.f32 %v2071_v11, %v1937_v62  ;;  %v3836_v13 = vpop.f32.mrb[155].mxu1 }
 0x222   : > { %v3854_v7 = vpop.f32.mrb[155].mxu0 }
 0x223   : > { %2991 = vst.msk [vmem:[%s4776_s9 + $0xb0] sm:$0xff] %vm2968_vm6, %v2111_v58  ;;  %v2112_v57 = vadd.f32 %v5313_v31, %v2102_v39 }
 0x225   : > { %2992 = vst.msk [vmem:[%s4776_s9 + $0xb8] sm:$0xff] %vm2968_vm6, %v2112_v57 }
 0x226   : > { %v2076_v2 = vpop.f32.mrb[156].mxu1 }
 0x227   : > { %v2173_v32 = vpop.f32.mrb[156].mxu0  ;;  %v2103_v41 = vadd.f32 %v2076_v2, %v1938_v61  ;;  %v3839_v56 = vpop.f32.mrb[157].mxu1 }
 0x228   : > { %v3857_v52 = vpop.f32.mrb[157].mxu0  ;;  %v2079_v12 = vpop.f32.mrb[158].mxu1 }
 0x229   : > { %v2176_v21 = vpop.f32.mrb[158].mxu0  ;;  %v2113_v18 = vadd.f32 %v5313_v31, %v2103_v41  ;;  %v2104_v62 = vadd.f32 %v2079_v12, %v1939_v20  ;;  %v3840_v16 = vpop.f32.mrb[159].mxu1 }
 0x22a   : > { %v3858_v6 = vpop.f32.mrb[159].mxu0 }
 0x22b   : > { %2993 = vst.msk [vmem:[%s4776_s9 + $0xc0] sm:$0xff] %vm2968_vm6, %v2113_v18  ;;  %v2114_v5 = vadd.f32 %v5313_v31, %v2104_v62 }
 0x22d   : > { %2994 = vst.msk [vmem:[%s4776_s9 + $0xc8] sm:$0xff] %vm2968_vm6, %v2114_v5 }
 0x22e   : > { %v2084_v29 = vpop.f32.mrb[160].mxu1 }
 0x22f   : > { %v2181_v36 = vpop.f32.mrb[160].mxu0  ;;  %v2105_v61 = vadd.f32 %v2084_v29, %v1940_v49  ;;  %v3843_v0 = vpop.f32.mrb[161].mxu1 }
 0x230   : > { %v3861_v63 = vpop.f32.mrb[161].mxu0  ;;  %v2087_v44 = vpop.f32.mrb[162].mxu1 }
 0x231   : > { %v2184_v48 = vpop.f32.mrb[162].mxu0  ;;  %v2115_v40 = vadd.f32 %v5313_v31, %v2105_v61  ;;  %v2106_v20 = vadd.f32 %v2087_v44, %v1941_v19  ;;  %v3844_v53 = vpop.f32.mrb[163].mxu1 }
 0x232   : > { %v3862_v43 = vpop.f32.mrb[163].mxu0 }
 0x233   : > { %2995 = vst.msk [vmem:[%s4776_s9 + $0xd0] sm:$0xff] %vm2968_vm6, %v2115_v40  ;;  %v2116_v50 = vadd.f32 %v5313_v31, %v2106_v20 }
 0x235   : > { %2996 = vst.msk [vmem:[%s4776_s9 + $0xd8] sm:$0xff] %vm2968_vm6, %v2116_v50 }
 0x236   : > { %v2092_v23 = vpop.f32.mrb[164].mxu1 }
 0x237   : > { %v2189_v59 = vpop.f32.mrb[164].mxu0  ;;  %v2107_v49 = vadd.f32 %v2092_v23, %v1942_v25  ;;  %v3847_v51 = vpop.f32.mrb[165].mxu1 }
 0x238   : > { %v3865_v22 = vpop.f32.mrb[165].mxu0  ;;  %v2095_v33 = vpop.f32.mrb[166].mxu1 }
 0x239   : > { %v2192_v30 = vpop.f32.mrb[166].mxu0  ;;  %v2117_v35 = vadd.f32 %v5313_v31, %v2107_v49  ;;  %v2108_v19 = vadd.f32 %v2095_v33, %v1943_v47  ;;  %v3848_v4 = vpop.f32.mrb[167].mxu1 }
 0x23a   : > { %v3866_v34 = vpop.f32.mrb[167].mxu0 }
 0x23b   : > { %2997 = vst.msk [vmem:[%s4776_s9 + $0xe0] sm:$0xff] %vm2968_vm6, %v2117_v35  ;;  %v2118_v8 = vadd.f32 %v5313_v31, %v2108_v19 }
 0x23d   : > { %2998 = vst.msk [vmem:[%s4776_s9 + $0xe8] sm:$0xff] %vm2968_vm6, %v2118_v8 }
 0x23e   : > { %v2244_v45 = vpop.f32.mrb[168].mxu1 }
 0x23f   : > { %v2197_v37 = vpop.f32.mrb[168].mxu0  ;;  %v2245_v3 = vadd.f32 %v2244_v45, %v2165_v17  ;;  %v3875_v46 = vpop.f32.mrb[169].mxu1 }
 0x240   : > { %v3869_v60 = vpop.f32.mrb[169].mxu0  ;;  %v2247_v55 = vpop.f32.mrb[170].mxu1 }
 0x241   : > { %v2200_v14 = vpop.f32.mrb[170].mxu0  ;;  %v2248_v54 = vadd.f32 %v2247_v55, %v2168_v24  ;;  %v3876_v15 = vpop.f32.mrb[171].mxu1 }
 0x242   : > { %v3870_v25 = vpop.f32.mrb[171].mxu0 }
 0x246   : > { %v2252_v38 = vpop.f32.mrb[172].mxu1 }
 0x247   : > { %v2326_v42 = vpop.f32.mrb[172].mxu0  ;;  %v2253_v28 = vadd.f32 %v2252_v38, %v2173_v32  ;;  %v3879_v26 = vpop.f32.mrb[173].mxu1 }
 0x248   : > { %v2365_v9 = vadd.f32 %v2326_v42, %v2245_v3  ;;  %v3897_v47 = vpop.f32.mrb[173].mxu0  ;;  %v2255_v7 = vpop.f32.mrb[174].mxu1 }
 0x249   : > { %v2329_v10 = vpop.f32.mrb[174].mxu0  ;;  %v2256_v11 = vadd.f32 %v2255_v7, %v2176_v21  ;;  %v3880_v58 = vpop.f32.mrb[175].mxu1 }
 0x24a   : > { %v2366_v27 = vadd.f32 %v2329_v10, %v2248_v54  ;;  %v3898_v1 = vpop.f32.mrb[175].mxu0 }
 0x24e   : > { %v2260_v57 = vpop.f32.mrb[176].mxu1 }
 0x24f   : > { %v2334_v39 = vpop.f32.mrb[176].mxu0  ;;  %v2261_v2 = vadd.f32 %v2260_v57, %v2181_v36  ;;  %v3883_v24 = vpop.f32.mrb[177].mxu1 }
 0x250   : > { %v2367_v13 = vadd.f32 %v2334_v39, %v2253_v28  ;;  %v3901_v17 = vpop.f32.mrb[177].mxu0  ;;  %v2263_v6 = vpop.f32.mrb[178].mxu1 }
 0x251   : > { %v2337_v52 = vpop.f32.mrb[178].mxu0  ;;  %v2264_v12 = vadd.f32 %v2263_v6, %v2184_v48  ;;  %v3884_v18 = vpop.f32.mrb[179].mxu1 }
 0x252   : > { %v2368_v41 = vadd.f32 %v2337_v52, %v2256_v11  ;;  %v3902_v56 = vpop.f32.mrb[179].mxu0 }
 0x256   : > { %v2268_v5 = vpop.f32.mrb[180].mxu1 }
 0x257   : > { %v2342_v62 = vpop.f32.mrb[180].mxu0  ;;  %v2269_v29 = vadd.f32 %v2268_v5, %v2189_v59  ;;  %v3887_v21 = vpop.f32.mrb[181].mxu1 }
 0x258   : > { %v2369_v32 = vadd.f32 %v2342_v62, %v2261_v2  ;;  %v3905_v16 = vpop.f32.mrb[181].mxu0  ;;  %v2271_v43 = vpop.f32.mrb[182].mxu1 }
 0x259   : > { %v2345_v63 = vpop.f32.mrb[182].mxu0  ;;  %v2272_v44 = vadd.f32 %v2271_v43, %v2192_v30  ;;  %v3888_v40 = vpop.f32.mrb[183].mxu1 }
 0x25a   : > { %v2370_v61 = vadd.f32 %v2345_v63, %v2264_v12  ;;  %v3906_v0 = vpop.f32.mrb[183].mxu0 }
 0x25e   : > { %v2276_v50 = vpop.f32.mrb[184].mxu1 }
 0x25f   : > { %v2350_v20 = vpop.f32.mrb[184].mxu0  ;;  %v2277_v23 = vadd.f32 %v2276_v50, %v2197_v37  ;;  %v3891_v48 = vpop.f32.mrb[185].mxu1 }
 0x260   : > { %v2371_v36 = vadd.f32 %v2350_v20, %v2269_v29  ;;  %v3909_v53 = vpop.f32.mrb[185].mxu0  ;;  %v2279_v34 = vpop.f32.mrb[186].mxu1 }
 0x261   : > { %v2353_v22 = vpop.f32.mrb[186].mxu0  ;;  %v2280_v33 = vadd.f32 %v2279_v34, %v2200_v14  ;;  %v3892_v35 = vpop.f32.mrb[187].mxu1 }
 0x262   : > { %v2372_v49 = vadd.f32 %v2353_v22, %v2272_v44  ;;  %v3910_v51 = vpop.f32.mrb[187].mxu0 }
 0x266   : > { %v2418_v8 = vpop.f32.mrb[188].mxu1 }
 0x267   : > { %v2358_v19 = vpop.f32.mrb[188].mxu0  ;;  %v2457_v45 = vadd.f32 %v2418_v8, %v2365_v9  ;;  %v3919_v30 = vpop.f32.mrb[189].mxu1 }
 0x268   : > { %v2373_v59 = vadd.f32 %v2358_v19, %v2277_v23  ;;  %v3913_v4 = vpop.f32.mrb[189].mxu0  ;;  %v2421_v25 = vpop.f32.mrb[190].mxu1 }
 0x269   : > { %v2361_v60 = vpop.f32.mrb[190].mxu0  ;;  %v2458_v55 = vadd.f32 %v2421_v25, %v2366_v27  ;;  %v3920_v54 = vpop.f32.mrb[191].mxu1 }
 0x26a   : > { %v2374_v3 = vadd.f32 %v2361_v60, %v2280_v33  ;;  %v3914_v46 = vpop.f32.mrb[191].mxu0 }
 0x26e   : > { %v2426_v47 = vpop.f32.mrb[192].mxu1 }
 0x26f   : > { %v2510_v15 = vpop.f32.mrb[192].mxu0  ;;  %v2459_v10 = vadd.f32 %v2426_v47, %v2367_v13  ;;  %v3923_v14 = vpop.f32.mrb[193].mxu1 }
 0x270   : > { %v2549_v37 = vadd.f32 %v2510_v15, %v2457_v45  ;;  %v3941_v42 = vpop.f32.mrb[193].mxu0  ;;  %v2429_v1 = vpop.f32.mrb[194].mxu1 }
 0x271   : > { %v2513_v38 = vpop.f32.mrb[194].mxu0  ;;  %v2460_v7 = vadd.f32 %v2429_v1, %v2368_v41  ;;  %v3924_v11 = vpop.f32.mrb[195].mxu1 }
 0x272   : > { %v2550_v28 = vadd.f32 %v2513_v38, %v2458_v55  ;;  %v3942_v26 = vpop.f32.mrb[195].mxu0 }
 0x276   : > { %v2434_v17 = vpop.f32.mrb[196].mxu1 }
 0x277   : > { %v2518_v58 = vpop.f32.mrb[196].mxu0  ;;  %v2461_v52 = vadd.f32 %v2434_v17, %v2369_v32  ;;  %v3927_v27 = vpop.f32.mrb[197].mxu1 }
 0x278   : > { %v2551_v9 = vadd.f32 %v2518_v58, %v2459_v10  ;;  %v3945_v39 = vpop.f32.mrb[197].mxu0  ;;  %v2437_v56 = vpop.f32.mrb[198].mxu1 }
 0x279   : > { %v2521_v57 = vpop.f32.mrb[198].mxu0  ;;  %v2462_v6 = vadd.f32 %v2437_v56, %v2370_v61  ;;  %v3928_v12 = vpop.f32.mrb[199].mxu1 }
 0x27a   : > { %v2552_v2 = vadd.f32 %v2521_v57, %v2460_v7  ;;  %v3946_v24 = vpop.f32.mrb[199].mxu0 }
 0x27e   : > { %v2442_v16 = vpop.f32.mrb[200].mxu1 }
 0x27f   : > { %v2526_v18 = vpop.f32.mrb[200].mxu0  ;;  %v2463_v63 = vadd.f32 %v2442_v16, %v2371_v36  ;;  %v3931_v41 = vpop.f32.mrb[201].mxu1 }
 0x280   : > { %v2553_v13 = vadd.f32 %v2526_v18, %v2461_v52  ;;  %v3949_v62 = vpop.f32.mrb[201].mxu0  ;;  %v2445_v0 = vpop.f32.mrb[202].mxu1 }
 0x281   : > { %v2529_v5 = vpop.f32.mrb[202].mxu0  ;;  %v2464_v43 = vadd.f32 %v2445_v0, %v2372_v49  ;;  %v3932_v44 = vpop.f32.mrb[203].mxu1 }
 0x282   : > { %v2554_v29 = vadd.f32 %v2529_v5, %v2462_v6  ;;  %v3950_v21 = vpop.f32.mrb[203].mxu0 }
 0x286   : > { %v2450_v53 = vpop.f32.mrb[204].mxu1 }
 0x287   : > { %v2534_v40 = vpop.f32.mrb[204].mxu0  ;;  %v2465_v22 = vadd.f32 %v2450_v53, %v2373_v59  ;;  %v3935_v61 = vpop.f32.mrb[205].mxu1 }
 0x288   : > { %v2555_v32 = vadd.f32 %v2534_v40, %v2463_v63  ;;  %v3953_v20 = vpop.f32.mrb[205].mxu0  ;;  %v2453_v51 = vpop.f32.mrb[206].mxu1 }
 0x289   : > { %v2537_v50 = vpop.f32.mrb[206].mxu0  ;;  %v2466_v34 = vadd.f32 %v2453_v51, %v2374_v3  ;;  %v3936_v33 = vpop.f32.mrb[207].mxu1 }
 0x28a   : > { %v2556_v23 = vadd.f32 %v2537_v50, %v2464_v43  ;;  %v3954_v48 = vpop.f32.mrb[207].mxu0 }
 0x28e   : > { %v2602_v4 = vpop.f32.mrb[208].mxu1 }
 0x28f   : > { %v2542_v35 = vpop.f32.mrb[208].mxu0  ;;  %v2641_v60 = vadd.f32 %v2602_v4, %v2549_v37  ;;  %v3963_v49 = vpop.f32.mrb[209].mxu1 }
 0x290   : > { %v2557_v36 = vadd.f32 %v2542_v35, %v2465_v22  ;;  %v3957_v19 = vpop.f32.mrb[209].mxu0  ;;  %v2605_v46 = vpop.f32.mrb[210].mxu1 }
 0x291   : > { %v2545_v8 = vpop.f32.mrb[210].mxu0  ;;  %v2642_v25 = vadd.f32 %v2605_v46, %v2550_v28  ;;  %v3964_v55 = vpop.f32.mrb[211].mxu1 }
 0x292   : > { %v2558_v45 = vadd.f32 %v2545_v8, %v2466_v34  ;;  %v3958_v30 = vpop.f32.mrb[211].mxu0 }
 0x296   : > { %v2610_v42 = vpop.f32.mrb[212].mxu1 }
 0x297   : > { %v2694_v54 = vpop.f32.mrb[212].mxu0  ;;  %v2643_v38 = vadd.f32 %v2610_v42, %v2551_v9  ;;  %v3967_v3 = vpop.f32.mrb[213].mxu1 }
 0x298   : > { %v2733_v59 = vadd.f32 %v2694_v54, %v2641_v60  ;;  %v3985_v15 = vpop.f32.mrb[213].mxu0  ;;  %v2613_v26 = vpop.f32.mrb[214].mxu1 }
 0x299   : > { %v2697_v47 = vpop.f32.mrb[214].mxu0  ;;  %v2644_v1 = vadd.f32 %v2613_v26, %v2552_v2  ;;  %v3968_v7 = vpop.f32.mrb[215].mxu1 }
 0x29a   : > { %v2734_v10 = vadd.f32 %v2697_v47, %v2642_v25  ;;  %v3986_v14 = vpop.f32.mrb[215].mxu0 }
 0x29e   : > { %v2618_v39 = vpop.f32.mrb[216].mxu1 }
 0x29f   : > { %v2702_v11 = vpop.f32.mrb[216].mxu0  ;;  %v2645_v57 = vadd.f32 %v2618_v39, %v2553_v13  ;;  %v3971_v28 = vpop.f32.mrb[217].mxu1 }
 0x2a0   : > { %v2735_v37 = vadd.f32 %v2702_v11, %v2643_v38  ;;  %v3989_v58 = vpop.f32.mrb[217].mxu0  ;;  %v2621_v24 = vpop.f32.mrb[218].mxu1 }
 0x2a1   : > { %v2705_v17 = vpop.f32.mrb[218].mxu0  ;;  %v2646_v56 = vadd.f32 %v2621_v24, %v2554_v29  ;;  %v3972_v6 = vpop.f32.mrb[219].mxu1 }
 0x2a2   : > { %v2736_v52 = vadd.f32 %v2705_v17, %v2644_v1  ;;  %v3990_v27 = vpop.f32.mrb[219].mxu0 }
 0x2a6   : > { %v2626_v62 = vpop.f32.mrb[220].mxu1 }
 0x2a7   : > { %v2710_v12 = vpop.f32.mrb[220].mxu0  ;;  %v2647_v5 = vadd.f32 %v2626_v62, %v2555_v32  ;;  %v3975_v2 = vpop.f32.mrb[221].mxu1 }
 0x2a8   : > { %v2737_v9 = vadd.f32 %v2710_v12, %v2645_v57  ;;  %v3993_v18 = vpop.f32.mrb[221].mxu0  ;;  %v2629_v21 = vpop.f32.mrb[222].mxu1 }
 0x2a9   : > { %v2713_v16 = vpop.f32.mrb[222].mxu0  ;;  %v2648_v0 = vadd.f32 %v2629_v21, %v2556_v23  ;;  %v3976_v43 = vpop.f32.mrb[223].mxu1 }
 0x2aa   : > { %v2738_v63 = vadd.f32 %v2713_v16, %v2646_v56  ;;  %v3994_v41 = vpop.f32.mrb[223].mxu0 }
 0x2ae   : > { %v2634_v20 = vpop.f32.mrb[224].mxu1 }
 0x2af   : > { %v2718_v44 = vpop.f32.mrb[224].mxu0  ;;  %v2649_v50 = vadd.f32 %v2634_v20, %v2557_v36  ;;  %v3979_v29 = vpop.f32.mrb[225].mxu1 }
 0x2b0   : > { %v2739_v13 = vadd.f32 %v2718_v44, %v2647_v5  ;;  %v3997_v40 = vpop.f32.mrb[225].mxu0  ;;  %v2637_v48 = vpop.f32.mrb[226].mxu1 }
 0x2b1   : > { %v2721_v53 = vpop.f32.mrb[226].mxu0  ;;  %v2650_v51 = vadd.f32 %v2637_v48, %v2558_v45  ;;  %v3980_v34 = vpop.f32.mrb[227].mxu1 }
 0x2b2   : > { %v2740_v22 = vadd.f32 %v2721_v53, %v2648_v0  ;;  %v3998_v61 = vpop.f32.mrb[227].mxu0 }
 0x2b6   : > { %v2786_v19 = vpop.f32.mrb[228].mxu1 }
 0x2b7   : > { %v2726_v33 = vpop.f32.mrb[228].mxu0  ;;  %v2825_v23 = vadd.f32 %v2786_v19, %v2733_v59  ;;  %v4007_v8 = vpop.f32.mrb[229].mxu1 }
 0x2b8   : > { %v5347_v32 = vadd.f32 %v2726_v33, %v2649_v50  ;;  %v4001_v35 = vpop.f32.mrb[229].mxu0  ;;  %v2789_v30 = vpop.f32.mrb[230].mxu1 }
 0x2b9   : > { %v2729_v4 = vpop.f32.mrb[230].mxu0  ;;  %v2826_v36 = vadd.f32 %v2789_v30, %v2734_v10  ;;  %v4008_v46 = vpop.f32.mrb[231].mxu1 }
 0x2ba   : > { %v5349_v60 = vadd.f32 %v2729_v4, %v2650_v51  ;;  %v4002_v49 = vpop.f32.mrb[231].mxu0 }
 0x2be   : > { %v2794_v54 = vpop.f32.mrb[232].mxu1 }
 0x2bf   : > { %v2909_v25 = vpop.f32.mrb[232].mxu0  ;;  %v2827_v42 = vadd.f32 %v2794_v54, %v2735_v37  ;;  %v4011_v38 = vpop.f32.mrb[233].mxu1 }
 0x2c0   : > { %v2948_v55 = vadd.f32 %v2909_v25, %v2825_v23  ;;  %v4029_v45 = vpop.f32.mrb[233].mxu0  ;;  %v2797_v14 = vpop.f32.mrb[234].mxu1 }
 0x2c1   : > { %v2912_v15 = vpop.f32.mrb[234].mxu0  ;;  %v2828_v26 = vadd.f32 %v2797_v14, %v2736_v52  ;;  %v4012_v1 = vpop.f32.mrb[235].mxu1 }
 0x2c2   : > { %v2958_v47 = vadd.f32 %v5313_v31, %v2948_v55  ;;  %v2949_v3 = vadd.f32 %v2912_v15, %v2826_v36  ;;  %v4030_v59 = vpop.f32.mrb[235].mxu0 }
 0x2c4   : > { %2999 = vst.msk [vmem:[%s4776_s9 + $0xf0] sm:$0xff] %vm2968_vm6, %v2958_v47  ;;  %v2959_v10 = vadd.f32 %v5313_v31, %v2949_v3 }
 0x2c6   : > { %3000 = vst.msk [vmem:[%s4776_s9 + $0xf8] sm:$0xff] %vm2968_vm6, %v2959_v10  ;;  %v2802_v37 = vpop.f32.mrb[236].mxu1 }
 0x2c7   : > { %v2917_v7 = vpop.f32.mrb[236].mxu0  ;;  %v2829_v17 = vadd.f32 %v2802_v37, %v2737_v9  ;;  %v4015_v28 = vpop.f32.mrb[237].mxu1 }
 0x2c8   : > { %v2950_v11 = vadd.f32 %v2917_v7, %v2827_v42  ;;  %v4033_v58 = vpop.f32.mrb[237].mxu0  ;;  %v2805_v56 = vpop.f32.mrb[238].mxu1 }
 0x2c9   : > { %v2920_v39 = vpop.f32.mrb[238].mxu0  ;;  %v2830_v52 = vadd.f32 %v2805_v56, %v2738_v63  ;;  %v4016_v12 = vpop.f32.mrb[239].mxu1 }
 0x2ca   : > { %v2960_v57 = vadd.f32 %v5313_v31, %v2950_v11  ;;  %v2951_v27 = vadd.f32 %v2920_v39, %v2828_v26  ;;  %v4034_v24 = vpop.f32.mrb[239].mxu0 }
 0x2cc   : > { %3001 = vst.msk [vmem:[%s4776_s9 + $0x100] sm:$0xff] %vm2968_vm6, %v2960_v57  ;;  %v2961_v6 = vadd.f32 %v5313_v31, %v2951_v27 }
 0x2ce   : > { %3002 = vst.msk [vmem:[%s4776_s9 + $0x108] sm:$0xff] %vm2968_vm6, %v2961_v6  ;;  %v2810_v9 = vpop.f32.mrb[240].mxu1 }
 0x2cf   : > { %v2925_v18 = vpop.f32.mrb[240].mxu0  ;;  %v2831_v2 = vadd.f32 %v2810_v9, %v2739_v13  ;;  %v4019_v21 = vpop.f32.mrb[241].mxu1 }
 0x2d0   : > { %v2952_v62 = vadd.f32 %v2925_v18, %v2829_v17  ;;  %v4037_v16 = vpop.f32.mrb[241].mxu0  ;;  %v2813_v44 = vpop.f32.mrb[242].mxu1 }
 0x2d1   : > { %v2928_v5 = vpop.f32.mrb[242].mxu0  ;;  %v2832_v63 = vadd.f32 %v2813_v44, %v2740_v22  ;;  %v4020_v20 = vpop.f32.mrb[243].mxu1 }
 0x2d2   : > { %v2962_v41 = vadd.f32 %v5313_v31, %v2952_v62  ;;  %v2953_v0 = vadd.f32 %v2928_v5, %v2830_v52  ;;  %v4038_v43 = vpop.f32.mrb[243].mxu0 }
 0x2d4   : > { %3003 = vst.msk [vmem:[%s4776_s9 + $0x110] sm:$0xff] %vm2968_vm6, %v2962_v41  ;;  %v2963_v40 = vadd.f32 %v5313_v31, %v2953_v0 }
 0x2d6   : > { %3004 = vst.msk [vmem:[%s4776_s9 + $0x118] sm:$0xff] %vm2968_vm6, %v2963_v40  ;;  %v2818_v13 = vpop.f32.mrb[244].mxu1 }
 0x2d7   : > { %v2933_v53 = vpop.f32.mrb[244].mxu0  ;;  %v2833_v48 = vadd.f32 %v2818_v13, %v5347_v32  ;;  %v4023_v34 = vpop.f32.mrb[245].mxu1 }
 0x2d8   : > { %v2954_v50 = vadd.f32 %v2933_v53, %v2831_v2  ;;  %v4041_v29 = vpop.f32.mrb[245].mxu0  ;;  %v2821_v22 = vpop.f32.mrb[246].mxu1 }
 0x2d9   : > { %v2936_v61 = vpop.f32.mrb[246].mxu0  ;;  %v2834_v19 = vadd.f32 %v2821_v22, %v5349_v60  ;;  %v4024_v23 = vpop.f32.mrb[247].mxu1 }
 0x2da   : > { %v2964_v51 = vadd.f32 %v5313_v31, %v2954_v50  ;;  %v2955_v33 = vadd.f32 %v2936_v61, %v2832_v63  ;;  %v4042_v35 = vpop.f32.mrb[247].mxu0 }
 0x2dc   : > { %3005 = vst.msk [vmem:[%s4776_s9 + $0x120] sm:$0xff] %vm2968_vm6, %v2964_v51  ;;  %v2965_v4 = vadd.f32 %v5313_v31, %v2955_v33 }
 0x2de   : > { %3006 = vst.msk [vmem:[%s4776_s9 + $0x128] sm:$0xff] %vm2968_vm6, %v2965_v4 }
 0x2df   : > { %v2941_v8 = vpop.f32.mrb[248].mxu0 }
 0x2e0   : > { %v2956_v49 = vadd.f32 %v2941_v8, %v2833_v48  ;;  %v4045_v32 = vpop.f32.mrb[249].mxu0 }
 0x2e1   : > { %v2944_v30 = vpop.f32.mrb[250].mxu0 }
 0x2e2   : > { %v2966_v36 = vadd.f32 %v5313_v31, %v2956_v49  ;;  %v2957_v46 = vadd.f32 %v2944_v30, %v2834_v19  ;;  %v4046_v25 = vpop.f32.mrb[251].mxu0 }
 0x2e4   : > { %3007 = vst.msk [vmem:[%s4776_s9 + $0x130] sm:$0xff] %vm2968_vm6, %v2966_v36  ;;  %v2967_v55 = vadd.f32 %v5313_v31, %v2957_v46 }
 0x2e6   : > { %3008 = vst.msk [vmem:[%s4776_s9 + $0x138] sm:$0xff] %vm2968_vm6, %v2967_v55 }
 0x2e7 PF: > { %s13_s14 = sadd.s32 1, %s4154_s14   ;;  %s5399_s12 = smov %s4150_s13 }
 0x2e8   : > { %p10_p5 = scmp.ge.s32.totalorder %s13_s14, 4   ;;  %s5400_s13 = smov %s5402_s15 }
 0x2ea   :  { %12 = sbr.rel (!%p10_p5) target bundleno = 2 (0x2), region = 92 }

</bundles_post_ra>
